<compile_context>
chip_gen: v6e
topology: v6e:2x2x1
jax: 0.10.0
libtpu: 0.0.40
codegen_flags: <defaults>
</compile_context>

<pallas_src>
import functools

import jax
import jax.numpy as jnp
from jax.experimental import pallas as pl
from jax.experimental.pallas import tpu as pltpu

LEN_FEATURE = 2000            # len_feature in the original script
H1, H2, H3 = 1000, 600, 300   # hidden widths fixed by CrystalNet.__init__
K = 10                        # K = max(labels) + 1  (synthetic choice)

# Lane-padded widths (multiples of 128 on the lane axis).
H1P, H2P, H3P, KP = 1024, 640, 384, 128
NEG_INF = -1e30               # padded-class logit fill (finite, underflows in exp)

# ~20 MiB actually needed at bb=512; 40 MiB leaves margin and stays well under
# v7x's 64 MiB physical per-TC VMEM.
VMEM_LIMIT_BYTES = 40 * 1024 * 1024


def _round_up(n, m):
    return ((n + m - 1) // m) * m


def crystalnet_kernel(x_ref,
                      w1_ref, b1_ref,
                      w2_ref, b2_ref,
                      w3_ref, b3_ref,
                      w4_ref, b4_ref,
                      out_ref):
    """Fused 4-layer MLP + log_softmax for one batch tile (all in VMEM)."""

    def linear(h_bf16, w_ref, b_ref):
        # bf16 x bf16 MXU matmul, f32 accumulation, f32 bias add.
        return jnp.dot(h_bf16, w_ref[...],
                       preferred_element_type=jnp.float32) + b_ref[...]

    # x arrives as f32; cast on the VPU here instead of a separate XLA pass in
    # the wrapper (saves one HBM round-trip over x and one kernel launch).
    x = x_ref[...].astype(jnp.bfloat16)

    h = jnp.maximum(linear(x, w1_ref, b1_ref), 0.0).astype(jnp.bfloat16)
    h = jnp.maximum(linear(h, w2_ref, b2_ref), 0.0).astype(jnp.bfloat16)
    h = jnp.maximum(linear(h, w3_ref, b3_ref), 0.0).astype(jnp.bfloat16)
    y = linear(h, w4_ref, b4_ref)          # (bb, 128) f32; padded classes ~ -1e30

    # Numerically stable log_softmax over the (padded) class axis.  Padded
    # columns carry -1e30 from the padded bias, so exp() underflows to 0 and
    # they do not perturb the real classes.
    m = jnp.max(y, axis=-1, keepdims=True)
    z = y - m
    lse = jnp.log(jnp.sum(jnp.exp(z), axis=-1, keepdims=True))
    out_ref[...] = z - lse


@functools.partial(jax.jit, static_argnames=("block_b",))
def crystalnet_forward(x, packed_params, *, block_b=512):
    """x: (..., LEN_FEATURE) float32 (any leading shape, like x.view(-1, 2000)).

    packed_params: output of pack_params() (padded, bf16 weights / f32 biases).
    Returns (B, K) float32 log-probabilities.
    """
    assert block_b % 16 == 0 and block_b >= 16
    w1, b1, w2, b2, w3, b3, w4, b4 = packed_params

    # view(-1, len_feature); NO cast here -- the kernel casts f32->bf16 itself.
    x = x.reshape(-1, LEN_FEATURE)
    B = x.shape[0]

    # Batch tile: up to block_b rows, multiple of 16 sublanes (bf16 packing).
    # With block_b=512 any batch > 512 rows produces >= 2 grid tiles, so the
    # "parallel" axis shards across v7x's two TensorCores for large batches
    # while small batches keep a single tile (no duplicated weight DMA).
    bb = min(block_b, _round_up(B, 16))
    B_pad = _round_up(B, bb)
    if B_pad != B:
        # Only a (< bb)-row pad; padded rows are finite under log_softmax and
        # sliced off below.
        x = jnp.pad(x, ((0, B_pad - B), (0, 0)))

    def resident():
        # Whole-array, VMEM-resident operand: no grid pipelining, hence
        # single-buffered (grid-invariant weights/biases never change block).
        return pl.BlockSpec(memory_space=pltpu.MemorySpace.VMEM)

    out = pl.pallas_call(
        crystalnet_kernel,
        out_shape=jax.ShapeDtypeStruct((B_pad, KP), jnp.float32),
        grid_spec=pltpu.PrefetchScalarGridSpec(
            num_scalar_prefetch=0,
            grid=(B_pad // bb,),
            in_specs=[
                # 2000 == full last dim of x, so the (8,128) rule is satisfied.
                pl.BlockSpec((bb, LEN_FEATURE), lambda i: (i, 0)),
                resident(), resident(),   # w1, b1
                resident(), resident(),   # w2, b2
                resident(), resident(),   # w3, b3
                resident(), resident(),   # w4, b4
            ],
            out_specs=pl.BlockSpec((bb, KP), lambda i: (i, 0)),
        ),
        compiler_params=pltpu.CompilerParams(
            # Batch tiles are independent -> shard across v7x's 2 TensorCores
            # whenever the grid has >= 2 tiles.
            dimension_semantics=("parallel",),
            vmem_limit_bytes=VMEM_LIMIT_BYTES,
        ),
    )(x, w1, b1, w2, b2, w3, b3, w4, b4)

    # Slice away batch padding and the lane padding of the class axis.
    return out[:B, :K]


def init_params(key):
    """Deterministic PyTorch-Linear-like init; weights stored as (in, out), f32."""
    dims = [(LEN_FEATURE, H1), (H1, H2), (H2, H3), (H3, K)]
    params = []
    for i, (fan_in, fan_out) in enumerate(dims):
        kw, kb = jax.random.split(jax.random.fold_in(key, i))
        bound = 1.0 / (fan_in ** 0.5)
        w = jax.random.uniform(kw, (fan_in, fan_out), jnp.float32, -bound, bound)
        b = jax.random.uniform(kb, (1, fan_out), jnp.float32, -bound, bound)
        params += [w, b]
    return tuple(params)


def _pad_to(a, shape, fill=0.0):
    pads = [(0, t - s) for s, t in zip(a.shape, shape)]
    return jnp.pad(a, pads, constant_values=fill)


def pack_params(params):
    """Pad widths to lane multiples and cast weights to bf16 (done once).

    Padded weight rows/cols are zero; the padded fc4 bias entries are -1e30 so
    the padded classes vanish under log_softmax.
    """
    # TODO(synk): int8 (v5e/v6e) / fp8-e4m3 (v7x) weight storage with
    # per-output-channel scales would halve the weight DMA that dominates
    # small-batch latency; kept bf16 here for one portable, accuracy-checked
    # kernel.
    w1, b1, w2, b2, w3, b3, w4, b4 = params
    w1p = _pad_to(w1, (LEN_FEATURE, H1P)).astype(jnp.bfloat16)
    b1p = _pad_to(b1, (1, H1P)).astype(jnp.float32)
    w2p = _pad_to(w2, (H1P, H2P)).astype(jnp.bfloat16)
    b2p = _pad_to(b2, (1, H2P)).astype(jnp.float32)
    w3p = _pad_to(w3, (H2P, H3P)).astype(jnp.bfloat16)
    b3p = _pad_to(b3, (1, H3P)).astype(jnp.float32)
    w4p = _pad_to(w4, (H3P, KP)).astype(jnp.bfloat16)
    b4p = _pad_to(b4, (1, KP), fill=NEG_INF).astype(jnp.float32)
    return (w1p, b1p, w2p, b2p, w3p, b3p, w4p, b4p)


def reference_forward_f32(x, params):
    """Original full-f32 semantics (matches the PyTorch module)."""
    w1, b1, w2, b2, w3, b3, w4, b4 = params
    x = x.reshape(-1, LEN_FEATURE)
    h = jax.nn.relu(x @ w1 + b1)
    h = jax.nn.relu(h @ w2 + b2)
    h = jax.nn.relu(h @ w3 + b3)
    return jax.nn.log_softmax(h @ w4 + b4, axis=-1)


def reference_forward_packed(x, packed):
    """Pure-JAX mirror of the kernel's bf16/f32-accum arithmetic."""
    w1, b1, w2, b2, w3, b3, w4, b4 = packed
    h = x.reshape(-1, LEN_FEATURE).astype(jnp.bfloat16)

    def lin(a, w, b):
        return jnp.dot(a, w, preferred_element_type=jnp.float32) + b

    h = jax.nn.relu(lin(h, w1, b1)).astype(jnp.bfloat16)
    h = jax.nn.relu(lin(h, w2, b2)).astype(jnp.bfloat16)
    h = jax.nn.relu(lin(h, w3, b3)).astype(jnp.bfloat16)
    y = lin(h, w4, b4)
    return jax.nn.log_softmax(y, axis=-1)[:, :K]


if __name__ == "__main__":
    key = jax.random.PRNGKey(0)
    k_x, k_p = jax.random.split(key)

    B = 16  # small demo batch; x.view(-1, len_feature) => (B, 2000)
    x = jax.random.normal(k_x, (B, LEN_FEATURE), jnp.float32)

    params = init_params(k_p)          # logical f32 parameters
    packed = pack_params(params)       # padded + bf16, built once, HBM-resident

    out = jax.block_until_ready(crystalnet_forward(x, packed))
    assert out.shape == (B, K)

    # Tight check: kernel matches a JAX mirror of the same bf16/f32-accum math.
    ref_q = reference_forward_packed(x, packed)
    assert jnp.allclose(out, ref_q, atol=2e-3, rtol=2e-3), "mismatch vs bf16 reference"

    # Loose check: stays close to the original full-f32 semantics
    # (tolerance loosened for bf16 weight/activation storage).
    ref_f = reference_forward_f32(x, params)
    assert jnp.allclose(out, ref_f, atol=3e-2, rtol=3e-2), "mismatch vs f32 reference"

    print("KERNEL_OK")
</pallas_src>

<mosaic_0001>
module attributes {stable_mosaic.version = 11 : i64} {
  func.func @crystalnet_kernel(%arg0: i32, %arg1: memref<16x2000xf32, #tpu.memory_space<vmem>>, %arg2: memref<2000x1024xbf16, #tpu.memory_space<vmem>>, %arg3: memref<1x1024xf32, #tpu.memory_space<vmem>>, %arg4: memref<1024x640xbf16, #tpu.memory_space<vmem>>, %arg5: memref<1x640xf32, #tpu.memory_space<vmem>>, %arg6: memref<640x384xbf16, #tpu.memory_space<vmem>>, %arg7: memref<1x384xf32, #tpu.memory_space<vmem>>, %arg8: memref<384x128xbf16, #tpu.memory_space<vmem>>, %arg9: memref<1x128xf32, #tpu.memory_space<vmem>>, %arg10: memref<16x128xf32, #tpu.memory_space<vmem>>) attributes {dimension_semantics = [#tpu.dimension_semantics<parallel>], iteration_bounds = array<i64: 1>, scalar_prefetch = 0 : i64, scratch_operands = 0 : i64, tpu.core_type = #tpu.core_type<tc>, window_params = [{transform_indices = @transform_0, window_bounds = array<i64: 16, 2000>}, {pipeline_mode = #tpu.pipeline_mode<synchronous>, transform_indices = @transform_1, window_bounds = array<i64: 2000, 1024>}, {pipeline_mode = #tpu.pipeline_mode<synchronous>, transform_indices = @transform_2, window_bounds = array<i64: 1, 1024>}, {pipeline_mode = #tpu.pipeline_mode<synchronous>, transform_indices = @transform_3, window_bounds = array<i64: 1024, 640>}, {pipeline_mode = #tpu.pipeline_mode<synchronous>, transform_indices = @transform_4, window_bounds = array<i64: 1, 640>}, {pipeline_mode = #tpu.pipeline_mode<synchronous>, transform_indices = @transform_5, window_bounds = array<i64: 640, 384>}, {pipeline_mode = #tpu.pipeline_mode<synchronous>, transform_indices = @transform_6, window_bounds = array<i64: 1, 384>}, {pipeline_mode = #tpu.pipeline_mode<synchronous>, transform_indices = @transform_7, window_bounds = array<i64: 384, 128>}, {pipeline_mode = #tpu.pipeline_mode<synchronous>, transform_indices = @transform_8, window_bounds = array<i64: 1, 128>}, {transform_indices = @transform_9, window_bounds = array<i64: 16, 128>}]} {
    %c0 = arith.constant 0 : index
    %c0_0 = arith.constant 0 : index
    %0 = vector.load %arg1[%c0, %c0_0] : memref<16x2000xf32, #tpu.memory_space<vmem>>, vector<16x2000xf32>
    %1 = arith.truncf %0 : vector<16x2000xf32> to vector<16x2000xbf16>
    %c0_1 = arith.constant 0 : index
    %c0_2 = arith.constant 0 : index
    %2 = vector.load %arg2[%c0_1, %c0_2] : memref<2000x1024xbf16, #tpu.memory_space<vmem>>, vector<2000x1024xbf16>
    %cst = arith.constant dense<0.000000e+00> : vector<16x1024xf32>
    %3 = tpu.matmul %1, %2, %cst {dimension_numbers = #tpu.dot_dimension_numbers<[1], [0], [0], [1], [0, 0, 1, 1], [], []>} : vector<16x2000xbf16>, vector<2000x1024xbf16>, vector<16x1024xf32> -> vector<16x1024xf32>
    %c0_3 = arith.constant 0 : index
    %c0_4 = arith.constant 0 : index
    %4 = vector.load %arg3[%c0_3, %c0_4] : memref<1x1024xf32, #tpu.memory_space<vmem>>, vector<1x1024xf32>
    %5 = vector.broadcast %4 : vector<1x1024xf32> to vector<16x1024xf32>
    %6 = arith.addf %3, %5 : vector<16x1024xf32>
    %cst_5 = arith.constant 0.000000e+00 : f32
    %7 = vector.broadcast %cst_5 : f32 to vector<16x1024xf32>
    %8 = arith.maximumf %6, %7 : vector<16x1024xf32>
    %9 = arith.truncf %8 : vector<16x1024xf32> to vector<16x1024xbf16>
    %c0_6 = arith.constant 0 : index
    %c0_7 = arith.constant 0 : index
    %10 = vector.load %arg4[%c0_6, %c0_7] : memref<1024x640xbf16, #tpu.memory_space<vmem>>, vector<1024x640xbf16>
    %cst_8 = arith.constant dense<0.000000e+00> : vector<16x640xf32>
    %11 = tpu.matmul %9, %10, %cst_8 {dimension_numbers = #tpu.dot_dimension_numbers<[1], [0], [0], [1], [0, 0, 1, 1], [], []>} : vector<16x1024xbf16>, vector<1024x640xbf16>, vector<16x640xf32> -> vector<16x640xf32>
    %c0_9 = arith.constant 0 : index
    %c0_10 = arith.constant 0 : index
    %12 = vector.load %arg5[%c0_9, %c0_10] : memref<1x640xf32, #tpu.memory_space<vmem>>, vector<1x640xf32>
    %13 = vector.broadcast %12 : vector<1x640xf32> to vector<16x640xf32>
    %14 = arith.addf %11, %13 : vector<16x640xf32>
    %cst_11 = arith.constant 0.000000e+00 : f32
    %15 = vector.broadcast %cst_11 : f32 to vector<16x640xf32>
    %16 = arith.maximumf %14, %15 : vector<16x640xf32>
    %17 = arith.truncf %16 : vector<16x640xf32> to vector<16x640xbf16>
    %c0_12 = arith.constant 0 : index
    %c0_13 = arith.constant 0 : index
    %18 = vector.load %arg6[%c0_12, %c0_13] : memref<640x384xbf16, #tpu.memory_space<vmem>>, vector<640x384xbf16>
    %cst_14 = arith.constant dense<0.000000e+00> : vector<16x384xf32>
    %19 = tpu.matmul %17, %18, %cst_14 {dimension_numbers = #tpu.dot_dimension_numbers<[1], [0], [0], [1], [0, 0, 1, 1], [], []>} : vector<16x640xbf16>, vector<640x384xbf16>, vector<16x384xf32> -> vector<16x384xf32>
    %c0_15 = arith.constant 0 : index
    %c0_16 = arith.constant 0 : index
    %20 = vector.load %arg7[%c0_15, %c0_16] : memref<1x384xf32, #tpu.memory_space<vmem>>, vector<1x384xf32>
    %21 = vector.broadcast %20 : vector<1x384xf32> to vector<16x384xf32>
    %22 = arith.addf %19, %21 : vector<16x384xf32>
    %cst_17 = arith.constant 0.000000e+00 : f32
    %23 = vector.broadcast %cst_17 : f32 to vector<16x384xf32>
    %24 = arith.maximumf %22, %23 : vector<16x384xf32>
    %25 = arith.truncf %24 : vector<16x384xf32> to vector<16x384xbf16>
    %c0_18 = arith.constant 0 : index
    %c0_19 = arith.constant 0 : index
    %26 = vector.load %arg8[%c0_18, %c0_19] : memref<384x128xbf16, #tpu.memory_space<vmem>>, vector<384x128xbf16>
    %cst_20 = arith.constant dense<0.000000e+00> : vector<16x128xf32>
    %27 = tpu.matmul %25, %26, %cst_20 {dimension_numbers = #tpu.dot_dimension_numbers<[1], [0], [0], [1], [0, 0, 1, 1], [], []>} : vector<16x384xbf16>, vector<384x128xbf16>, vector<16x128xf32> -> vector<16x128xf32>
    %c0_21 = arith.constant 0 : index
    %c0_22 = arith.constant 0 : index
    %28 = vector.load %arg9[%c0_21, %c0_22] : memref<1x128xf32, #tpu.memory_space<vmem>>, vector<1x128xf32>
    %29 = vector.broadcast %28 : vector<1x128xf32> to vector<16x128xf32>
    %30 = arith.addf %27, %29 : vector<16x128xf32>
    %cst_23 = arith.constant dense<0xFF800000> : vector<16xf32>
    %31 = vector.multi_reduction <maximumf>, %30, %cst_23 [1] : vector<16x128xf32> to vector<16xf32>
    %32 = vector.shape_cast %31 : vector<16xf32> to vector<16x1xf32>
    %33 = vector.broadcast %32 : vector<16x1xf32> to vector<16x128xf32>
    %34 = arith.subf %30, %33 : vector<16x128xf32>
    %35 = math.exp %34 : vector<16x128xf32>
    %cst_24 = arith.constant dense<0.000000e+00> : vector<16xf32>
    %36 = vector.multi_reduction <add>, %35, %cst_24 [1] : vector<16x128xf32> to vector<16xf32>
    %37 = vector.shape_cast %36 : vector<16xf32> to vector<16x1xf32>
    %38 = math.log %37 : vector<16x1xf32>
    %39 = vector.broadcast %38 : vector<16x1xf32> to vector<16x128xf32>
    %40 = arith.subf %34, %39 : vector<16x128xf32>
    %c0_25 = arith.constant 0 : index
    %c0_26 = arith.constant 0 : index
    %41 = vector.load %arg10[%c0_25, %c0_26] : memref<16x128xf32, #tpu.memory_space<vmem>>, vector<16x128xf32>
    tpu.vector_store %arg10[%c0_25, %c0_26], %40 {strides = array<i32>} : memref<16x128xf32, #tpu.memory_space<vmem>>, vector<16x128xf32>,
    return
  }
  func.func @transform_0(%arg0: i32) -> (i32, i32) {
    %c0_i32 = arith.constant 0 : i32
    %c0_i32_0 = arith.constant 0 : i32
    return %arg0, %c0_i32 : i32, i32
  }
  func.func @transform_1(%arg0: i32) -> (i32, i32) {
    %c0_i32 = arith.constant 0 : i32
    %c0_i32_0 = arith.constant 0 : i32
    %c0_i32_1 = arith.constant 0 : i32
    return %c0_i32, %c0_i32_0 : i32, i32
  }
  func.func @transform_2(%arg0: i32) -> (i32, i32) {
    %c0_i32 = arith.constant 0 : i32
    %c0_i32_0 = arith.constant 0 : i32
    %c0_i32_1 = arith.constant 0 : i32
    return %c0_i32, %c0_i32_0 : i32, i32
  }
  func.func @transform_3(%arg0: i32) -> (i32, i32) {
    %c0_i32 = arith.constant 0 : i32
    %c0_i32_0 = arith.constant 0 : i32
    %c0_i32_1 = arith.constant 0 : i32
    return %c0_i32, %c0_i32_0 : i32, i32
  }
  func.func @transform_4(%arg0: i32) -> (i32, i32) {
    %c0_i32 = arith.constant 0 : i32
    %c0_i32_0 = arith.constant 0 : i32
    %c0_i32_1 = arith.constant 0 : i32
    return %c0_i32, %c0_i32_0 : i32, i32
  }
  func.func @transform_5(%arg0: i32) -> (i32, i32) {
    %c0_i32 = arith.constant 0 : i32
    %c0_i32_0 = arith.constant 0 : i32
    %c0_i32_1 = arith.constant 0 : i32
    return %c0_i32, %c0_i32_0 : i32, i32
  }
  func.func @transform_6(%arg0: i32) -> (i32, i32) {
    %c0_i32 = arith.constant 0 : i32
    %c0_i32_0 = arith.constant 0 : i32
    %c0_i32_1 = arith.constant 0 : i32
    return %c0_i32, %c0_i32_0 : i32, i32
  }
  func.func @transform_7(%arg0: i32) -> (i32, i32) {
    %c0_i32 = arith.constant 0 : i32
    %c0_i32_0 = arith.constant 0 : i32
    %c0_i32_1 = arith.constant 0 : i32
    return %c0_i32, %c0_i32_0 : i32, i32
  }
  func.func @transform_8(%arg0: i32) -> (i32, i32) {
    %c0_i32 = arith.constant 0 : i32
    %c0_i32_0 = arith.constant 0 : i32
    %c0_i32_1 = arith.constant 0 : i32
    return %c0_i32, %c0_i32_0 : i32, i32
  }
  func.func @transform_9(%arg0: i32) -> (i32, i32) {
    %c0_i32 = arith.constant 0 : i32
    %c0_i32_0 = arith.constant 0 : i32
    return %arg0, %c0_i32 : i32, i32
  }
}

</mosaic_0001>

<bundles_post_ra>
// kernel: crystalnet_forward.1
= control target key start
LH: loop header
LB: loop body
LE: loop exit
PB: predicated region body
PF: predicated region fallthrough
CT: control target
= control target key end

     0   :  { %14 = vsyncpa [#allocation3], 0  ;;  %s14727_s0 = inlined_call_operand.hbm [shape: f32[16,2000], index: 0, kind: input, shape index: {}]   ;;  %s14728_s1 = inlined_call_operand.hbm [shape: bf16[2000,1024], index: 1, kind: input, shape index: {}]   ;;  %s14729_s2 = inlined_call_operand.hbm [shape: f32[1,1024], index: 2, kind: input, shape index: {}]   ;;  %s14730_s3 = inlined_call_operand.hbm [shape: bf16[1024,640], index: 3, kind: input, shape index: {}]   ;;  %s14731_s4 = inlined_call_operand.hbm [shape: f32[1,640], index: 4, kind: input, shape index: {}]   ;;  %s14732_s5 = inlined_call_operand.hbm [shape: bf16[640,384], index: 5, kind: input, shape index: {}]   ;;  %s14733_s6 = inlined_call_operand.hbm [shape: f32[1,384], index: 6, kind: input, shape index: {}]   ;;  %s14734_s7 = inlined_call_operand.hbm [shape: bf16[384,128], index: 7, kind: input, shape index: {}]   ;;  %s14735_s8 = inlined_call_operand.hbm [shape: f32[1,128], index: 8, kind: input, shape index: {}]   ;;  %s14736_s9 = inlined_call_operand.hbm [shape: f32[16,128], index: 9, kind: output, shape index: {}]  }
   0x1   :  { %15 = vsyncpa [#allocation6], 0 }
   0x2   :  { %16 = vsyncpa [#allocation9], 0 }
   0x3   :  { %17 = vsyncpa [#allocation12], 0 }
   0x4   :  { %18 = vsyncpa [#allocation15], 0 }
   0x5   :  { %19 = vsyncpa [#allocation4], 0  ;;  %s14202_s30 = smov [#allocation5]  }
   0x6   :  { %s37_s10 = sshll.u32 %s14202_s30, 4  ;;  %s38_s10 = int_to_ptr.vmem [resolvable:$true] %s37_s10 }
   0x7   :  { %s13998_s11 = scalar_lea.vmem %s38_s10, 128000  ;;  %p14003_p1 = scmp.lt.s32.totalorder %s38_s10, %s38_s10 }
   0x8   :  { %p13999_p0 = scmp.ne.s32.totalorder %s38_s10, %s13998_s11  ;;  %p14004_p2 = scmp.lt.s32.totalorder %s13998_s11, %s13998_s11 }
   0xa   :  { %p14005_p3 = por %p14004_p2, %p14003_p1 }
   0xc   :  { %p14006_p4 = pnand %p14005_p3, %p13999_p0 }
   0xe   :  { %14009 = shalt.err (!%p14006_p4)
}
   0xf   :  { %s14203_s12 = smov 512   ;;  %s14204_s13 = smov 32  }
  0x10   :  { %43 = dma.hbm_to_vmem [thread:$0]  %s14728_s1, 128000, %s38_s10, [#allocation6], %s14203_s12, %s14203_s12, %s14204_s13  }
  0x11   :  { %s14205_s16 = smov [#allocation8]  }
  0x12   :  { %s59_s17 = sshll.u32 %s14205_s16, 4  ;;  %s60_s17 = int_to_ptr.vmem [resolvable:$true] %s59_s17 }
  0x13   :  { %s14018_s18 = scalar_lea.vmem %s60_s17, 40960  ;;  %p14023_p6 = scmp.lt.s32.totalorder %s60_s17, %s60_s17 }
  0x14   :  { %p14019_p5 = scmp.ne.s32.totalorder %s60_s17, %s14018_s18  ;;  %p14024_p7 = scmp.lt.s32.totalorder %s14018_s18, %s14018_s18 }
  0x16   :  { %p14025_p8 = por %p14024_p7, %p14023_p6 }
  0x18   :  { %p14026_p9 = pnand %p14025_p8, %p14019_p5 }
  0x1a   :  { %14029 = shalt.err (!%p14026_p9)
}
  0x1b   :  { %s14206_s19 = smov 320   ;;  %s14207_s20 = smov 20  }
  0x1c   :  { %65 = dma.hbm_to_vmem [thread:$0]  %s14730_s3, 40960, %s60_s17, [#allocation9], %s14206_s19, %s14206_s19, %s14207_s20  }
  0x1d   :  { %s14208_s23 = smov [#allocation11]  }
  0x1e   :  { %s81_s24 = sshll.u32 %s14208_s23, 4  ;;  %s82_s24 = int_to_ptr.vmem [resolvable:$true] %s81_s24 }
  0x1f   :  { %s14038_s1 = scalar_lea.vmem %s82_s24, 15360  ;;  %p14043_p11 = scmp.lt.s32.totalorder %s82_s24, %s82_s24 }
  0x20   :  { %p14039_p10 = scmp.ne.s32.totalorder %s82_s24, %s14038_s1  ;;  %p14044_p12 = scmp.lt.s32.totalorder %s14038_s1, %s14038_s1 }
  0x22   :  { %p14045_p13 = por %p14044_p12, %p14043_p11 }
  0x24   :  { %p14046_p0 = pnand %p14045_p13, %p14039_p10 }
  0x26   :  { %14049 = shalt.err (!%p14046_p0)
}
  0x27   :  { %s14209_s25 = smov 192   ;;  %s14210_s26 = smov 12  }
  0x28   :  { %87 = dma.hbm_to_vmem [thread:$0]  %s14732_s5, 15360, %s82_s24, [#allocation12], %s14209_s25, %s14209_s25, %s14210_s26  }
  0x29   :  { %s14211_s29 = smov [#allocation14]  }
  0x2a   :  { %s103_s30 = sshll.u32 %s14211_s29, 4  ;;  %s104_s30 = int_to_ptr.vmem [resolvable:$true] %s103_s30 }
  0x2b   :  { %s14058_s3 = scalar_lea.vmem %s104_s30, 3072  ;;  %p14063_p2 = scmp.lt.s32.totalorder %s104_s30, %s104_s30 }
  0x2c   :  { %p14059_p1 = scmp.ne.s32.totalorder %s104_s30, %s14058_s3  ;;  %p14064_p3 = scmp.lt.s32.totalorder %s14058_s3, %s14058_s3 }
  0x2e   :  { %p14065_p4 = por %p14064_p3, %p14063_p2 }
  0x30   :  { %p14066_p5 = pnand %p14065_p4, %p14059_p1 }
  0x32   :  { %14069 = shalt.err (!%p14066_p5)
}
  0x33   :  { %s14212_s10 = smov 64   ;;  %s14213_s11 = smov 4  }
  0x34   :  { %109 = dma.hbm_to_vmem [thread:$0]  %s14734_s7, 3072, %s104_s30, [#allocation15], %s14212_s10, %s14212_s10, %s14213_s11  }
  0x35   :  { %s14214_s14 = smov [#allocation2]  }
  0x36   :  { %s25_s15 = sshll.u32 %s14214_s14, 4  ;;  %s26_s15 = int_to_ptr.vmem [resolvable:$true] %s25_s15 }
  0x37   :  { %s14078_s5 = scalar_lea.vmem %s26_s15, 4096  ;;  %p14083_p7 = scmp.lt.s32.totalorder %s26_s15, %s26_s15 }
  0x38   :  { %p14079_p6 = scmp.ne.s32.totalorder %s26_s15, %s14078_s5  ;;  %p14084_p8 = scmp.lt.s32.totalorder %s14078_s5, %s14078_s5 }
  0x3a   :  { %p14085_p9 = por %p14084_p8, %p14083_p7 }
  0x3c   :  { %p14086_p10 = pnand %p14085_p9, %p14079_p6 }
  0x3e   :  { %14089 = shalt.err (!%p14086_p10)
}
  0x3f   :  { %s14215_s16 = smov 2048   ;;  %s14216_s17 = smov 128  }
  0x40   :  { %31 = dma.hbm_to_vmem [thread:$0]  %s14727_s0, 4096, %s26_s15, [#allocation3], %s14215_s16, %s14215_s16, %s14216_s17  }
  0x41   :  { %s14217_s20 = smov [#allocation7]   ;;  %s14218_s7 = smov [#allocation10]  }
  0x42   :  { %s50_s21 = sshll.u32 %s14217_s20, 4  ;;  %s72_s22 = sshll.u32 %s14218_s7, 4  ;;  %s51_s21 = int_to_ptr.vmem [resolvable:$true] %s50_s21  ;;  %s73_s22 = int_to_ptr.vmem [resolvable:$true] %s72_s22 }
  0x43   :  { %s14098_s23 = scalar_lea.vmem %s51_s21, 128  ;;  %p14103_p12 = scmp.lt.s32.totalorder %s51_s21, %s51_s21 }
  0x44   :  { %p14099_p11 = scmp.ne.s32.totalorder %s51_s21, %s14098_s23  ;;  %p14104_p13 = scmp.lt.s32.totalorder %s14098_s23, %s14098_s23 }
  0x46   :  { %p14105_p0 = por %p14104_p13, %p14103_p12 }
  0x48   :  { %p14106_p1 = pnand %p14105_p0, %p14099_p11 }
  0x4a   :  { %14109 = shalt.err (!%p14106_p1)
}
  0x4b   :  { %53 = dma.hbm_to_vmem [thread:$0]  %s14729_s2, 128, %s51_s21, [#allocation6]  }
  0x4c   :  { %s14118_s25 = scalar_lea.vmem %s73_s22, 80  ;;  %s14122_s0 = scalar_lea.vmem %s73_s22, 96 }
  0x4d   :  { %p14119_p2 = scmp.ne.s32.totalorder %s73_s22, %s14118_s25  ;;  %p14123_p3 = scmp.lt.s32.totalorder %s73_s22, %s73_s22 }
  0x4e   :  { %p14124_p4 = scmp.lt.s32.totalorder %s14122_s0, %s14118_s25 }
  0x50   :  { %p14125_p5 = por %p14124_p4, %p14123_p3 }
  0x52   :  { %p14126_p6 = pnand %p14125_p5, %p14119_p2 }
  0x54   :  { %14129 = shalt.err (!%p14126_p6)
}
  0x55   :  { %75 = dma.hbm_to_vmem [thread:$0]  %s14731_s4, 80, %s73_s22, [#allocation9]  }
  0x56   :  { %s14219_s28 = smov [#allocation13]   ;;  %s14220_s30 = smov [#allocation16]  }
  0x57   :  { %s94_s29 = sshll.u32 %s14219_s28, 4  ;;  %s116_s3 = sshll.u32 %s14220_s30, 4  ;;  %s95_s29 = int_to_ptr.vmem [resolvable:$true] %s94_s29  ;;  %s117_s3 = int_to_ptr.vmem [resolvable:$true] %s116_s3 }
  0x58   :  { %s14138_s10 = scalar_lea.vmem %s95_s29, 48  ;;  %s14142_s2 = scalar_lea.vmem %s95_s29, 64 }
  0x59   :  { %p14139_p7 = scmp.ne.s32.totalorder %s95_s29, %s14138_s10  ;;  %p14143_p8 = scmp.lt.s32.totalorder %s95_s29, %s95_s29 }
  0x5a   :  { %p14144_p9 = scmp.lt.s32.totalorder %s14142_s2, %s14138_s10 }
  0x5c   :  { %p14145_p10 = por %p14144_p9, %p14143_p8 }
  0x5e   :  { %p14146_p11 = pnand %p14145_p10, %p14139_p7 }
  0x60   :  { %14149 = shalt.err (!%p14146_p11)
}
  0x61   :  { %97 = dma.hbm_to_vmem [thread:$0]  %s14733_s6, 48, %s95_s29, [#allocation12]  }
  0x62   :  { %s14158_s13 = scalar_lea.vmem %s117_s3, 16  ;;  %s14162_s4 = scalar_lea.vmem %s117_s3, 32 }
  0x63   :  { %p14159_p12 = scmp.ne.s32.totalorder %s117_s3, %s14158_s13  ;;  %p14163_p13 = scmp.lt.s32.totalorder %s117_s3, %s117_s3 }
  0x64   :  { %p14164_p0 = scmp.lt.s32.totalorder %s14162_s4, %s14158_s13 }
  0x66   :  { %p14165_p1 = por %p14164_p0, %p14163_p13 }
  0x68   :  { %p14166_p2 = pnand %p14165_p1, %p14159_p12 }
  0x6a   :  { %14169 = shalt.err (!%p14166_p2)
}
  0x6b   :  { %119 = dma.hbm_to_vmem [thread:$0]  %s14735_s8, 16, %s117_s3, [#allocation15]  }
  0x6c   :  { %14190 = dma.done.wait [#allocation3], 4096  }
  0x6d   :  { %14191 = vsyncadd [#allocation3], 4294963200 }
  0x6e   :  { %14192 = dma.done.wait [#allocation6], 128128  }
  0x6f   :  { %14193 = vsyncadd [#allocation6], 4294839168 }
  0x70   :  { %14194 = dma.done.wait [#allocation9], 41040  }
  0x71   :  { %14195 = vsyncadd [#allocation9], 4294926256 }
  0x72   :  { %14196 = dma.done.wait [#allocation12], 15408  }
  0x73   :  { %14197 = vsyncadd [#allocation12], 4294951888 }
  0x74   :  { %14198 = dma.done.wait [#allocation15], 3088  }
  0x75   :  { %14199 = vsyncadd [#allocation15], 4294964208  ;;  %v252_v0 = vld [vmem:[#allocation5 + $0x1c0] sm:$0xff]  ;;  %v149_v54 = vld [vmem:[#allocation2 + $0x8] sm:$0xff]  ;;  %vm6238_vm0 = vcmask 654336   ;;  %vm14223_vm1 = vmmov 0  }
  0x76   :  { %v256_v1 = vld [vmem:[#allocation5 + $0x1e0] sm:$0xff]  ;;  %v165_v55 = vld [vmem:[#allocation2 + $0x88] sm:$0xff]  ;;  %v151_v59 = vld [vmem:[#allocation2 + $0x18] sm:$0xff]  ;;  %s14224_s6 = smov [#allocation17]  }
  0x77   :  { %v380_v2 = vld [vmem:[#allocation5 + $0x5c0] sm:$0xff]  ;;  %v11699_v3 = vcombine.high %v252_v0, %v256_v1  ;;  %v11698_v5 = vcombine.low %v252_v0, %v256_v1  ;;  %v14304_v58 = vpack.c.bf16 %v165_v55, %v149_v54  ;;  %v167_v60 = vld [vmem:[#allocation2 + $0x98] sm:$0xff]  ;;  %s11626_s8 = sshll.u32 %s14224_s6, 4  ;;  %s11627_s8 = int_to_ptr.vmem [resolvable:$true] %s11626_s8 }
  0x78   :  { %v384_v4 = vld [vmem:[#allocation5 + $0x5e0] sm:$0xff]  ;;  %v14306_v63 = vpack.c.bf16 %v167_v60, %v151_v59  ;;  %s14170_s5 = scalar_lea.vmem %s11627_s8, 256  ;;  %p14175_p4 = scmp.lt.s32.totalorder %s11627_s8, %s11627_s8 }
  0x79   :  { %v244_v6 = vld [vmem:[#allocation5 + $0x180] sm:$0xff]  ;;  %v11827_v8 = vcombine.high %v380_v2, %v384_v4  ;;  %v11826_v9 = vcombine.low %v380_v2, %v384_v4  ;;  %6242 = vmatprep.subr.bf16.mxu0 %v11699_v3  ;;  %6274 = vmatprep.mubr.bf16.mxu0 %v14304_v58  ;;  %p14171_p3 = scmp.ne.s32.totalorder %s11627_s8, %s14170_s5  ;;  %p14176_p5 = scmp.lt.s32.totalorder %s14170_s5, %s14170_s5 }
  0x7a   :  { %v248_v7 = vld [vmem:[#allocation5 + $0x1a0] sm:$0xff]  ;;  %6243 = vmatpush1.bf16.msra.mxu0 %v11698_v5  ;;  %6317 = vmatprep.mubr.bf16.mxu1 %v14306_v63 }
  0x7b   :  { %v11691_v10 = vcombine.high %v244_v6, %v248_v7  ;;  %v372_v11 = vld [vmem:[#allocation5 + $0x580] sm:$0xff]  ;;  %6285 = vmatprep.subr.bf16.mxu1 %v11827_v8  ;;  %v11690_v18 = vcombine.low %v244_v6, %v248_v7  ;;  %p14177_p6 = por %p14176_p5, %p14175_p4 }
  0x7c   :  { %v376_v12 = vld [vmem:[#allocation5 + $0x5a0] sm:$0xff]  ;;  %6286 = vmatpush1.bf16.msra.mxu1 %v11826_v9 }
  0x7d   :  { %v236_v13 = vld [vmem:[#allocation5 + $0x140] sm:$0xff]  ;;  %v11819_v14 = vcombine.high %v372_v11, %v376_v12  ;;  %6244 = vmatprep.subr.bf16.mxu0 %v11691_v10  ;;  %v11818_v19 = vcombine.low %v372_v11, %v376_v12  ;;  %p14178_p7 = pnand %p14177_p6, %p14171_p3 }
  0x7e   :  { %v240_v15 = vld [vmem:[#allocation5 + $0x160] sm:$0xff]  ;;  %6245 = vmatpush1.bf16.msra.mxu0 %v11690_v18 }
  0x7f   :  { %v364_v16 = vld [vmem:[#allocation5 + $0x540] sm:$0xff]  ;;  %v11683_v20 = vcombine.high %v236_v13, %v240_v15  ;;  %6287 = vmatprep.subr.bf16.mxu1 %v11819_v14  ;;  %v11682_v26 = vcombine.low %v236_v13, %v240_v15 }
  0x80   :  { %v368_v17 = vld [vmem:[#allocation5 + $0x560] sm:$0xff]  ;;  %6288 = vmatpush1.bf16.msra.mxu1 %v11818_v19 }
  0x81   :  { %v11811_v21 = vcombine.high %v364_v16, %v368_v17  ;;  %v228_v22 = vld [vmem:[#allocation5 + $0x100] sm:$0xff]  ;;  %6246 = vmatprep.subr.bf16.mxu0 %v11683_v20  ;;  %v11810_v27 = vcombine.low %v364_v16, %v368_v17 }
  0x82   :  { %v232_v23 = vld [vmem:[#allocation5 + $0x120] sm:$0xff]  ;;  %6247 = vmatpush1.bf16.msra.mxu0 %v11682_v26 }
  0x83   :  { %v356_v24 = vld [vmem:[#allocation5 + $0x500] sm:$0xff]  ;;  %v11675_v28 = vcombine.high %v228_v22, %v232_v23  ;;  %6289 = vmatprep.subr.bf16.mxu1 %v11811_v21  ;;  %v11674_v34 = vcombine.low %v228_v22, %v232_v23 }
  0x84   :  { %v360_v25 = vld [vmem:[#allocation5 + $0x520] sm:$0xff]  ;;  %6290 = vmatpush1.bf16.msra.mxu1 %v11810_v27 }
  0x85   :  { %v11803_v29 = vcombine.high %v356_v24, %v360_v25  ;;  %v220_v30 = vld [vmem:[#allocation5 + $0xc0] sm:$0xff]  ;;  %6248 = vmatprep.subr.bf16.mxu0 %v11675_v28  ;;  %v11802_v35 = vcombine.low %v356_v24, %v360_v25 }
  0x86   :  { %v224_v31 = vld [vmem:[#allocation5 + $0xe0] sm:$0xff]  ;;  %6249 = vmatpush1.bf16.msra.mxu0 %v11674_v34 }
  0x87   :  { %v348_v32 = vld [vmem:[#allocation5 + $0x4c0] sm:$0xff]  ;;  %v11667_v36 = vcombine.high %v220_v30, %v224_v31  ;;  %6291 = vmatprep.subr.bf16.mxu1 %v11803_v29  ;;  %v11666_v42 = vcombine.low %v220_v30, %v224_v31 }
  0x88   :  { %v352_v33 = vld [vmem:[#allocation5 + $0x4e0] sm:$0xff]  ;;  %6292 = vmatpush1.bf16.msra.mxu1 %v11802_v35 }
  0x89   :  { %v11795_v37 = vcombine.high %v348_v32, %v352_v33  ;;  %v212_v38 = vld [vmem:[#allocation5 + $0x80] sm:$0xff]  ;;  %6250 = vmatprep.subr.bf16.mxu0 %v11667_v36  ;;  %v11794_v43 = vcombine.low %v348_v32, %v352_v33 }
  0x8a   :  { %v216_v39 = vld [vmem:[#allocation5 + $0xa0] sm:$0xff]  ;;  %6251 = vmatpush1.bf16.msra.mxu0 %v11666_v42 }
  0x8b   :  { %v340_v40 = vld [vmem:[#allocation5 + $0x480] sm:$0xff]  ;;  %v11659_v44 = vcombine.high %v212_v38, %v216_v39  ;;  %6293 = vmatprep.subr.bf16.mxu1 %v11795_v37  ;;  %v11658_v50 = vcombine.low %v212_v38, %v216_v39 }
  0x8c   :  { %v344_v41 = vld [vmem:[#allocation5 + $0x4a0] sm:$0xff]  ;;  %6294 = vmatpush1.bf16.msra.mxu1 %v11794_v43 }
  0x8d   :  { %v11787_v45 = vcombine.high %v340_v40, %v344_v41  ;;  %v204_v46 = vld [vmem:[#allocation5 + $0x40] sm:$0xff]  ;;  %6252 = vmatprep.subr.bf16.mxu0 %v11659_v44  ;;  %v11786_v51 = vcombine.low %v340_v40, %v344_v41 }
  0x8e   :  { %v208_v47 = vld [vmem:[#allocation5 + $0x60] sm:$0xff]  ;;  %6253 = vmatpush1.bf16.msra.mxu0 %v11658_v50 }
  0x8f   :  { %v332_v48 = vld [vmem:[#allocation5 + $0x440] sm:$0xff]  ;;  %v11651_v52 = vcombine.high %v204_v46, %v208_v47  ;;  %6295 = vmatprep.subr.bf16.mxu1 %v11787_v45  ;;  %v11650_v0 = vcombine.low %v204_v46, %v208_v47 }
  0x90   :  { %v336_v49 = vld [vmem:[#allocation5 + $0x460] sm:$0xff]  ;;  %6296 = vmatpush1.bf16.msra.mxu1 %v11786_v51 }
  0x91   :  { %v196_v53 = vld [vmem:[#allocation5] sm:$0xff]  ;;  %v11779_v56 = vcombine.high %v332_v48, %v336_v49  ;;  %6254 = vmatprep.subr.bf16.mxu0 %v11651_v52  ;;  %v11778_v1 = vcombine.low %v332_v48, %v336_v49 }
  0x92   :  { %v200_v57 = vld [vmem:[#allocation5 + $0x20] sm:$0xff]  ;;  %6255 = vmatpush1.bf16.msra.mxu0 %v11650_v0 }
  0x93   :  { %v324_v61 = vld [vmem:[#allocation5 + $0x400] sm:$0xff]  ;;  %v11643_v2 = vcombine.high %v196_v53, %v200_v57  ;;  %6297 = vmatprep.subr.bf16.mxu1 %v11779_v56  ;;  %v11642_v8 = vcombine.low %v196_v53, %v200_v57 }
  0x94   :  { %v328_v62 = vld [vmem:[#allocation5 + $0x420] sm:$0xff]  ;;  %6298 = vmatpush1.bf16.msra.mxu1 %v11778_v1 }
  0x95   :  { %v11771_v3 = vcombine.high %v324_v61, %v328_v62  ;;  %v316_v4 = vld [vmem:[#allocation5 + $0x3c0] sm:$0xff]  ;;  %6256 = vmatprep.subr.bf16.mxu0 %v11643_v2  ;;  %v11770_v9 = vcombine.low %v324_v61, %v328_v62 }
  0x96   :  { %v320_v5 = vld [vmem:[#allocation5 + $0x3e0] sm:$0xff]  ;;  %6257 = vmatpush1.bf16.msra.mxu0 %v11642_v8 }
  0x97   :  { %v444_v6 = vld [vmem:[#allocation5 + $0x7c0] sm:$0xff]  ;;  %v11763_v10 = vcombine.high %v316_v4, %v320_v5  ;;  %6299 = vmatprep.subr.bf16.mxu1 %v11771_v3  ;;  %v11762_v16 = vcombine.low %v316_v4, %v320_v5 }
  0x98   :  { %v448_v7 = vld [vmem:[#allocation5 + $0x7e0] sm:$0xff]  ;;  %6300 = vmatpush1.bf16.msra.mxu1 %v11770_v9 }
  0x99   :  { %v11891_v11 = vcombine.high %v444_v6, %v448_v7  ;;  %v308_v12 = vld [vmem:[#allocation5 + $0x380] sm:$0xff]  ;;  %6258 = vmatprep.subr.bf16.mxu0 %v11763_v10  ;;  %v11890_v17 = vcombine.low %v444_v6, %v448_v7 }
  0x9a   :  { %v312_v13 = vld [vmem:[#allocation5 + $0x3a0] sm:$0xff]  ;;  %6259 = vmatpush2.bf16.msra.mxu0 %v11762_v16 }
  0x9b   :  { %v436_v14 = vld [vmem:[#allocation5 + $0x780] sm:$0xff]  ;;  %v11755_v18 = vcombine.high %v308_v12, %v312_v13  ;;  %6301 = vmatprep.subr.bf16.mxu1 %v11891_v11  ;;  %v11754_v24 = vcombine.low %v308_v12, %v312_v13 }
  0x9c   :  { %v440_v15 = vld [vmem:[#allocation5 + $0x7a0] sm:$0xff]  ;;  %6302 = vmatpush2.bf16.msra.mxu1 %v11890_v17 }
  0x9d   :  { %v11883_v19 = vcombine.high %v436_v14, %v440_v15  ;;  %v300_v20 = vld [vmem:[#allocation5 + $0x340] sm:$0xff]  ;;  %6260 = vmatprep.subr.bf16.mxu0 %v11755_v18  ;;  %v11882_v25 = vcombine.low %v436_v14, %v440_v15  ;;  %v150_v14 = vld [vmem:[#allocation2 + $0x10] sm:$0xff] }
  0x9e   :  { %v304_v21 = vld [vmem:[#allocation5 + $0x360] sm:$0xff]  ;;  %6261 = vmatpush2.bf16.msra.mxu0 %v11754_v24  ;;  %v166_v15 = vld [vmem:[#allocation2 + $0x90] sm:$0xff]  ;;  %v169_v24 = vld [vmem:[#allocation2 + $0xa8] sm:$0xff] }
  0x9f   :  { %v428_v22 = vld [vmem:[#allocation5 + $0x740] sm:$0xff]  ;;  %v11747_v26 = vcombine.high %v300_v20, %v304_v21  ;;  %6303 = vmatprep.subr.bf16.mxu1 %v11883_v19  ;;  %v11746_v32 = vcombine.low %v300_v20, %v304_v21 }
  0xa0   :  { %v432_v23 = vld [vmem:[#allocation5 + $0x760] sm:$0xff]  ;;  %6304 = vmatpush2.bf16.msra.mxu1 %v11882_v25  ;;  %v14312_v25 = vpack.c.bf16 %v166_v15, %v150_v14 }
  0xa1   :  { %v11875_v27 = vcombine.high %v428_v22, %v432_v23  ;;  %v292_v28 = vld [vmem:[#allocation5 + $0x300] sm:$0xff]  ;;  %6262 = vmatprep.subr.bf16.mxu0 %v11747_v26  ;;  %v11874_v33 = vcombine.low %v428_v22, %v432_v23  ;;  %v153_v23 = vld [vmem:[#allocation2 + $0x28] sm:$0xff] }
  0xa2   :  { %v296_v29 = vld [vmem:[#allocation5 + $0x320] sm:$0xff]  ;;  %6263 = vmatpush2.bf16.msra.mxu0 %v11746_v32 }
  0xa3   :  { %v420_v30 = vld [vmem:[#allocation5 + $0x700] sm:$0xff]  ;;  %v11739_v34 = vcombine.high %v292_v28, %v296_v29  ;;  %6305 = vmatprep.subr.bf16.mxu1 %v11875_v27  ;;  %v11738_v40 = vcombine.low %v292_v28, %v296_v29  ;;  %v155_v27 = vld [vmem:[#allocation2 + $0x38] sm:$0xff] }
  0xa4   :  { %v424_v31 = vld [vmem:[#allocation5 + $0x720] sm:$0xff]  ;;  %6306 = vmatpush2.bf16.msra.mxu1 %v11874_v33  ;;  %v171_v28 = vld [vmem:[#allocation2 + $0xb8] sm:$0xff] }
  0xa5   :  { %v11867_v35 = vcombine.high %v420_v30, %v424_v31  ;;  %v284_v36 = vld [vmem:[#allocation5 + $0x2c0] sm:$0xff]  ;;  %6264 = vmatprep.subr.bf16.mxu0 %v11739_v34  ;;  %v11866_v41 = vcombine.low %v420_v30, %v424_v31  ;;  %v14314_v34 = vpack.c.bf16 %v169_v24, %v153_v23 }
  0xa6   :  { %v288_v37 = vld [vmem:[#allocation5 + $0x2e0] sm:$0xff]  ;;  %6265 = vmatpush2.bf16.msra.mxu0 %v11738_v40 }
  0xa7   :  { %v412_v38 = vld [vmem:[#allocation5 + $0x6c0] sm:$0xff]  ;;  %v11731_v42 = vcombine.high %v284_v36, %v288_v37  ;;  %6307 = vmatprep.subr.bf16.mxu1 %v11867_v35  ;;  %v11730_v48 = vcombine.low %v284_v36, %v288_v37  ;;  %v14317_v37 = vpack.c.bf16 %v171_v28, %v155_v27 }
  0xa8   :  { %v416_v39 = vld [vmem:[#allocation5 + $0x6e0] sm:$0xff]  ;;  %6308 = vmatpush2.bf16.msra.mxu1 %v11866_v41 }
  0xa9   :  { %v11859_v43 = vcombine.high %v412_v38, %v416_v39  ;;  %v276_v44 = vld [vmem:[#allocation5 + $0x280] sm:$0xff]  ;;  %6266 = vmatprep.subr.bf16.mxu0 %v11731_v42  ;;  %v11858_v49 = vcombine.low %v412_v38, %v416_v39 }
  0xaa   :  { %v280_v45 = vld [vmem:[#allocation5 + $0x2a0] sm:$0xff]  ;;  %6267 = vmatpush2.bf16.msra.mxu0 %v11730_v48 }
  0xab   :  { %v404_v46 = vld [vmem:[#allocation5 + $0x680] sm:$0xff]  ;;  %v11723_v50 = vcombine.high %v276_v44, %v280_v45  ;;  %6309 = vmatprep.subr.bf16.mxu1 %v11859_v43  ;;  %v11722_v56 = vcombine.low %v276_v44, %v280_v45 }
  0xac   :  { %v408_v47 = vld [vmem:[#allocation5 + $0x6a0] sm:$0xff]  ;;  %6310 = vmatpush2.bf16.msra.mxu1 %v11858_v49 }
  0xad   :  { %v11851_v51 = vcombine.high %v404_v46, %v408_v47  ;;  %v268_v52 = vld [vmem:[#allocation5 + $0x240] sm:$0xff]  ;;  %6268 = vmatprep.subr.bf16.mxu0 %v11723_v50  ;;  %v11850_v57 = vcombine.low %v404_v46, %v408_v47 }
  0xae   :  { %v272_v53 = vld [vmem:[#allocation5 + $0x260] sm:$0xff]  ;;  %6269 = vmatpush2.bf16.msra.mxu0 %v11722_v56 }
  0xaf   :  { %v396_v54 = vld [vmem:[#allocation5 + $0x640] sm:$0xff]  ;;  %v11715_v59 = vcombine.high %v268_v52, %v272_v53  ;;  %6311 = vmatprep.subr.bf16.mxu1 %v11851_v51  ;;  %v11714_v2 = vcombine.low %v268_v52, %v272_v53 }
  0xb0   :  { %v400_v55 = vld [vmem:[#allocation5 + $0x660] sm:$0xff]  ;;  %6312 = vmatpush2.bf16.msra.mxu1 %v11850_v57 }
  0xb1   :  { %v11843_v60 = vcombine.high %v396_v54, %v400_v55  ;;  %v260_v61 = vld [vmem:[#allocation5 + $0x200] sm:$0xff]  ;;  %6270 = vmatprep.subr.bf16.mxu0 %v11715_v59  ;;  %v11842_v3 = vcombine.low %v396_v54, %v400_v55 }
  0xb2   :  { %v264_v62 = vld [vmem:[#allocation5 + $0x220] sm:$0xff]  ;;  %6271 = vmatpush2.bf16.msra.mxu0 %v11714_v2 }
  0xb3   :  { %v388_v0 = vld [vmem:[#allocation5 + $0x600] sm:$0xff]  ;;  %v11707_v4 = vcombine.high %v260_v61, %v264_v62  ;;  %6313 = vmatprep.subr.bf16.mxu1 %v11843_v60  ;;  %v11706_v10 = vcombine.low %v260_v61, %v264_v62 }
  0xb4   :  { %v392_v1 = vld [vmem:[#allocation5 + $0x620] sm:$0xff]  ;;  %6314 = vmatpush2.bf16.msra.mxu1 %v11842_v3 }
  0xb5   :  { %v11835_v5 = vcombine.high %v388_v0, %v392_v1  ;;  %v508_v6 = vld [vmem:[#allocation5 + $0x9c0] sm:$0xff]  ;;  %6272 = vmatprep.subr.bf16.mxu0 %v11707_v4  ;;  %v11834_v13 = vcombine.low %v388_v0, %v392_v1 }
  0xb6   :  { %v512_v7 = vld [vmem:[#allocation5 + $0x9e0] sm:$0xff]  ;;  %6273 = vmatpush2.bf16.msra.mxu0 %v11706_v10 }
  0xb7   :  { %v636_v8 = vld [vmem:[#allocation5 + $0xdc0] sm:$0xff]  ;;  %v11955_v16 = vcombine.high %v508_v6, %v512_v7  ;;  %6315 = vmatprep.subr.bf16.mxu1 %v11835_v5  ;;  %v11954_v26 = vcombine.low %v508_v6, %v512_v7 }
  0xb8   :  { %v640_v9 = vld [vmem:[#allocation5 + $0xde0] sm:$0xff]  ;;  %6316 = vmatpush2.bf16.msra.mxu1 %v11834_v13 }
  0xb9   :  { %v148_v11 = vld [vmem:[#allocation2] sm:$0xff]  ;;  %v12083_v17 = vcombine.high %v636_v8, %v640_v9  ;;  %6328 = vmatprep.subr.bf16.mxu0 %v11955_v16  ;;  %v12082_v29 = vcombine.low %v636_v8, %v640_v9 }
  0xba   :  { %v164_v12 = vld [vmem:[#allocation2 + $0x80] sm:$0xff] }
  0xbb   :  { %v500_v18 = vld [vmem:[#allocation5 + $0x980] sm:$0xff]  ;;  %v14310_v21 = vpack.c.bf16 %v164_v12, %v148_v11  ;;  %6371 = vmatprep.subr.bf16.mxu1 %v12083_v17  ;;  %6318 = vmatmul.mubr.bf16.vlgmr.msra.gmra.mxu1 %v14312_v25 }
  0xbc   :  { %v504_v19 = vld [vmem:[#allocation5 + $0x9a0] sm:$0xff]  ;;  %6372 = vmatpush1.bf16.msra.mxu1 %v12082_v29  ;;  %6403 = vmatprep.mubr.bf16.mxu1 %v14317_v37 }
  0xbd   :  { %v628_v20 = vld [vmem:[#allocation5 + $0xd80] sm:$0xff]  ;;  %v11947_v30 = vcombine.high %v500_v18, %v504_v19  ;;  %6275 = vmatmul.mubr.bf16.vlgmr.msra.gmra.mxu0 %v14310_v21  ;;  %v11946_v38 = vcombine.low %v500_v18, %v504_v19 }
  0xbe   :  { %v632_v22 = vld [vmem:[#allocation5 + $0xda0] sm:$0xff]  ;;  %6329 = vmatpush1.bf16.msra.mxu0 %v11954_v26  ;;  %6360 = vmatprep.mubr.bf16.mxu0 %v14314_v34 }
  0xbf   :  { %v12075_v31 = vcombine.high %v628_v20, %v632_v22  ;;  %v492_v32 = vld [vmem:[#allocation5 + $0x940] sm:$0xff]  ;;  %6330 = vmatprep.subr.bf16.mxu0 %v11947_v30  ;;  %v12074_v39 = vcombine.low %v628_v20, %v632_v22 }
  0xc0   :  { %v496_v33 = vld [vmem:[#allocation5 + $0x960] sm:$0xff] }
  0xc1   :  { %v620_v35 = vld [vmem:[#allocation5 + $0xd40] sm:$0xff]  ;;  %v11939_v40 = vcombine.high %v492_v32, %v496_v33  ;;  %6373 = vmatprep.subr.bf16.mxu1 %v12075_v31  ;;  %v11938_v46 = vcombine.low %v492_v32, %v496_v33 }
  0xc2   :  { %v624_v36 = vld [vmem:[#allocation5 + $0xd60] sm:$0xff]  ;;  %6331 = vmatpush1.bf16.msra.mxu0 %v11946_v38  ;;  %6374 = vmatpush1.bf16.msra.mxu1 %v12074_v39 }
  0xc3   :  { %v12067_v41 = vcombine.high %v620_v35, %v624_v36  ;;  %v484_v42 = vld [vmem:[#allocation5 + $0x900] sm:$0xff]  ;;  %6332 = vmatprep.subr.bf16.mxu0 %v11939_v40  ;;  %v12066_v47 = vcombine.low %v620_v35, %v624_v36 }
  0xc4   :  { %v488_v43 = vld [vmem:[#allocation5 + $0x920] sm:$0xff] }
  0xc5   :  { %v612_v44 = vld [vmem:[#allocation5 + $0xd00] sm:$0xff]  ;;  %v11931_v48 = vcombine.high %v484_v42, %v488_v43  ;;  %6375 = vmatprep.subr.bf16.mxu1 %v12067_v41  ;;  %v11930_v54 = vcombine.low %v484_v42, %v488_v43 }
  0xc6   :  { %v616_v45 = vld [vmem:[#allocation5 + $0xd20] sm:$0xff]  ;;  %6333 = vmatpush1.bf16.msra.mxu0 %v11938_v46  ;;  %6376 = vmatpush1.bf16.msra.mxu1 %v12066_v47 }
  0xc7   :  { %v12059_v49 = vcombine.high %v612_v44, %v616_v45  ;;  %v476_v50 = vld [vmem:[#allocation5 + $0x8c0] sm:$0xff]  ;;  %6334 = vmatprep.subr.bf16.mxu0 %v11931_v48  ;;  %v12058_v55 = vcombine.low %v612_v44, %v616_v45 }
  0xc8   :  { %v480_v51 = vld [vmem:[#allocation5 + $0x8e0] sm:$0xff] }
  0xc9   :  { %v604_v52 = vld [vmem:[#allocation5 + $0xcc0] sm:$0xff]  ;;  %v11923_v56 = vcombine.high %v476_v50, %v480_v51  ;;  %6377 = vmatprep.subr.bf16.mxu1 %v12059_v49  ;;  %v11922_v0 = vcombine.low %v476_v50, %v480_v51 }
  0xca   :  { %v608_v53 = vld [vmem:[#allocation5 + $0xce0] sm:$0xff]  ;;  %6335 = vmatpush1.bf16.msra.mxu0 %v11930_v54  ;;  %6378 = vmatpush1.bf16.msra.mxu1 %v12058_v55 }
  0xcb   :  { %v468_v57 = vld [vmem:[#allocation5 + $0x880] sm:$0xff]  ;;  %v12051_v61 = vcombine.high %v604_v52, %v608_v53  ;;  %6336 = vmatprep.subr.bf16.mxu0 %v11923_v56  ;;  %v12050_v1 = vcombine.low %v604_v52, %v608_v53 }
  0xcc   :  { %v472_v59 = vld [vmem:[#allocation5 + $0x8a0] sm:$0xff] }
  0xcd   :  { %v596_v60 = vld [vmem:[#allocation5 + $0xc80] sm:$0xff]  ;;  %v11915_v2 = vcombine.high %v468_v57, %v472_v59  ;;  %6379 = vmatprep.subr.bf16.mxu1 %v12051_v61  ;;  %v11914_v8 = vcombine.low %v468_v57, %v472_v59 }
  0xce   :  { %v600_v62 = vld [vmem:[#allocation5 + $0xca0] sm:$0xff]  ;;  %6337 = vmatpush1.bf16.msra.mxu0 %v11922_v0  ;;  %6380 = vmatpush1.bf16.msra.mxu1 %v12050_v1 }
  0xcf   :  { %v460_v3 = vld [vmem:[#allocation5 + $0x840] sm:$0xff]  ;;  %v12043_v6 = vcombine.high %v596_v60, %v600_v62  ;;  %6338 = vmatprep.subr.bf16.mxu0 %v11915_v2  ;;  %v12042_v9 = vcombine.low %v596_v60, %v600_v62 }
  0xd0   :  { %v464_v4 = vld [vmem:[#allocation5 + $0x860] sm:$0xff] }
  0xd1   :  { %v588_v5 = vld [vmem:[#allocation5 + $0xc40] sm:$0xff]  ;;  %v11907_v10 = vcombine.high %v460_v3, %v464_v4  ;;  %6381 = vmatprep.subr.bf16.mxu1 %v12043_v6  ;;  %v11906_v16 = vcombine.low %v460_v3, %v464_v4 }
  0xd2   :  { %v592_v7 = vld [vmem:[#allocation5 + $0xc60] sm:$0xff]  ;;  %6339 = vmatpush1.bf16.msra.mxu0 %v11914_v8  ;;  %6382 = vmatpush1.bf16.msra.mxu1 %v12042_v9 }
  0xd3   :  { %v452_v11 = vld [vmem:[#allocation5 + $0x800] sm:$0xff]  ;;  %v12035_v14 = vcombine.high %v588_v5, %v592_v7  ;;  %6340 = vmatprep.subr.bf16.mxu0 %v11907_v10  ;;  %v12034_v17 = vcombine.low %v588_v5, %v592_v7 }
  0xd4   :  { %v456_v12 = vld [vmem:[#allocation5 + $0x820] sm:$0xff] }
  0xd5   :  { %v580_v13 = vld [vmem:[#allocation5 + $0xc00] sm:$0xff]  ;;  %v11899_v18 = vcombine.high %v452_v11, %v456_v12  ;;  %6383 = vmatprep.subr.bf16.mxu1 %v12035_v14  ;;  %v11898_v26 = vcombine.low %v452_v11, %v456_v12 }
  0xd6   :  { %v584_v15 = vld [vmem:[#allocation5 + $0xc20] sm:$0xff]  ;;  %6341 = vmatpush1.bf16.msra.mxu0 %v11906_v16  ;;  %6384 = vmatpush1.bf16.msra.mxu1 %v12034_v17 }
  0xd7   :  { %v572_v19 = vld [vmem:[#allocation5 + $0xbc0] sm:$0xff]  ;;  %v12027_v23 = vcombine.high %v580_v13, %v584_v15  ;;  %6342 = vmatprep.subr.bf16.mxu0 %v11899_v18  ;;  %v12026_v27 = vcombine.low %v580_v13, %v584_v15 }
  0xd8   :  { %v576_v20 = vld [vmem:[#allocation5 + $0xbe0] sm:$0xff] }
  0xd9   :  { %v700_v22 = vld [vmem:[#allocation5 + $0xfc0] sm:$0xff]  ;;  %v12019_v28 = vcombine.high %v572_v19, %v576_v20  ;;  %6385 = vmatprep.subr.bf16.mxu1 %v12027_v23  ;;  %v12018_v35 = vcombine.low %v572_v19, %v576_v20 }
  0xda   :  { %v704_v24 = vld [vmem:[#allocation5 + $0xfe0] sm:$0xff]  ;;  %6343 = vmatpush1.bf16.msra.mxu0 %v11898_v26  ;;  %6386 = vmatpush1.bf16.msra.mxu1 %v12026_v27 }
  0xdb   :  { %v564_v29 = vld [vmem:[#allocation5 + $0xb80] sm:$0xff]  ;;  %v12147_v32 = vcombine.high %v700_v22, %v704_v24  ;;  %6344 = vmatprep.subr.bf16.mxu0 %v12019_v28  ;;  %v12146_v36 = vcombine.low %v700_v22, %v704_v24 }
  0xdc   :  { %v568_v30 = vld [vmem:[#allocation5 + $0xba0] sm:$0xff] }
  0xdd   :  { %v692_v31 = vld [vmem:[#allocation5 + $0xf80] sm:$0xff]  ;;  %v12011_v38 = vcombine.high %v564_v29, %v568_v30  ;;  %6387 = vmatprep.subr.bf16.mxu1 %v12147_v32  ;;  %v12010_v44 = vcombine.low %v564_v29, %v568_v30 }
  0xde   :  { %v696_v33 = vld [vmem:[#allocation5 + $0xfa0] sm:$0xff]  ;;  %6345 = vmatpush2.bf16.msra.mxu0 %v12018_v35  ;;  %6388 = vmatpush2.bf16.msra.mxu1 %v12146_v36  ;;  %v154_v35 = vld [vmem:[#allocation2 + $0x30] sm:$0xff] }
  0xdf   :  { %v556_v39 = vld [vmem:[#allocation5 + $0xb40] sm:$0xff]  ;;  %v12139_v42 = vcombine.high %v692_v31, %v696_v33  ;;  %6346 = vmatprep.subr.bf16.mxu0 %v12011_v38  ;;  %v12138_v45 = vcombine.low %v692_v31, %v696_v33  ;;  %v170_v36 = vld [vmem:[#allocation2 + $0xb0] sm:$0xff] }
  0xe0   :  { %v560_v40 = vld [vmem:[#allocation5 + $0xb60] sm:$0xff] }
  0xe1   :  { %v684_v41 = vld [vmem:[#allocation5 + $0xf40] sm:$0xff]  ;;  %v12003_v46 = vcombine.high %v556_v39, %v560_v40  ;;  %6389 = vmatprep.subr.bf16.mxu1 %v12139_v42  ;;  %v12002_v52 = vcombine.low %v556_v39, %v560_v40 }
  0xe2   :  { %v688_v43 = vld [vmem:[#allocation5 + $0xf60] sm:$0xff]  ;;  %6347 = vmatpush2.bf16.msra.mxu0 %v12010_v44  ;;  %6390 = vmatpush2.bf16.msra.mxu1 %v12138_v45  ;;  %v157_v45 = vld [vmem:[#allocation2 + $0x48] sm:$0xff] }
  0xe3   :  { %v548_v47 = vld [vmem:[#allocation5 + $0xb00] sm:$0xff]  ;;  %v12131_v50 = vcombine.high %v684_v41, %v688_v43  ;;  %6348 = vmatprep.subr.bf16.mxu0 %v12003_v46  ;;  %v12130_v53 = vcombine.low %v684_v41, %v688_v43 }
  0xe4   :  { %v552_v48 = vld [vmem:[#allocation5 + $0xb20] sm:$0xff] }
  0xe5   :  { %v676_v49 = vld [vmem:[#allocation5 + $0xf00] sm:$0xff]  ;;  %v11995_v54 = vcombine.high %v548_v47, %v552_v48  ;;  %6391 = vmatprep.subr.bf16.mxu1 %v12131_v50  ;;  %v11994_v61 = vcombine.low %v548_v47, %v552_v48  ;;  %v173_v47 = vld [vmem:[#allocation2 + $0xc8] sm:$0xff] }
  0xe6   :  { %v680_v51 = vld [vmem:[#allocation5 + $0xf20] sm:$0xff]  ;;  %6349 = vmatpush2.bf16.msra.mxu0 %v12002_v52  ;;  %6392 = vmatpush2.bf16.msra.mxu1 %v12130_v53  ;;  %v175_v52 = vld [vmem:[#allocation2 + $0xd8] sm:$0xff] }
  0xe7   :  { %v540_v55 = vld [vmem:[#allocation5 + $0xac0] sm:$0xff]  ;;  %v12123_v59 = vcombine.high %v676_v49, %v680_v51  ;;  %6350 = vmatprep.subr.bf16.mxu0 %v11995_v54  ;;  %v12122_v62 = vcombine.low %v676_v49, %v680_v51  ;;  %v14324_v49 = vpack.c.bf16 %v170_v36, %v154_v35  ;;  %v159_v51 = vld [vmem:[#allocation2 + $0x58] sm:$0xff] }
  0xe8   :  { %v544_v56 = vld [vmem:[#allocation5 + $0xae0] sm:$0xff] }
  0xe9   :  { %v668_v57 = vld [vmem:[#allocation5 + $0xec0] sm:$0xff]  ;;  %v11987_v0 = vcombine.high %v540_v55, %v544_v56  ;;  %6393 = vmatprep.subr.bf16.mxu1 %v12123_v59  ;;  %v11986_v6 = vcombine.low %v540_v55, %v544_v56 }
  0xea   :  { %v672_v60 = vld [vmem:[#allocation5 + $0xee0] sm:$0xff]  ;;  %6351 = vmatpush2.bf16.msra.mxu0 %v11994_v61  ;;  %6394 = vmatpush2.bf16.msra.mxu1 %v12122_v62  ;;  %v14329_v62 = vpack.c.bf16 %v175_v52, %v159_v51 }
  0xeb   :  { %v532_v1 = vld [vmem:[#allocation5 + $0xa80] sm:$0xff]  ;;  %v12115_v4 = vcombine.high %v668_v57, %v672_v60  ;;  %6352 = vmatprep.subr.bf16.mxu0 %v11987_v0  ;;  %v12114_v7 = vcombine.low %v668_v57, %v672_v60  ;;  %v14326_v60 = vpack.c.bf16 %v173_v47, %v157_v45 }
  0xec   :  { %v536_v2 = vld [vmem:[#allocation5 + $0xaa0] sm:$0xff] }
  0xed   :  { %v660_v3 = vld [vmem:[#allocation5 + $0xe80] sm:$0xff]  ;;  %v11979_v8 = vcombine.high %v532_v1, %v536_v2  ;;  %6395 = vmatprep.subr.bf16.mxu1 %v12115_v4  ;;  %v11978_v14 = vcombine.low %v532_v1, %v536_v2 }
  0xee   :  { %v664_v5 = vld [vmem:[#allocation5 + $0xea0] sm:$0xff]  ;;  %6353 = vmatpush2.bf16.msra.mxu0 %v11986_v6  ;;  %6396 = vmatpush2.bf16.msra.mxu1 %v12114_v7 }
  0xef   :  { %v524_v9 = vld [vmem:[#allocation5 + $0xa40] sm:$0xff]  ;;  %v12107_v12 = vcombine.high %v660_v3, %v664_v5  ;;  %6354 = vmatprep.subr.bf16.mxu0 %v11979_v8  ;;  %v12106_v15 = vcombine.low %v660_v3, %v664_v5 }
  0xf0   :  { %v528_v10 = vld [vmem:[#allocation5 + $0xa60] sm:$0xff] }
  0xf1   :  { %v652_v11 = vld [vmem:[#allocation5 + $0xe40] sm:$0xff]  ;;  %v11971_v16 = vcombine.high %v524_v9, %v528_v10  ;;  %6397 = vmatprep.subr.bf16.mxu1 %v12107_v12  ;;  %v11970_v23 = vcombine.low %v524_v9, %v528_v10 }
  0xf2   :  { %v656_v13 = vld [vmem:[#allocation5 + $0xe60] sm:$0xff]  ;;  %6355 = vmatpush2.bf16.msra.mxu0 %v11978_v14  ;;  %6398 = vmatpush2.bf16.msra.mxu1 %v12106_v15 }
  0xf3   :  { %v516_v17 = vld [vmem:[#allocation5 + $0xa00] sm:$0xff]  ;;  %v12099_v18 = vcombine.high %v652_v11, %v656_v13  ;;  %6356 = vmatprep.subr.bf16.mxu0 %v11971_v16  ;;  %v12098_v24 = vcombine.low %v652_v11, %v656_v13 }
  0xf4   :  { %v520_v19 = vld [vmem:[#allocation5 + $0xa20] sm:$0xff] }
  0xf5   :  { %v644_v20 = vld [vmem:[#allocation5 + $0xe00] sm:$0xff]  ;;  %v11963_v26 = vcombine.high %v516_v17, %v520_v19  ;;  %6399 = vmatprep.subr.bf16.mxu1 %v12099_v18  ;;  %v11962_v38 = vcombine.low %v516_v17, %v520_v19 }
  0xf6   :  { %v648_v22 = vld [vmem:[#allocation5 + $0xe20] sm:$0xff]  ;;  %6357 = vmatpush2.bf16.msra.mxu0 %v11970_v23  ;;  %6400 = vmatpush2.bf16.msra.mxu1 %v12098_v24 }
  0xf7   :  { %v764_v27 = vld [vmem:[#allocation5 + $0x11c0] sm:$0xff]  ;;  %v12091_v30 = vcombine.high %v644_v20, %v648_v22  ;;  %6358 = vmatprep.subr.bf16.mxu0 %v11963_v26  ;;  %v12090_v41 = vcombine.low %v644_v20, %v648_v22 }
  0xf8   :  { %v768_v28 = vld [vmem:[#allocation5 + $0x11e0] sm:$0xff] }
  0xf9   :  { %v892_v29 = vld [vmem:[#allocation5 + $0x15c0] sm:$0xff]  ;;  %v12211_v42 = vcombine.high %v764_v27, %v768_v28  ;;  %6401 = vmatprep.subr.bf16.mxu1 %v12091_v30  ;;  %v12210_v50 = vcombine.low %v764_v27, %v768_v28 }
  0xfa   :  { %v152_v31 = vld [vmem:[#allocation2 + $0x20] sm:$0xff]  ;;  %6359 = vmatpush2.bf16.msra.mxu0 %v11962_v38  ;;  %6402 = vmatpush2.bf16.msra.mxu1 %v12090_v41 }
  0xfb   :  { %v168_v32 = vld [vmem:[#allocation2 + $0xa0] sm:$0xff]  ;;  %6414 = vmatprep.subr.bf16.mxu0 %v12211_v42 }
  0xfc   :  { %v896_v33 = vld [vmem:[#allocation5 + $0x15e0] sm:$0xff]  ;;  %v14322_v48 = vpack.c.bf16 %v168_v32, %v152_v31 }
  0xfd   :  { %v756_v39 = vld [vmem:[#allocation5 + $0x1180] sm:$0xff]  ;;  %v12339_v46 = vcombine.high %v892_v29, %v896_v33  ;;  %v12338_v53 = vcombine.low %v892_v29, %v896_v33  ;;  %6404 = vmatmul.mubr.bf16.vlgmr.msra.gmra.mxu1 %v14324_v49 }
  0xfe   :  { %v760_v40 = vld [vmem:[#allocation5 + $0x11a0] sm:$0xff]  ;;  %6361 = vmatmul.mubr.bf16.vlgmr.msra.gmra.mxu0 %v14322_v48  ;;  %6489 = vmatprep.mubr.bf16.mxu1 %v14329_v62 }
  0xff   :  { %v884_v43 = vld [vmem:[#allocation5 + $0x1580] sm:$0xff]  ;;  %v12203_v54 = vcombine.high %v756_v39, %v760_v40  ;;  %6457 = vmatprep.subr.bf16.mxu1 %v12339_v46  ;;  %6415 = vmatpush1.bf16.msra.mxu0 %v12210_v50  ;;  %v12202_v0 = vcombine.low %v756_v39, %v760_v40 }
 0x100   :  { %v888_v44 = vld [vmem:[#allocation5 + $0x15a0] sm:$0xff]  ;;  %6458 = vmatpush1.bf16.msra.mxu1 %v12338_v53  ;;  %6446 = vmatprep.mubr.bf16.mxu0 %v14326_v60 }
 0x101   :  { %v12331_v55 = vcombine.high %v884_v43, %v888_v44  ;;  %v748_v56 = vld [vmem:[#allocation5 + $0x1140] sm:$0xff]  ;;  %6416 = vmatprep.subr.bf16.mxu0 %v12203_v54  ;;  %v12330_v1 = vcombine.low %v884_v43, %v888_v44 }
 0x102   :  { %v752_v57 = vld [vmem:[#allocation5 + $0x1160] sm:$0xff] }
 0x103   :  { %v876_v59 = vld [vmem:[#allocation5 + $0x1540] sm:$0xff]  ;;  %v12195_v2 = vcombine.high %v748_v56, %v752_v57  ;;  %6459 = vmatprep.subr.bf16.mxu1 %v12331_v55  ;;  %6417 = vmatpush1.bf16.msra.mxu0 %v12202_v0  ;;  %v12194_v8 = vcombine.low %v748_v56, %v752_v57 }
 0x104   :  { %v880_v61 = vld [vmem:[#allocation5 + $0x1560] sm:$0xff]  ;;  %6460 = vmatpush1.bf16.msra.mxu1 %v12330_v1 }
 0x105   :  { %v740_v3 = vld [vmem:[#allocation5 + $0x1100] sm:$0xff]  ;;  %v12323_v6 = vcombine.high %v876_v59, %v880_v61  ;;  %6418 = vmatprep.subr.bf16.mxu0 %v12195_v2  ;;  %v12322_v9 = vcombine.low %v876_v59, %v880_v61 }
 0x106   :  { %v744_v4 = vld [vmem:[#allocation5 + $0x1120] sm:$0xff] }
 0x107   :  { %v868_v5 = vld [vmem:[#allocation5 + $0x1500] sm:$0xff]  ;;  %v12187_v10 = vcombine.high %v740_v3, %v744_v4  ;;  %6461 = vmatprep.subr.bf16.mxu1 %v12323_v6  ;;  %6419 = vmatpush1.bf16.msra.mxu0 %v12194_v8  ;;  %v12186_v16 = vcombine.low %v740_v3, %v744_v4 }
 0x108   :  { %v872_v7 = vld [vmem:[#allocation5 + $0x1520] sm:$0xff]  ;;  %6462 = vmatpush1.bf16.msra.mxu1 %v12322_v9 }
 0x109   :  { %v732_v11 = vld [vmem:[#allocation5 + $0x10c0] sm:$0xff]  ;;  %v12315_v14 = vcombine.high %v868_v5, %v872_v7  ;;  %6420 = vmatprep.subr.bf16.mxu0 %v12187_v10  ;;  %v12314_v17 = vcombine.low %v868_v5, %v872_v7 }
 0x10a   :  { %v736_v12 = vld [vmem:[#allocation5 + $0x10e0] sm:$0xff] }
 0x10b   :  { %v860_v13 = vld [vmem:[#allocation5 + $0x14c0] sm:$0xff]  ;;  %v12179_v18 = vcombine.high %v732_v11, %v736_v12  ;;  %6463 = vmatprep.subr.bf16.mxu1 %v12315_v14  ;;  %6421 = vmatpush1.bf16.msra.mxu0 %v12186_v16  ;;  %v12178_v26 = vcombine.low %v732_v11, %v736_v12 }
 0x10c   :  { %v864_v15 = vld [vmem:[#allocation5 + $0x14e0] sm:$0xff]  ;;  %6464 = vmatpush1.bf16.msra.mxu1 %v12314_v17 }
 0x10d   :  { %v724_v19 = vld [vmem:[#allocation5 + $0x1080] sm:$0xff]  ;;  %v12307_v23 = vcombine.high %v860_v13, %v864_v15  ;;  %6422 = vmatprep.subr.bf16.mxu0 %v12179_v18  ;;  %v12306_v27 = vcombine.low %v860_v13, %v864_v15 }
 0x10e   :  { %v728_v20 = vld [vmem:[#allocation5 + $0x10a0] sm:$0xff] }
 0x10f   :  { %v852_v22 = vld [vmem:[#allocation5 + $0x1480] sm:$0xff]  ;;  %v12171_v28 = vcombine.high %v724_v19, %v728_v20  ;;  %6465 = vmatprep.subr.bf16.mxu1 %v12307_v23  ;;  %6423 = vmatpush1.bf16.msra.mxu0 %v12178_v26  ;;  %v12170_v35 = vcombine.low %v724_v19, %v728_v20 }
 0x110   :  { %v856_v24 = vld [vmem:[#allocation5 + $0x14a0] sm:$0xff]  ;;  %6466 = vmatpush1.bf16.msra.mxu1 %v12306_v27 }
 0x111   :  { %v716_v29 = vld [vmem:[#allocation5 + $0x1040] sm:$0xff]  ;;  %v12299_v32 = vcombine.high %v852_v22, %v856_v24  ;;  %6424 = vmatprep.subr.bf16.mxu0 %v12171_v28  ;;  %v12298_v36 = vcombine.low %v852_v22, %v856_v24 }
 0x112   :  { %v720_v30 = vld [vmem:[#allocation5 + $0x1060] sm:$0xff] }
 0x113   :  { %v844_v31 = vld [vmem:[#allocation5 + $0x1440] sm:$0xff]  ;;  %v12163_v38 = vcombine.high %v716_v29, %v720_v30  ;;  %6467 = vmatprep.subr.bf16.mxu1 %v12299_v32  ;;  %6425 = vmatpush1.bf16.msra.mxu0 %v12170_v35  ;;  %v12162_v44 = vcombine.low %v716_v29, %v720_v30 }
 0x114   :  { %v848_v33 = vld [vmem:[#allocation5 + $0x1460] sm:$0xff]  ;;  %6468 = vmatpush1.bf16.msra.mxu1 %v12298_v36 }
 0x115   :  { %v708_v39 = vld [vmem:[#allocation5 + $0x1000] sm:$0xff]  ;;  %v12291_v42 = vcombine.high %v844_v31, %v848_v33  ;;  %6426 = vmatprep.subr.bf16.mxu0 %v12163_v38  ;;  %v12290_v45 = vcombine.low %v844_v31, %v848_v33 }
 0x116   :  { %v712_v40 = vld [vmem:[#allocation5 + $0x1020] sm:$0xff] }
 0x117   :  { %v836_v41 = vld [vmem:[#allocation5 + $0x1400] sm:$0xff]  ;;  %v12155_v46 = vcombine.high %v708_v39, %v712_v40  ;;  %6469 = vmatprep.subr.bf16.mxu1 %v12291_v42  ;;  %6427 = vmatpush1.bf16.msra.mxu0 %v12162_v44  ;;  %v12154_v54 = vcombine.low %v708_v39, %v712_v40 }
 0x118   :  { %v840_v43 = vld [vmem:[#allocation5 + $0x1420] sm:$0xff]  ;;  %6470 = vmatpush1.bf16.msra.mxu1 %v12290_v45 }
 0x119   :  { %v828_v47 = vld [vmem:[#allocation5 + $0x13c0] sm:$0xff]  ;;  %v12283_v52 = vcombine.high %v836_v41, %v840_v43  ;;  %6428 = vmatprep.subr.bf16.mxu0 %v12155_v46  ;;  %v12282_v55 = vcombine.low %v836_v41, %v840_v43 }
 0x11a   :  { %v832_v50 = vld [vmem:[#allocation5 + $0x13e0] sm:$0xff] }
 0x11b   :  { %v956_v51 = vld [vmem:[#allocation5 + $0x17c0] sm:$0xff]  ;;  %v12275_v56 = vcombine.high %v828_v47, %v832_v50  ;;  %6471 = vmatprep.subr.bf16.mxu1 %v12283_v52  ;;  %6429 = vmatpush1.bf16.msra.mxu0 %v12154_v54  ;;  %v12274_v2 = vcombine.low %v828_v47, %v832_v50 }
 0x11c   :  { %v960_v53 = vld [vmem:[#allocation5 + $0x17e0] sm:$0xff]  ;;  %6472 = vmatpush1.bf16.msra.mxu1 %v12282_v55 }
 0x11d   :  { %v820_v57 = vld [vmem:[#allocation5 + $0x1380] sm:$0xff]  ;;  %v12403_v0 = vcombine.high %v956_v51, %v960_v53  ;;  %6430 = vmatprep.subr.bf16.mxu0 %v12275_v56  ;;  %v12402_v3 = vcombine.low %v956_v51, %v960_v53 }
 0x11e   :  { %v824_v59 = vld [vmem:[#allocation5 + $0x13a0] sm:$0xff] }
 0x11f   :  { %v948_v61 = vld [vmem:[#allocation5 + $0x1780] sm:$0xff]  ;;  %v12267_v4 = vcombine.high %v820_v57, %v824_v59  ;;  %6473 = vmatprep.subr.bf16.mxu1 %v12403_v0  ;;  %6431 = vmatpush2.bf16.msra.mxu0 %v12274_v2  ;;  %v12266_v10 = vcombine.low %v820_v57, %v824_v59 }
 0x120   :  { %v952_v1 = vld [vmem:[#allocation5 + $0x17a0] sm:$0xff]  ;;  %6474 = vmatpush2.bf16.msra.mxu1 %v12402_v3 }
 0x121   :  { %v812_v5 = vld [vmem:[#allocation5 + $0x1340] sm:$0xff]  ;;  %v12395_v8 = vcombine.high %v948_v61, %v952_v1  ;;  %6432 = vmatprep.subr.bf16.mxu0 %v12267_v4  ;;  %v12394_v11 = vcombine.low %v948_v61, %v952_v1 }
 0x122   :  { %v816_v6 = vld [vmem:[#allocation5 + $0x1360] sm:$0xff] }
 0x123   :  { %v940_v7 = vld [vmem:[#allocation5 + $0x1740] sm:$0xff]  ;;  %v12259_v12 = vcombine.high %v812_v5, %v816_v6  ;;  %6475 = vmatprep.subr.bf16.mxu1 %v12395_v8  ;;  %6433 = vmatpush2.bf16.msra.mxu0 %v12266_v10  ;;  %v12258_v18 = vcombine.low %v812_v5, %v816_v6  ;;  %v158_v6 = vld [vmem:[#allocation2 + $0x50] sm:$0xff] }
 0x124   :  { %v944_v9 = vld [vmem:[#allocation5 + $0x1760] sm:$0xff]  ;;  %6476 = vmatpush2.bf16.msra.mxu1 %v12394_v11 }
 0x125   :  { %v804_v13 = vld [vmem:[#allocation5 + $0x1300] sm:$0xff]  ;;  %v12387_v16 = vcombine.high %v940_v7, %v944_v9  ;;  %6434 = vmatprep.subr.bf16.mxu0 %v12259_v12  ;;  %v12386_v19 = vcombine.low %v940_v7, %v944_v9  ;;  %v174_v7 = vld [vmem:[#allocation2 + $0xd0] sm:$0xff] }
 0x126   :  { %v808_v14 = vld [vmem:[#allocation5 + $0x1320] sm:$0xff] }
 0x127   :  { %v932_v15 = vld [vmem:[#allocation5 + $0x1700] sm:$0xff]  ;;  %v12251_v20 = vcombine.high %v804_v13, %v808_v14  ;;  %6477 = vmatprep.subr.bf16.mxu1 %v12387_v16  ;;  %6435 = vmatpush2.bf16.msra.mxu0 %v12258_v18  ;;  %v12250_v28 = vcombine.low %v804_v13, %v808_v14  ;;  %v179_v16 = vld [vmem:[#allocation2 + $0xf8] sm:$0xff]  ;;  %v161_v18 = vld [vmem:[#allocation2 + $0x68] sm:$0xff] }
 0x128   :  { %v936_v17 = vld [vmem:[#allocation5 + $0x1720] sm:$0xff]  ;;  %6478 = vmatpush2.bf16.msra.mxu1 %v12386_v19  ;;  %v177_v19 = vld [vmem:[#allocation2 + $0xe8] sm:$0xff] }
 0x129   :  { %v796_v22 = vld [vmem:[#allocation5 + $0x12c0] sm:$0xff]  ;;  %v12379_v26 = vcombine.high %v932_v15, %v936_v17  ;;  %6436 = vmatprep.subr.bf16.mxu0 %v12251_v20  ;;  %v12378_v29 = vcombine.low %v932_v15, %v936_v17  ;;  %v163_v15 = vld [vmem:[#allocation2 + $0x78] sm:$0xff] }
 0x12a   :  { %v800_v23 = vld [vmem:[#allocation5 + $0x12e0] sm:$0xff] }
 0x12b   :  { %v924_v24 = vld [vmem:[#allocation5 + $0x16c0] sm:$0xff]  ;;  %v12243_v30 = vcombine.high %v796_v22, %v800_v23  ;;  %6479 = vmatprep.subr.bf16.mxu1 %v12379_v26  ;;  %6437 = vmatpush2.bf16.msra.mxu0 %v12250_v28  ;;  %v12242_v38 = vcombine.low %v796_v22, %v800_v23  ;;  %v14336_v22 = vpack.c.bf16 %v174_v7, %v158_v6 }
 0x12c   :  { %v928_v27 = vld [vmem:[#allocation5 + $0x16e0] sm:$0xff]  ;;  %6480 = vmatpush2.bf16.msra.mxu1 %v12378_v29 }
 0x12d   :  { %v788_v31 = vld [vmem:[#allocation5 + $0x1280] sm:$0xff]  ;;  %v12371_v35 = vcombine.high %v924_v24, %v928_v27  ;;  %6438 = vmatprep.subr.bf16.mxu0 %v12243_v30  ;;  %v12370_v39 = vcombine.low %v924_v24, %v928_v27 }
 0x12e   :  { %v792_v32 = vld [vmem:[#allocation5 + $0x12a0] sm:$0xff] }
 0x12f   :  { %v916_v33 = vld [vmem:[#allocation5 + $0x1680] sm:$0xff]  ;;  %v12235_v40 = vcombine.high %v788_v31, %v792_v32  ;;  %6481 = vmatprep.subr.bf16.mxu1 %v12371_v35  ;;  %6439 = vmatpush2.bf16.msra.mxu0 %v12242_v38  ;;  %v12234_v46 = vcombine.low %v788_v31, %v792_v32  ;;  %v14338_v32 = vpack.c.bf16 %v179_v16, %v163_v15 }
 0x130   :  { %v920_v36 = vld [vmem:[#allocation5 + $0x16a0] sm:$0xff]  ;;  %6482 = vmatpush2.bf16.msra.mxu1 %v12370_v39 }
 0x131   :  { %v780_v41 = vld [vmem:[#allocation5 + $0x1240] sm:$0xff]  ;;  %v12363_v44 = vcombine.high %v916_v33, %v920_v36  ;;  %6440 = vmatprep.subr.bf16.mxu0 %v12235_v40  ;;  %v12362_v47 = vcombine.low %v916_v33, %v920_v36  ;;  %v14341_v33 = vpack.c.bf16 %v177_v19, %v161_v18 }
 0x132   :  { %v784_v42 = vld [vmem:[#allocation5 + $0x1260] sm:$0xff] }
 0x133   :  { %v908_v43 = vld [vmem:[#allocation5 + $0x1640] sm:$0xff]  ;;  %v12227_v50 = vcombine.high %v780_v41, %v784_v42  ;;  %6483 = vmatprep.subr.bf16.mxu1 %v12363_v44  ;;  %6441 = vmatpush2.bf16.msra.mxu0 %v12234_v46  ;;  %v12226_v56 = vcombine.low %v780_v41, %v784_v42 }
 0x134   :  { %v912_v45 = vld [vmem:[#allocation5 + $0x1660] sm:$0xff]  ;;  %6484 = vmatpush2.bf16.msra.mxu1 %v12362_v47 }
 0x135   :  { %v772_v51 = vld [vmem:[#allocation5 + $0x1200] sm:$0xff]  ;;  %v12355_v54 = vcombine.high %v908_v43, %v912_v45  ;;  %6442 = vmatprep.subr.bf16.mxu0 %v12227_v50  ;;  %v12354_v57 = vcombine.low %v908_v43, %v912_v45 }
 0x136   :  { %v776_v52 = vld [vmem:[#allocation5 + $0x1220] sm:$0xff] }
 0x137   :  { %v900_v53 = vld [vmem:[#allocation5 + $0x1600] sm:$0xff]  ;;  %v12219_v59 = vcombine.high %v772_v51, %v776_v52  ;;  %6485 = vmatprep.subr.bf16.mxu1 %v12355_v54  ;;  %6443 = vmatpush2.bf16.msra.mxu0 %v12226_v56  ;;  %v12218_v8 = vcombine.low %v772_v51, %v776_v52 }
 0x138   :  { %v904_v55 = vld [vmem:[#allocation5 + $0x1620] sm:$0xff]  ;;  %6486 = vmatpush2.bf16.msra.mxu1 %v12354_v57 }
 0x139   :  { %v1020_v61 = vld [vmem:[#allocation5 + $0x19c0] sm:$0xff]  ;;  %v12347_v2 = vcombine.high %v900_v53, %v904_v55  ;;  %6444 = vmatprep.subr.bf16.mxu0 %v12219_v59  ;;  %v12346_v11 = vcombine.low %v900_v53, %v904_v55 }
 0x13a   :  { %v1024_v0 = vld [vmem:[#allocation5 + $0x19e0] sm:$0xff] }
 0x13b   :  { %v1148_v1 = vld [vmem:[#allocation5 + $0x1dc0] sm:$0xff]  ;;  %v12467_v12 = vcombine.high %v1020_v61, %v1024_v0  ;;  %6487 = vmatprep.subr.bf16.mxu1 %v12347_v2  ;;  %6445 = vmatpush2.bf16.msra.mxu0 %v12218_v8  ;;  %v12466_v23 = vcombine.low %v1020_v61, %v1024_v0 }
 0x13c   :  { %v156_v3 = vld [vmem:[#allocation2 + $0x40] sm:$0xff]  ;;  %6488 = vmatpush2.bf16.msra.mxu1 %v12346_v11 }
 0x13d   :  { %v172_v4 = vld [vmem:[#allocation2 + $0xc0] sm:$0xff]  ;;  %6500 = vmatprep.subr.bf16.mxu0 %v12467_v12 }
 0x13e   :  { %v1152_v5 = vld [vmem:[#allocation5 + $0x1de0] sm:$0xff]  ;;  %v14334_v20 = vpack.c.bf16 %v172_v4, %v156_v3 }
 0x13f   :  { %v1012_v9 = vld [vmem:[#allocation5 + $0x1980] sm:$0xff]  ;;  %v12595_v17 = vcombine.high %v1148_v1, %v1152_v5  ;;  %v12594_v24 = vcombine.low %v1148_v1, %v1152_v5  ;;  %6490 = vmatmul.mubr.bf16.vlgmr.msra.gmra.mxu1 %v14336_v22 }
 0x140   :  { %v1016_v10 = vld [vmem:[#allocation5 + $0x19a0] sm:$0xff]  ;;  %6447 = vmatmul.mubr.bf16.vlgmr.msra.gmra.mxu0 %v14334_v20  ;;  %12642 = vmatprep.mubr.msk.bf16.mxu1 %vm6238_vm0, %v14338_v32 }
 0x141   :  { %v1140_v13 = vld [vmem:[#allocation5 + $0x1d80] sm:$0xff]  ;;  %v12459_v26 = vcombine.high %v1012_v9, %v1016_v10  ;;  %6543 = vmatprep.subr.bf16.mxu1 %v12595_v17  ;;  %6501 = vmatpush1.bf16.msra.mxu0 %v12466_v23  ;;  %v12458_v35 = vcombine.low %v1012_v9, %v1016_v10 }
 0x142   :  { %v1144_v14 = vld [vmem:[#allocation5 + $0x1da0] sm:$0xff]  ;;  %6544 = vmatpush1.bf16.msra.mxu1 %v12594_v24  ;;  %6532 = vmatprep.mubr.bf16.mxu0 %v14341_v33 }
 0x143   :  { %v1004_v27 = vld [vmem:[#allocation5 + $0x1940] sm:$0xff]  ;;  %v12587_v30 = vcombine.high %v1140_v13, %v1144_v14  ;;  %6502 = vmatprep.subr.bf16.mxu0 %v12459_v26  ;;  %v12586_v36 = vcombine.low %v1140_v13, %v1144_v14 }
 0x144   :  { %v1008_v28 = vld [vmem:[#allocation5 + $0x1960] sm:$0xff] }
 0x145   :  { %v1132_v29 = vld [vmem:[#allocation5 + $0x1d40] sm:$0xff]  ;;  %v12451_v38 = vcombine.high %v1004_v27, %v1008_v28  ;;  %6545 = vmatprep.subr.bf16.mxu1 %v12587_v30  ;;  %6503 = vmatpush1.bf16.msra.mxu0 %v12458_v35  ;;  %v12450_v44 = vcombine.low %v1004_v27, %v1008_v28 }
 0x146   :  { %v1136_v31 = vld [vmem:[#allocation5 + $0x1d60] sm:$0xff]  ;;  %6546 = vmatpush1.bf16.msra.mxu1 %v12586_v36 }
 0x147   :  { %v996_v39 = vld [vmem:[#allocation5 + $0x1900] sm:$0xff]  ;;  %v12579_v42 = vcombine.high %v1132_v29, %v1136_v31  ;;  %6504 = vmatprep.subr.bf16.mxu0 %v12451_v38  ;;  %v12578_v45 = vcombine.low %v1132_v29, %v1136_v31 }
 0x148   :  { %v1000_v40 = vld [vmem:[#allocation5 + $0x1920] sm:$0xff] }
 0x149   :  { %v1124_v41 = vld [vmem:[#allocation5 + $0x1d00] sm:$0xff]  ;;  %v12443_v46 = vcombine.high %v996_v39, %v1000_v40  ;;  %6547 = vmatprep.subr.bf16.mxu1 %v12579_v42  ;;  %6505 = vmatpush1.bf16.msra.mxu0 %v12450_v44  ;;  %v12442_v54 = vcombine.low %v996_v39, %v1000_v40 }
 0x14a   :  { %v1128_v43 = vld [vmem:[#allocation5 + $0x1d20] sm:$0xff]  ;;  %6548 = vmatpush1.bf16.msra.mxu1 %v12578_v45 }
 0x14b   :  { %v988_v47 = vld [vmem:[#allocation5 + $0x18c0] sm:$0xff]  ;;  %v12571_v52 = vcombine.high %v1124_v41, %v1128_v43  ;;  %6506 = vmatprep.subr.bf16.mxu0 %v12443_v46  ;;  %v12570_v55 = vcombine.low %v1124_v41, %v1128_v43 }
 0x14c   :  { %v992_v50 = vld [vmem:[#allocation5 + $0x18e0] sm:$0xff] }
 0x14d   :  { %v1116_v51 = vld [vmem:[#allocation5 + $0x1cc0] sm:$0xff]  ;;  %v12435_v56 = vcombine.high %v988_v47, %v992_v50  ;;  %6549 = vmatprep.subr.bf16.mxu1 %v12571_v52  ;;  %6507 = vmatpush1.bf16.msra.mxu0 %v12442_v54  ;;  %v12434_v2 = vcombine.low %v988_v47, %v992_v50 }
 0x14e   :  { %v1120_v53 = vld [vmem:[#allocation5 + $0x1ce0] sm:$0xff]  ;;  %6550 = vmatpush1.bf16.msra.mxu1 %v12570_v55 }
 0x14f   :  { %v980_v57 = vld [vmem:[#allocation5 + $0x1880] sm:$0xff]  ;;  %v12563_v0 = vcombine.high %v1116_v51, %v1120_v53  ;;  %6508 = vmatprep.subr.bf16.mxu0 %v12435_v56  ;;  %v12562_v3 = vcombine.low %v1116_v51, %v1120_v53 }
 0x150   :  { %v984_v59 = vld [vmem:[#allocation5 + $0x18a0] sm:$0xff] }
 0x151   :  { %v1108_v61 = vld [vmem:[#allocation5 + $0x1c80] sm:$0xff]  ;;  %v12427_v4 = vcombine.high %v980_v57, %v984_v59  ;;  %6551 = vmatprep.subr.bf16.mxu1 %v12563_v0  ;;  %6509 = vmatpush1.bf16.msra.mxu0 %v12434_v2  ;;  %v12426_v10 = vcombine.low %v980_v57, %v984_v59 }
 0x152   :  { %v1112_v1 = vld [vmem:[#allocation5 + $0x1ca0] sm:$0xff]  ;;  %6552 = vmatpush1.bf16.msra.mxu1 %v12562_v3 }
 0x153   :  { %v972_v5 = vld [vmem:[#allocation5 + $0x1840] sm:$0xff]  ;;  %v12555_v8 = vcombine.high %v1108_v61, %v1112_v1  ;;  %6510 = vmatprep.subr.bf16.mxu0 %v12427_v4  ;;  %v12554_v11 = vcombine.low %v1108_v61, %v1112_v1 }
 0x154   :  { %v976_v6 = vld [vmem:[#allocation5 + $0x1860] sm:$0xff] }
 0x155   :  { %v1100_v7 = vld [vmem:[#allocation5 + $0x1c40] sm:$0xff]  ;;  %v12419_v12 = vcombine.high %v972_v5, %v976_v6  ;;  %6553 = vmatprep.subr.bf16.mxu1 %v12555_v8  ;;  %6511 = vmatpush1.bf16.msra.mxu0 %v12426_v10  ;;  %v12418_v18 = vcombine.low %v972_v5, %v976_v6 }
 0x156   :  { %v1104_v9 = vld [vmem:[#allocation5 + $0x1c60] sm:$0xff]  ;;  %6554 = vmatpush1.bf16.msra.mxu1 %v12554_v11 }
 0x157   :  { %v964_v13 = vld [vmem:[#allocation5 + $0x1800] sm:$0xff]  ;;  %v12547_v16 = vcombine.high %v1100_v7, %v1104_v9  ;;  %6512 = vmatprep.subr.bf16.mxu0 %v12419_v12  ;;  %v12546_v19 = vcombine.low %v1100_v7, %v1104_v9 }
 0x158   :  { %v968_v14 = vld [vmem:[#allocation5 + $0x1820] sm:$0xff] }
 0x159   :  { %v1092_v15 = vld [vmem:[#allocation5 + $0x1c00] sm:$0xff]  ;;  %v12411_v23 = vcombine.high %v964_v13, %v968_v14  ;;  %6555 = vmatprep.subr.bf16.mxu1 %v12547_v16  ;;  %6513 = vmatpush1.bf16.msra.mxu0 %v12418_v18  ;;  %v12410_v30 = vcombine.low %v964_v13, %v968_v14  ;;  %v253_v13 = vld [vmem:[#allocation5 + $0x1c8] sm:$0xff]  ;;  %v162_v16 = vld [vmem:[#allocation2 + $0x70] sm:$0xff] }
 0x15a   :  { %v1096_v17 = vld [vmem:[#allocation5 + $0x1c20] sm:$0xff]  ;;  %6556 = vmatpush1.bf16.msra.mxu1 %v12546_v19 }
 0x15b   :  { %v1084_v24 = vld [vmem:[#allocation5 + $0x1bc0] sm:$0xff]  ;;  %v12539_v28 = vcombine.high %v1092_v15, %v1096_v17  ;;  %6514 = vmatprep.subr.bf16.mxu0 %v12411_v23  ;;  %v12538_v31 = vcombine.low %v1092_v15, %v1096_v17  ;;  %v257_v15 = vld [vmem:[#allocation5 + $0x1e8] sm:$0xff]  ;;  %v178_v17 = vld [vmem:[#allocation2 + $0xf0] sm:$0xff] }
 0x15c   :  { %v1088_v26 = vld [vmem:[#allocation5 + $0x1be0] sm:$0xff] }
 0x15d   :  { %v1188_v27 = vld [vmem:[#allocation5 + $0x1f00] sm:$0xff]  ;;  %v12531_v35 = vcombine.high %v1084_v24, %v1088_v26  ;;  %6557 = vmatprep.subr.bf16.mxu1 %v12539_v28  ;;  %6515 = vmatpush1.bf16.msra.mxu0 %v12410_v30  ;;  %v12530_v42 = vcombine.low %v1084_v24, %v1088_v26  ;;  %v11701_v28 = vcombine.high %v253_v13, %v257_v15 }
 0x15e   :  { %v1192_v29 = vld [vmem:[#allocation5 + $0x1f20] sm:$0xff]  ;;  %6558 = vmatpush1.bf16.msra.mxu1 %v12538_v31  ;;  %v14347_v31 = vpack.c.bf16 %v178_v17, %v162_v16  ;;  %v369_v16 = vld [vmem:[#allocation5 + $0x568] sm:$0xff] }
 0x15f   :  { %v1076_v36 = vld [vmem:[#allocation5 + $0x1b80] sm:$0xff]  ;;  %v12635_v40 = vcombine.high %v1188_v27, %v1192_v29  ;;  %6516 = vmatprep.subr.bf16.mxu0 %v12531_v35  ;;  %v12634_v43 = vcombine.low %v1188_v27, %v1192_v29  ;;  %v245_v27 = vld [vmem:[#allocation5 + $0x188] sm:$0xff]  ;;  %v1198_v35 = vlaneseq }
 0x160   :  { %v1080_v38 = vld [vmem:[#allocation5 + $0x1ba0] sm:$0xff]  ;;  %v249_v29 = vld [vmem:[#allocation5 + $0x1a8] sm:$0xff] }
 0x161   :  { %v1180_v39 = vld [vmem:[#allocation5 + $0x1ec0] sm:$0xff]  ;;  %v12523_v44 = vcombine.high %v1076_v36, %v1080_v38  ;;  %6565 = vmatprep.subr.bf16.mxu1 %v12635_v40  ;;  %6517 = vmatpush2.bf16.msra.mxu0 %v12530_v42  ;;  %v12522_v52 = vcombine.low %v1076_v36, %v1080_v38  ;;  %v11700_v36 = vcombine.low %v253_v13, %v257_v15  ;;  %v217_v13 = vld [vmem:[#allocation5 + $0xa8] sm:$0xff] }
 0x162   :  { %v1184_v41 = vld [vmem:[#allocation5 + $0x1ee0] sm:$0xff]  ;;  %6566 = vmatpush2.bf16.msra.mxu1 %v12634_v43  ;;  %v11693_v42 = vcombine.high %v245_v27, %v249_v29  ;;  %v241_v43 = vld [vmem:[#allocation5 + $0x168] sm:$0xff] }
 0x163   :  { %v1068_v45 = vld [vmem:[#allocation5 + $0x1b40] sm:$0xff]  ;;  %v12627_v50 = vcombine.high %v1180_v39, %v1184_v41  ;;  %6518 = vmatprep.subr.bf16.mxu0 %v12523_v44  ;;  %v12626_v53 = vcombine.low %v1180_v39, %v1184_v41  ;;  %v237_v41 = vld [vmem:[#allocation5 + $0x148] sm:$0xff] }
 0x164   :  { %v1072_v46 = vld [vmem:[#allocation5 + $0x1b60] sm:$0xff] }
 0x165   :  { %v1172_v47 = vld [vmem:[#allocation5 + $0x1e80] sm:$0xff]  ;;  %v12515_v54 = vcombine.high %v1068_v45, %v1072_v46  ;;  %6567 = vmatprep.subr.bf16.mxu1 %v12627_v50  ;;  %6519 = vmatpush2.bf16.msra.mxu0 %v12522_v52  ;;  %v12514_v0 = vcombine.low %v1068_v45, %v1072_v46  ;;  %v14350_v45 = vshrl.u32 %v1198_v35, 7  ;;  %v11692_v46 = vcombine.low %v245_v27, %v249_v29  ;;  %v229_v50 = vld [vmem:[#allocation5 + $0x108] sm:$0xff] }
 0x166   :  { %v1176_v51 = vld [vmem:[#allocation5 + $0x1ea0] sm:$0xff]  ;;  %6568 = vmatpush2.bf16.msra.mxu1 %v12626_v53  ;;  %v381_v52 = vld [vmem:[#allocation5 + $0x5c8] sm:$0xff]  ;;  %v11685_v53 = vcombine.high %v237_v41, %v241_v43 }
 0x167   :  { %v1060_v55 = vld [vmem:[#allocation5 + $0x1b00] sm:$0xff]  ;;  %v12619_v59 = vcombine.high %v1172_v47, %v1176_v51  ;;  %6520 = vmatprep.subr.bf16.mxu0 %v12515_v54  ;;  %v12618_v1 = vcombine.low %v1172_v47, %v1176_v51  ;;  %v233_v51 = vld [vmem:[#allocation5 + $0x128] sm:$0xff] }
 0x168   :  { %v1064_v56 = vld [vmem:[#allocation5 + $0x1b20] sm:$0xff]  ;;  %v209_v29 = vld [vmem:[#allocation5 + $0x68] sm:$0xff] }
 0x169   :  { %v1164_v57 = vld [vmem:[#allocation5 + $0x1e40] sm:$0xff]  ;;  %v12507_v2 = vcombine.high %v1060_v55, %v1064_v56  ;;  %6569 = vmatprep.subr.bf16.mxu1 %v12619_v59  ;;  %6521 = vmatpush2.bf16.msra.mxu0 %v12514_v0  ;;  %v12506_v8 = vcombine.low %v1060_v55, %v1064_v56  ;;  %v385_v56 = vld [vmem:[#allocation5 + $0x5e8] sm:$0xff]  ;;  %v11684_v0 = vcombine.low %v237_v41, %v241_v43 }
 0x16a   :  { %v1168_v61 = vld [vmem:[#allocation5 + $0x1e60] sm:$0xff]  ;;  %6570 = vmatpush2.bf16.msra.mxu1 %v12618_v1  ;;  %v11829_v1 = vcombine.high %v381_v52, %v385_v56 }
 0x16b   :  { %v1052_v3 = vld [vmem:[#allocation5 + $0x1ac0] sm:$0xff]  ;;  %v12611_v6 = vcombine.high %v1164_v57, %v1168_v61  ;;  %6522 = vmatprep.subr.bf16.mxu0 %v12507_v2  ;;  %v12610_v9 = vcombine.low %v1164_v57, %v1168_v61  ;;  %v14354_v61 = vsub.s32 0, %v14350_v45  ;;  %v221_v2 = vld [vmem:[#allocation5 + $0xc8] sm:$0xff] }
 0x16c   :  { %v1056_v4 = vld [vmem:[#allocation5 + $0x1ae0] sm:$0xff] }
 0x16d   :  { %v1156_v5 = vld [vmem:[#allocation5 + $0x1e00] sm:$0xff]  ;;  %v12499_v10 = vcombine.high %v1052_v3, %v1056_v4  ;;  %6571 = vmatprep.subr.bf16.mxu1 %v12611_v6  ;;  %6523 = vmatpush2.bf16.msra.mxu0 %v12506_v8  ;;  %v12498_v18 = vcombine.low %v1052_v3, %v1056_v4  ;;  %14744 = vst [vmem:[#allocation24_spill] sm:$0xff] %v14354_v61  ;;  %v225_v3 = vld [vmem:[#allocation5 + $0xe8] sm:$0xff] }
 0x16e   :  { %v1160_v7 = vld [vmem:[#allocation5 + $0x1e20] sm:$0xff]  ;;  %6572 = vmatpush2.bf16.msra.mxu1 %v12610_v9  ;;  %v373_v4 = vld [vmem:[#allocation5 + $0x588] sm:$0xff]  ;;  %v11828_v9 = vcombine.low %v381_v52, %v385_v56  ;;  %v11669_v15 = vcombine.high %v221_v2, %v225_v3 }
 0x16f   :  { %v1044_v11 = vld [vmem:[#allocation5 + $0x1a80] sm:$0xff]  ;;  %v12603_v14 = vcombine.high %v1156_v5, %v1160_v7  ;;  %6524 = vmatprep.subr.bf16.mxu0 %v12499_v10  ;;  %v12602_v19 = vcombine.low %v1156_v5, %v1160_v7  ;;  %v11677_v5 = vcombine.high %v229_v50, %v233_v51  ;;  %v377_v6 = vld [vmem:[#allocation5 + $0x5a8] sm:$0xff]  ;;  %v11676_v10 = vcombine.low %v229_v50, %v233_v51 }
 0x170   :  { %v1048_v12 = vld [vmem:[#allocation5 + $0x1aa0] sm:$0xff]  ;;  %v201_v50 = vld [vmem:[#allocation5 + $0x28] sm:$0xff] }
 0x171   :  { %v12491_v23 = vcombine.high %v1044_v11, %v1048_v12  ;;  %v1036_v24 = vld [vmem:[#allocation5 + $0x1a40] sm:$0xff]  ;;  %6573 = vmatprep.subr.bf16.mxu1 %v12603_v14  ;;  %6525 = vmatpush2.bf16.msra.mxu0 %v12498_v18  ;;  %v12490_v30 = vcombine.low %v1044_v11, %v1048_v12  ;;  %v11821_v11 = vcombine.high %v373_v4, %v377_v6  ;;  %v213_v12 = vld [vmem:[#allocation5 + $0x88] sm:$0xff] }
 0x172   :  { %v1040_v26 = vld [vmem:[#allocation5 + $0x1a60] sm:$0xff]  ;;  %6574 = vmatpush2.bf16.msra.mxu1 %v12602_v19  ;;  %v365_v14 = vld [vmem:[#allocation5 + $0x548] sm:$0xff] }
 0x173   :  { %6526 = vmatprep.subr.bf16.mxu0 %v12491_v23  ;;  %v12483_v38 = vcombine.high %v1036_v24, %v1040_v26  ;;  %v1028_v39 = vld [vmem:[#allocation5 + $0x1a00] sm:$0xff]  ;;  %6586 = vmatprep.subr.bf16.mxu1 %v11701_v28  ;;  %v12482_v44 = vcombine.low %v1036_v24, %v1040_v26  ;;  %v11820_v23 = vcombine.low %v373_v4, %v377_v6  ;;  %v205_v28 = vld [vmem:[#allocation5 + $0x48] sm:$0xff] }
 0x174   :  { %v1032_v40 = vld [vmem:[#allocation5 + $0x1a20] sm:$0xff]  ;;  %v11668_v26 = vcombine.low %v221_v2, %v225_v3  ;;  %v11813_v27 = vcombine.high %v365_v14, %v369_v16  ;;  %v349_v51 = vld [vmem:[#allocation5 + $0x4c8] sm:$0xff]  ;;  %v11652_v56 = vcombine.low %v205_v28, %v209_v29 }
 0x175   :  { %6576 = vmatmul.mubr.bf16.vlgmr.msra.gmra.mxu1 %v14347_v31  ;;  %6527 = vmatpush2.bf16.msra.mxu0 %v12490_v30  ;;  %v12475_v47 = vcombine.high %v1028_v39, %v1032_v40  ;;  %v160_v54 = vld [vmem:[#allocation2 + $0x60] sm:$0xff]  ;;  %v12474_v59 = vcombine.low %v1028_v39, %v1032_v40  ;;  %v357_v30 = vld [vmem:[#allocation5 + $0x508] sm:$0xff] }
 0x176   :  { %6587 = vmatpush1.bf16.msra.mxu1 %v11700_v36  ;;  %6528 = vmatprep.subr.bf16.mxu0 %v12483_v38  ;;  %v176_v55 = vld [vmem:[#allocation2 + $0xe0] sm:$0xff]  ;;  %v11661_v38 = vcombine.high %v213_v12, %v217_v13  ;;  %v361_v39 = vld [vmem:[#allocation5 + $0x528] sm:$0xff] }
 0x177   :  { %6588 = vmatprep.subr.bf16.mxu1 %v11693_v42  ;;  %6618 = vmatprep.mubr.bf16.mxu1 %v14304_v58  ;;  %v1196_v57 = vld [vmem:[#allocation7] sm:$0xff]  ;;  %v14356_v7 = vpack.c.bf16 %v176_v55, %v160_v54  ;;  %v11812_v42 = vcombine.low %v365_v14, %v369_v16  ;;  %v353_v54 = vld [vmem:[#allocation5 + $0x4e8] sm:$0xff]  ;;  %v11804_v55 = vcombine.low %v357_v30, %v361_v39 }
 0x178   :  { %v1201_v8 = vrot.slane %v1196_v57, %v14354_v61  ;;  %v11797_v57 = vcombine.high %v349_v51, %v353_v54  ;;  %v345_v3 = vld [vmem:[#allocation5 + $0x4a8] sm:$0xff]  ;;  %v11796_v4 = vcombine.low %v349_v51, %v353_v54 }
 0x179   :  { %6529 = vmatpush2.bf16.msra.mxu0 %v12482_v44  ;;  %v11660_v44 = vcombine.low %v213_v12, %v217_v13  ;;  %v337_v12 = vld [vmem:[#allocation5 + $0x468] sm:$0xff] }
 0x17a   :  { %6589 = vmatpush1.bf16.msra.mxu1 %v11692_v46  ;;  %6530 = vmatprep.subr.bf16.mxu0 %v12475_v47  ;;  %v11805_v46 = vcombine.high %v357_v30, %v361_v39  ;;  %v197_v47 = vld [vmem:[#allocation5 + $0x8] sm:$0xff] }
 0x17b   :  { %6590 = vmatprep.subr.bf16.mxu1 %v11685_v53  ;;  %v6319_v19 = vpop.f32.mrf.mxu1  ;;  %v11653_v53 = vcombine.high %v205_v28, %v209_v29  ;;  %v11645_v2 = vcombine.high %v197_v47, %v201_v50  ;;  %v301_v16 = vld [vmem:[#allocation5 + $0x348] sm:$0xff] }
 0x17c   :  { %v293_v29 = vld [vmem:[#allocation5 + $0x308] sm:$0xff] }
 0x17d   :  { %6531 = vmatpush2.bf16.msra.mxu0 %v12474_v59  ;;  %v6276_v17 = vpop.f32.mrf.mxu0  ;;  %v14365_v36 = vpop.f32.mrf.mxu1  ;;  %v317_v59 = vld [vmem:[#allocation5 + $0x3c8] sm:$0xff] }
 0x17e   :  { %6591 = vmatpush1.bf16.msra.mxu1 %v11684_v0  ;;  %6629 = vmatprep.subr.bf16.mxu0 %v11829_v1  ;;  %v6277_v18 = vadd.f32 %v6276_v17, %v1201_v8  ;;  %v321_v0 = vld [vmem:[#allocation5 + $0x3e8] sm:$0xff] }
 0x17f   :  { %6592 = vmatprep.subr.bf16.mxu1 %v11677_v5  ;;  %v14361_v24 = vpop.f32.mrf.mxu0  ;;  %v6323_v43 = vpop.f32.mrf.mxu1  ;;  %v341_v1 = vld [vmem:[#allocation5 + $0x488] sm:$0xff]  ;;  %v11644_v5 = vcombine.low %v197_v47, %v201_v50  ;;  %v11764_v14 = vcombine.low %v317_v59, %v321_v0 }
 0x180   :  { %6533 = vmatmul.mubr.bf16.vlgmr.msra.gmra.mxu0 %v14356_v7  ;;  %v14363_v35 = vadd.f32 %v6319_v19, %v6277_v18  ;;  %v11789_v6 = vcombine.high %v341_v1, %v345_v3  ;;  %v11788_v13 = vcombine.low %v341_v1, %v345_v3  ;;  %v305_v17 = vld [vmem:[#allocation5 + $0x368] sm:$0xff] }
 0x181   :  { %6630 = vmatpush1.bf16.msra.mxu0 %v11828_v9  ;;  %6661 = vmatprep.mubr.bf16.mxu0 %v14306_v63  ;;  %v6280_v40 = vpop.f32.mrf.mxu0  ;;  %v313_v9 = vld [vmem:[#allocation5 + $0x3a8] sm:$0xff]  ;;  %v11749_v39 = vcombine.high %v301_v16, %v305_v17 }
 0x182   :  { %6593 = vmatpush1.bf16.msra.mxu1 %v11676_v10  ;;  %6631 = vmatprep.subr.bf16.mxu0 %v11821_v11  ;;  %v6281_v41 = vadd.f32 %v6280_v40, %v1201_v8  ;;  %v309_v8 = vld [vmem:[#allocation5 + $0x388] sm:$0xff]  ;;  %v11765_v11 = vcombine.high %v317_v59, %v321_v0 }
 0x183   :  { %6594 = vmatprep.subr.bf16.mxu1 %v11669_v15  ;;  %v333_v10 = vld [vmem:[#allocation5 + $0x448] sm:$0xff]  ;;  %v11757_v19 = vcombine.high %v309_v8, %v313_v9 }
 0x184   :  { %v14367_v52 = vadd.f32 %v6323_v43, %v6281_v41  ;;  %v11781_v15 = vcombine.high %v333_v10, %v337_v12  ;;  %v325_v18 = vld [vmem:[#allocation5 + $0x408] sm:$0xff] }
 0x185   :  { %6632 = vmatpush1.bf16.msra.mxu0 %v11820_v23  ;;  %v329_v23 = vld [vmem:[#allocation5 + $0x428] sm:$0xff] }
 0x186   :  { %6595 = vmatpush1.bf16.msra.mxu1 %v11668_v26  ;;  %6633 = vmatprep.subr.bf16.mxu0 %v11813_v27  ;;  %v11780_v26 = vcombine.low %v333_v10, %v337_v12  ;;  %v11756_v27 = vcombine.low %v309_v8, %v313_v9  ;;  %v11773_v28 = vcombine.high %v325_v18, %v329_v23  ;;  %v297_v30 = vld [vmem:[#allocation5 + $0x328] sm:$0xff] }
 0x187   :  { %6596 = vmatprep.subr.bf16.mxu1 %v11661_v38  ;;  %v445_v38 = vld [vmem:[#allocation5 + $0x7c8] sm:$0xff]  ;;  %v11772_v41 = vcombine.low %v325_v18, %v329_v23  ;;  %v11741_v50 = vcombine.high %v293_v29, %v297_v30  ;;  %v11740_v54 = vcombine.low %v293_v29, %v297_v30 }
 0x188   :  { %v449_v40 = vld [vmem:[#allocation5 + $0x7e8] sm:$0xff] }
 0x189   :  { %6634 = vmatpush1.bf16.msra.mxu0 %v11812_v42  ;;  %v11748_v42 = vcombine.low %v301_v16, %v305_v17  ;;  %v11893_v43 = vcombine.high %v445_v38, %v449_v40  ;;  %v437_v47 = vld [vmem:[#allocation5 + $0x788] sm:$0xff] }
 0x18a   :  { %6597 = vmatpush1.bf16.msra.mxu1 %v11660_v44  ;;  %6635 = vmatprep.subr.bf16.mxu0 %v11805_v46  ;;  %v285_v44 = vld [vmem:[#allocation5 + $0x2c8] sm:$0xff] }
 0x18b   :  { %6598 = vmatprep.subr.bf16.mxu1 %v11653_v53  ;;  %v289_v46 = vld [vmem:[#allocation5 + $0x2e8] sm:$0xff]  ;;  %v11892_v53 = vcombine.low %v445_v38, %v449_v40 }
 0x18c   :  { %v441_v51 = vld [vmem:[#allocation5 + $0x7a8] sm:$0xff]  ;;  %v11733_v0 = vcombine.high %v285_v44, %v289_v46  ;;  %v11732_v3 = vcombine.low %v285_v44, %v289_v46 }
 0x18d   :  { %6636 = vmatpush1.bf16.msra.mxu0 %v11804_v55  ;;  %v11885_v55 = vcombine.high %v437_v47, %v441_v51  ;;  %v429_v59 = vld [vmem:[#allocation5 + $0x748] sm:$0xff] }
 0x18e   :  { %6599 = vmatpush1.bf16.msra.mxu1 %v11652_v56  ;;  %6637 = vmatprep.subr.bf16.mxu0 %v11797_v57  ;;  %v277_v56 = vld [vmem:[#allocation5 + $0x288] sm:$0xff] }
 0x18f   :  { %6600 = vmatprep.subr.bf16.mxu1 %v11645_v2  ;;  %v281_v57 = vld [vmem:[#allocation5 + $0x2a8] sm:$0xff]  ;;  %v11884_v2 = vcombine.low %v437_v47, %v441_v51 }
 0x190   :  { %v433_v1 = vld [vmem:[#allocation5 + $0x768] sm:$0xff]  ;;  %v11725_v9 = vcombine.high %v277_v56, %v281_v57  ;;  %v11724_v12 = vcombine.low %v277_v56, %v281_v57 }
 0x191   :  { %6638 = vmatpush1.bf16.msra.mxu0 %v11796_v4  ;;  %v11877_v4 = vcombine.high %v429_v59, %v433_v1  ;;  %v421_v8 = vld [vmem:[#allocation5 + $0x708] sm:$0xff] }
 0x192   :  { %6601 = vmatpush1.bf16.msra.mxu1 %v11644_v5  ;;  %6639 = vmatprep.subr.bf16.mxu0 %v11789_v6  ;;  %v269_v5 = vld [vmem:[#allocation5 + $0x248] sm:$0xff] }
 0x193   :  { %6602 = vmatprep.subr.bf16.mxu1 %v11765_v11  ;;  %v273_v6 = vld [vmem:[#allocation5 + $0x268] sm:$0xff]  ;;  %v11876_v11 = vcombine.low %v429_v59, %v433_v1 }
 0x194   :  { %v425_v10 = vld [vmem:[#allocation5 + $0x728] sm:$0xff]  ;;  %v11717_v17 = vcombine.high %v269_v5, %v273_v6  ;;  %v11716_v23 = vcombine.low %v269_v5, %v273_v6 }
 0x195   :  { %6640 = vmatpush1.bf16.msra.mxu0 %v11788_v13  ;;  %v11869_v13 = vcombine.high %v421_v8, %v425_v10  ;;  %v413_v16 = vld [vmem:[#allocation5 + $0x6c8] sm:$0xff] }
 0x196   :  { %6603 = vmatpush2.bf16.msra.mxu1 %v11764_v14  ;;  %6641 = vmatprep.subr.bf16.mxu0 %v11781_v15  ;;  %v261_v14 = vld [vmem:[#allocation5 + $0x208] sm:$0xff] }
 0x197   :  { %6604 = vmatprep.subr.bf16.mxu1 %v11757_v19  ;;  %v265_v15 = vld [vmem:[#allocation5 + $0x228] sm:$0xff]  ;;  %v11868_v19 = vcombine.low %v421_v8, %v425_v10 }
 0x198   :  { %v417_v18 = vld [vmem:[#allocation5 + $0x6e8] sm:$0xff]  ;;  %v11709_v30 = vcombine.high %v261_v14, %v265_v15  ;;  %v11708_v40 = vcombine.low %v261_v14, %v265_v15 }
 0x199   :  { %6642 = vmatpush1.bf16.msra.mxu0 %v11780_v26  ;;  %v11861_v26 = vcombine.high %v413_v16, %v417_v18  ;;  %v509_v29 = vld [vmem:[#allocation5 + $0x9c8] sm:$0xff] }
 0x19a   :  { %6605 = vmatpush2.bf16.msra.mxu1 %v11756_v27  ;;  %6643 = vmatprep.subr.bf16.mxu0 %v11773_v28  ;;  %v405_v27 = vld [vmem:[#allocation5 + $0x688] sm:$0xff] }
 0x19b   :  { %6606 = vmatprep.subr.bf16.mxu1 %v11749_v39  ;;  %v409_v28 = vld [vmem:[#allocation5 + $0x6a8] sm:$0xff]  ;;  %v11860_v39 = vcombine.low %v413_v16, %v417_v18  ;;  %v14371_v18 = vpop.f32.mrf.mxu0 }
 0x19c   :  { %v513_v38 = vld [vmem:[#allocation5 + $0x9e8] sm:$0xff] }
 0x19d   :  { %6644 = vmatpush1.bf16.msra.mxu0 %v11772_v41  ;;  %v11853_v41 = vcombine.high %v405_v27, %v409_v28  ;;  %v501_v44 = vld [vmem:[#allocation5 + $0x988] sm:$0xff]  ;;  %v11957_v46 = vcombine.high %v509_v29, %v513_v38  ;;  %v11956_v51 = vcombine.low %v509_v29, %v513_v38  ;;  %v14373_v29 = vpop.f32.mrf.mxu1 }
 0x19e   :  { %6607 = vmatpush2.bf16.msra.mxu1 %v11748_v42  ;;  %6645 = vmatprep.subr.bf16.mxu0 %v11893_v43  ;;  %v397_v42 = vld [vmem:[#allocation5 + $0x648] sm:$0xff] }
 0x19f   :  { %6608 = vmatprep.subr.bf16.mxu1 %v11741_v50  ;;  %v401_v43 = vld [vmem:[#allocation5 + $0x668] sm:$0xff]  ;;  %v11852_v50 = vcombine.low %v405_v27, %v409_v28 }
 0x1a0   :  { %v505_v47 = vld [vmem:[#allocation5 + $0x9a8] sm:$0xff] }
 0x1a1   :  { %6646 = vmatpush2.bf16.msra.mxu0 %v11892_v53  ;;  %v11845_v53 = vcombine.high %v397_v42, %v401_v43  ;;  %v493_v56 = vld [vmem:[#allocation5 + $0x948] sm:$0xff]  ;;  %v11949_v57 = vcombine.high %v501_v44, %v505_v47  ;;  %v11948_v1 = vcombine.low %v501_v44, %v505_v47 }
 0x1a2   :  { %6609 = vmatpush2.bf16.msra.mxu1 %v11740_v54  ;;  %6647 = vmatprep.subr.bf16.mxu0 %v11885_v55  ;;  %v389_v54 = vld [vmem:[#allocation5 + $0x608] sm:$0xff] }
 0x1a3   :  { %6610 = vmatprep.subr.bf16.mxu1 %v11733_v0  ;;  %v393_v55 = vld [vmem:[#allocation5 + $0x628] sm:$0xff]  ;;  %v11844_v0 = vcombine.low %v397_v42, %v401_v43 }
 0x1a4   :  { %v497_v59 = vld [vmem:[#allocation5 + $0x968] sm:$0xff] }
 0x1a5   :  { %6648 = vmatpush2.bf16.msra.mxu0 %v11884_v2  ;;  %v11837_v2 = vcombine.high %v389_v54, %v393_v55  ;;  %v637_v5 = vld [vmem:[#allocation5 + $0xdc8] sm:$0xff]  ;;  %v11941_v6 = vcombine.high %v493_v56, %v497_v59  ;;  %v11940_v10 = vcombine.low %v493_v56, %v497_v59 }
 0x1a6   :  { %6611 = vmatpush2.bf16.msra.mxu1 %v11732_v3  ;;  %6649 = vmatprep.subr.bf16.mxu0 %v11877_v4  ;;  %v485_v3 = vld [vmem:[#allocation5 + $0x908] sm:$0xff] }
 0x1a7   :  { %6612 = vmatprep.subr.bf16.mxu1 %v11725_v9  ;;  %v489_v4 = vld [vmem:[#allocation5 + $0x928] sm:$0xff]  ;;  %v11836_v9 = vcombine.low %v389_v54, %v393_v55 }
 0x1a8   :  { %v641_v8 = vld [vmem:[#allocation5 + $0xde8] sm:$0xff]  ;;  %v11933_v15 = vcombine.high %v485_v3, %v489_v4 }
 0x1a9   :  { %6650 = vmatpush2.bf16.msra.mxu0 %v11876_v11  ;;  %v12085_v11 = vcombine.high %v637_v5, %v641_v8  ;;  %v629_v14 = vld [vmem:[#allocation5 + $0xd88] sm:$0xff] }
 0x1aa   :  { %6613 = vmatpush2.bf16.msra.mxu1 %v11724_v12  ;;  %6651 = vmatprep.subr.bf16.mxu0 %v11869_v13  ;;  %v477_v12 = vld [vmem:[#allocation5 + $0x8c8] sm:$0xff] }
 0x1ab   :  { %6614 = vmatprep.subr.bf16.mxu1 %v11717_v17  ;;  %v481_v13 = vld [vmem:[#allocation5 + $0x8e8] sm:$0xff]  ;;  %v12084_v17 = vcombine.low %v637_v5, %v641_v8 }
 0x1ac   :  { %v633_v16 = vld [vmem:[#allocation5 + $0xda8] sm:$0xff]  ;;  %v11924_v44 = vcombine.low %v477_v12, %v481_v13 }
 0x1ad   :  { %6652 = vmatpush2.bf16.msra.mxu0 %v11868_v19  ;;  %v11932_v19 = vcombine.low %v485_v3, %v489_v4  ;;  %v473_v27 = vld [vmem:[#allocation5 + $0x8a8] sm:$0xff]  ;;  %v12076_v42 = vcombine.low %v629_v14, %v633_v16 }
 0x1ae   :  { %6615 = vmatpush2.bf16.msra.mxu1 %v11716_v23  ;;  %6653 = vmatprep.subr.bf16.mxu0 %v11861_v26  ;;  %v12077_v23 = vcombine.high %v629_v14, %v633_v16  ;;  %v469_v26 = vld [vmem:[#allocation5 + $0x888] sm:$0xff] }
 0x1af   :  { %6616 = vmatprep.subr.bf16.mxu1 %v11709_v30  ;;  %v621_v28 = vld [vmem:[#allocation5 + $0xd48] sm:$0xff]  ;;  %v11925_v30 = vcombine.high %v477_v12, %v481_v13 }
 0x1b0   :  { %v625_v38 = vld [vmem:[#allocation5 + $0xd68] sm:$0xff] }
 0x1b1   :  { %6654 = vmatpush2.bf16.msra.mxu0 %v11860_v39  ;;  %v461_v47 = vld [vmem:[#allocation5 + $0x848] sm:$0xff]  ;;  %v12068_v59 = vcombine.low %v621_v28, %v625_v38 }
 0x1b2   :  { %6617 = vmatpush2.bf16.msra.mxu1 %v11708_v40  ;;  %6655 = vmatprep.subr.bf16.mxu0 %v11853_v41  ;;  %v617_v55 = vld [vmem:[#allocation5 + $0xd28] sm:$0xff] }
 0x1b3   :  { %6672 = vmatprep.subr.bf16.mxu1 %v11957_v46  ;;  %v12069_v46 = vcombine.high %v621_v28, %v625_v38  ;;  %v453_v3 = vld [vmem:[#allocation5 + $0x808] sm:$0xff] }
 0x1b4   :  { %v457_v4 = vld [vmem:[#allocation5 + $0x828] sm:$0xff] }
 0x1b5   :  { %6619 = vmatmul.mubr.bf16.vlgmr.msra.gmra.mxu1 %v14310_v21  ;;  %6656 = vmatpush2.bf16.msra.mxu0 %v11852_v50  ;;  %v465_v50 = vld [vmem:[#allocation5 + $0x868] sm:$0xff] }
 0x1b6   :  { %6673 = vmatpush1.bf16.msra.mxu1 %v11956_v51  ;;  %6657 = vmatprep.subr.bf16.mxu0 %v11845_v53  ;;  %v613_v51 = vld [vmem:[#allocation5 + $0xd08] sm:$0xff]  ;;  %v11909_v8 = vcombine.high %v461_v47, %v465_v50 }
 0x1b7   :  { %6674 = vmatprep.subr.bf16.mxu1 %v11949_v57  ;;  %6704 = vmatprep.mubr.bf16.mxu1 %v14314_v34  ;;  %v605_v5 = vld [vmem:[#allocation5 + $0xcc8] sm:$0xff] }
 0x1b8   :  { %v573_v12 = vld [vmem:[#allocation5 + $0xbc8] sm:$0xff] }
 0x1b9   :  { %6658 = vmatpush2.bf16.msra.mxu0 %v11844_v0  ;;  %v577_v13 = vld [vmem:[#allocation5 + $0xbe8] sm:$0xff] }
 0x1ba   :  { %6675 = vmatpush1.bf16.msra.mxu1 %v11948_v1  ;;  %6659 = vmatprep.subr.bf16.mxu0 %v11837_v2  ;;  %v11916_v1 = vcombine.low %v469_v26, %v473_v27  ;;  %v12061_v2 = vcombine.high %v613_v51, %v617_v55  ;;  %v597_v14 = vld [vmem:[#allocation5 + $0xc88] sm:$0xff] }
 0x1bb   :  { %6676 = vmatprep.subr.bf16.mxu1 %v11941_v6  ;;  %v601_v16 = vld [vmem:[#allocation5 + $0xca8] sm:$0xff] }
 0x1bc   :  { %v589_v28 = vld [vmem:[#allocation5 + $0xc48] sm:$0xff] }
 0x1bd   :  { %6660 = vmatpush2.bf16.msra.mxu0 %v11836_v9  ;;  %v6405_v41 = vpop.f32.mrf.mxu1  ;;  %v609_v9 = vld [vmem:[#allocation5 + $0xce8] sm:$0xff] }
 0x1be   :  { %6677 = vmatpush1.bf16.msra.mxu1 %v11940_v10  ;;  %6715 = vmatprep.subr.bf16.mxu0 %v12085_v11  ;;  %v6362_v39 = vpop.f32.mrf.mxu0  ;;  %v12060_v10 = vcombine.low %v613_v51, %v617_v55  ;;  %v11908_v11 = vcombine.low %v461_v47, %v465_v50  ;;  %v593_v38 = vld [vmem:[#allocation5 + $0xc68] sm:$0xff] }
 0x1bf   :  { %6678 = vmatprep.subr.bf16.mxu1 %v11933_v15  ;;  %v6363_v40 = vadd.f32 %v6362_v39, %v14363_v35  ;;  %v14382_v54 = vpop.f32.mrf.mxu1  ;;  %v11917_v35 = vcombine.high %v469_v26, %v473_v27  ;;  %v11901_v15 = vcombine.high %v453_v3, %v457_v4  ;;  %v565_v26 = vld [vmem:[#allocation5 + $0xb88] sm:$0xff]  ;;  %v12044_v39 = vcombine.low %v597_v14, %v601_v16 }
 0x1c0   :  { %6662 = vmatmul.mubr.bf16.vlgmr.msra.gmra.mxu0 %v14312_v25  ;;  %v14378_v43 = vpop.f32.mrf.mxu0  ;;  %v569_v27 = vld [vmem:[#allocation5 + $0xba8] sm:$0xff]  ;;  %v12036_v51 = vcombine.low %v589_v28, %v593_v38 }
 0x1c1   :  { %6716 = vmatpush1.bf16.msra.mxu0 %v12084_v17  ;;  %6747 = vmatprep.mubr.bf16.mxu0 %v14317_v37  ;;  %v14380_v53 = vadd.f32 %v6405_v41, %v6363_v40  ;;  %v6409_v0 = vpop.f32.mrf.mxu1  ;;  %v12052_v17 = vcombine.low %v605_v5, %v609_v9  ;;  %v12020_v40 = vcombine.low %v573_v12, %v577_v13  ;;  %v585_v50 = vld [vmem:[#allocation5 + $0xc28] sm:$0xff] }
 0x1c2   :  { %6679 = vmatpush1.bf16.msra.mxu1 %v11932_v19  ;;  %6717 = vmatprep.subr.bf16.mxu0 %v12077_v23  ;;  %v6366_v56 = vpop.f32.mrf.mxu0  ;;  %v11900_v19 = vcombine.low %v453_v3, %v457_v4  ;;  %v12045_v23 = vcombine.high %v597_v14, %v601_v16  ;;  %v12037_v41 = vcombine.high %v589_v28, %v593_v38  ;;  %v533_v14 = vld [vmem:[#allocation5 + $0xa88] sm:$0xff] }
 0x1c3   :  { %6680 = vmatprep.subr.bf16.mxu1 %v11925_v30  ;;  %v6367_v57 = vadd.f32 %v6366_v56, %v14367_v52  ;;  %v12053_v52 = vcombine.high %v605_v5, %v609_v9  ;;  %v12021_v30 = vcombine.high %v573_v12, %v577_v13  ;;  %v12013_v47 = vcombine.high %v565_v26, %v569_v27  ;;  %v549_v56 = vld [vmem:[#allocation5 + $0xb08] sm:$0xff] }
 0x1c4   :  { %v541_v5 = vld [vmem:[#allocation5 + $0xac8] sm:$0xff] }
 0x1c5   :  { %6718 = vmatpush1.bf16.msra.mxu0 %v12076_v42  ;;  %v14385_v6 = vadd.f32 %v6409_v0, %v6367_v57  ;;  %v557_v42 = vld [vmem:[#allocation5 + $0xb48] sm:$0xff] }
 0x1c6   :  { %6681 = vmatpush1.bf16.msra.mxu1 %v11924_v44  ;;  %6719 = vmatprep.subr.bf16.mxu0 %v12069_v46  ;;  %v561_v44 = vld [vmem:[#allocation5 + $0xb68] sm:$0xff] }
 0x1c7   :  { %6682 = vmatprep.subr.bf16.mxu1 %v11917_v35  ;;  %v581_v46 = vld [vmem:[#allocation5 + $0xc08] sm:$0xff]  ;;  %v12012_v35 = vcombine.low %v565_v26, %v569_v27  ;;  %v12005_v0 = vcombine.high %v557_v42, %v561_v44  ;;  %v12004_v3 = vcombine.low %v557_v42, %v561_v44 }
 0x1c8   :  { %v12029_v55 = vcombine.high %v581_v46, %v585_v50  ;;  %v553_v57 = vld [vmem:[#allocation5 + $0xb28] sm:$0xff] }
 0x1c9   :  { %6720 = vmatpush1.bf16.msra.mxu0 %v12068_v59  ;;  %v701_v59 = vld [vmem:[#allocation5 + $0xfc8] sm:$0xff]  ;;  %v11996_v12 = vcombine.low %v549_v56, %v553_v57 }
 0x1ca   :  { %6683 = vmatpush1.bf16.msra.mxu1 %v11916_v1  ;;  %6721 = vmatprep.subr.bf16.mxu0 %v12061_v2  ;;  %v705_v1 = vld [vmem:[#allocation5 + $0xfe8] sm:$0xff]  ;;  %v12028_v2 = vcombine.low %v581_v46, %v585_v50 }
 0x1cb   :  { %6684 = vmatprep.subr.bf16.mxu1 %v11909_v8  ;;  %v12149_v4 = vcombine.high %v701_v59, %v705_v1  ;;  %v545_v8 = vld [vmem:[#allocation5 + $0xae8] sm:$0xff] }
 0x1cc   :  { %v693_v9 = vld [vmem:[#allocation5 + $0xf88] sm:$0xff]  ;;  %v11988_v26 = vcombine.low %v541_v5, %v545_v8 }
 0x1cd   :  { %6722 = vmatpush1.bf16.msra.mxu0 %v12060_v10  ;;  %v11997_v10 = vcombine.high %v549_v56, %v553_v57  ;;  %v685_v16 = vld [vmem:[#allocation5 + $0xf48] sm:$0xff] }
 0x1ce   :  { %6685 = vmatpush1.bf16.msra.mxu1 %v11908_v11  ;;  %6723 = vmatprep.subr.bf16.mxu0 %v12053_v52  ;;  %v697_v11 = vld [vmem:[#allocation5 + $0xfa8] sm:$0xff]  ;;  %v12148_v52 = vcombine.low %v701_v59, %v705_v1 }
 0x1cf   :  { %6686 = vmatprep.subr.bf16.mxu1 %v11901_v15  ;;  %v12141_v13 = vcombine.high %v693_v9, %v697_v11  ;;  %v537_v15 = vld [vmem:[#allocation5 + $0xaa8] sm:$0xff] }
 0x1d0   :  { %v525_v28 = vld [vmem:[#allocation5 + $0xa48] sm:$0xff]  ;;  %v11980_v42 = vcombine.low %v533_v14, %v537_v15 }
 0x1d1   :  { %6724 = vmatpush1.bf16.msra.mxu0 %v12052_v17  ;;  %v11989_v17 = vcombine.high %v541_v5, %v545_v8  ;;  %v677_v38 = vld [vmem:[#allocation5 + $0xf08] sm:$0xff] }
 0x1d2   :  { %6687 = vmatpush1.bf16.msra.mxu1 %v11900_v19  ;;  %6725 = vmatprep.subr.bf16.mxu0 %v12045_v23  ;;  %v689_v19 = vld [vmem:[#allocation5 + $0xf68] sm:$0xff]  ;;  %v12140_v23 = vcombine.low %v693_v9, %v697_v11 }
 0x1d3   :  { %6688 = vmatprep.subr.bf16.mxu1 %v12021_v30  ;;  %v12133_v27 = vcombine.high %v685_v16, %v689_v19  ;;  %v529_v30 = vld [vmem:[#allocation5 + $0xa68] sm:$0xff] }
 0x1d4   :  { %v517_v46 = vld [vmem:[#allocation5 + $0xa08] sm:$0xff]  ;;  %v11972_v56 = vcombine.low %v525_v28, %v529_v30 }
 0x1d5   :  { %6726 = vmatpush1.bf16.msra.mxu0 %v12044_v39  ;;  %v11981_v39 = vcombine.high %v533_v14, %v537_v15  ;;  %v669_v50 = vld [vmem:[#allocation5 + $0xec8] sm:$0xff] }
 0x1d6   :  { %6689 = vmatpush2.bf16.msra.mxu1 %v12020_v40  ;;  %6727 = vmatprep.subr.bf16.mxu0 %v12037_v41  ;;  %v681_v40 = vld [vmem:[#allocation5 + $0xf28] sm:$0xff]  ;;  %v12132_v41 = vcombine.low %v685_v16, %v689_v19 }
 0x1d7   :  { %6690 = vmatprep.subr.bf16.mxu1 %v12013_v47  ;;  %v12125_v44 = vcombine.high %v677_v38, %v681_v40  ;;  %v521_v47 = vld [vmem:[#allocation5 + $0xa28] sm:$0xff] }
 0x1d8   :  { %v661_v59 = vld [vmem:[#allocation5 + $0xe88] sm:$0xff]  ;;  %v11964_v5 = vcombine.low %v517_v46, %v521_v47 }
 0x1d9   :  { %6728 = vmatpush1.bf16.msra.mxu0 %v12036_v51  ;;  %v11973_v51 = vcombine.high %v525_v28, %v529_v30  ;;  %v765_v1 = vld [vmem:[#allocation5 + $0x11c8] sm:$0xff] }
 0x1da   :  { %6691 = vmatpush2.bf16.msra.mxu1 %v12012_v35  ;;  %6729 = vmatprep.subr.bf16.mxu0 %v12029_v55  ;;  %v673_v35 = vld [vmem:[#allocation5 + $0xee8] sm:$0xff]  ;;  %v12124_v55 = vcombine.low %v677_v38, %v681_v40 }
 0x1db   :  { %6692 = vmatprep.subr.bf16.mxu1 %v12005_v0  ;;  %v12117_v57 = vcombine.high %v669_v50, %v673_v35  ;;  %v665_v0 = vld [vmem:[#allocation5 + $0xea8] sm:$0xff] }
 0x1dc   :  { %v12109_v8 = vcombine.high %v661_v59, %v665_v0  ;;  %v653_v9 = vld [vmem:[#allocation5 + $0xe48] sm:$0xff] }
 0x1dd   :  { %6730 = vmatpush1.bf16.msra.mxu0 %v12028_v2  ;;  %v11965_v2 = vcombine.high %v517_v46, %v521_v47  ;;  %v757_v11 = vld [vmem:[#allocation5 + $0x1188] sm:$0xff] }
 0x1de   :  { %6693 = vmatpush2.bf16.msra.mxu1 %v12004_v3  ;;  %6731 = vmatprep.subr.bf16.mxu0 %v12149_v4  ;;  %v769_v3 = vld [vmem:[#allocation5 + $0x11e8] sm:$0xff]  ;;  %v12116_v4 = vcombine.low %v669_v50, %v673_v35 }
 0x1df   :  { %6694 = vmatprep.subr.bf16.mxu1 %v11997_v10  ;;  %v657_v10 = vld [vmem:[#allocation5 + $0xe68] sm:$0xff]  ;;  %v12212_v14 = vcombine.low %v765_v1, %v769_v3 }
 0x1e0   :  { %v12101_v15 = vcombine.high %v653_v9, %v657_v10  ;;  %v645_v16 = vld [vmem:[#allocation5 + $0xe08] sm:$0xff] }
 0x1e1   :  { %6732 = vmatpush2.bf16.msra.mxu0 %v12148_v52  ;;  %v12213_v52 = vcombine.high %v765_v1, %v769_v3  ;;  %v749_v19 = vld [vmem:[#allocation5 + $0x1148] sm:$0xff] }
 0x1e2   :  { %6695 = vmatpush2.bf16.msra.mxu1 %v11996_v12  ;;  %6733 = vmatprep.subr.bf16.mxu0 %v12141_v13  ;;  %v761_v12 = vld [vmem:[#allocation5 + $0x11a8] sm:$0xff]  ;;  %v12108_v13 = vcombine.low %v661_v59, %v665_v0  ;;  %v14389_v59 = vpop.f32.mrf.mxu0 }
 0x1e3   :  { %6696 = vmatprep.subr.bf16.mxu1 %v11989_v17  ;;  %v649_v17 = vld [vmem:[#allocation5 + $0xe28] sm:$0xff]  ;;  %v12204_v28 = vcombine.low %v757_v11, %v761_v12 }
 0x1e4   :  { %v12093_v30 = vcombine.high %v645_v16, %v649_v17  ;;  %v897_v40 = vld [vmem:[#allocation5 + $0x15e8] sm:$0xff] }
 0x1e5   :  { %6734 = vmatpush2.bf16.msra.mxu0 %v12140_v23  ;;  %v12205_v23 = vcombine.high %v757_v11, %v761_v12  ;;  %v889_v35 = vld [vmem:[#allocation5 + $0x15a8] sm:$0xff] }
 0x1e6   :  { %6697 = vmatpush2.bf16.msra.mxu1 %v11988_v26  ;;  %6735 = vmatprep.subr.bf16.mxu0 %v12133_v27  ;;  %v753_v26 = vld [vmem:[#allocation5 + $0x1168] sm:$0xff]  ;;  %v12100_v27 = vcombine.low %v653_v9, %v657_v10 }
 0x1e7   :  { %6698 = vmatprep.subr.bf16.mxu1 %v11981_v39  ;;  %v12197_v38 = vcombine.high %v749_v19, %v753_v26  ;;  %v893_v39 = vld [vmem:[#allocation5 + $0x15c8] sm:$0xff]  ;;  %v12196_v46 = vcombine.low %v749_v19, %v753_v26 }
 0x1e8   :  { %v12341_v47 = vcombine.high %v893_v39, %v897_v40  ;;  %v725_v9 = vld [vmem:[#allocation5 + $0x1088] sm:$0xff] }
 0x1e9   :  { %6736 = vmatpush2.bf16.msra.mxu0 %v12132_v41  ;;  %v741_v41 = vld [vmem:[#allocation5 + $0x1108] sm:$0xff] }
 0x1ea   :  { %6699 = vmatpush2.bf16.msra.mxu1 %v11980_v42  ;;  %6737 = vmatprep.subr.bf16.mxu0 %v12125_v44  ;;  %v745_v42 = vld [vmem:[#allocation5 + $0x1128] sm:$0xff]  ;;  %v12092_v44 = vcombine.low %v645_v16, %v649_v17 }
 0x1eb   :  { %6700 = vmatprep.subr.bf16.mxu1 %v11973_v51  ;;  %v12189_v50 = vcombine.high %v741_v41, %v745_v42  ;;  %v885_v51 = vld [vmem:[#allocation5 + $0x1588] sm:$0xff]  ;;  %v12188_v0 = vcombine.low %v741_v41, %v745_v42 }
 0x1ec   :  { %v12333_v1 = vcombine.high %v885_v51, %v889_v35  ;;  %v729_v10 = vld [vmem:[#allocation5 + $0x10a8] sm:$0xff]  ;;  %v12332_v12 = vcombine.low %v885_v51, %v889_v35 }
 0x1ed   :  { %6738 = vmatpush2.bf16.msra.mxu0 %v12124_v55  ;;  %v733_v55 = vld [vmem:[#allocation5 + $0x10c8] sm:$0xff]  ;;  %v12173_v19 = vcombine.high %v725_v9, %v729_v10 }
 0x1ee   :  { %6701 = vmatpush2.bf16.msra.mxu1 %v11972_v56  ;;  %6739 = vmatprep.subr.bf16.mxu0 %v12117_v57  ;;  %v737_v56 = vld [vmem:[#allocation5 + $0x10e8] sm:$0xff]  ;;  %v12340_v57 = vcombine.low %v893_v39, %v897_v40  ;;  %v12172_v40 = vcombine.low %v725_v9, %v729_v10 }
 0x1ef   :  { %6702 = vmatprep.subr.bf16.mxu1 %v11965_v2  ;;  %v14391_v2 = vpop.f32.mrf.mxu1  ;;  %v12181_v3 = vcombine.high %v733_v55, %v737_v56  ;;  %v873_v26 = vld [vmem:[#allocation5 + $0x1528] sm:$0xff] }
 0x1f0   :  { %v713_v51 = vld [vmem:[#allocation5 + $0x1028] sm:$0xff] }
 0x1f1   :  { %6740 = vmatpush2.bf16.msra.mxu0 %v12116_v4  ;;  %v877_v4 = vld [vmem:[#allocation5 + $0x1548] sm:$0xff] }
 0x1f2   :  { %6703 = vmatpush2.bf16.msra.mxu1 %v11964_v5  ;;  %6741 = vmatprep.subr.bf16.mxu0 %v12109_v8  ;;  %v881_v5 = vld [vmem:[#allocation5 + $0x1568] sm:$0xff] }
 0x1f3   :  { %6758 = vmatprep.subr.bf16.mxu1 %v12213_v52  ;;  %v845_v10 = vld [vmem:[#allocation5 + $0x1448] sm:$0xff] }
 0x1f5   :  { %6705 = vmatmul.mubr.bf16.vlgmr.msra.gmra.mxu1 %v14322_v48  ;;  %6742 = vmatpush2.bf16.msra.mxu0 %v12108_v13 }
 0x1f6   :  { %6759 = vmatpush1.bf16.msra.mxu1 %v12212_v14  ;;  %6743 = vmatprep.subr.bf16.mxu0 %v12101_v15  ;;  %v12180_v14 = vcombine.low %v733_v55, %v737_v56  ;;  %v12325_v15 = vcombine.high %v877_v4, %v881_v5 }
 0x1f7   :  { %6760 = vmatprep.subr.bf16.mxu1 %v12205_v23  ;;  %6790 = vmatprep.mubr.bf16.mxu1 %v14326_v60  ;;  %v869_v23 = vld [vmem:[#allocation5 + $0x1508] sm:$0xff] }
 0x1f8   :  { %v12317_v41 = vcombine.high %v869_v23, %v873_v26  ;;  %v12316_v35 = vcombine.low %v869_v23, %v873_v26  ;;  %v837_v26 = vld [vmem:[#allocation5 + $0x1408] sm:$0xff] }
 0x1f9   :  { %6744 = vmatpush2.bf16.msra.mxu0 %v12100_v27  ;;  %v717_v27 = vld [vmem:[#allocation5 + $0x1048] sm:$0xff] }
 0x1fa   :  { %6761 = vmatpush1.bf16.msra.mxu1 %v12204_v28  ;;  %6745 = vmatprep.subr.bf16.mxu0 %v12093_v30  ;;  %v721_v28 = vld [vmem:[#allocation5 + $0x1068] sm:$0xff] }
 0x1fb   :  { %6762 = vmatprep.subr.bf16.mxu1 %v12197_v38  ;;  %v12324_v38 = vcombine.low %v877_v4, %v881_v5  ;;  %v12164_v55 = vcombine.low %v717_v27, %v721_v28 }
 0x1fd   :  { %6746 = vmatpush2.bf16.msra.mxu0 %v12092_v44  ;;  %v12165_v44 = vcombine.high %v717_v27, %v721_v28  ;;  %v813_v27 = vld [vmem:[#allocation5 + $0x1348] sm:$0xff] }
 0x1fe   :  { %6763 = vmatpush1.bf16.msra.mxu1 %v12196_v46  ;;  %6801 = vmatprep.subr.bf16.mxu0 %v12341_v47  ;;  %v861_v46 = vld [vmem:[#allocation5 + $0x14c8] sm:$0xff] }
 0x1ff   :  { %6764 = vmatprep.subr.bf16.mxu1 %v12189_v50  ;;  %v6491_v52 = vpop.f32.mrf.mxu1  ;;  %v865_v47 = vld [vmem:[#allocation5 + $0x14e8] sm:$0xff] }
 0x200   :  { %v6448_v8 = vpop.f32.mrf.mxu0  ;;  %6748 = vmatmul.mubr.bf16.vlgmr.msra.gmra.mxu0 %v14324_v49  ;;  %v709_v50 = vld [vmem:[#allocation5 + $0x1008] sm:$0xff]  ;;  %v12308_v4 = vcombine.low %v861_v46, %v865_v47 }
 0x201   :  { %v6449_v11 = vadd.f32 %v6448_v8, %v14380_v53  ;;  %6802 = vmatpush1.bf16.msra.mxu0 %v12340_v57  ;;  %6833 = vmatprep.mubr.bf16.mxu0 %v14329_v62  ;;  %v14400_v17 = vpop.f32.mrf.mxu1  ;;  %v12157_v56 = vcombine.high %v709_v50, %v713_v51  ;;  %v853_v57 = vld [vmem:[#allocation5 + $0x1488] sm:$0xff]  ;;  %v12156_v5 = vcombine.low %v709_v50, %v713_v51 }
 0x202   :  { %6765 = vmatpush1.bf16.msra.mxu1 %v12188_v0  ;;  %v14396_v13 = vpop.f32.mrf.mxu0  ;;  %6803 = vmatprep.subr.bf16.mxu0 %v12333_v1  ;;  %14745 = vst [vmem:[#allocation25_spill] sm:$0xff] %v14400_v17  ;;  %v857_v0 = vld [vmem:[#allocation5 + $0x14a8] sm:$0xff] }
 0x203   :  { %v14398_v16 = vadd.f32 %v6491_v52, %v6449_v11  ;;  %6766 = vmatprep.subr.bf16.mxu1 %v12181_v3  ;;  %v6495_v39 = vpop.f32.mrf.mxu1  ;;  %v829_v1 = vld [vmem:[#allocation5 + $0x13c8] sm:$0xff]  ;;  %v12301_v8 = vcombine.high %v853_v57, %v857_v0 }
 0x204   :  { %v6452_v53 = vpop.f32.mrf.mxu0  ;;  %v833_v3 = vld [vmem:[#allocation5 + $0x13e8] sm:$0xff] }
 0x205   :  { %v6453_v30 = vadd.f32 %v6452_v53, %v14385_v6  ;;  %6804 = vmatpush1.bf16.msra.mxu0 %v12332_v12  ;;  %v12309_v6 = vcombine.high %v861_v46, %v865_v47  ;;  %v12277_v9 = vcombine.high %v829_v1, %v833_v3  ;;  %v849_v11 = vld [vmem:[#allocation5 + $0x1468] sm:$0xff] }
 0x206   :  { %6767 = vmatpush1.bf16.msra.mxu1 %v12180_v14  ;;  %6805 = vmatprep.subr.bf16.mxu0 %v12325_v15  ;;  %v821_v52 = vld [vmem:[#allocation5 + $0x1388] sm:$0xff]  ;;  %v12300_v14 = vcombine.low %v853_v57, %v857_v0  ;;  %v12276_v15 = vcombine.low %v829_v1, %v833_v3 }
 0x207   :  { %v14403_v42 = vadd.f32 %v6495_v39, %v6453_v30  ;;  %6768 = vmatprep.subr.bf16.mxu1 %v12173_v19  ;;  %v825_v12 = vld [vmem:[#allocation5 + $0x13a8] sm:$0xff]  ;;  %v12293_v19 = vcombine.high %v845_v10, %v849_v11  ;;  %v12292_v30 = vcombine.low %v845_v10, %v849_v11 }
 0x208   :  { %v12269_v23 = vcombine.high %v821_v52, %v825_v12  ;;  %v841_v53 = vld [vmem:[#allocation5 + $0x1428] sm:$0xff] }
 0x209   :  { %6806 = vmatpush1.bf16.msra.mxu0 %v12324_v38  ;;  %v817_v28 = vld [vmem:[#allocation5 + $0x1368] sm:$0xff]  ;;  %v12268_v38 = vcombine.low %v821_v52, %v825_v12  ;;  %v12285_v39 = vcombine.high %v837_v26, %v841_v53  ;;  %v12284_v50 = vcombine.low %v837_v26, %v841_v53 }
 0x20a   :  { %6769 = vmatpush1.bf16.msra.mxu1 %v12172_v40  ;;  %6807 = vmatprep.subr.bf16.mxu0 %v12317_v41  ;;  %v12261_v40 = vcombine.high %v813_v27, %v817_v28  ;;  %v957_v41 = vld [vmem:[#allocation5 + $0x17c8] sm:$0xff]  ;;  %v12260_v51 = vcombine.low %v813_v27, %v817_v28 }
 0x20b   :  { %6770 = vmatprep.subr.bf16.mxu1 %v12165_v44  ;;  %v961_v44 = vld [vmem:[#allocation5 + $0x17e8] sm:$0xff] }
 0x20c   :  { %v805_v46 = vld [vmem:[#allocation5 + $0x1308] sm:$0xff]  ;;  %v12404_v1 = vcombine.low %v957_v41, %v961_v44 }
 0x20d   :  { %6808 = vmatpush1.bf16.msra.mxu0 %v12316_v35  ;;  %v809_v47 = vld [vmem:[#allocation5 + $0x1328] sm:$0xff]  ;;  %v12405_v35 = vcombine.high %v957_v41, %v961_v44 }
 0x20e   :  { %6771 = vmatpush1.bf16.msra.mxu1 %v12164_v55  ;;  %6809 = vmatprep.subr.bf16.mxu0 %v12309_v6  ;;  %v12253_v55 = vcombine.high %v805_v46, %v809_v47  ;;  %v949_v6 = vld [vmem:[#allocation5 + $0x1788] sm:$0xff]  ;;  %v12252_v3 = vcombine.low %v805_v46, %v809_v47 }
 0x20f   :  { %6772 = vmatprep.subr.bf16.mxu1 %v12157_v56  ;;  %v953_v56 = vld [vmem:[#allocation5 + $0x17a8] sm:$0xff] }
 0x210   :  { %v797_v57 = vld [vmem:[#allocation5 + $0x12c8] sm:$0xff]  ;;  %v12396_v52 = vcombine.low %v949_v6, %v953_v56 }
 0x211   :  { %6810 = vmatpush1.bf16.msra.mxu0 %v12308_v4  ;;  %v801_v0 = vld [vmem:[#allocation5 + $0x12e8] sm:$0xff]  ;;  %v12397_v4 = vcombine.high %v949_v6, %v953_v56 }
 0x212   :  { %6773 = vmatpush1.bf16.msra.mxu1 %v12156_v5  ;;  %6811 = vmatprep.subr.bf16.mxu0 %v12301_v8  ;;  %v12245_v5 = vcombine.high %v797_v57, %v801_v0  ;;  %v941_v8 = vld [vmem:[#allocation5 + $0x1748] sm:$0xff]  ;;  %v12244_v12 = vcombine.low %v797_v57, %v801_v0 }
 0x213   :  { %6774 = vmatprep.subr.bf16.mxu1 %v12277_v9  ;;  %v945_v9 = vld [vmem:[#allocation5 + $0x1768] sm:$0xff] }
 0x214   :  { %v789_v10 = vld [vmem:[#allocation5 + $0x1288] sm:$0xff]  ;;  %v12388_v27 = vcombine.low %v941_v8, %v945_v9 }
 0x215   :  { %6812 = vmatpush1.bf16.msra.mxu0 %v12300_v14  ;;  %v793_v11 = vld [vmem:[#allocation5 + $0x12a8] sm:$0xff]  ;;  %v12389_v14 = vcombine.high %v941_v8, %v945_v9 }
 0x216   :  { %6775 = vmatpush2.bf16.msra.mxu1 %v12276_v15  ;;  %6813 = vmatprep.subr.bf16.mxu0 %v12293_v19  ;;  %v12237_v15 = vcombine.high %v789_v10, %v793_v11  ;;  %v933_v19 = vld [vmem:[#allocation5 + $0x1708] sm:$0xff]  ;;  %v12236_v28 = vcombine.low %v789_v10, %v793_v11 }
 0x217   :  { %6776 = vmatprep.subr.bf16.mxu1 %v12269_v23  ;;  %v937_v23 = vld [vmem:[#allocation5 + $0x1728] sm:$0xff] }
 0x218   :  { %v781_v26 = vld [vmem:[#allocation5 + $0x1248] sm:$0xff]  ;;  %v12380_v46 = vcombine.low %v933_v19, %v937_v23 }
 0x219   :  { %6814 = vmatpush1.bf16.msra.mxu0 %v12292_v30  ;;  %v785_v53 = vld [vmem:[#allocation5 + $0x1268] sm:$0xff]  ;;  %v12381_v30 = vcombine.high %v933_v19, %v937_v23 }
 0x21a   :  { %6777 = vmatpush2.bf16.msra.mxu1 %v12268_v38  ;;  %6815 = vmatprep.subr.bf16.mxu0 %v12285_v39  ;;  %v12229_v38 = vcombine.high %v781_v26, %v785_v53  ;;  %v925_v39 = vld [vmem:[#allocation5 + $0x16c8] sm:$0xff]  ;;  %v12228_v47 = vcombine.low %v781_v26, %v785_v53 }
 0x21b   :  { %6778 = vmatprep.subr.bf16.mxu1 %v12261_v40  ;;  %v929_v40 = vld [vmem:[#allocation5 + $0x16e8] sm:$0xff] }
 0x21c   :  { %v773_v41 = vld [vmem:[#allocation5 + $0x1208] sm:$0xff]  ;;  %v12372_v57 = vcombine.low %v925_v39, %v929_v40 }
 0x21d   :  { %6816 = vmatpush1.bf16.msra.mxu0 %v12284_v50  ;;  %v777_v44 = vld [vmem:[#allocation5 + $0x1228] sm:$0xff]  ;;  %v12373_v50 = vcombine.high %v925_v39, %v929_v40 }
 0x21e   :  { %6779 = vmatpush2.bf16.msra.mxu1 %v12260_v51  ;;  %6817 = vmatprep.subr.bf16.mxu0 %v12405_v35  ;;  %v12221_v51 = vcombine.high %v773_v41, %v777_v44  ;;  %v917_v35 = vld [vmem:[#allocation5 + $0x1688] sm:$0xff]  ;;  %v12220_v0 = vcombine.low %v773_v41, %v777_v44 }
 0x21f   :  { %6780 = vmatprep.subr.bf16.mxu1 %v12253_v55  ;;  %v921_v55 = vld [vmem:[#allocation5 + $0x16a8] sm:$0xff] }
 0x220   :  { %v1021_v6 = vld [vmem:[#allocation5 + $0x19c8] sm:$0xff]  ;;  %v12364_v10 = vcombine.low %v917_v35, %v921_v55 }
 0x221   :  { %6818 = vmatpush2.bf16.msra.mxu0 %v12404_v1  ;;  %v1025_v56 = vld [vmem:[#allocation5 + $0x19e8] sm:$0xff]  ;;  %v12365_v1 = vcombine.high %v917_v35, %v921_v55  ;;  %v14407_v35 = vpop.f32.mrf.mxu1 }
 0x222   :  { %6781 = vmatpush2.bf16.msra.mxu1 %v12252_v3  ;;  %6819 = vmatprep.subr.bf16.mxu0 %v12397_v4  ;;  %v12469_v3 = vcombine.high %v1021_v6, %v1025_v56  ;;  %v909_v4 = vld [vmem:[#allocation5 + $0x1648] sm:$0xff]  ;;  %v12468_v11 = vcombine.low %v1021_v6, %v1025_v56  ;;  %14746 = vst [vmem:[#allocation26_spill] sm:$0xff] %v14407_v35 }
 0x223   :  { %6782 = vmatprep.subr.bf16.mxu1 %v12245_v5  ;;  %v913_v5 = vld [vmem:[#allocation5 + $0x1668] sm:$0xff] }
 0x224   :  { %v1013_v8 = vld [vmem:[#allocation5 + $0x1988] sm:$0xff]  ;;  %v12356_v26 = vcombine.low %v909_v4, %v913_v5 }
 0x225   :  { %6820 = vmatpush2.bf16.msra.mxu0 %v12396_v52  ;;  %v1017_v9 = vld [vmem:[#allocation5 + $0x19a8] sm:$0xff]  ;;  %v12357_v52 = vcombine.high %v909_v4, %v913_v5 }
 0x226   :  { %6783 = vmatpush2.bf16.msra.mxu1 %v12244_v12  ;;  %6821 = vmatprep.subr.bf16.mxu0 %v12389_v14  ;;  %v12461_v12 = vcombine.high %v1013_v8, %v1017_v9  ;;  %v901_v14 = vld [vmem:[#allocation5 + $0x1608] sm:$0xff]  ;;  %v12460_v53 = vcombine.low %v1013_v8, %v1017_v9 }
 0x227   :  { %6784 = vmatprep.subr.bf16.mxu1 %v12237_v15  ;;  %v905_v15 = vld [vmem:[#allocation5 + $0x1628] sm:$0xff] }
 0x228   :  { %v1005_v19 = vld [vmem:[#allocation5 + $0x1948] sm:$0xff]  ;;  %v12348_v41 = vcombine.low %v901_v14, %v905_v15 }
 0x229   :  { %6822 = vmatpush2.bf16.msra.mxu0 %v12388_v27  ;;  %v1009_v23 = vld [vmem:[#allocation5 + $0x1968] sm:$0xff]  ;;  %v12349_v27 = vcombine.high %v901_v14, %v905_v15 }
 0x22a   :  { %6785 = vmatpush2.bf16.msra.mxu1 %v12236_v28  ;;  %6823 = vmatprep.subr.bf16.mxu0 %v12381_v30  ;;  %v12453_v28 = vcombine.high %v1005_v19, %v1009_v23  ;;  %v1149_v30 = vld [vmem:[#allocation5 + $0x1dc8] sm:$0xff]  ;;  %v12452_v44 = vcombine.low %v1005_v19, %v1009_v23 }
 0x22b   :  { %6786 = vmatprep.subr.bf16.mxu1 %v12229_v38  ;;  %v1153_v38 = vld [vmem:[#allocation5 + $0x1de8] sm:$0xff] }
 0x22c   :  { %v997_v39 = vld [vmem:[#allocation5 + $0x1908] sm:$0xff]  ;;  %v12596_v56 = vcombine.low %v1149_v30, %v1153_v38 }
 0x22d   :  { %6824 = vmatpush2.bf16.msra.mxu0 %v12380_v46  ;;  %v1001_v40 = vld [vmem:[#allocation5 + $0x1928] sm:$0xff]  ;;  %v12597_v46 = vcombine.high %v1149_v30, %v1153_v38 }
 0x22e   :  { %6787 = vmatpush2.bf16.msra.mxu1 %v12228_v47  ;;  %6825 = vmatprep.subr.bf16.mxu0 %v12373_v50  ;;  %v12445_v47 = vcombine.high %v997_v39, %v1001_v40  ;;  %v1141_v50 = vld [vmem:[#allocation5 + $0x1d88] sm:$0xff] }
 0x22f   :  { %6788 = vmatprep.subr.bf16.mxu1 %v12221_v51  ;;  %v1145_v51 = vld [vmem:[#allocation5 + $0x1da8] sm:$0xff] }
 0x230   :  { %v989_v55 = vld [vmem:[#allocation5 + $0x18c8] sm:$0xff] }
 0x231   :  { %6826 = vmatpush2.bf16.msra.mxu0 %v12372_v57  ;;  %v993_v6 = vld [vmem:[#allocation5 + $0x18e8] sm:$0xff]  ;;  %v14409_v57 = vpop.f32.mrf.mxu0 }
 0x232   :  { %6789 = vmatpush2.bf16.msra.mxu1 %v12220_v0  ;;  %6827 = vmatprep.subr.bf16.mxu0 %v12365_v1  ;;  %v12444_v1 = vcombine.low %v997_v39, %v1001_v40  ;;  %v12437_v4 = vcombine.high %v989_v55, %v993_v6  ;;  %v1133_v5 = vld [vmem:[#allocation5 + $0x1d48] sm:$0xff]  ;;  %v12436_v19 = vcombine.low %v989_v55, %v993_v6 }
 0x233   :  { %6844 = vmatprep.subr.bf16.mxu1 %v12469_v3  ;;  %v12589_v3 = vcombine.high %v1141_v50, %v1145_v51  ;;  %v1137_v8 = vld [vmem:[#allocation5 + $0x1d68] sm:$0xff] }
 0x234   :  { %v12581_v23 = vcombine.high %v1133_v5, %v1137_v8  ;;  %v977_v38 = vld [vmem:[#allocation5 + $0x1868] sm:$0xff]  ;;  %v12580_v40 = vcombine.low %v1133_v5, %v1137_v8 }
 0x235   :  { %6791 = vmatmul.mubr.bf16.vlgmr.msra.gmra.mxu1 %v14334_v20  ;;  %6828 = vmatpush2.bf16.msra.mxu0 %v12364_v10  ;;  %v6577_v0 = vpop.f32.mrf.mxu1  ;;  %v981_v10 = vld [vmem:[#allocation5 + $0x1888] sm:$0xff] }
 0x236   :  { %6845 = vmatpush1.bf16.msra.mxu1 %v12468_v11  ;;  %6829 = vmatprep.subr.bf16.mxu0 %v12357_v52  ;;  %v985_v11 = vld [vmem:[#allocation5 + $0x18a8] sm:$0xff] }
 0x237   :  { %6846 = vmatprep.subr.bf16.mxu1 %v12461_v12  ;;  %6876 = vmatprep.mubr.bf16.mxu1 %v14341_v33  ;;  %v12588_v12 = vcombine.low %v1141_v50, %v1145_v51  ;;  %v14415_v14 = vpop.f32.mrf.mxu1  ;;  %v1117_v51 = vld [vmem:[#allocation5 + $0x1cc8] sm:$0xff] }
 0x238   :  { %14747 = vst [vmem:[#allocation27_spill] sm:$0xff] %v14415_v14  ;;  %v1121_v55 = vld [vmem:[#allocation5 + $0x1ce8] sm:$0xff] }
 0x239   :  { %6830 = vmatpush2.bf16.msra.mxu0 %v12356_v26  ;;  %v965_v6 = vld [vmem:[#allocation5 + $0x1808] sm:$0xff] }
 0x23a   :  { %6847 = vmatpush1.bf16.msra.mxu1 %v12460_v53  ;;  %6831 = vmatprep.subr.bf16.mxu0 %v12349_v27  ;;  %v12429_v53 = vcombine.high %v981_v10, %v985_v11  ;;  %v1125_v27 = vld [vmem:[#allocation5 + $0x1d08] sm:$0xff] }
 0x23b   :  { %6848 = vmatprep.subr.bf16.mxu1 %v12453_v28  ;;  %v1129_v28 = vld [vmem:[#allocation5 + $0x1d28] sm:$0xff] }
 0x23d   :  { %6832 = vmatpush2.bf16.msra.mxu0 %v12348_v41  ;;  %v6581_v41 = vpop.f32.mrf.mxu1 }
 0x23e   :  { %6849 = vmatpush1.bf16.msra.mxu1 %v12452_v44  ;;  %6887 = vmatprep.subr.bf16.mxu0 %v12597_v46  ;;  %v12428_v44 = vcombine.low %v981_v10, %v985_v11  ;;  %v12573_v46 = vcombine.high %v1125_v27, %v1129_v28  ;;  %v1113_v10 = vld [vmem:[#allocation5 + $0x1ca8] sm:$0xff] }
 0x23f   :  { %6850 = vmatprep.subr.bf16.mxu1 %v12445_v47  ;;  %v1085_v11 = vld [vmem:[#allocation5 + $0x1bc8] sm:$0xff] }
 0x240   :  { %v6534_v9 = vpop.f32.mrf.mxu0  ;;  %6834 = vmatmul.mubr.bf16.vlgmr.msra.gmra.mxu0 %v14336_v22 }
 0x241   :  { %v6535_v52 = vadd.f32 %v6534_v9, %v14398_v16  ;;  %6888 = vmatpush1.bf16.msra.mxu0 %v12596_v56  ;;  %12643 = vmatprep.mubr.msk.bf16.mxu0 %vm6238_vm0, %v14338_v32  ;;  %v973_v16 = vld [vmem:[#allocation5 + $0x1848] sm:$0xff] }
 0x242   :  { %6851 = vmatpush1.bf16.msra.mxu1 %v12444_v1  ;;  %v14417_v15 = vpop.f32.mrf.mxu0  ;;  %6889 = vmatprep.subr.bf16.mxu0 %v12589_v3  ;;  %v12421_v50 = vcombine.high %v973_v16, %v977_v38  ;;  %v969_v56 = vld [vmem:[#allocation5 + $0x1828] sm:$0xff]  ;;  %v12572_v3 = vcombine.low %v1125_v27, %v1129_v28 }
 0x243   :  { %14748 = vst [vmem:[#allocation28_spill] sm:$0xff] %v14417_v15  ;;  %v6578_v26 = vadd.f32 %v6577_v0, %v6535_v52  ;;  %6852 = vmatprep.subr.bf16.mxu1 %v12437_v4  ;;  %v12565_v4 = vcombine.high %v1117_v51, %v1121_v55  ;;  %v12413_v8 = vcombine.high %v965_v6, %v969_v56  ;;  %v1109_v9 = vld [vmem:[#allocation5 + $0x1c88] sm:$0xff] }
 0x244   :  { %v6538_v30 = vpop.f32.mrf.mxu0  ;;  %v1089_v52 = vld [vmem:[#allocation5 + $0x1be8] sm:$0xff] }
 0x245   :  { %v6539_v39 = vadd.f32 %v6538_v30, %v14403_v42  ;;  %6890 = vmatpush1.bf16.msra.mxu0 %v12588_v12  ;;  %v7618_v0 = vmax.f32 %v6578_v26, 0.0  ;;  %v12420_v42 = vcombine.low %v973_v16, %v977_v38  ;;  %v12564_v12 = vcombine.low %v1117_v51, %v1121_v55  ;;  %v1105_v27 = vld [vmem:[#allocation5 + $0x1c68] sm:$0xff] }
 0x246   :  { %6853 = vmatpush1.bf16.msra.mxu1 %v12436_v19  ;;  %6891 = vmatprep.subr.bf16.mxu0 %v12581_v23  ;;  %v12412_v19 = vcombine.low %v965_v6, %v969_v56  ;;  %v12557_v23 = vcombine.high %v1109_v9, %v1113_v10  ;;  %v12533_v26 = vcombine.high %v1085_v11, %v1089_v52  ;;  %v1077_v28 = vld [vmem:[#allocation5 + $0x1b88] sm:$0xff] }
 0x247   :  { %v6582_v47 = vadd.f32 %v6581_v41, %v6539_v39  ;;  %6854 = vmatprep.subr.bf16.mxu1 %v12429_v53  ;;  %v1101_v53 = vld [vmem:[#allocation5 + $0x1c48] sm:$0xff]  ;;  %v12556_v16 = vcombine.low %v1109_v9, %v1113_v10  ;;  %v12532_v38 = vcombine.low %v1085_v11, %v1089_v52 }
 0x248   :  { %v1081_v30 = vld [vmem:[#allocation5 + $0x1ba8] sm:$0xff]  ;;  %v12549_v39 = vcombine.high %v1101_v53, %v1105_v27 }
 0x249   :  { %v7626_v1 = vmax.f32 %v6582_v47, 0.0  ;;  %6892 = vmatpush1.bf16.msra.mxu0 %v12580_v40  ;;  %v12525_v40 = vcombine.high %v1077_v28, %v1081_v30  ;;  %v1093_v41 = vld [vmem:[#allocation5 + $0x1c08] sm:$0xff]  ;;  %v12524_v51 = vcombine.low %v1077_v28, %v1081_v30 }
 0x24a   :  { %6855 = vmatpush1.bf16.msra.mxu1 %v12428_v44  ;;  %6893 = vmatprep.subr.bf16.mxu0 %v12573_v46  ;;  %v1097_v44 = vld [vmem:[#allocation5 + $0x1c28] sm:$0xff] }
 0x24b   :  { %v14420_v5 = vpack.c.bf16 %v7626_v1, %v7618_v0  ;;  %6856 = vmatprep.subr.bf16.mxu1 %v12421_v50  ;;  %v1069_v46 = vld [vmem:[#allocation5 + $0x1b48] sm:$0xff]  ;;  %v12548_v50 = vcombine.low %v1101_v53, %v1105_v27  ;;  %v12541_v55 = vcombine.high %v1093_v41, %v1097_v44 }
 0x24c   :  { %v1073_v47 = vld [vmem:[#allocation5 + $0x1b68] sm:$0xff] }
 0x24d   :  { %14749 = vst [vmem:[#allocation29_spill] sm:$0xff] %v14420_v5  ;;  %6894 = vmatpush1.bf16.msra.mxu0 %v12572_v3  ;;  %v12517_v6 = vcombine.high %v1069_v46, %v1073_v47  ;;  %v1189_v56 = vld [vmem:[#allocation5 + $0x1f08] sm:$0xff]  ;;  %v594_v5 = vld [vmem:[#allocation5 + $0xc70] sm:$0xff] }
 0x24e   :  { %6857 = vmatpush1.bf16.msra.mxu1 %v12420_v42  ;;  %6895 = vmatprep.subr.bf16.mxu0 %v12565_v4  ;;  %v1193_v0 = vld [vmem:[#allocation5 + $0x1f28] sm:$0xff]  ;;  %v12540_v42 = vcombine.low %v1093_v41, %v1097_v44  ;;  %v12516_v4 = vcombine.low %v1069_v46, %v1073_v47 }
 0x24f   :  { %6858 = vmatprep.subr.bf16.mxu1 %v12413_v8  ;;  %v1061_v1 = vld [vmem:[#allocation5 + $0x1b08] sm:$0xff]  ;;  %v12637_v8 = vcombine.high %v1189_v56, %v1193_v0 }
 0x250   :  { %v1065_v3 = vld [vmem:[#allocation5 + $0x1b28] sm:$0xff] }
 0x251   :  { %6896 = vmatpush1.bf16.msra.mxu0 %v12564_v12  ;;  %v12509_v9 = vcombine.high %v1061_v1, %v1065_v3  ;;  %v1181_v10 = vld [vmem:[#allocation5 + $0x1ec8] sm:$0xff] }
 0x252   :  { %6859 = vmatpush1.bf16.msra.mxu1 %v12412_v19  ;;  %6897 = vmatprep.subr.bf16.mxu0 %v12557_v23  ;;  %v1185_v11 = vld [vmem:[#allocation5 + $0x1ee8] sm:$0xff]  ;;  %v12636_v19 = vcombine.low %v1189_v56, %v1193_v0  ;;  %v12508_v23 = vcombine.low %v1061_v1, %v1065_v3 }
 0x253   :  { %6860 = vmatprep.subr.bf16.mxu1 %v12533_v26  ;;  %v1053_v52 = vld [vmem:[#allocation5 + $0x1ac8] sm:$0xff]  ;;  %v12629_v26 = vcombine.high %v1181_v10, %v1185_v11 }
 0x254   :  { %v1057_v12 = vld [vmem:[#allocation5 + $0x1ae8] sm:$0xff] }
 0x255   :  { %6898 = vmatpush1.bf16.msra.mxu0 %v12556_v16  ;;  %v12501_v53 = vcombine.high %v1053_v52, %v1057_v12  ;;  %v1173_v27 = vld [vmem:[#allocation5 + $0x1e88] sm:$0xff] }
 0x256   :  { %6861 = vmatpush2.bf16.msra.mxu1 %v12532_v38  ;;  %6899 = vmatprep.subr.bf16.mxu0 %v12549_v39  ;;  %v1177_v28 = vld [vmem:[#allocation5 + $0x1ea8] sm:$0xff]  ;;  %v12628_v38 = vcombine.low %v1181_v10, %v1185_v11  ;;  %v12500_v39 = vcombine.low %v1053_v52, %v1057_v12  ;;  %v254_v11 = vld [vmem:[#allocation5 + $0x1d0] sm:$0xff] }
 0x257   :  { %6862 = vmatprep.subr.bf16.mxu1 %v12525_v40  ;;  %v1045_v30 = vld [vmem:[#allocation5 + $0x1a88] sm:$0xff]  ;;  %v12621_v40 = vcombine.high %v1173_v27, %v1177_v28  ;;  %v258_v52 = vld [vmem:[#allocation5 + $0x1f0] sm:$0xff] }
 0x258   :  { %v1049_v16 = vld [vmem:[#allocation5 + $0x1aa8] sm:$0xff]  ;;  %v382_v12 = vld [vmem:[#allocation5 + $0x5d0] sm:$0xff] }
 0x259   :  { %6900 = vmatpush1.bf16.msra.mxu0 %v12548_v50  ;;  %v12493_v41 = vcombine.high %v1045_v30, %v1049_v16  ;;  %v1165_v44 = vld [vmem:[#allocation5 + $0x1e48] sm:$0xff] }
 0x25a   :  { %6863 = vmatpush2.bf16.msra.mxu1 %v12524_v51  ;;  %6901 = vmatprep.subr.bf16.mxu0 %v12541_v55  ;;  %v1169_v46 = vld [vmem:[#allocation5 + $0x1e68] sm:$0xff]  ;;  %v12620_v51 = vcombine.low %v1173_v27, %v1177_v28  ;;  %v12492_v55 = vcombine.low %v1045_v30, %v1049_v16  ;;  %v246_v28 = vld [vmem:[#allocation5 + $0x190] sm:$0xff] }
 0x25b   :  { %6864 = vmatprep.subr.bf16.mxu1 %v12517_v6  ;;  %v1037_v47 = vld [vmem:[#allocation5 + $0x1a48] sm:$0xff]  ;;  %v12613_v6 = vcombine.high %v1165_v44, %v1169_v46  ;;  %v250_v30 = vld [vmem:[#allocation5 + $0x1b0] sm:$0xff] }
 0x25c   :  { %v1041_v50 = vld [vmem:[#allocation5 + $0x1a68] sm:$0xff]  ;;  %v374_v16 = vld [vmem:[#allocation5 + $0x590] sm:$0xff] }
 0x25d   :  { %6902 = vmatpush1.bf16.msra.mxu0 %v12540_v42  ;;  %v12485_v56 = vcombine.high %v1037_v47, %v1041_v50  ;;  %v1157_v0 = vld [vmem:[#allocation5 + $0x1e08] sm:$0xff] }
 0x25e   :  { %6865 = vmatpush2.bf16.msra.mxu1 %v12516_v4  ;;  %6909 = vmatprep.subr.bf16.mxu0 %v12637_v8  ;;  %v1161_v1 = vld [vmem:[#allocation5 + $0x1e28] sm:$0xff]  ;;  %v12612_v4 = vcombine.low %v1165_v44, %v1169_v46  ;;  %v12484_v8 = vcombine.low %v1037_v47, %v1041_v50  ;;  %v238_v46 = vld [vmem:[#allocation5 + $0x150] sm:$0xff] }
 0x25f   :  { %6866 = vmatprep.subr.bf16.mxu1 %v12509_v9  ;;  %v1029_v3 = vld [vmem:[#allocation5 + $0x1a08] sm:$0xff]  ;;  %v12605_v9 = vcombine.high %v1157_v0, %v1161_v1  ;;  %v242_v47 = vld [vmem:[#allocation5 + $0x170] sm:$0xff] }
 0x260   :  { %v1033_v42 = vld [vmem:[#allocation5 + $0x1a28] sm:$0xff]  ;;  %v366_v50 = vld [vmem:[#allocation5 + $0x550] sm:$0xff] }
 0x261   :  { %6910 = vmatpush2.bf16.msra.mxu0 %v12636_v19  ;;  %v12477_v10 = vcombine.high %v1029_v3, %v1033_v42  ;;  %v386_v19 = vld [vmem:[#allocation5 + $0x5f0] sm:$0xff] }
 0x262   :  { %6867 = vmatpush2.bf16.msra.mxu1 %v12508_v23  ;;  %6911 = vmatprep.subr.bf16.mxu0 %v12629_v26  ;;  %v12604_v23 = vcombine.low %v1157_v0, %v1161_v1  ;;  %v12476_v26 = vcombine.low %v1029_v3, %v1033_v42  ;;  %v11831_v27 = vcombine.high %v382_v12, %v386_v19  ;;  %v14427_v1 = vsub.s32 2, %v14350_v45  ;;  %v230_v42 = vld [vmem:[#allocation5 + $0x110] sm:$0xff] }
 0x263   :  { %6868 = vmatprep.subr.bf16.mxu1 %v12501_v53  ;;  %v11703_v53 = vcombine.high %v254_v11, %v258_v52  ;;  %v11687_v0 = vcombine.high %v238_v46, %v242_v47 }
 0x264   :  { %14751 = vst [vmem:[#allocation31_spill] sm:$0xff] %v14427_v1 }
 0x265   :  { %6912 = vmatpush2.bf16.msra.mxu0 %v12628_v38  ;;  %v378_v38 = vld [vmem:[#allocation5 + $0x5b0] sm:$0xff] }
 0x266   :  { %6869 = vmatpush2.bf16.msra.mxu1 %v12500_v39  ;;  %6913 = vmatprep.subr.bf16.mxu0 %v12621_v40  ;;  %v11702_v39 = vcombine.low %v254_v11, %v258_v52  ;;  %v11830_v40 = vcombine.low %v382_v12, %v386_v19  ;;  %v11823_v44 = vcombine.high %v374_v16, %v378_v38  ;;  %v13987_v19 = vld [vmem:[#allocation7] sm:$0xff] }
 0x267   :  { %6870 = vmatprep.subr.bf16.mxu1 %v12493_v41  ;;  %v11695_v41 = vcombine.high %v246_v28, %v250_v30  ;;  %v11686_v11 = vcombine.low %v238_v46, %v242_v47  ;;  %v214_v47 = vld [vmem:[#allocation5 + $0x90] sm:$0xff] }
 0x269   :  { %6914 = vmatpush2.bf16.msra.mxu0 %v12620_v51  ;;  %v370_v51 = vld [vmem:[#allocation5 + $0x570] sm:$0xff] }
 0x26a   :  { %6871 = vmatpush2.bf16.msra.mxu1 %v12492_v55  ;;  %6915 = vmatprep.subr.bf16.mxu0 %v12613_v6  ;;  %v11694_v55 = vcombine.low %v246_v28, %v250_v30  ;;  %v14424_v6 = vpop.f32.mrf.mxu1  ;;  %v11815_v3 = vcombine.high %v366_v50, %v370_v51  ;;  %v11814_v52 = vcombine.low %v366_v50, %v370_v51  ;;  %v350_v30 = vld [vmem:[#allocation5 + $0x4d0] sm:$0xff] }
 0x26b   :  { %6872 = vmatprep.subr.bf16.mxu1 %v12485_v56  ;;  %14750 = vst [vmem:[#allocation30_spill] sm:$0xff] %v14424_v6  ;;  %v11822_v56 = vcombine.low %v374_v16, %v378_v38  ;;  %v354_v16 = vld [vmem:[#allocation5 + $0x4f0] sm:$0xff] }
 0x26c   :  { %v11799_v46 = vcombine.high %v350_v30, %v354_v16  ;;  %v218_v50 = vld [vmem:[#allocation5 + $0xb0] sm:$0xff] }
 0x26d   :  { %6916 = vmatpush2.bf16.msra.mxu0 %v12612_v4  ;;  %v234_v4 = vld [vmem:[#allocation5 + $0x130] sm:$0xff] }
 0x26e   :  { %6873 = vmatpush2.bf16.msra.mxu1 %v12484_v8  ;;  %6917 = vmatprep.subr.bf16.mxu0 %v12605_v9  ;;  %v358_v9 = vld [vmem:[#allocation5 + $0x510] sm:$0xff]  ;;  %v11679_v12 = vcombine.high %v230_v42, %v234_v4  ;;  %v11678_v38 = vcombine.low %v230_v42, %v234_v4  ;;  %v11798_v4 = vcombine.low %v350_v30, %v354_v16 }
 0x26f   :  { %6874 = vmatprep.subr.bf16.mxu1 %v12477_v10  ;;  %v362_v10 = vld [vmem:[#allocation5 + $0x530] sm:$0xff] }
 0x270   :  { %v198_v30 = vld [vmem:[#allocation5 + $0x10] sm:$0xff] }
 0x271   :  { %6918 = vmatpush2.bf16.msra.mxu0 %v12604_v23  ;;  %v1209_v23 = vrot.slane %v13987_v19, %v14427_v1  ;;  %v338_v1 = vld [vmem:[#allocation5 + $0x470] sm:$0xff] }
 0x272   :  { %6875 = vmatpush2.bf16.msra.mxu1 %v12476_v26  ;;  %6930 = vmatprep.subr.bf16.mxu0 %v11703_v53  ;;  %v11807_v26 = vcombine.high %v358_v9, %v362_v10  ;;  %v222_v53 = vld [vmem:[#allocation5 + $0xd0] sm:$0xff] }
 0x273   :  { %6973 = vmatprep.subr.bf16.mxu1 %v11831_v27  ;;  %v226_v27 = vld [vmem:[#allocation5 + $0xf0] sm:$0xff] }
 0x274   :  { %6920 = vmatmul.mubr.bf16.vlgmr.msra.gmra.mxu0 %v14347_v31  ;;  %v202_v16 = vld [vmem:[#allocation5 + $0x30] sm:$0xff] }
 0x275   :  { %6877 = vmatmul.mubr.bf16.vlgmr.msra.gmra.mxu1 %v14356_v7  ;;  %6931 = vmatpush1.bf16.msra.mxu0 %v11702_v39  ;;  %v6620_v8 = vpop.f32.mrf.mxu1  ;;  %v14434_v39 = vpop.f32.mrf.mxu0 }
 0x276   :  { %6974 = vmatpush1.bf16.msra.mxu1 %v11830_v40  ;;  %6932 = vmatprep.subr.bf16.mxu0 %v11695_v41  ;;  %14752 = vst [vmem:[#allocation32_spill] sm:$0xff] %v14434_v39  ;;  %v11806_v40 = vcombine.low %v358_v9, %v362_v10  ;;  %v11671_v41 = vcombine.high %v222_v53, %v226_v27  ;;  %v850_v39 = vld [vmem:[#allocation5 + $0x1470] sm:$0xff] }
 0x277   :  { %6975 = vmatprep.subr.bf16.mxu1 %v11823_v44  ;;  %6962 = vmatprep.mubr.bf16.mxu0 %v14304_v58  ;;  %v14432_v28 = vpop.f32.mrf.mxu1  ;;  %v6621_v44 = vadd.f32 %v6620_v8, %v1209_v23  ;;  %v11663_v9 = vcombine.high %v214_v47, %v218_v50 }
 0x278   :  { %7005 = vmatprep.mubr.bf16.mxu1 %v14306_v63 }
 0x279   :  { %6933 = vmatpush1.bf16.msra.mxu0 %v11694_v55  ;;  %v6624_v51 = vpop.f32.mrf.mxu1 }
 0x27a   :  { %6976 = vmatpush1.bf16.msra.mxu1 %v11822_v56  ;;  %6934 = vmatprep.subr.bf16.mxu0 %v11687_v0  ;;  %v342_v56 = vld [vmem:[#allocation5 + $0x490] sm:$0xff]  ;;  %v6625_v10 = vadd.f32 %v6624_v51, %v1209_v23  ;;  %v11647_v51 = vcombine.high %v198_v30, %v202_v16 }
 0x27b   :  { %6977 = vmatprep.subr.bf16.mxu1 %v11815_v3  ;;  %v346_v0 = vld [vmem:[#allocation5 + $0x4b0] sm:$0xff] }
 0x27c   :  { %v11791_v8 = vcombine.high %v342_v56, %v346_v0  ;;  %v326_v23 = vld [vmem:[#allocation5 + $0x410] sm:$0xff] }
 0x27d   :  { %6935 = vmatpush1.bf16.msra.mxu0 %v11686_v11  ;;  %v11670_v11 = vcombine.low %v222_v53, %v226_v27  ;;  %v11790_v53 = vcombine.low %v342_v56, %v346_v0  ;;  %v11646_v56 = vcombine.low %v198_v30, %v202_v16  ;;  %v430_v30 = vld [vmem:[#allocation5 + $0x750] sm:$0xff] }
 0x27e   :  { %6978 = vmatpush1.bf16.msra.mxu1 %v11814_v52  ;;  %6936 = vmatprep.subr.bf16.mxu0 %v11679_v12  ;;  %v206_v52 = vld [vmem:[#allocation5 + $0x50] sm:$0xff] }
 0x27f   :  { %6979 = vmatprep.subr.bf16.mxu1 %v11807_v26  ;;  %v210_v12 = vld [vmem:[#allocation5 + $0x70] sm:$0xff] }
 0x280   :  { %v6663_v55 = vpop.f32.mrf.mxu0  ;;  %v334_v26 = vld [vmem:[#allocation5 + $0x450] sm:$0xff]  ;;  %v11655_v27 = vcombine.high %v206_v52, %v210_v12 }
 0x281   :  { %v14436_v3 = vadd.f32 %v6663_v55, %v6621_v44  ;;  %6937 = vmatpush1.bf16.msra.mxu0 %v11678_v38  ;;  %v11662_v44 = vcombine.low %v214_v47, %v218_v50  ;;  %v11783_v38 = vcombine.high %v334_v26, %v338_v1  ;;  %v322_v47 = vld [vmem:[#allocation5 + $0x3f0] sm:$0xff] }
 0x282   :  { %6980 = vmatpush1.bf16.msra.mxu1 %v11806_v40  ;;  %v14438_v42 = vpop.f32.mrf.mxu0  ;;  %6938 = vmatprep.subr.bf16.mxu0 %v11671_v41  ;;  %v330_v40 = vld [vmem:[#allocation5 + $0x430] sm:$0xff]  ;;  %v11654_v41 = vcombine.low %v206_v52, %v210_v12 }
 0x283   :  { %6981 = vmatprep.subr.bf16.mxu1 %v11799_v46  ;;  %v11782_v46 = vcombine.low %v334_v26, %v338_v1  ;;  %v11775_v55 = vcombine.high %v326_v23, %v330_v40  ;;  %v446_v50 = vld [vmem:[#allocation5 + $0x7d0] sm:$0xff]  ;;  %v11774_v0 = vcombine.low %v326_v23, %v330_v40 }
 0x284   :  { %v6667_v19 = vpop.f32.mrf.mxu0  ;;  %v314_v52 = vld [vmem:[#allocation5 + $0x3b0] sm:$0xff] }
 0x285   :  { %v14440_v61 = vadd.f32 %v6667_v19, %v6625_v10  ;;  %6939 = vmatpush1.bf16.msra.mxu0 %v11670_v11  ;;  %v318_v11 = vld [vmem:[#allocation5 + $0x3d0] sm:$0xff] }
 0x286   :  { %6982 = vmatpush1.bf16.msra.mxu1 %v11798_v4  ;;  %6940 = vmatprep.subr.bf16.mxu0 %v11663_v9  ;;  %v450_v4 = vld [vmem:[#allocation5 + $0x7f0] sm:$0xff]  ;;  %v11767_v9 = vcombine.high %v318_v11, %v322_v47  ;;  %v11766_v1 = vcombine.low %v318_v11, %v322_v47 }
 0x287   :  { %6983 = vmatprep.subr.bf16.mxu1 %v11791_v8  ;;  %v11895_v10 = vcombine.high %v446_v50, %v450_v4  ;;  %v310_v8 = vld [vmem:[#allocation5 + $0x390] sm:$0xff]  ;;  %v11894_v26 = vcombine.low %v446_v50, %v450_v4 }
 0x288   :  { %v438_v12 = vld [vmem:[#allocation5 + $0x790] sm:$0xff]  ;;  %v11758_v23 = vcombine.low %v310_v8, %v314_v52 }
 0x289   :  { %6941 = vmatpush1.bf16.msra.mxu0 %v11662_v44  ;;  %v442_v19 = vld [vmem:[#allocation5 + $0x7b0] sm:$0xff]  ;;  %v11759_v44 = vcombine.high %v310_v8, %v314_v52 }
 0x28a   :  { %6984 = vmatpush1.bf16.msra.mxu1 %v11790_v53  ;;  %6942 = vmatprep.subr.bf16.mxu0 %v11655_v27  ;;  %v11887_v53 = vcombine.high %v438_v12, %v442_v19  ;;  %v302_v27 = vld [vmem:[#allocation5 + $0x350] sm:$0xff]  ;;  %v11886_v40 = vcombine.low %v438_v12, %v442_v19 }
 0x28b   :  { %6985 = vmatprep.subr.bf16.mxu1 %v11783_v38  ;;  %v306_v38 = vld [vmem:[#allocation5 + $0x370] sm:$0xff] }
 0x28c   :  { %v434_v16 = vld [vmem:[#allocation5 + $0x770] sm:$0xff]  ;;  %v11750_v50 = vcombine.low %v302_v27, %v306_v38 }
 0x28d   :  { %6943 = vmatpush1.bf16.msra.mxu0 %v11654_v41  ;;  %v11751_v41 = vcombine.high %v302_v27, %v306_v38  ;;  %v422_v11 = vld [vmem:[#allocation5 + $0x710] sm:$0xff]  ;;  %v11878_v4 = vcombine.low %v430_v30, %v434_v16 }
 0x28e   :  { %6986 = vmatpush1.bf16.msra.mxu1 %v11782_v46  ;;  %6944 = vmatprep.subr.bf16.mxu0 %v11647_v51  ;;  %v11879_v46 = vcombine.high %v430_v30, %v434_v16  ;;  %v294_v51 = vld [vmem:[#allocation5 + $0x310] sm:$0xff] }
 0x28f   :  { %6987 = vmatprep.subr.bf16.mxu1 %v11775_v55  ;;  %v298_v55 = vld [vmem:[#allocation5 + $0x330] sm:$0xff] }
 0x290   :  { %v426_v47 = vld [vmem:[#allocation5 + $0x730] sm:$0xff]  ;;  %v11742_v12 = vcombine.low %v294_v51, %v298_v55 }
 0x291   :  { %6945 = vmatpush1.bf16.msra.mxu0 %v11646_v56  ;;  %v11743_v56 = vcombine.high %v294_v51, %v298_v55  ;;  %v414_v8 = vld [vmem:[#allocation5 + $0x6d0] sm:$0xff]  ;;  %v11870_v19 = vcombine.low %v422_v11, %v426_v47 }
 0x292   :  { %6988 = vmatpush1.bf16.msra.mxu1 %v11774_v0  ;;  %6946 = vmatprep.subr.bf16.mxu0 %v11767_v9  ;;  %v11871_v0 = vcombine.high %v422_v11, %v426_v47  ;;  %v286_v9 = vld [vmem:[#allocation5 + $0x2d0] sm:$0xff] }
 0x293   :  { %6989 = vmatprep.subr.bf16.mxu1 %v11895_v10  ;;  %v290_v10 = vld [vmem:[#allocation5 + $0x2f0] sm:$0xff] }
 0x294   :  { %v418_v52 = vld [vmem:[#allocation5 + $0x6f0] sm:$0xff]  ;;  %v11734_v30 = vcombine.low %v286_v9, %v290_v10 }
 0x295   :  { %6947 = vmatpush2.bf16.msra.mxu0 %v11766_v1  ;;  %v11735_v1 = vcombine.high %v286_v9, %v290_v10  ;;  %v406_v27 = vld [vmem:[#allocation5 + $0x690] sm:$0xff]  ;;  %v11862_v16 = vcombine.low %v414_v8, %v418_v52 }
 0x296   :  { %6990 = vmatpush2.bf16.msra.mxu1 %v11894_v26  ;;  %6948 = vmatprep.subr.bf16.mxu0 %v11759_v44  ;;  %v11863_v26 = vcombine.high %v414_v8, %v418_v52  ;;  %v278_v44 = vld [vmem:[#allocation5 + $0x290] sm:$0xff] }
 0x297   :  { %6991 = vmatprep.subr.bf16.mxu1 %v11887_v53  ;;  %v282_v53 = vld [vmem:[#allocation5 + $0x2b0] sm:$0xff] }
 0x298   :  { %v410_v38 = vld [vmem:[#allocation5 + $0x6b0] sm:$0xff]  ;;  %v11726_v11 = vcombine.low %v278_v44, %v282_v53 }
 0x299   :  { %6949 = vmatpush2.bf16.msra.mxu0 %v11758_v23  ;;  %v11727_v23 = vcombine.high %v278_v44, %v282_v53  ;;  %v398_v51 = vld [vmem:[#allocation5 + $0x650] sm:$0xff]  ;;  %v11854_v47 = vcombine.low %v406_v27, %v410_v38 }
 0x29a   :  { %6992 = vmatpush2.bf16.msra.mxu1 %v11886_v40  ;;  %6950 = vmatprep.subr.bf16.mxu0 %v11751_v41  ;;  %v11855_v40 = vcombine.high %v406_v27, %v410_v38  ;;  %v270_v41 = vld [vmem:[#allocation5 + $0x250] sm:$0xff] }
 0x29b   :  { %6993 = vmatprep.subr.bf16.mxu1 %v11879_v46  ;;  %v274_v46 = vld [vmem:[#allocation5 + $0x270] sm:$0xff] }
 0x29c   :  { %v402_v55 = vld [vmem:[#allocation5 + $0x670] sm:$0xff]  ;;  %v11718_v8 = vcombine.low %v270_v41, %v274_v46 }
 0x29d   :  { %6951 = vmatpush2.bf16.msra.mxu0 %v11750_v50  ;;  %v11719_v50 = vcombine.high %v270_v41, %v274_v46  ;;  %v390_v9 = vld [vmem:[#allocation5 + $0x610] sm:$0xff]  ;;  %v11846_v52 = vcombine.low %v398_v51, %v402_v55 }
 0x29e   :  { %6994 = vmatpush2.bf16.msra.mxu1 %v11878_v4  ;;  %6952 = vmatprep.subr.bf16.mxu0 %v11743_v56  ;;  %v11847_v4 = vcombine.high %v398_v51, %v402_v55  ;;  %v262_v56 = vld [vmem:[#allocation5 + $0x210] sm:$0xff] }
 0x29f   :  { %6995 = vmatprep.subr.bf16.mxu1 %v11871_v0  ;;  %v266_v0 = vld [vmem:[#allocation5 + $0x230] sm:$0xff] }
 0x2a0   :  { %v394_v10 = vld [vmem:[#allocation5 + $0x630] sm:$0xff]  ;;  %v11710_v27 = vcombine.low %v262_v56, %v266_v0 }
 0x2a1   :  { %6953 = vmatpush2.bf16.msra.mxu0 %v11742_v12  ;;  %v11711_v12 = vcombine.high %v262_v56, %v266_v0  ;;  %v638_v44 = vld [vmem:[#allocation5 + $0xdd0] sm:$0xff]  ;;  %v11838_v38 = vcombine.low %v390_v9, %v394_v10 }
 0x2a2   :  { %6996 = vmatpush2.bf16.msra.mxu1 %v11870_v19  ;;  %6954 = vmatprep.subr.bf16.mxu0 %v11735_v1  ;;  %v11839_v19 = vcombine.high %v390_v9, %v394_v10  ;;  %v510_v1 = vld [vmem:[#allocation5 + $0x9d0] sm:$0xff] }
 0x2a3   :  { %6997 = vmatprep.subr.bf16.mxu1 %v11863_v26  ;;  %v514_v26 = vld [vmem:[#allocation5 + $0x9f0] sm:$0xff] }
 0x2a4   :  { %v642_v53 = vld [vmem:[#allocation5 + $0xdf0] sm:$0xff]  ;;  %v11958_v51 = vcombine.low %v510_v1, %v514_v26 }
 0x2a5   :  { %6955 = vmatpush2.bf16.msra.mxu0 %v11734_v30  ;;  %v11959_v30 = vcombine.high %v510_v1, %v514_v26  ;;  %v630_v41 = vld [vmem:[#allocation5 + $0xd90] sm:$0xff]  ;;  %v12086_v55 = vcombine.low %v638_v44, %v642_v53 }
 0x2a6   :  { %6998 = vmatpush2.bf16.msra.mxu1 %v11862_v16  ;;  %6956 = vmatprep.subr.bf16.mxu0 %v11727_v23  ;;  %v12087_v16 = vcombine.high %v638_v44, %v642_v53  ;;  %v502_v23 = vld [vmem:[#allocation5 + $0x990] sm:$0xff] }
 0x2a7   :  { %6999 = vmatprep.subr.bf16.mxu1 %v11855_v40  ;;  %v506_v40 = vld [vmem:[#allocation5 + $0x9b0] sm:$0xff] }
 0x2a8   :  { %v634_v46 = vld [vmem:[#allocation5 + $0xdb0] sm:$0xff] }
 0x2a9   :  { %6957 = vmatpush2.bf16.msra.mxu0 %v11726_v11  ;;  %v11951_v11 = vcombine.high %v502_v23, %v506_v40  ;;  %v498_v56 = vld [vmem:[#allocation5 + $0x970] sm:$0xff] }
 0x2aa   :  { %7000 = vmatpush2.bf16.msra.mxu1 %v11854_v47  ;;  %6958 = vmatprep.subr.bf16.mxu0 %v11719_v50  ;;  %v14442_v47 = vpop.f32.mrf.mxu1  ;;  %v12079_v50 = vcombine.high %v630_v41, %v634_v46  ;;  %v622_v0 = vld [vmem:[#allocation5 + $0xd50] sm:$0xff] }
 0x2ab   :  { %7001 = vmatprep.subr.bf16.mxu1 %v11847_v4  ;;  %v494_v4 = vld [vmem:[#allocation5 + $0x950] sm:$0xff] }
 0x2ac   :  { %v626_v9 = vld [vmem:[#allocation5 + $0xd70] sm:$0xff] }
 0x2ad   :  { %6959 = vmatpush2.bf16.msra.mxu0 %v11718_v8  ;;  %v11950_v8 = vcombine.low %v502_v23, %v506_v40  ;;  %v12071_v26 = vcombine.high %v622_v0, %v626_v9  ;;  %v486_v44 = vld [vmem:[#allocation5 + $0x910] sm:$0xff]  ;;  %v12070_v23 = vcombine.low %v622_v0, %v626_v9 }
 0x2ae   :  { %7002 = vmatpush2.bf16.msra.mxu1 %v11846_v52  ;;  %6960 = vmatprep.subr.bf16.mxu0 %v11711_v12  ;;  %v12078_v12 = vcombine.low %v630_v41, %v634_v46  ;;  %v490_v53 = vld [vmem:[#allocation5 + $0x930] sm:$0xff] }
 0x2af   :  { %7003 = vmatprep.subr.bf16.mxu1 %v11839_v19  ;;  %v11943_v19 = vcombine.high %v494_v4, %v498_v56  ;;  %v11935_v40 = vcombine.high %v486_v44, %v490_v53  ;;  %v478_v46 = vld [vmem:[#allocation5 + $0x8d0] sm:$0xff] }
 0x2b0   :  { %v598_v9 = vld [vmem:[#allocation5 + $0xc90] sm:$0xff] }
 0x2b1   :  { %6961 = vmatpush2.bf16.msra.mxu0 %v11710_v27  ;;  %v614_v27 = vld [vmem:[#allocation5 + $0xd10] sm:$0xff] }
 0x2b2   :  { %7004 = vmatpush2.bf16.msra.mxu1 %v11838_v38  ;;  %7016 = vmatprep.subr.bf16.mxu0 %v11959_v30  ;;  %v618_v38 = vld [vmem:[#allocation5 + $0xd30] sm:$0xff] }
 0x2b3   :  { %7059 = vmatprep.subr.bf16.mxu1 %v12087_v16  ;;  %v11942_v16 = vcombine.low %v494_v4, %v498_v56  ;;  %v12063_v41 = vcombine.high %v614_v27, %v618_v38  ;;  %v470_v56 = vld [vmem:[#allocation5 + $0x890] sm:$0xff] }
 0x2b4   :  { %6963 = vmatmul.mubr.bf16.vlgmr.msra.gmra.mxu0 %v14310_v21 }
 0x2b5   :  { %v6706_v10 = vpop.f32.mrf.mxu1  ;;  %7006 = vmatmul.mubr.bf16.vlgmr.msra.gmra.mxu1 %v14312_v25  ;;  %7017 = vmatpush1.bf16.msra.mxu0 %v11958_v51  ;;  %v482_v51 = vld [vmem:[#allocation5 + $0x8f0] sm:$0xff] }
 0x2b6   :  { %v6707_v52 = vadd.f32 %v6706_v10, %v14436_v3  ;;  %7060 = vmatpush1.bf16.msra.mxu1 %v12086_v55  ;;  %7018 = vmatprep.subr.bf16.mxu0 %v11951_v11  ;;  %v606_v55 = vld [vmem:[#allocation5 + $0xcd0] sm:$0xff]  ;;  %v14452_v10 = vpop.f32.mrf.mxu0  ;;  %v11927_v4 = vcombine.high %v478_v46, %v482_v51 }
 0x2b7   :  { %v14447_v1 = vpop.f32.mrf.mxu1  ;;  %7061 = vmatprep.subr.bf16.mxu1 %v12079_v50  ;;  %7048 = vmatprep.mubr.bf16.mxu0 %v14314_v34  ;;  %v610_v11 = vld [vmem:[#allocation5 + $0xcf0] sm:$0xff]  ;;  %v11934_v50 = vcombine.low %v486_v44, %v490_v53 }
 0x2b8   :  { %7091 = vmatprep.mubr.bf16.mxu1 %v14317_v37  ;;  %v12054_v44 = vcombine.low %v606_v55, %v610_v11 }
 0x2b9   :  { %v6710_v30 = vpop.f32.mrf.mxu1  ;;  %7019 = vmatpush1.bf16.msra.mxu0 %v11950_v8  ;;  %v12062_v8 = vcombine.low %v614_v27, %v618_v38  ;;  %v462_v38 = vld [vmem:[#allocation5 + $0x850] sm:$0xff] }
 0x2ba   :  { %v6711_v3 = vadd.f32 %v6710_v30, %v14440_v61  ;;  %7062 = vmatpush1.bf16.msra.mxu1 %v12078_v12  ;;  %7020 = vmatprep.subr.bf16.mxu0 %v11943_v19  ;;  %v12055_v61 = vcombine.high %v606_v55, %v610_v11  ;;  %v474_v12 = vld [vmem:[#allocation5 + $0x8b0] sm:$0xff]  ;;  %v11926_v30 = vcombine.low %v478_v46, %v482_v51 }
 0x2bb   :  { %7063 = vmatprep.subr.bf16.mxu1 %v12071_v26  ;;  %v602_v19 = vld [vmem:[#allocation5 + $0xcb0] sm:$0xff]  ;;  %v11919_v53 = vcombine.high %v470_v56, %v474_v12 }
 0x2bc   :  { %v12047_v27 = vcombine.high %v598_v9, %v602_v19  ;;  %v12046_v46 = vcombine.low %v598_v9, %v602_v19  ;;  %v458_v55 = vld [vmem:[#allocation5 + $0x830] sm:$0xff] }
 0x2bd   :  { %7021 = vmatpush1.bf16.msra.mxu0 %v11942_v16  ;;  %v582_v11 = vld [vmem:[#allocation5 + $0xc10] sm:$0xff] }
 0x2be   :  { %7064 = vmatpush1.bf16.msra.mxu1 %v12070_v23  ;;  %7022 = vmatprep.subr.bf16.mxu0 %v11935_v40  ;;  %v466_v23 = vld [vmem:[#allocation5 + $0x870] sm:$0xff] }
 0x2bf   :  { %7065 = vmatprep.subr.bf16.mxu1 %v12063_v41  ;;  %v590_v41 = vld [vmem:[#allocation5 + $0xc50] sm:$0xff]  ;;  %v11911_v51 = vcombine.high %v462_v38, %v466_v23 }
 0x2c0   :  { %v6749_v0 = vpop.f32.mrf.mxu0 }
 0x2c1   :  { %v14454_v26 = vadd.f32 %v6749_v0, %v6707_v52  ;;  %7023 = vmatpush1.bf16.msra.mxu0 %v11934_v50  ;;  %v11918_v52 = vcombine.low %v470_v56, %v474_v12  ;;  %v12039_v50 = vcombine.high %v590_v41, %v594_v5  ;;  %v12038_v0 = vcombine.low %v590_v41, %v594_v5  ;;  %v578_v56 = vld [vmem:[#allocation5 + $0xbf0] sm:$0xff] }
 0x2c2   :  { %7066 = vmatpush1.bf16.msra.mxu1 %v12062_v8  ;;  %v14456_v16 = vpop.f32.mrf.mxu0  ;;  %7024 = vmatprep.subr.bf16.mxu0 %v11927_v4  ;;  %v454_v8 = vld [vmem:[#allocation5 + $0x810] sm:$0xff] }
 0x2c3   :  { %7067 = vmatprep.subr.bf16.mxu1 %v12055_v61  ;;  %v586_v4 = vld [vmem:[#allocation5 + $0xc30] sm:$0xff]  ;;  %v11910_v61 = vcombine.low %v462_v38, %v466_v23  ;;  %v11903_v6 = vcombine.high %v454_v8, %v458_v55  ;;  %v11902_v9 = vcombine.low %v454_v8, %v458_v55 }
 0x2c4   :  { %v6753_v40 = vpop.f32.mrf.mxu0  ;;  %v702_v12 = vld [vmem:[#allocation5 + $0xfd0] sm:$0xff]  ;;  %v12030_v19 = vcombine.low %v582_v11, %v586_v4 }
 0x2c5   :  { %v14458_v14 = vadd.f32 %v6753_v40, %v6711_v3  ;;  %7025 = vmatpush1.bf16.msra.mxu0 %v11926_v30  ;;  %v12031_v3 = vcombine.high %v582_v11, %v586_v4  ;;  %v574_v30 = vld [vmem:[#allocation5 + $0xbd0] sm:$0xff] }
 0x2c6   :  { %7068 = vmatpush1.bf16.msra.mxu1 %v12054_v44  ;;  %7026 = vmatprep.subr.bf16.mxu0 %v11919_v53  ;;  %v706_v44 = vld [vmem:[#allocation5 + $0xff0] sm:$0xff]  ;;  %v12023_v53 = vcombine.high %v574_v30, %v578_v56  ;;  %v12022_v5 = vcombine.low %v574_v30, %v578_v56  ;;  %v14470_v15 = vpop.f32.mrf.mxu0 }
 0x2c7   :  { %7069 = vmatprep.subr.bf16.mxu1 %v12047_v27  ;;  %v12151_v27 = vcombine.high %v702_v12, %v706_v44  ;;  %v566_v40 = vld [vmem:[#allocation5 + $0xb90] sm:$0xff]  ;;  %v12150_v41 = vcombine.low %v702_v12, %v706_v44 }
 0x2c8   :  { %v570_v38 = vld [vmem:[#allocation5 + $0xbb0] sm:$0xff] }
 0x2c9   :  { %7027 = vmatpush1.bf16.msra.mxu0 %v11918_v52  ;;  %v694_v23 = vld [vmem:[#allocation5 + $0xf90] sm:$0xff]  ;;  %v12014_v11 = vcombine.low %v566_v40, %v570_v38 }
 0x2ca   :  { %7070 = vmatpush1.bf16.msra.mxu1 %v12046_v46  ;;  %7028 = vmatprep.subr.bf16.mxu0 %v11911_v51  ;;  %v698_v52 = vld [vmem:[#allocation5 + $0xfb0] sm:$0xff]  ;;  %v12015_v46 = vcombine.high %v566_v40, %v570_v38 }
 0x2cb   :  { %7071 = vmatprep.subr.bf16.mxu1 %v12039_v50  ;;  %v12143_v51 = vcombine.high %v694_v23, %v698_v52  ;;  %v558_v50 = vld [vmem:[#allocation5 + $0xb50] sm:$0xff]  ;;  %v12142_v4 = vcombine.low %v694_v23, %v698_v52 }
 0x2cc   :  { %v562_v8 = vld [vmem:[#allocation5 + $0xb70] sm:$0xff] }
 0x2cd   :  { %7029 = vmatpush1.bf16.msra.mxu0 %v11910_v61  ;;  %v686_v55 = vld [vmem:[#allocation5 + $0xf50] sm:$0xff]  ;;  %v12007_v61 = vcombine.high %v558_v50, %v562_v8  ;;  %v12006_v12 = vcombine.low %v558_v50, %v562_v8 }
 0x2ce   :  { %7072 = vmatpush1.bf16.msra.mxu1 %v12038_v0  ;;  %7030 = vmatprep.subr.bf16.mxu0 %v11903_v6  ;;  %v690_v6 = vld [vmem:[#allocation5 + $0xf70] sm:$0xff] }
 0x2cf   :  { %7073 = vmatprep.subr.bf16.mxu1 %v12031_v3  ;;  %v12135_v0 = vcombine.high %v686_v55, %v690_v6  ;;  %v550_v3 = vld [vmem:[#allocation5 + $0xb10] sm:$0xff]  ;;  %v12134_v44 = vcombine.low %v686_v55, %v690_v6 }
 0x2d0   :  { %v554_v30 = vld [vmem:[#allocation5 + $0xb30] sm:$0xff] }
 0x2d1   :  { %7031 = vmatpush1.bf16.msra.mxu0 %v11902_v9  ;;  %v678_v56 = vld [vmem:[#allocation5 + $0xf10] sm:$0xff]  ;;  %v11998_v23 = vcombine.low %v550_v3, %v554_v30 }
 0x2d2   :  { %7074 = vmatpush1.bf16.msra.mxu1 %v12030_v19  ;;  %7032 = vmatprep.subr.bf16.mxu0 %v12023_v53  ;;  %v682_v9 = vld [vmem:[#allocation5 + $0xf30] sm:$0xff]  ;;  %v11999_v19 = vcombine.high %v550_v3, %v554_v30 }
 0x2d3   :  { %7075 = vmatprep.subr.bf16.mxu1 %v12151_v27  ;;  %v12127_v53 = vcombine.high %v678_v56, %v682_v9  ;;  %v542_v27 = vld [vmem:[#allocation5 + $0xad0] sm:$0xff]  ;;  %v12126_v52 = vcombine.low %v678_v56, %v682_v9 }
 0x2d4   :  { %v546_v40 = vld [vmem:[#allocation5 + $0xaf0] sm:$0xff] }
 0x2d5   :  { %7033 = vmatpush2.bf16.msra.mxu0 %v12022_v5  ;;  %v670_v38 = vld [vmem:[#allocation5 + $0xed0] sm:$0xff]  ;;  %v11990_v55 = vcombine.low %v542_v27, %v546_v40 }
 0x2d6   :  { %7076 = vmatpush2.bf16.msra.mxu1 %v12150_v41  ;;  %7034 = vmatprep.subr.bf16.mxu0 %v12015_v46  ;;  %v674_v5 = vld [vmem:[#allocation5 + $0xef0] sm:$0xff]  ;;  %v11991_v41 = vcombine.high %v542_v27, %v546_v40 }
 0x2d7   :  { %7077 = vmatprep.subr.bf16.mxu1 %v12143_v51  ;;  %v12119_v46 = vcombine.high %v670_v38, %v674_v5  ;;  %v534_v51 = vld [vmem:[#allocation5 + $0xa90] sm:$0xff]  ;;  %v12118_v6 = vcombine.low %v670_v38, %v674_v5 }
 0x2d8   :  { %v538_v50 = vld [vmem:[#allocation5 + $0xab0] sm:$0xff] }
 0x2d9   :  { %7035 = vmatpush2.bf16.msra.mxu0 %v12014_v11  ;;  %v662_v8 = vld [vmem:[#allocation5 + $0xe90] sm:$0xff]  ;;  %v11982_v56 = vcombine.low %v534_v51, %v538_v50 }
 0x2da   :  { %7078 = vmatpush2.bf16.msra.mxu1 %v12142_v4  ;;  %7036 = vmatprep.subr.bf16.mxu0 %v12007_v61  ;;  %v666_v11 = vld [vmem:[#allocation5 + $0xeb0] sm:$0xff]  ;;  %v11983_v4 = vcombine.high %v534_v51, %v538_v50 }
 0x2db   :  { %7079 = vmatprep.subr.bf16.mxu1 %v12135_v0  ;;  %v12111_v61 = vcombine.high %v662_v8, %v666_v11  ;;  %v526_v0 = vld [vmem:[#allocation5 + $0xa50] sm:$0xff]  ;;  %v12110_v9 = vcombine.low %v662_v8, %v666_v11 }
 0x2dc   :  { %v530_v3 = vld [vmem:[#allocation5 + $0xa70] sm:$0xff] }
 0x2dd   :  { %7037 = vmatpush2.bf16.msra.mxu0 %v12006_v12  ;;  %v654_v30 = vld [vmem:[#allocation5 + $0xe50] sm:$0xff]  ;;  %v11974_v38 = vcombine.low %v526_v0, %v530_v3 }
 0x2de   :  { %7080 = vmatpush2.bf16.msra.mxu1 %v12134_v44  ;;  %7038 = vmatprep.subr.bf16.mxu0 %v11999_v19  ;;  %v658_v12 = vld [vmem:[#allocation5 + $0xe70] sm:$0xff]  ;;  %v11975_v44 = vcombine.high %v526_v0, %v530_v3 }
 0x2df   :  { %7081 = vmatprep.subr.bf16.mxu1 %v12127_v53  ;;  %v12103_v19 = vcombine.high %v654_v30, %v658_v12  ;;  %v518_v53 = vld [vmem:[#allocation5 + $0xa10] sm:$0xff]  ;;  %v12102_v5 = vcombine.low %v654_v30, %v658_v12 }
 0x2e0   :  { %v522_v27 = vld [vmem:[#allocation5 + $0xa30] sm:$0xff] }
 0x2e1   :  { %7039 = vmatpush2.bf16.msra.mxu0 %v11998_v23  ;;  %v646_v40 = vld [vmem:[#allocation5 + $0xe10] sm:$0xff]  ;;  %v11966_v8 = vcombine.low %v518_v53, %v522_v27 }
 0x2e2   :  { %7082 = vmatpush2.bf16.msra.mxu1 %v12126_v52  ;;  %7040 = vmatprep.subr.bf16.mxu0 %v11991_v41  ;;  %v650_v23 = vld [vmem:[#allocation5 + $0xe30] sm:$0xff]  ;;  %v11967_v52 = vcombine.high %v518_v53, %v522_v27 }
 0x2e3   :  { %7083 = vmatprep.subr.bf16.mxu1 %v12119_v46  ;;  %v12095_v41 = vcombine.high %v646_v40, %v650_v23  ;;  %v766_v46 = vld [vmem:[#allocation5 + $0x11d0] sm:$0xff]  ;;  %v12094_v11 = vcombine.low %v646_v40, %v650_v23 }
 0x2e4   :  { %v770_v51 = vld [vmem:[#allocation5 + $0x11f0] sm:$0xff] }
 0x2e5   :  { %7041 = vmatpush2.bf16.msra.mxu0 %v11990_v55  ;;  %v894_v50 = vld [vmem:[#allocation5 + $0x15d0] sm:$0xff]  ;;  %v12214_v30 = vcombine.low %v766_v46, %v770_v51 }
 0x2e6   :  { %7084 = vmatpush2.bf16.msra.mxu1 %v12118_v6  ;;  %7042 = vmatprep.subr.bf16.mxu0 %v11983_v4  ;;  %v898_v55 = vld [vmem:[#allocation5 + $0x15f0] sm:$0xff]  ;;  %v12215_v6 = vcombine.high %v766_v46, %v770_v51 }
 0x2e7   :  { %7085 = vmatprep.subr.bf16.mxu1 %v12111_v61  ;;  %v12343_v4 = vcombine.high %v894_v50, %v898_v55  ;;  %v758_v61 = vld [vmem:[#allocation5 + $0x1190] sm:$0xff]  ;;  %v12342_v12 = vcombine.low %v894_v50, %v898_v55 }
 0x2e8   :  { %v762_v0 = vld [vmem:[#allocation5 + $0x11b0] sm:$0xff] }
 0x2e9   :  { %7043 = vmatpush2.bf16.msra.mxu0 %v11982_v56  ;;  %v886_v3 = vld [vmem:[#allocation5 + $0x1590] sm:$0xff] }
 0x2ea   :  { %7086 = vmatpush2.bf16.msra.mxu1 %v12110_v9  ;;  %7044 = vmatprep.subr.bf16.mxu0 %v11975_v44  ;;  %v890_v56 = vld [vmem:[#allocation5 + $0x15b0] sm:$0xff]  ;;  %v12207_v9 = vcombine.high %v758_v61, %v762_v0  ;;  %v14460_v44 = vpop.f32.mrf.mxu1 }
 0x2eb   :  { %7087 = vmatprep.subr.bf16.mxu1 %v12103_v19  ;;  %v12335_v19 = vcombine.high %v886_v3, %v890_v56  ;;  %v750_v53 = vld [vmem:[#allocation5 + $0x1150] sm:$0xff] }
 0x2ec   :  { %v754_v27 = vld [vmem:[#allocation5 + $0x1170] sm:$0xff] }
 0x2ed   :  { %7045 = vmatpush2.bf16.msra.mxu0 %v11974_v38  ;;  %v878_v40 = vld [vmem:[#allocation5 + $0x1550] sm:$0xff]  ;;  %v12199_v46 = vcombine.high %v750_v53, %v754_v27 }
 0x2ee   :  { %7088 = vmatpush2.bf16.msra.mxu1 %v12102_v5  ;;  %7046 = vmatprep.subr.bf16.mxu0 %v11967_v52  ;;  %v882_v23 = vld [vmem:[#allocation5 + $0x1570] sm:$0xff]  ;;  %v12206_v5 = vcombine.low %v758_v61, %v762_v0  ;;  %v12198_v61 = vcombine.low %v750_v53, %v754_v27 }
 0x2ef   :  { %7089 = vmatprep.subr.bf16.mxu1 %v12095_v41  ;;  %v12334_v41 = vcombine.low %v886_v3, %v890_v56  ;;  %v12327_v50 = vcombine.high %v878_v40, %v882_v23  ;;  %v742_v55 = vld [vmem:[#allocation5 + $0x1110] sm:$0xff]  ;;  %v12326_v0 = vcombine.low %v878_v40, %v882_v23 }
 0x2f0   :  { %v726_v27 = vld [vmem:[#allocation5 + $0x1090] sm:$0xff] }
 0x2f1   :  { %7047 = vmatpush2.bf16.msra.mxu0 %v11966_v8  ;;  %v746_v8 = vld [vmem:[#allocation5 + $0x1130] sm:$0xff] }
 0x2f2   :  { %7090 = vmatpush2.bf16.msra.mxu1 %v12094_v11  ;;  %7102 = vmatprep.subr.bf16.mxu0 %v12215_v6  ;;  %v870_v11 = vld [vmem:[#allocation5 + $0x1510] sm:$0xff]  ;;  %v12191_v3 = vcombine.high %v742_v55, %v746_v8 }
 0x2f3   :  { %7145 = vmatprep.subr.bf16.mxu1 %v12343_v4  ;;  %v874_v6 = vld [vmem:[#allocation5 + $0x1530] sm:$0xff] }
 0x2f4   :  { %7049 = vmatmul.mubr.bf16.vlgmr.msra.gmra.mxu0 %v14322_v48  ;;  %v12319_v56 = vcombine.high %v870_v11, %v874_v6  ;;  %v854_v23 = vld [vmem:[#allocation5 + $0x1490] sm:$0xff] }
 0x2f5   :  { %v6792_v38 = vpop.f32.mrf.mxu1  ;;  %7092 = vmatmul.mubr.bf16.vlgmr.msra.gmra.mxu1 %v14324_v49  ;;  %7103 = vmatpush1.bf16.msra.mxu0 %v12214_v30  ;;  %v734_v30 = vld [vmem:[#allocation5 + $0x10d0] sm:$0xff] }
 0x2f6   :  { %v6793_v52 = vadd.f32 %v6792_v38, %v14454_v26  ;;  %7146 = vmatpush1.bf16.msra.mxu1 %v12342_v12  ;;  %7104 = vmatprep.subr.bf16.mxu0 %v12207_v9  ;;  %v738_v12 = vld [vmem:[#allocation5 + $0x10f0] sm:$0xff]  ;;  %v12190_v38 = vcombine.low %v742_v55, %v746_v8 }
 0x2f7   :  { %v14465_v51 = vpop.f32.mrf.mxu1  ;;  %7147 = vmatprep.subr.bf16.mxu1 %v12335_v19  ;;  %7134 = vmatprep.mubr.bf16.mxu0 %v14326_v60  ;;  %v862_v9 = vld [vmem:[#allocation5 + $0x14d0] sm:$0xff]  ;;  %v12183_v53 = vcombine.high %v734_v30, %v738_v12 }
 0x2f8   :  { %14753 = vst [vmem:[#allocation33_spill] sm:$0xff] %v14465_v51  ;;  %7177 = vmatprep.mubr.bf16.mxu1 %v14329_v62  ;;  %v866_v19 = vld [vmem:[#allocation5 + $0x14f0] sm:$0xff] }
 0x2f9   :  { %v6796_v4 = vpop.f32.mrf.mxu1  ;;  %7105 = vmatpush1.bf16.msra.mxu0 %v12206_v5  ;;  %v12318_v5 = vcombine.low %v870_v11, %v874_v6  ;;  %v12310_v55 = vcombine.low %v862_v9, %v866_v19  ;;  %v718_v6 = vld [vmem:[#allocation5 + $0x1050] sm:$0xff] }
 0x2fa   :  { %v6797_v26 = vadd.f32 %v6796_v4, %v14458_v14  ;;  %7148 = vmatpush1.bf16.msra.mxu1 %v12334_v41  ;;  %7106 = vmatprep.subr.bf16.mxu0 %v12199_v46  ;;  %v12311_v14 = vcombine.high %v862_v9, %v866_v19  ;;  %v730_v41 = vld [vmem:[#allocation5 + $0x10b0] sm:$0xff]  ;;  %v12182_v4 = vcombine.low %v734_v30, %v738_v12 }
 0x2fb   :  { %7149 = vmatprep.subr.bf16.mxu1 %v12327_v50  ;;  %v858_v46 = vld [vmem:[#allocation5 + $0x14b0] sm:$0xff]  ;;  %v12175_v8 = vcombine.high %v726_v27, %v730_v41 }
 0x2fc   :  { %v12303_v11 = vcombine.high %v854_v23, %v858_v46  ;;  %v12302_v30 = vcombine.low %v854_v23, %v858_v46  ;;  %v714_v9 = vld [vmem:[#allocation5 + $0x1030] sm:$0xff] }
 0x2fd   :  { %7107 = vmatpush1.bf16.msra.mxu0 %v12198_v61  ;;  %v838_v19 = vld [vmem:[#allocation5 + $0x1410] sm:$0xff] }
 0x2fe   :  { %7150 = vmatpush1.bf16.msra.mxu1 %v12326_v0  ;;  %7108 = vmatprep.subr.bf16.mxu0 %v12191_v3  ;;  %v722_v0 = vld [vmem:[#allocation5 + $0x1070] sm:$0xff] }
 0x2ff   :  { %7151 = vmatprep.subr.bf16.mxu1 %v12319_v56  ;;  %v846_v56 = vld [vmem:[#allocation5 + $0x1450] sm:$0xff]  ;;  %v12167_v12 = vcombine.high %v718_v6, %v722_v0 }
 0x300   :  { %v6835_v40 = vpop.f32.mrf.mxu0 }
 0x301   :  { %v14472_v50 = vadd.f32 %v6835_v40, %v6793_v52  ;;  %7109 = vmatpush1.bf16.msra.mxu0 %v12190_v38  ;;  %v12174_v52 = vcombine.low %v726_v27, %v730_v41  ;;  %v12295_v38 = vcombine.high %v846_v56, %v850_v39  ;;  %v12294_v40 = vcombine.low %v846_v56, %v850_v39  ;;  %v834_v27 = vld [vmem:[#allocation5 + $0x13f0] sm:$0xff] }
 0x302   :  { %7152 = vmatpush1.bf16.msra.mxu1 %v12318_v5  ;;  %v14474_v61 = vpop.f32.mrf.mxu0  ;;  %7110 = vmatprep.subr.bf16.mxu0 %v12183_v53  ;;  %v710_v5 = vld [vmem:[#allocation5 + $0x1010] sm:$0xff] }
 0x303   :  { %14754 = vst [vmem:[#allocation34_spill] sm:$0xff] %v14474_v61  ;;  %7153 = vmatprep.subr.bf16.mxu1 %v12311_v14  ;;  %v842_v53 = vld [vmem:[#allocation5 + $0x1430] sm:$0xff]  ;;  %v12166_v14 = vcombine.low %v718_v6, %v722_v0  ;;  %v12159_v61 = vcombine.high %v710_v5, %v714_v9  ;;  %v12158_v23 = vcombine.low %v710_v5, %v714_v9 }
 0x304   :  { %v6839_v3 = vpop.f32.mrf.mxu0  ;;  %v958_v41 = vld [vmem:[#allocation5 + $0x17d0] sm:$0xff]  ;;  %v12286_v46 = vcombine.low %v838_v19, %v842_v53 }
 0x305   :  { %v14476_v17 = vadd.f32 %v6839_v3, %v6797_v26  ;;  %7111 = vmatpush1.bf16.msra.mxu0 %v12182_v4  ;;  %v12287_v26 = vcombine.high %v838_v19, %v842_v53  ;;  %v830_v4 = vld [vmem:[#allocation5 + $0x13d0] sm:$0xff] }
 0x306   :  { %7154 = vmatpush1.bf16.msra.mxu1 %v12310_v55  ;;  %7112 = vmatprep.subr.bf16.mxu0 %v12175_v8  ;;  %v962_v55 = vld [vmem:[#allocation5 + $0x17f0] sm:$0xff]  ;;  %v12279_v8 = vcombine.high %v830_v4, %v834_v27  ;;  %v12278_v39 = vcombine.low %v830_v4, %v834_v27 }
 0x307   :  { %7155 = vmatprep.subr.bf16.mxu1 %v12303_v11  ;;  %v12407_v11 = vcombine.high %v958_v41, %v962_v55  ;;  %v822_v3 = vld [vmem:[#allocation5 + $0x1390] sm:$0xff]  ;;  %v12406_v56 = vcombine.low %v958_v41, %v962_v55 }
 0x308   :  { %v826_v6 = vld [vmem:[#allocation5 + $0x13b0] sm:$0xff] }
 0x309   :  { %7113 = vmatpush1.bf16.msra.mxu0 %v12174_v52  ;;  %v950_v0 = vld [vmem:[#allocation5 + $0x1790] sm:$0xff]  ;;  %v12270_v19 = vcombine.low %v822_v3, %v826_v6 }
 0x30a   :  { %7156 = vmatpush1.bf16.msra.mxu1 %v12302_v30  ;;  %7114 = vmatprep.subr.bf16.mxu0 %v12167_v12  ;;  %v954_v52 = vld [vmem:[#allocation5 + $0x17b0] sm:$0xff]  ;;  %v12271_v30 = vcombine.high %v822_v3, %v826_v6 }
 0x30b   :  { %7157 = vmatprep.subr.bf16.mxu1 %v12295_v38  ;;  %v12399_v12 = vcombine.high %v950_v0, %v954_v52  ;;  %v814_v38 = vld [vmem:[#allocation5 + $0x1350] sm:$0xff]  ;;  %v12398_v53 = vcombine.low %v950_v0, %v954_v52 }
 0x30c   :  { %v818_v5 = vld [vmem:[#allocation5 + $0x1370] sm:$0xff] }
 0x30d   :  { %7115 = vmatpush1.bf16.msra.mxu0 %v12166_v14  ;;  %v942_v9 = vld [vmem:[#allocation5 + $0x1750] sm:$0xff]  ;;  %v12263_v14 = vcombine.high %v814_v38, %v818_v5  ;;  %v12262_v41 = vcombine.low %v814_v38, %v818_v5 }
 0x30e   :  { %7158 = vmatpush1.bf16.msra.mxu1 %v12294_v40  ;;  %7116 = vmatprep.subr.bf16.mxu0 %v12159_v61  ;;  %v946_v61 = vld [vmem:[#allocation5 + $0x1770] sm:$0xff] }
 0x30f   :  { %7159 = vmatprep.subr.bf16.mxu1 %v12287_v26  ;;  %v12391_v40 = vcombine.high %v942_v9, %v946_v61  ;;  %v806_v26 = vld [vmem:[#allocation5 + $0x1310] sm:$0xff]  ;;  %v12390_v55 = vcombine.low %v942_v9, %v946_v61 }
 0x310   :  { %v810_v4 = vld [vmem:[#allocation5 + $0x1330] sm:$0xff] }
 0x311   :  { %7117 = vmatpush1.bf16.msra.mxu0 %v12158_v23  ;;  %v934_v27 = vld [vmem:[#allocation5 + $0x1710] sm:$0xff]  ;;  %v12254_v0 = vcombine.low %v806_v26, %v810_v4 }
 0x312   :  { %7160 = vmatpush1.bf16.msra.mxu1 %v12286_v46  ;;  %7118 = vmatprep.subr.bf16.mxu0 %v12279_v8  ;;  %v938_v23 = vld [vmem:[#allocation5 + $0x1730] sm:$0xff]  ;;  %v12255_v46 = vcombine.high %v806_v26, %v810_v4 }
 0x313   :  { %7161 = vmatprep.subr.bf16.mxu1 %v12407_v11  ;;  %v12383_v8 = vcombine.high %v934_v27, %v938_v23  ;;  %v798_v11 = vld [vmem:[#allocation5 + $0x12d0] sm:$0xff]  ;;  %v12382_v52 = vcombine.low %v934_v27, %v938_v23 }
 0x314   :  { %v802_v3 = vld [vmem:[#allocation5 + $0x12f0] sm:$0xff] }
 0x315   :  { %7119 = vmatpush2.bf16.msra.mxu0 %v12278_v39  ;;  %v926_v6 = vld [vmem:[#allocation5 + $0x16d0] sm:$0xff]  ;;  %v12246_v9 = vcombine.low %v798_v11, %v802_v3 }
 0x316   :  { %7162 = vmatpush2.bf16.msra.mxu1 %v12406_v56  ;;  %7120 = vmatprep.subr.bf16.mxu0 %v12271_v30  ;;  %v930_v39 = vld [vmem:[#allocation5 + $0x16f0] sm:$0xff]  ;;  %v12247_v56 = vcombine.high %v798_v11, %v802_v3 }
 0x317   :  { %7163 = vmatprep.subr.bf16.mxu1 %v12399_v12  ;;  %v12375_v30 = vcombine.high %v926_v6, %v930_v39  ;;  %v790_v12 = vld [vmem:[#allocation5 + $0x1290] sm:$0xff]  ;;  %v12374_v61 = vcombine.low %v926_v6, %v930_v39 }
 0x318   :  { %v794_v38 = vld [vmem:[#allocation5 + $0x12b0] sm:$0xff] }
 0x319   :  { %7121 = vmatpush2.bf16.msra.mxu0 %v12270_v19  ;;  %v918_v5 = vld [vmem:[#allocation5 + $0x1690] sm:$0xff]  ;;  %v12238_v27 = vcombine.low %v790_v12, %v794_v38 }
 0x31a   :  { %7164 = vmatpush2.bf16.msra.mxu1 %v12398_v53  ;;  %7122 = vmatprep.subr.bf16.mxu0 %v12263_v14  ;;  %v922_v19 = vld [vmem:[#allocation5 + $0x16b0] sm:$0xff]  ;;  %v12239_v53 = vcombine.high %v790_v12, %v794_v38 }
 0x31b   :  { %7165 = vmatprep.subr.bf16.mxu1 %v12391_v40  ;;  %v12367_v14 = vcombine.high %v918_v5, %v922_v19  ;;  %v782_v40 = vld [vmem:[#allocation5 + $0x1250] sm:$0xff]  ;;  %v12366_v23 = vcombine.low %v918_v5, %v922_v19 }
 0x31c   :  { %v786_v26 = vld [vmem:[#allocation5 + $0x1270] sm:$0xff] }
 0x31d   :  { %7123 = vmatpush2.bf16.msra.mxu0 %v12262_v41  ;;  %v910_v4 = vld [vmem:[#allocation5 + $0x1650] sm:$0xff]  ;;  %v12230_v6 = vcombine.low %v782_v40, %v786_v26 }
 0x31e   :  { %7166 = vmatpush2.bf16.msra.mxu1 %v12390_v55  ;;  %7124 = vmatprep.subr.bf16.mxu0 %v12255_v46  ;;  %v914_v41 = vld [vmem:[#allocation5 + $0x1670] sm:$0xff]  ;;  %v12231_v55 = vcombine.high %v782_v40, %v786_v26 }
 0x31f   :  { %7167 = vmatprep.subr.bf16.mxu1 %v12383_v8  ;;  %v12359_v46 = vcombine.high %v910_v4, %v914_v41  ;;  %v774_v8 = vld [vmem:[#allocation5 + $0x1210] sm:$0xff]  ;;  %v12358_v39 = vcombine.low %v910_v4, %v914_v41  ;;  %v14478_v41 = vpop.f32.mrf.mxu0 }
 0x320   :  { %v778_v11 = vld [vmem:[#allocation5 + $0x1230] sm:$0xff]  ;;  %14755 = vst [vmem:[#allocation35_spill] sm:$0xff] %v14478_v41 }
 0x321   :  { %7125 = vmatpush2.bf16.msra.mxu0 %v12254_v0  ;;  %v902_v3 = vld [vmem:[#allocation5 + $0x1610] sm:$0xff]  ;;  %v12222_v5 = vcombine.low %v774_v8, %v778_v11 }
 0x322   :  { %7168 = vmatpush2.bf16.msra.mxu1 %v12382_v52  ;;  %7126 = vmatprep.subr.bf16.mxu0 %v12247_v56  ;;  %v906_v0 = vld [vmem:[#allocation5 + $0x1630] sm:$0xff]  ;;  %v12223_v52 = vcombine.high %v774_v8, %v778_v11 }
 0x323   :  { %7169 = vmatprep.subr.bf16.mxu1 %v12375_v30  ;;  %v12351_v56 = vcombine.high %v902_v3, %v906_v0  ;;  %v1022_v30 = vld [vmem:[#allocation5 + $0x19d0] sm:$0xff]  ;;  %v12350_v19 = vcombine.low %v902_v3, %v906_v0 }
 0x324   :  { %v1026_v12 = vld [vmem:[#allocation5 + $0x19f0] sm:$0xff] }
 0x325   :  { %7127 = vmatpush2.bf16.msra.mxu0 %v12246_v9  ;;  %v1150_v38 = vld [vmem:[#allocation5 + $0x1dd0] sm:$0xff]  ;;  %v12470_v4 = vcombine.low %v1022_v30, %v1026_v12 }
 0x326   :  { %7170 = vmatpush2.bf16.msra.mxu1 %v12374_v61  ;;  %7128 = vmatprep.subr.bf16.mxu0 %v12239_v53  ;;  %v1154_v9 = vld [vmem:[#allocation5 + $0x1df0] sm:$0xff]  ;;  %v12471_v61 = vcombine.high %v1022_v30, %v1026_v12 }
 0x327   :  { %7171 = vmatprep.subr.bf16.mxu1 %v12367_v14  ;;  %v12599_v53 = vcombine.high %v1150_v38, %v1154_v9  ;;  %v1014_v14 = vld [vmem:[#allocation5 + $0x1990] sm:$0xff] }
 0x328   :  { %v1018_v40 = vld [vmem:[#allocation5 + $0x19b0] sm:$0xff] }
 0x329   :  { %7129 = vmatpush2.bf16.msra.mxu0 %v12238_v27  ;;  %v1142_v26 = vld [vmem:[#allocation5 + $0x1d90] sm:$0xff] }
 0x32a   :  { %7172 = vmatpush2.bf16.msra.mxu1 %v12366_v23  ;;  %7130 = vmatprep.subr.bf16.mxu0 %v12231_v55  ;;  %v1146_v27 = vld [vmem:[#allocation5 + $0x1db0] sm:$0xff]  ;;  %v12598_v23 = vcombine.low %v1150_v38, %v1154_v9  ;;  %v12463_v55 = vcombine.high %v1014_v14, %v1018_v40 }
 0x32b   :  { %7173 = vmatprep.subr.bf16.mxu1 %v12359_v46  ;;  %v14480_v46 = vpop.f32.mrf.mxu1  ;;  %v12591_v8 = vcombine.high %v1142_v26, %v1146_v27  ;;  %v1006_v11 = vld [vmem:[#allocation5 + $0x1950] sm:$0xff]  ;;  %v12590_v12 = vcombine.low %v1142_v26, %v1146_v27 }
 0x32c   :  { %14756 = vst [vmem:[#allocation36_spill] sm:$0xff] %v14480_v46  ;;  %v1010_v3 = vld [vmem:[#allocation5 + $0x1970] sm:$0xff] }
 0x32d   :  { %7131 = vmatpush2.bf16.msra.mxu0 %v12230_v6  ;;  %v1134_v6 = vld [vmem:[#allocation5 + $0x1d50] sm:$0xff]  ;;  %v12455_v38 = vcombine.high %v1006_v11, %v1010_v3 }
 0x32e   :  { %7174 = vmatpush2.bf16.msra.mxu1 %v12358_v39  ;;  %7132 = vmatprep.subr.bf16.mxu0 %v12223_v52  ;;  %v1138_v39 = vld [vmem:[#allocation5 + $0x1d70] sm:$0xff] }
 0x32f   :  { %7175 = vmatprep.subr.bf16.mxu1 %v12351_v56  ;;  %v12462_v56 = vcombine.low %v1014_v14, %v1018_v40  ;;  %v1130_v14 = vld [vmem:[#allocation5 + $0x1d30] sm:$0xff]  ;;  %v12454_v40 = vcombine.low %v1006_v11, %v1010_v3  ;;  %v12582_v27 = vcombine.low %v1134_v6, %v1138_v39 }
 0x331   :  { %7133 = vmatpush2.bf16.msra.mxu0 %v12222_v5 }
 0x332   :  { %7176 = vmatpush2.bf16.msra.mxu1 %v12350_v19  ;;  %7188 = vmatprep.subr.bf16.mxu0 %v12471_v61  ;;  %v12583_v19 = vcombine.high %v1134_v6, %v1138_v39  ;;  %v998_v61 = vld [vmem:[#allocation5 + $0x1910] sm:$0xff] }
 0x333   :  { %7231 = vmatprep.subr.bf16.mxu1 %v12599_v53  ;;  %v1002_v53 = vld [vmem:[#allocation5 + $0x1930] sm:$0xff] }
 0x334   :  { %v6921_v0 = vpop.f32.mrf.mxu0  ;;  %7135 = vmatmul.mubr.bf16.vlgmr.msra.gmra.mxu0 %v14334_v20  ;;  %v12446_v51 = vcombine.low %v998_v61, %v1002_v53  ;;  %v982_v6 = vld [vmem:[#allocation5 + $0x1890] sm:$0xff] }
 0x335   :  { %v6878_v52 = vpop.f32.mrf.mxu1  ;;  %7178 = vmatmul.mubr.bf16.vlgmr.msra.gmra.mxu1 %v14336_v22  ;;  %7189 = vmatpush1.bf16.msra.mxu0 %v12470_v4  ;;  %v1126_v4 = vld [vmem:[#allocation5 + $0x1d10] sm:$0xff] }
 0x336   :  { %v6879_v30 = vadd.f32 %v6878_v52, %v14472_v50  ;;  %7232 = vmatpush1.bf16.msra.mxu1 %v12598_v23  ;;  %7190 = vmatprep.subr.bf16.mxu0 %v12463_v55  ;;  %v14487_v5 = vpop.f32.mrf.mxu0  ;;  %v12447_v23 = vcombine.high %v998_v61, %v1002_v53  ;;  %v990_v52 = vld [vmem:[#allocation5 + $0x18d0] sm:$0xff]  ;;  %v12574_v11 = vcombine.low %v1126_v4, %v1130_v14 }
 0x337   :  { %v14485_v9 = vpop.f32.mrf.mxu1  ;;  %14758 = vst [vmem:[#allocation38_spill] sm:$0xff] %v14487_v5  ;;  %7233 = vmatprep.subr.bf16.mxu1 %v12591_v8  ;;  %12644 = vmatprep.mubr.msk.bf16.mxu1 %vm6238_vm0, %v14338_v32  ;;  %v12575_v8 = vcombine.high %v1126_v4, %v1130_v14  ;;  %v994_v5 = vld [vmem:[#allocation5 + $0x18f0] sm:$0xff] }
 0x338   :  { %14757 = vst [vmem:[#allocation37_spill] sm:$0xff] %v14485_v9  ;;  %v6922_v41 = vadd.f32 %v6921_v0, %v6879_v30  ;;  %7220 = vmatprep.mubr.bf16.mxu0 %v14341_v33  ;;  %v6925_v55 = vpop.f32.mrf.mxu0  ;;  %v1118_v0 = vld [vmem:[#allocation5 + $0x1cd0] sm:$0xff] }
 0x339   :  { %v6882_v50 = vpop.f32.mrf.mxu1  ;;  %7191 = vmatpush1.bf16.msra.mxu0 %v12462_v56  ;;  %v1122_v30 = vld [vmem:[#allocation5 + $0x1cf0] sm:$0xff] }
 0x33a   :  { %v6883_v26 = vadd.f32 %v6882_v50, %v14476_v17  ;;  %7234 = vmatpush1.bf16.msra.mxu1 %v12590_v12  ;;  %7192 = vmatprep.subr.bf16.mxu0 %v12455_v38  ;;  %v7620_v35 = vmax.f32 %v6922_v41, 0.0  ;;  %v12439_v17 = vcombine.high %v990_v52, %v994_v5  ;;  %v12567_v3 = vcombine.high %v1118_v0, %v1122_v30  ;;  %v986_v39 = vld [vmem:[#allocation5 + $0x18b0] sm:$0xff] }
 0x33b   :  { %7235 = vmatprep.subr.bf16.mxu1 %v12583_v19  ;;  %v1110_v12 = vld [vmem:[#allocation5 + $0x1c90] sm:$0xff]  ;;  %v12438_v19 = vcombine.low %v990_v52, %v994_v5  ;;  %v12566_v50 = vcombine.low %v1118_v0, %v1122_v30  ;;  %v12431_v61 = vcombine.high %v982_v6, %v986_v39 }
 0x33c   :  { %v6926_v9 = vadd.f32 %v6925_v55, %v6883_v26  ;;  %v1114_v38 = vld [vmem:[#allocation5 + $0x1cb0] sm:$0xff] }
 0x33d   :  { %7193 = vmatpush1.bf16.msra.mxu0 %v12454_v40  ;;  %v12559_v41 = vcombine.high %v1110_v12, %v1114_v38  ;;  %v978_v53 = vld [vmem:[#allocation5 + $0x1870] sm:$0xff]  ;;  %v12430_v40 = vcombine.low %v982_v6, %v986_v39 }
 0x33e   :  { %v7628_v46 = vmax.f32 %v6926_v9, 0.0  ;;  %7236 = vmatpush1.bf16.msra.mxu1 %v12582_v27  ;;  %7194 = vmatprep.subr.bf16.mxu0 %v12447_v23  ;;  %v974_v9 = vld [vmem:[#allocation5 + $0x1850] sm:$0xff] }
 0x33f   :  { %7237 = vmatprep.subr.bf16.mxu1 %v12575_v8  ;;  %v1102_v4 = vld [vmem:[#allocation5 + $0x1c50] sm:$0xff]  ;;  %v12422_v55 = vcombine.low %v974_v9, %v978_v53 }
 0x340   :  { %v14493_v56 = vpack.c.bf16 %v7628_v46, %v7620_v35  ;;  %v1106_v14 = vld [vmem:[#allocation5 + $0x1c70] sm:$0xff]  ;;  %v12558_v35 = vcombine.low %v1110_v12, %v1114_v38  ;;  %v12423_v46 = vcombine.high %v974_v9, %v978_v53 }
 0x341   :  { %7195 = vmatpush1.bf16.msra.mxu0 %v12446_v51  ;;  %v12551_v26 = vcombine.high %v1102_v4, %v1106_v14  ;;  %v966_v51 = vld [vmem:[#allocation5 + $0x1810] sm:$0xff]  ;;  %v12550_v8 = vcombine.low %v1102_v4, %v1106_v14 }
 0x342   :  { %14759 = vst [vmem:[#allocation39_spill] sm:$0xff] %v14493_v56  ;;  %7238 = vmatpush1.bf16.msra.mxu1 %v12574_v11  ;;  %7196 = vmatprep.subr.bf16.mxu0 %v12439_v17  ;;  %v970_v5 = vld [vmem:[#allocation5 + $0x1830] sm:$0xff] }
 0x343   :  { %7239 = vmatprep.subr.bf16.mxu1 %v12567_v3  ;;  %v1094_v27 = vld [vmem:[#allocation5 + $0x1c10] sm:$0xff]  ;;  %v12415_v52 = vcombine.high %v966_v51, %v970_v5  ;;  %v12414_v6 = vcombine.low %v966_v51, %v970_v5 }
 0x344   :  { %v1098_v23 = vld [vmem:[#allocation5 + $0x1c30] sm:$0xff] }
 0x345   :  { %7197 = vmatpush1.bf16.msra.mxu0 %v12438_v19  ;;  %v12543_v0 = vcombine.high %v1094_v27, %v1098_v23  ;;  %v1086_v30 = vld [vmem:[#allocation5 + $0x1bd0] sm:$0xff]  ;;  %v12542_v39 = vcombine.low %v1094_v27, %v1098_v23 }
 0x346   :  { %7240 = vmatpush1.bf16.msra.mxu1 %v12566_v50  ;;  %7198 = vmatprep.subr.bf16.mxu0 %v12431_v61  ;;  %v1090_v11 = vld [vmem:[#allocation5 + $0x1bf0] sm:$0xff] }
 0x347   :  { %7241 = vmatprep.subr.bf16.mxu1 %v12559_v41  ;;  %v1190_v17 = vld [vmem:[#allocation5 + $0x1f10] sm:$0xff]  ;;  %v12535_v12 = vcombine.high %v1086_v30, %v1090_v11  ;;  %v12534_v9 = vcombine.low %v1086_v30, %v1090_v11 }
 0x348   :  { %v1194_v3 = vld [vmem:[#allocation5 + $0x1f30] sm:$0xff] }
 0x349   :  { %7199 = vmatpush1.bf16.msra.mxu0 %v12430_v40  ;;  %v12639_v38 = vcombine.high %v1190_v17, %v1194_v3  ;;  %v1078_v19 = vld [vmem:[#allocation5 + $0x1b90] sm:$0xff]  ;;  %v12638_v53 = vcombine.low %v1190_v17, %v1194_v3 }
 0x34a   :  { %7242 = vmatpush1.bf16.msra.mxu1 %v12558_v35  ;;  %7200 = vmatprep.subr.bf16.mxu0 %v12423_v46  ;;  %v1082_v50 = vld [vmem:[#allocation5 + $0x1bb0] sm:$0xff] }
 0x34b   :  { %7243 = vmatprep.subr.bf16.mxu1 %v12551_v26  ;;  %v1182_v61 = vld [vmem:[#allocation5 + $0x1ed0] sm:$0xff]  ;;  %v12527_v4 = vcombine.high %v1078_v19, %v1082_v50  ;;  %v12526_v51 = vcombine.low %v1078_v19, %v1082_v50 }
 0x34c   :  { %v1186_v41 = vld [vmem:[#allocation5 + $0x1ef0] sm:$0xff] }
 0x34d   :  { %7201 = vmatpush1.bf16.msra.mxu0 %v12422_v55  ;;  %v12631_v14 = vcombine.high %v1182_v61, %v1186_v41  ;;  %v1070_v40 = vld [vmem:[#allocation5 + $0x1b50] sm:$0xff]  ;;  %v12630_v5 = vcombine.low %v1182_v61, %v1186_v41 }
 0x34e   :  { %7244 = vmatpush1.bf16.msra.mxu1 %v12550_v8  ;;  %7202 = vmatprep.subr.bf16.mxu0 %v12415_v52  ;;  %v1074_v35 = vld [vmem:[#allocation5 + $0x1b70] sm:$0xff] }
 0x34f   :  { %7245 = vmatprep.subr.bf16.mxu1 %v12543_v0  ;;  %v1174_v46 = vld [vmem:[#allocation5 + $0x1e90] sm:$0xff]  ;;  %v12519_v27 = vcombine.high %v1070_v40, %v1074_v35  ;;  %v12518_v30 = vcombine.low %v1070_v40, %v1074_v35 }
 0x350   :  { %v1178_v26 = vld [vmem:[#allocation5 + $0x1eb0] sm:$0xff] }
 0x351   :  { %7203 = vmatpush1.bf16.msra.mxu0 %v12414_v6  ;;  %v12623_v23 = vcombine.high %v1174_v46, %v1178_v26  ;;  %v1062_v55 = vld [vmem:[#allocation5 + $0x1b10] sm:$0xff]  ;;  %v12622_v11 = vcombine.low %v1174_v46, %v1178_v26 }
 0x352   :  { %7246 = vmatpush1.bf16.msra.mxu1 %v12542_v39  ;;  %7204 = vmatprep.subr.bf16.mxu0 %v12535_v12  ;;  %v1066_v8 = vld [vmem:[#allocation5 + $0x1b30] sm:$0xff] }
 0x353   :  { %7253 = vmatprep.subr.bf16.mxu1 %v12639_v38  ;;  %v1166_v52 = vld [vmem:[#allocation5 + $0x1e50] sm:$0xff]  ;;  %v12511_v17 = vcombine.high %v1062_v55, %v1066_v8  ;;  %v12510_v19 = vcombine.low %v1062_v55, %v1066_v8 }
 0x354   :  { %v1170_v0 = vld [vmem:[#allocation5 + $0x1e70] sm:$0xff] }
 0x355   :  { %7205 = vmatpush2.bf16.msra.mxu0 %v12534_v9  ;;  %v12615_v3 = vcombine.high %v1166_v52, %v1170_v0  ;;  %v1054_v6 = vld [vmem:[#allocation5 + $0x1ad0] sm:$0xff]  ;;  %v12614_v50 = vcombine.low %v1166_v52, %v1170_v0 }
 0x356   :  { %7254 = vmatpush2.bf16.msra.mxu1 %v12638_v53  ;;  %7206 = vmatprep.subr.bf16.mxu0 %v12527_v4  ;;  %v1058_v39 = vld [vmem:[#allocation5 + $0x1af0] sm:$0xff]  ;;  %v255_v4 = vld [vmem:[#allocation5 + $0x1d8] sm:$0xff] }
 0x357   :  { %7255 = vmatprep.subr.bf16.mxu1 %v12631_v14  ;;  %v1158_v12 = vld [vmem:[#allocation5 + $0x1e10] sm:$0xff]  ;;  %v12503_v61 = vcombine.high %v1054_v6, %v1058_v39  ;;  %v259_v14 = vld [vmem:[#allocation5 + $0x1f8] sm:$0xff]  ;;  %v12502_v40 = vcombine.low %v1054_v6, %v1058_v39 }
 0x358   :  { %v1162_v38 = vld [vmem:[#allocation5 + $0x1e30] sm:$0xff]  ;;  %v11705_v26 = vcombine.high %v255_v4, %v259_v14  ;;  %v11704_v8 = vcombine.low %v255_v4, %v259_v14 }
 0x359   :  { %7207 = vmatpush2.bf16.msra.mxu0 %v12526_v51  ;;  %v12607_v41 = vcombine.high %v1158_v12, %v1162_v38  ;;  %v1046_v9 = vld [vmem:[#allocation5 + $0x1a90] sm:$0xff]  ;;  %v12606_v35 = vcombine.low %v1158_v12, %v1162_v38 }
 0x35a   :  { %7256 = vmatpush2.bf16.msra.mxu1 %v12630_v5  ;;  %7208 = vmatprep.subr.bf16.mxu0 %v12519_v27  ;;  %v1050_v53 = vld [vmem:[#allocation5 + $0x1ab0] sm:$0xff]  ;;  %v247_v27 = vld [vmem:[#allocation5 + $0x198] sm:$0xff] }
 0x35b   :  { %7257 = vmatprep.subr.bf16.mxu1 %v12623_v23  ;;  %v12495_v46 = vcombine.high %v1046_v9, %v1050_v53  ;;  %v1038_v51 = vld [vmem:[#allocation5 + $0x1a50] sm:$0xff]  ;;  %v251_v23 = vld [vmem:[#allocation5 + $0x1b8] sm:$0xff]  ;;  %v12494_v55 = vcombine.low %v1046_v9, %v1050_v53  ;;  %v14742_v53 = vsub.s32 4, %v14350_v45 }
 0x35c   :  { %v1042_v5 = vld [vmem:[#allocation5 + $0x1a70] sm:$0xff]  ;;  %v11697_v0 = vcombine.high %v247_v27, %v251_v23  ;;  %v11696_v39 = vcombine.low %v247_v27, %v251_v23  ;;  %v14500_v23 = vpop.f32.mrf.mxu0 }
 0x35d   :  { %7209 = vmatpush2.bf16.msra.mxu0 %v12518_v30  ;;  %v12487_v52 = vcombine.high %v1038_v51, %v1042_v5  ;;  %v1030_v30 = vld [vmem:[#allocation5 + $0x1a10] sm:$0xff]  ;;  %v12486_v6 = vcombine.low %v1038_v51, %v1042_v5  ;;  %v227_v51 = vld [vmem:[#allocation5 + $0xf8] sm:$0xff]  ;;  %v13988_v5 = vld [vmem:[#allocation7] sm:$0xff] }
 0x35e   :  { %7258 = vmatpush2.bf16.msra.mxu1 %v12622_v11  ;;  %7210 = vmatprep.subr.bf16.mxu0 %v12511_v17  ;;  %v1034_v11 = vld [vmem:[#allocation5 + $0x1a30] sm:$0xff]  ;;  %v239_v17 = vld [vmem:[#allocation5 + $0x158] sm:$0xff] }
 0x35f   :  { %7259 = vmatprep.subr.bf16.mxu1 %v12615_v3  ;;  %v243_v3 = vld [vmem:[#allocation5 + $0x178] sm:$0xff]  ;;  %v12479_v12 = vcombine.high %v1030_v30, %v1034_v11  ;;  %v12478_v9 = vcombine.low %v1030_v30, %v1034_v11 }
 0x360   :  { %v11689_v38 = vcombine.high %v239_v17, %v243_v3  ;;  %v11688_v4 = vcombine.low %v239_v17, %v243_v3  ;;  %v367_v30 = vld [vmem:[#allocation5 + $0x558] sm:$0xff] }
 0x361   :  { %7211 = vmatpush2.bf16.msra.mxu0 %v12510_v19  ;;  %v383_v19 = vld [vmem:[#allocation5 + $0x5d8] sm:$0xff] }
 0x362   :  { %7260 = vmatpush2.bf16.msra.mxu1 %v12614_v50  ;;  %7212 = vmatprep.subr.bf16.mxu0 %v12503_v61  ;;  %v387_v50 = vld [vmem:[#allocation5 + $0x5f8] sm:$0xff] }
 0x363   :  { %7261 = vmatprep.subr.bf16.mxu1 %v12607_v41  ;;  %v231_v61 = vld [vmem:[#allocation5 + $0x118] sm:$0xff]  ;;  %v11833_v14 = vcombine.high %v383_v19, %v387_v50  ;;  %v11832_v27 = vcombine.low %v383_v19, %v387_v50 }
 0x364   :  { %v235_v41 = vld [vmem:[#allocation5 + $0x138] sm:$0xff] }
 0x365   :  { %7213 = vmatpush2.bf16.msra.mxu0 %v12502_v40  ;;  %v11681_v40 = vcombine.high %v231_v61, %v235_v41  ;;  %v371_v11 = vld [vmem:[#allocation5 + $0x578] sm:$0xff] }
 0x366   :  { %7262 = vmatpush2.bf16.msra.mxu1 %v12606_v35  ;;  %7214 = vmatprep.subr.bf16.mxu0 %v12495_v46  ;;  %v375_v35 = vld [vmem:[#allocation5 + $0x598] sm:$0xff] }
 0x367   :  { %7274 = vmatprep.subr.bf16.mxu1 %v11705_v26  ;;  %v379_v46 = vld [vmem:[#allocation5 + $0x5b8] sm:$0xff] }
 0x368   :  { %v223_v26 = vld [vmem:[#allocation5 + $0xd8] sm:$0xff] }
 0x369   :  { %7264 = vmatmul.mubr.bf16.vlgmr.msra.gmra.mxu1 %v14347_v31  ;;  %7215 = vmatpush2.bf16.msra.mxu0 %v12494_v55  ;;  %v11680_v55 = vcombine.low %v231_v61, %v235_v41  ;;  %v215_v3 = vld [vmem:[#allocation5 + $0x98] sm:$0xff]  ;;  %v11672_v50 = vcombine.low %v223_v26, %v227_v51  ;;  %v11817_v61 = vcombine.high %v367_v30, %v371_v11 }
 0x36a   :  { %7275 = vmatpush1.bf16.msra.mxu1 %v11704_v8  ;;  %7216 = vmatprep.subr.bf16.mxu0 %v12487_v52  ;;  %v11825_v8 = vcombine.high %v375_v35, %v379_v46  ;;  %v14502_v52 = vpop.f32.mrf.mxu1 }
 0x36b   :  { %7276 = vmatprep.subr.bf16.mxu1 %v11697_v0  ;;  %7306 = vmatprep.mubr.bf16.mxu1 %v14304_v58  ;;  %v1217_v58 = vrot.slane %v13988_v5, %v14742_v53  ;;  %v11673_v0 = vcombine.high %v223_v26, %v227_v51  ;;  %v203_v53 = vld [vmem:[#allocation5 + $0x38] sm:$0xff] }
 0x36d   :  { %7217 = vmatpush2.bf16.msra.mxu0 %v12486_v6  ;;  %v219_v6 = vld [vmem:[#allocation5 + $0xb8] sm:$0xff] }
 0x36e   :  { %7277 = vmatpush1.bf16.msra.mxu1 %v11696_v39  ;;  %7218 = vmatprep.subr.bf16.mxu0 %v12479_v12 }
 0x36f   :  { %7278 = vmatprep.subr.bf16.mxu1 %v11689_v38  ;;  %v11824_v38 = vcombine.low %v375_v35, %v379_v46 }
 0x371   :  { %7219 = vmatpush2.bf16.msra.mxu0 %v12478_v9 }
 0x372   :  { %7279 = vmatpush1.bf16.msra.mxu1 %v11688_v4  ;;  %7317 = vmatprep.subr.bf16.mxu0 %v11833_v14  ;;  %v11665_v4 = vcombine.high %v215_v3, %v219_v6  ;;  %v359_v14 = vld [vmem:[#allocation5 + $0x518] sm:$0xff] }
 0x373   :  { %7280 = vmatprep.subr.bf16.mxu1 %v11681_v40  ;;  %v363_v40 = vld [vmem:[#allocation5 + $0x538] sm:$0xff] }
 0x374   :  { %v6964_v17 = vpop.f32.mrf.mxu0  ;;  %7221 = vmatmul.mubr.bf16.vlgmr.msra.gmra.mxu0 %v14356_v7  ;;  %v11809_v26 = vcombine.high %v359_v14, %v363_v40  ;;  %v11808_v56 = vcombine.low %v359_v14, %v363_v40  ;;  %v339_v14 = vld [vmem:[#allocation5 + $0x478] sm:$0xff] }
 0x375   :  { %v6965_v39 = vadd.f32 %v6964_v17, %v1217_v58  ;;  %v7007_v12 = vpop.f32.mrf.mxu1  ;;  %7318 = vmatpush1.bf16.msra.mxu0 %v11832_v27  ;;  %7349 = vmatprep.mubr.bf16.mxu0 %v14306_v63  ;;  %v207_v17 = vld [vmem:[#allocation5 + $0x58] sm:$0xff]  ;;  %v11816_v63 = vcombine.low %v367_v30, %v371_v11 }
 0x376   :  { %7281 = vmatpush1.bf16.msra.mxu1 %v11680_v55  ;;  %v14506_v19 = vpop.f32.mrf.mxu0  ;;  %7319 = vmatprep.subr.bf16.mxu0 %v11825_v8  ;;  %v211_v27 = vld [vmem:[#allocation5 + $0x78] sm:$0xff]  ;;  %v11664_v55 = vcombine.low %v215_v3, %v219_v6 }
 0x377   :  { %v14508_v41 = vadd.f32 %v7007_v12, %v6965_v39  ;;  %v14510_v9 = vpop.f32.mrf.mxu1  ;;  %7282 = vmatprep.subr.bf16.mxu1 %v11673_v0  ;;  %v11657_v8 = vcombine.high %v207_v17, %v211_v27  ;;  %v351_v39 = vld [vmem:[#allocation5 + $0x4d8] sm:$0xff] }
 0x378   :  { %14760 = vst [vmem:[#allocation40_spill] sm:$0xff] %v14510_v9  ;;  %v6968_v5 = vpop.f32.mrf.mxu0  ;;  %v355_v0 = vld [vmem:[#allocation5 + $0x4f8] sm:$0xff]  ;;  %v11656_v9 = vcombine.low %v207_v17, %v211_v27 }
 0x379   :  { %v6969_v35 = vadd.f32 %v6968_v5, %v1217_v58  ;;  %7320 = vmatpush1.bf16.msra.mxu0 %v11824_v38  ;;  %v7011_v46 = vpop.f32.mrf.mxu1  ;;  %v199_v12 = vld [vmem:[#allocation5 + $0x18] sm:$0xff]  ;;  %v11801_v58 = vcombine.high %v351_v39, %v355_v0 }
 0x37a   :  { %7283 = vmatpush1.bf16.msra.mxu1 %v11672_v50  ;;  %7321 = vmatprep.subr.bf16.mxu0 %v11817_v61  ;;  %v11649_v30 = vcombine.high %v199_v12, %v203_v53  ;;  %v343_v11 = vld [vmem:[#allocation5 + $0x498] sm:$0xff]  ;;  %v11800_v50 = vcombine.low %v351_v39, %v355_v0  ;;  %v11648_v61 = vcombine.low %v199_v12, %v203_v53 }
 0x37b   :  { %v14512_v51 = vadd.f32 %v7011_v46, %v6969_v35  ;;  %7284 = vmatprep.subr.bf16.mxu1 %v11665_v4  ;;  %v347_v3 = vld [vmem:[#allocation5 + $0x4b8] sm:$0xff] }
 0x37c   :  { %v319_v6 = vld [vmem:[#allocation5 + $0x3d8] sm:$0xff]  ;;  %v11793_v4 = vcombine.high %v343_v11, %v347_v3  ;;  %v11792_v27 = vcombine.low %v343_v11, %v347_v3 }
 0x37d   :  { %7322 = vmatpush1.bf16.msra.mxu0 %v11816_v63  ;;  %v323_v38 = vld [vmem:[#allocation5 + $0x3f8] sm:$0xff] }
 0x37e   :  { %7285 = vmatpush1.bf16.msra.mxu1 %v11664_v55  ;;  %7323 = vmatprep.subr.bf16.mxu0 %v11809_v26  ;;  %v11769_v5 = vcombine.high %v319_v6, %v323_v38  ;;  %v335_v35 = vld [vmem:[#allocation5 + $0x458] sm:$0xff]  ;;  %v11768_v63 = vcombine.low %v319_v6, %v323_v38 }
 0x37f   :  { %7286 = vmatprep.subr.bf16.mxu1 %v11657_v8  ;;  %v311_v40 = vld [vmem:[#allocation5 + $0x398] sm:$0xff]  ;;  %v11785_v46 = vcombine.high %v335_v35, %v339_v14  ;;  %v11784_v8 = vcombine.low %v335_v35, %v339_v14 }
 0x380   :  { %v315_v17 = vld [vmem:[#allocation5 + $0x3b8] sm:$0xff] }
 0x381   :  { %7324 = vmatpush1.bf16.msra.mxu0 %v11808_v56  ;;  %v11761_v55 = vcombine.high %v311_v40, %v315_v17  ;;  %v327_v56 = vld [vmem:[#allocation5 + $0x418] sm:$0xff]  ;;  %v11760_v39 = vcombine.low %v311_v40, %v315_v17 }
 0x382   :  { %7287 = vmatpush1.bf16.msra.mxu1 %v11656_v9  ;;  %7325 = vmatprep.subr.bf16.mxu0 %v11801_v58  ;;  %v331_v26 = vld [vmem:[#allocation5 + $0x438] sm:$0xff] }
 0x383   :  { %7288 = vmatprep.subr.bf16.mxu1 %v11649_v30  ;;  %v303_v9 = vld [vmem:[#allocation5 + $0x358] sm:$0xff]  ;;  %v11777_v0 = vcombine.high %v327_v56, %v331_v26  ;;  %v11776_v6 = vcombine.low %v327_v56, %v331_v26 }
 0x384   :  { %v307_v53 = vld [vmem:[#allocation5 + $0x378] sm:$0xff] }
 0x385   :  { %7326 = vmatpush1.bf16.msra.mxu0 %v11800_v50  ;;  %v11753_v12 = vcombine.high %v303_v9, %v307_v53  ;;  %v447_v58 = vld [vmem:[#allocation5 + $0x7d8] sm:$0xff]  ;;  %v11752_v38 = vcombine.low %v303_v9, %v307_v53 }
 0x386   :  { %7289 = vmatpush1.bf16.msra.mxu1 %v11648_v61  ;;  %7327 = vmatprep.subr.bf16.mxu0 %v11793_v4  ;;  %v451_v30 = vld [vmem:[#allocation5 + $0x7f8] sm:$0xff] }
 0x387   :  { %7290 = vmatprep.subr.bf16.mxu1 %v11769_v5  ;;  %v295_v11 = vld [vmem:[#allocation5 + $0x318] sm:$0xff]  ;;  %v11897_v50 = vcombine.high %v447_v58, %v451_v30  ;;  %v11896_v40 = vcombine.low %v447_v58, %v451_v30 }
 0x388   :  { %v299_v3 = vld [vmem:[#allocation5 + $0x338] sm:$0xff] }
 0x389   :  { %7328 = vmatpush1.bf16.msra.mxu0 %v11792_v27  ;;  %v11745_v61 = vcombine.high %v295_v11, %v299_v3  ;;  %v439_v4 = vld [vmem:[#allocation5 + $0x798] sm:$0xff]  ;;  %v11744_v17 = vcombine.low %v295_v11, %v299_v3 }
 0x38a   :  { %7291 = vmatpush2.bf16.msra.mxu1 %v11768_v63  ;;  %7329 = vmatprep.subr.bf16.mxu0 %v11785_v46  ;;  %v443_v5 = vld [vmem:[#allocation5 + $0x7b8] sm:$0xff] }
 0x38b   :  { %7292 = vmatprep.subr.bf16.mxu1 %v11761_v55  ;;  %v287_v35 = vld [vmem:[#allocation5 + $0x2d8] sm:$0xff]  ;;  %v11889_v27 = vcombine.high %v439_v4, %v443_v5  ;;  %v11888_v9 = vcombine.low %v439_v4, %v443_v5 }
 0x38c   :  { %v291_v14 = vld [vmem:[#allocation5 + $0x2f8] sm:$0xff] }
 0x38d   :  { %7330 = vmatpush1.bf16.msra.mxu0 %v11784_v8  ;;  %v11737_v63 = vcombine.high %v287_v35, %v291_v14  ;;  %v431_v46 = vld [vmem:[#allocation5 + $0x758] sm:$0xff]  ;;  %v11736_v53 = vcombine.low %v287_v35, %v291_v14 }
 0x38e   :  { %7293 = vmatpush2.bf16.msra.mxu1 %v11760_v39  ;;  %7331 = vmatprep.subr.bf16.mxu0 %v11777_v0  ;;  %v435_v55 = vld [vmem:[#allocation5 + $0x778] sm:$0xff] }
 0x38f   :  { %7294 = vmatprep.subr.bf16.mxu1 %v11753_v12  ;;  %v279_v56 = vld [vmem:[#allocation5 + $0x298] sm:$0xff]  ;;  %v11881_v8 = vcombine.high %v431_v46, %v435_v55  ;;  %v11880_v11 = vcombine.low %v431_v46, %v435_v55 }
 0x390   :  { %v283_v26 = vld [vmem:[#allocation5 + $0x2b8] sm:$0xff] }
 0x391   :  { %7332 = vmatpush1.bf16.msra.mxu0 %v11776_v6  ;;  %v11729_v39 = vcombine.high %v279_v56, %v283_v26  ;;  %v423_v0 = vld [vmem:[#allocation5 + $0x718] sm:$0xff]  ;;  %v11728_v3 = vcombine.low %v279_v56, %v283_v26 }
 0x392   :  { %7295 = vmatpush2.bf16.msra.mxu1 %v11752_v38  ;;  %7333 = vmatprep.subr.bf16.mxu0 %v11897_v50  ;;  %v427_v12 = vld [vmem:[#allocation5 + $0x738] sm:$0xff] }
 0x393   :  { %7296 = vmatprep.subr.bf16.mxu1 %v11745_v61  ;;  %v271_v58 = vld [vmem:[#allocation5 + $0x258] sm:$0xff]  ;;  %v11873_v6 = vcombine.high %v423_v0, %v427_v12  ;;  %v11872_v35 = vcombine.low %v423_v0, %v427_v12 }
 0x394   :  { %v275_v30 = vld [vmem:[#allocation5 + $0x278] sm:$0xff] }
 0x395   :  { %7334 = vmatpush2.bf16.msra.mxu0 %v11896_v40  ;;  %v11721_v38 = vcombine.high %v271_v58, %v275_v30  ;;  %v415_v50 = vld [vmem:[#allocation5 + $0x6d8] sm:$0xff]  ;;  %v11720_v14 = vcombine.low %v271_v58, %v275_v30 }
 0x396   :  { %7297 = vmatpush2.bf16.msra.mxu1 %v11744_v17  ;;  %7335 = vmatprep.subr.bf16.mxu0 %v11889_v27  ;;  %v419_v61 = vld [vmem:[#allocation5 + $0x6f8] sm:$0xff] }
 0x397   :  { %7298 = vmatprep.subr.bf16.mxu1 %v11737_v63  ;;  %v263_v4 = vld [vmem:[#allocation5 + $0x218] sm:$0xff]  ;;  %v11865_v40 = vcombine.high %v415_v50, %v419_v61  ;;  %v11864_v56 = vcombine.low %v415_v50, %v419_v61 }
 0x398   :  { %v267_v5 = vld [vmem:[#allocation5 + $0x238] sm:$0xff] }
 0x399   :  { %7336 = vmatpush2.bf16.msra.mxu0 %v11888_v9  ;;  %v11713_v17 = vcombine.high %v263_v4, %v267_v5  ;;  %v407_v27 = vld [vmem:[#allocation5 + $0x698] sm:$0xff]  ;;  %v11712_v26 = vcombine.low %v263_v4, %v267_v5 }
 0x39a   :  { %7299 = vmatpush2.bf16.msra.mxu1 %v11736_v53  ;;  %7337 = vmatprep.subr.bf16.mxu0 %v11881_v8  ;;  %v411_v63 = vld [vmem:[#allocation5 + $0x6b8] sm:$0xff] }
 0x39b   :  { %7300 = vmatprep.subr.bf16.mxu1 %v11729_v39  ;;  %v511_v46 = vld [vmem:[#allocation5 + $0x9d8] sm:$0xff]  ;;  %v11857_v9 = vcombine.high %v407_v27, %v411_v63  ;;  %v11856_v58 = vcombine.low %v407_v27, %v411_v63 }
 0x39c   :  { %v515_v55 = vld [vmem:[#allocation5 + $0x9f8] sm:$0xff] }
 0x39d   :  { %7338 = vmatpush2.bf16.msra.mxu0 %v11880_v11  ;;  %v11961_v53 = vcombine.high %v511_v46, %v515_v55  ;;  %v399_v8 = vld [vmem:[#allocation5 + $0x658] sm:$0xff]  ;;  %v11960_v30 = vcombine.low %v511_v46, %v515_v55 }
 0x39e   :  { %7301 = vmatpush2.bf16.msra.mxu1 %v11728_v3  ;;  %7339 = vmatprep.subr.bf16.mxu0 %v11873_v6  ;;  %v403_v39 = vld [vmem:[#allocation5 + $0x678] sm:$0xff] }
 0x39f   :  { %7302 = vmatprep.subr.bf16.mxu1 %v11721_v38  ;;  %v503_v0 = vld [vmem:[#allocation5 + $0x998] sm:$0xff]  ;;  %v11849_v11 = vcombine.high %v399_v8, %v403_v39  ;;  %v11848_v4 = vcombine.low %v399_v8, %v403_v39 }
 0x3a0   :  { %v507_v12 = vld [vmem:[#allocation5 + $0x9b8] sm:$0xff] }
 0x3a1   :  { %7340 = vmatpush2.bf16.msra.mxu0 %v11872_v35  ;;  %v11953_v3 = vcombine.high %v503_v0, %v507_v12  ;;  %v391_v6 = vld [vmem:[#allocation5 + $0x618] sm:$0xff]  ;;  %v11952_v5 = vcombine.low %v503_v0, %v507_v12  ;;  %v14516_v0 = vpop.f32.mrf.mxu0 }
 0x3a2   :  { %7303 = vmatpush2.bf16.msra.mxu1 %v11720_v14  ;;  %7341 = vmatprep.subr.bf16.mxu0 %v11865_v40  ;;  %v395_v38 = vld [vmem:[#allocation5 + $0x638] sm:$0xff] }
 0x3a3   :  { %7304 = vmatprep.subr.bf16.mxu1 %v11713_v17  ;;  %v495_v50 = vld [vmem:[#allocation5 + $0x958] sm:$0xff]  ;;  %v11841_v35 = vcombine.high %v391_v6, %v395_v38  ;;  %v11840_v46 = vcombine.low %v391_v6, %v395_v38 }
 0x3a4   :  { %v499_v61 = vld [vmem:[#allocation5 + $0x978] sm:$0xff] }
 0x3a5   :  { %7342 = vmatpush2.bf16.msra.mxu0 %v11864_v56  ;;  %v11945_v14 = vcombine.high %v495_v50, %v499_v61  ;;  %v639_v40 = vld [vmem:[#allocation5 + $0xdd8] sm:$0xff]  ;;  %v11944_v55 = vcombine.low %v495_v50, %v499_v61 }
 0x3a6   :  { %7305 = vmatpush2.bf16.msra.mxu1 %v11712_v26  ;;  %7343 = vmatprep.subr.bf16.mxu0 %v11857_v9  ;;  %v643_v17 = vld [vmem:[#allocation5 + $0xdf8] sm:$0xff] }
 0x3a7   :  { %7360 = vmatprep.subr.bf16.mxu1 %v11961_v53  ;;  %v487_v27 = vld [vmem:[#allocation5 + $0x918] sm:$0xff]  ;;  %v12088_v39 = vcombine.low %v639_v40, %v643_v17 }
 0x3a8   :  { %v491_v63 = vld [vmem:[#allocation5 + $0x938] sm:$0xff] }
 0x3a9   :  { %7307 = vmatmul.mubr.bf16.vlgmr.msra.gmra.mxu1 %v14310_v21  ;;  %7344 = vmatpush2.bf16.msra.mxu0 %v11856_v58  ;;  %v12089_v21 = vcombine.high %v639_v40, %v643_v17  ;;  %v11937_v56 = vcombine.high %v487_v27, %v491_v63  ;;  %v631_v26 = vld [vmem:[#allocation5 + $0xd98] sm:$0xff]  ;;  %v14518_v58 = vpop.f32.mrf.mxu1 }
 0x3aa   :  { %7361 = vmatpush1.bf16.msra.mxu1 %v11960_v30  ;;  %7345 = vmatprep.subr.bf16.mxu0 %v11849_v11  ;;  %v635_v9 = vld [vmem:[#allocation5 + $0xdb8] sm:$0xff] }
 0x3ab   :  { %7362 = vmatprep.subr.bf16.mxu1 %v11953_v3  ;;  %7392 = vmatprep.mubr.bf16.mxu1 %v14314_v34  ;;  %v479_v53 = vld [vmem:[#allocation5 + $0x8d8] sm:$0xff]  ;;  %v11936_v34 = vcombine.low %v487_v27, %v491_v63  ;;  %v12081_v12 = vcombine.high %v631_v26, %v635_v9 }
 0x3ac   :  { %v483_v8 = vld [vmem:[#allocation5 + $0x8f8] sm:$0xff] }
 0x3ad   :  { %7346 = vmatpush2.bf16.msra.mxu0 %v11848_v4  ;;  %v11929_v30 = vcombine.high %v479_v53, %v483_v8  ;;  %v623_v11 = vld [vmem:[#allocation5 + $0xd58] sm:$0xff] }
 0x3ae   :  { %7363 = vmatpush1.bf16.msra.mxu1 %v11952_v5  ;;  %7347 = vmatprep.subr.bf16.mxu0 %v11841_v35  ;;  %v627_v3 = vld [vmem:[#allocation5 + $0xd78] sm:$0xff]  ;;  %v12080_v5 = vcombine.low %v631_v26, %v635_v9 }
 0x3af   :  { %7364 = vmatprep.subr.bf16.mxu1 %v11945_v14  ;;  %v471_v38 = vld [vmem:[#allocation5 + $0x898] sm:$0xff]  ;;  %v11928_v14 = vcombine.low %v479_v53, %v483_v8  ;;  %v12073_v40 = vcombine.high %v623_v11, %v627_v3 }
 0x3b0   :  { %v475_v50 = vld [vmem:[#allocation5 + $0x8b8] sm:$0xff] }
 0x3b1   :  { %7348 = vmatpush2.bf16.msra.mxu0 %v11840_v46  ;;  %v615_v63 = vld [vmem:[#allocation5 + $0xd18] sm:$0xff]  ;;  %v11920_v9 = vcombine.low %v471_v38, %v475_v50 }
 0x3b2   :  { %7365 = vmatpush1.bf16.msra.mxu1 %v11944_v55  ;;  %7403 = vmatprep.subr.bf16.mxu0 %v12089_v21  ;;  %v619_v46 = vld [vmem:[#allocation5 + $0xd38] sm:$0xff] }
 0x3b3   :  { %7366 = vmatprep.subr.bf16.mxu1 %v11937_v56  ;;  %v463_v55 = vld [vmem:[#allocation5 + $0x858] sm:$0xff]  ;;  %v12065_v53 = vcombine.high %v615_v63, %v619_v46 }
 0x3b4   :  { %v7050_v6 = vpop.f32.mrf.mxu0  ;;  %7350 = vmatmul.mubr.bf16.vlgmr.msra.gmra.mxu0 %v14312_v25  ;;  %v11921_v25 = vcombine.high %v471_v38, %v475_v50  ;;  %v467_v21 = vld [vmem:[#allocation5 + $0x878] sm:$0xff] }
 0x3b5   :  { %v7051_v61 = vadd.f32 %v7050_v6, %v14508_v41  ;;  %v7093_v4 = vpop.f32.mrf.mxu1  ;;  %7404 = vmatpush1.bf16.msra.mxu0 %v12088_v39  ;;  %7435 = vmatprep.mubr.bf16.mxu0 %v14317_v37  ;;  %v12072_v37 = vcombine.low %v623_v11, %v627_v3  ;;  %v11913_v39 = vcombine.high %v463_v55, %v467_v21  ;;  %v459_v6 = vld [vmem:[#allocation5 + $0x838] sm:$0xff] }
 0x3b6   :  { %7367 = vmatpush1.bf16.msra.mxu1 %v11936_v34  ;;  %v14523_v35 = vpop.f32.mrf.mxu0  ;;  %7405 = vmatprep.subr.bf16.mxu0 %v12081_v12  ;;  %v607_v34 = vld [vmem:[#allocation5 + $0xcd8] sm:$0xff] }
 0x3b7   :  { %v14525_v17 = vadd.f32 %v7093_v4, %v7051_v61  ;;  %v14527_v27 = vpop.f32.mrf.mxu1  ;;  %7368 = vmatprep.subr.bf16.mxu1 %v11929_v30  ;;  %v611_v12 = vld [vmem:[#allocation5 + $0xcf8] sm:$0xff]  ;;  %v12064_v61 = vcombine.low %v615_v63, %v619_v46  ;;  %v11912_v4 = vcombine.low %v463_v55, %v467_v21 }
 0x3b8   :  { %v7054_v41 = vpop.f32.mrf.mxu0  ;;  %v455_v30 = vld [vmem:[#allocation5 + $0x818] sm:$0xff] }
 0x3b9   :  { %v7055_v56 = vadd.f32 %v7054_v41, %v14512_v51  ;;  %7406 = vmatpush1.bf16.msra.mxu0 %v12080_v5  ;;  %v7097_v26 = vpop.f32.mrf.mxu1  ;;  %v12057_v51 = vcombine.high %v607_v34, %v611_v12  ;;  %v11905_v11 = vcombine.high %v455_v30, %v459_v6  ;;  %v599_v3 = vld [vmem:[#allocation5 + $0xc98] sm:$0xff] }
 0x3ba   :  { %7369 = vmatpush1.bf16.msra.mxu1 %v11928_v14  ;;  %7407 = vmatprep.subr.bf16.mxu0 %v12073_v40  ;;  %v603_v38 = vld [vmem:[#allocation5 + $0xcb8] sm:$0xff]  ;;  %v12056_v14 = vcombine.low %v607_v34, %v611_v12  ;;  %v11904_v40 = vcombine.low %v455_v30, %v459_v6 }
 0x3bb   :  { %v14530_v8 = vadd.f32 %v7097_v26, %v7055_v56  ;;  %7370 = vmatprep.subr.bf16.mxu1 %v11921_v25  ;;  %v575_v50 = vld [vmem:[#allocation5 + $0xbd8] sm:$0xff]  ;;  %v12049_v25 = vcombine.high %v599_v3, %v603_v38  ;;  %v12048_v21 = vcombine.low %v599_v3, %v603_v38 }
 0x3bc   :  { %v579_v5 = vld [vmem:[#allocation5 + $0xbf8] sm:$0xff] }
 0x3bd   :  { %7408 = vmatpush1.bf16.msra.mxu0 %v12072_v37  ;;  %v12025_v41 = vcombine.high %v575_v50, %v579_v5  ;;  %v591_v56 = vld [vmem:[#allocation5 + $0xc58] sm:$0xff]  ;;  %v12024_v37 = vcombine.low %v575_v50, %v579_v5 }
 0x3be   :  { %7371 = vmatpush1.bf16.msra.mxu1 %v11920_v9  ;;  %7409 = vmatprep.subr.bf16.mxu0 %v12065_v53  ;;  %v595_v63 = vld [vmem:[#allocation5 + $0xc78] sm:$0xff] }
 0x3bf   :  { %7372 = vmatprep.subr.bf16.mxu1 %v11913_v39  ;;  %v567_v46 = vld [vmem:[#allocation5 + $0xb98] sm:$0xff]  ;;  %v12041_v26 = vcombine.high %v591_v56, %v595_v63  ;;  %v12040_v30 = vcombine.low %v591_v56, %v595_v63 }
 0x3c0   :  { %v571_v55 = vld [vmem:[#allocation5 + $0xbb8] sm:$0xff] }
 0x3c1   :  { %7410 = vmatpush1.bf16.msra.mxu0 %v12064_v61  ;;  %v12017_v9 = vcombine.high %v567_v46, %v571_v55  ;;  %v583_v53 = vld [vmem:[#allocation5 + $0xc18] sm:$0xff]  ;;  %v12016_v6 = vcombine.low %v567_v46, %v571_v55 }
 0x3c2   :  { %7373 = vmatpush1.bf16.msra.mxu1 %v11912_v4  ;;  %7411 = vmatprep.subr.bf16.mxu0 %v12057_v51  ;;  %v587_v39 = vld [vmem:[#allocation5 + $0xc38] sm:$0xff] }
 0x3c3   :  { %7374 = vmatprep.subr.bf16.mxu1 %v11905_v11  ;;  %v559_v34 = vld [vmem:[#allocation5 + $0xb58] sm:$0xff]  ;;  %v12033_v61 = vcombine.high %v583_v53, %v587_v39  ;;  %v12032_v50 = vcombine.low %v583_v53, %v587_v39 }
 0x3c4   :  { %v563_v12 = vld [vmem:[#allocation5 + $0xb78] sm:$0xff] }
 0x3c5   :  { %7412 = vmatpush1.bf16.msra.mxu0 %v12056_v14  ;;  %v12009_v4 = vcombine.high %v559_v34, %v563_v12  ;;  %v703_v51 = vld [vmem:[#allocation5 + $0xfd8] sm:$0xff]  ;;  %v12008_v5 = vcombine.low %v559_v34, %v563_v12 }
 0x3c6   :  { %7375 = vmatpush1.bf16.msra.mxu1 %v11904_v40  ;;  %7413 = vmatprep.subr.bf16.mxu0 %v12049_v25  ;;  %v707_v11 = vld [vmem:[#allocation5 + $0xff8] sm:$0xff] }
 0x3c7   :  { %7376 = vmatprep.subr.bf16.mxu1 %v12025_v41  ;;  %v551_v3 = vld [vmem:[#allocation5 + $0xb18] sm:$0xff]  ;;  %v12153_v14 = vcombine.high %v703_v51, %v707_v11  ;;  %v12152_v46 = vcombine.low %v703_v51, %v707_v11 }
 0x3c8   :  { %v555_v38 = vld [vmem:[#allocation5 + $0xb38] sm:$0xff] }
 0x3c9   :  { %7414 = vmatpush1.bf16.msra.mxu0 %v12048_v21  ;;  %v12001_v40 = vcombine.high %v551_v3, %v555_v38  ;;  %v695_v25 = vld [vmem:[#allocation5 + $0xf98] sm:$0xff]  ;;  %v12000_v55 = vcombine.low %v551_v3, %v555_v38 }
 0x3ca   :  { %7377 = vmatpush2.bf16.msra.mxu1 %v12024_v37  ;;  %7415 = vmatprep.subr.bf16.mxu0 %v12041_v26  ;;  %v699_v41 = vld [vmem:[#allocation5 + $0xfb8] sm:$0xff] }
 0x3cb   :  { %7378 = vmatprep.subr.bf16.mxu1 %v12017_v9  ;;  %v543_v56 = vld [vmem:[#allocation5 + $0xad8] sm:$0xff]  ;;  %v12145_v21 = vcombine.high %v695_v25, %v699_v41  ;;  %v12144_v34 = vcombine.low %v695_v25, %v699_v41 }
 0x3cc   :  { %v547_v63 = vld [vmem:[#allocation5 + $0xaf8] sm:$0xff] }
 0x3cd   :  { %7416 = vmatpush1.bf16.msra.mxu0 %v12040_v30  ;;  %v11993_v37 = vcombine.high %v543_v56, %v547_v63  ;;  %v687_v26 = vld [vmem:[#allocation5 + $0xf58] sm:$0xff]  ;;  %v11992_v12 = vcombine.low %v543_v56, %v547_v63 }
 0x3ce   :  { %7379 = vmatpush2.bf16.msra.mxu1 %v12016_v6  ;;  %7417 = vmatprep.subr.bf16.mxu0 %v12033_v61  ;;  %v691_v9 = vld [vmem:[#allocation5 + $0xf78] sm:$0xff] }
 0x3cf   :  { %7380 = vmatprep.subr.bf16.mxu1 %v12009_v4  ;;  %v535_v53 = vld [vmem:[#allocation5 + $0xa98] sm:$0xff]  ;;  %v12137_v30 = vcombine.high %v687_v26, %v691_v9  ;;  %v12136_v3 = vcombine.low %v687_v26, %v691_v9 }
 0x3d0   :  { %v539_v39 = vld [vmem:[#allocation5 + $0xab8] sm:$0xff] }
 0x3d1   :  { %7418 = vmatpush1.bf16.msra.mxu0 %v12032_v50  ;;  %v11985_v6 = vcombine.high %v535_v53, %v539_v39  ;;  %v679_v61 = vld [vmem:[#allocation5 + $0xf18] sm:$0xff]  ;;  %v11984_v38 = vcombine.low %v535_v53, %v539_v39 }
 0x3d2   :  { %7381 = vmatpush2.bf16.msra.mxu1 %v12008_v5  ;;  %7419 = vmatprep.subr.bf16.mxu0 %v12153_v14  ;;  %v683_v4 = vld [vmem:[#allocation5 + $0xf38] sm:$0xff] }
 0x3d3   :  { %7382 = vmatprep.subr.bf16.mxu1 %v12001_v40  ;;  %v527_v51 = vld [vmem:[#allocation5 + $0xa58] sm:$0xff]  ;;  %v12129_v50 = vcombine.high %v679_v61, %v683_v4  ;;  %v12128_v56 = vcombine.low %v679_v61, %v683_v4 }
 0x3d4   :  { %v531_v11 = vld [vmem:[#allocation5 + $0xa78] sm:$0xff] }
 0x3d5   :  { %7420 = vmatpush2.bf16.msra.mxu0 %v12152_v46  ;;  %v11977_v5 = vcombine.high %v527_v51, %v531_v11  ;;  %v671_v14 = vld [vmem:[#allocation5 + $0xed8] sm:$0xff]  ;;  %v11976_v63 = vcombine.low %v527_v51, %v531_v11 }
 0x3d6   :  { %7383 = vmatpush2.bf16.msra.mxu1 %v12000_v55  ;;  %7421 = vmatprep.subr.bf16.mxu0 %v12145_v21  ;;  %v675_v40 = vld [vmem:[#allocation5 + $0xef8] sm:$0xff] }
 0x3d7   :  { %7384 = vmatprep.subr.bf16.mxu1 %v11993_v37  ;;  %v519_v25 = vld [vmem:[#allocation5 + $0xa18] sm:$0xff]  ;;  %v12121_v46 = vcombine.high %v671_v14, %v675_v40  ;;  %v12120_v53 = vcombine.low %v671_v14, %v675_v40 }
 0x3d8   :  { %v523_v41 = vld [vmem:[#allocation5 + $0xa38] sm:$0xff] }
 0x3d9   :  { %7422 = vmatpush2.bf16.msra.mxu0 %v12144_v34  ;;  %v11969_v55 = vcombine.high %v519_v25, %v523_v41  ;;  %v663_v21 = vld [vmem:[#allocation5 + $0xe98] sm:$0xff]  ;;  %v11968_v39 = vcombine.low %v519_v25, %v523_v41 }
 0x3da   :  { %7385 = vmatpush2.bf16.msra.mxu1 %v11992_v12  ;;  %7423 = vmatprep.subr.bf16.mxu0 %v12137_v30  ;;  %v667_v37 = vld [vmem:[#allocation5 + $0xeb8] sm:$0xff] }
 0x3db   :  { %7386 = vmatprep.subr.bf16.mxu1 %v11985_v6  ;;  %v767_v26 = vld [vmem:[#allocation5 + $0x11d8] sm:$0xff]  ;;  %v12113_v34 = vcombine.high %v663_v21, %v667_v37  ;;  %v12112_v51 = vcombine.low %v663_v21, %v667_v37 }
 0x3dc   :  { %v771_v9 = vld [vmem:[#allocation5 + $0x11f8] sm:$0xff] }
 0x3dd   :  { %7424 = vmatpush2.bf16.msra.mxu0 %v12136_v3  ;;  %v12217_v12 = vcombine.high %v767_v26, %v771_v9  ;;  %v655_v30 = vld [vmem:[#allocation5 + $0xe58] sm:$0xff]  ;;  %v12216_v11 = vcombine.low %v767_v26, %v771_v9 }
 0x3de   :  { %7387 = vmatpush2.bf16.msra.mxu1 %v11984_v38  ;;  %7425 = vmatprep.subr.bf16.mxu0 %v12129_v50  ;;  %v659_v6 = vld [vmem:[#allocation5 + $0xe78] sm:$0xff] }
 0x3df   :  { %7388 = vmatprep.subr.bf16.mxu1 %v11977_v5  ;;  %v759_v61 = vld [vmem:[#allocation5 + $0x1198] sm:$0xff]  ;;  %v12105_v3 = vcombine.high %v655_v30, %v659_v6  ;;  %v12104_v25 = vcombine.low %v655_v30, %v659_v6 }
 0x3e0   :  { %v763_v4 = vld [vmem:[#allocation5 + $0x11b8] sm:$0xff] }
 0x3e1   :  { %7426 = vmatpush2.bf16.msra.mxu0 %v12128_v56  ;;  %v12209_v38 = vcombine.high %v759_v61, %v763_v4  ;;  %v647_v50 = vld [vmem:[#allocation5 + $0xe18] sm:$0xff]  ;;  %v12208_v41 = vcombine.low %v759_v61, %v763_v4  ;;  %v14534_v61 = vpop.f32.mrf.mxu0 }
 0x3e2   :  { %7389 = vmatpush2.bf16.msra.mxu1 %v11976_v63  ;;  %7427 = vmatprep.subr.bf16.mxu0 %v12121_v46  ;;  %v651_v5 = vld [vmem:[#allocation5 + $0xe38] sm:$0xff] }
 0x3e3   :  { %7390 = vmatprep.subr.bf16.mxu1 %v11969_v55  ;;  %v751_v14 = vld [vmem:[#allocation5 + $0x1158] sm:$0xff]  ;;  %v12097_v56 = vcombine.high %v647_v50, %v651_v5  ;;  %v12096_v26 = vcombine.low %v647_v50, %v651_v5 }
 0x3e4   :  { %v755_v40 = vld [vmem:[#allocation5 + $0x1178] sm:$0xff] }
 0x3e5   :  { %7428 = vmatpush2.bf16.msra.mxu0 %v12120_v53  ;;  %v12201_v63 = vcombine.high %v751_v14, %v755_v40  ;;  %v895_v46 = vld [vmem:[#allocation5 + $0x15d8] sm:$0xff]  ;;  %v12200_v9 = vcombine.low %v751_v14, %v755_v40 }
 0x3e6   :  { %7391 = vmatpush2.bf16.msra.mxu1 %v11968_v39  ;;  %7429 = vmatprep.subr.bf16.mxu0 %v12113_v34  ;;  %v899_v55 = vld [vmem:[#allocation5 + $0x15f8] sm:$0xff] }
 0x3e7   :  { %7446 = vmatprep.subr.bf16.mxu1 %v12217_v12  ;;  %v743_v21 = vld [vmem:[#allocation5 + $0x1118] sm:$0xff]  ;;  %v12344_v6 = vcombine.low %v895_v46, %v899_v55 }
 0x3e8   :  { %v747_v37 = vld [vmem:[#allocation5 + $0x1138] sm:$0xff] }
 0x3e9   :  { %7393 = vmatmul.mubr.bf16.vlgmr.msra.gmra.mxu1 %v14322_v48  ;;  %7430 = vmatpush2.bf16.msra.mxu0 %v12112_v51  ;;  %v12345_v48 = vcombine.high %v895_v46, %v899_v55  ;;  %v12193_v53 = vcombine.high %v743_v21, %v747_v37  ;;  %v887_v39 = vld [vmem:[#allocation5 + $0x1598] sm:$0xff]  ;;  %v14536_v51 = vpop.f32.mrf.mxu1 }
 0x3ea   :  { %7447 = vmatpush1.bf16.msra.mxu1 %v12216_v11  ;;  %7431 = vmatprep.subr.bf16.mxu0 %v12105_v3  ;;  %v891_v34 = vld [vmem:[#allocation5 + $0x15b8] sm:$0xff] }
 0x3eb   :  { %7448 = vmatprep.subr.bf16.mxu1 %v12209_v38  ;;  %7478 = vmatprep.mubr.bf16.mxu1 %v14326_v60  ;;  %v735_v12 = vld [vmem:[#allocation5 + $0x10d8] sm:$0xff]  ;;  %v12192_v60 = vcombine.low %v743_v21, %v747_v37  ;;  %v12337_v4 = vcombine.high %v887_v39, %v891_v34 }
 0x3ec   :  { %v739_v30 = vld [vmem:[#allocation5 + $0x10f8] sm:$0xff] }
 0x3ed   :  { %7432 = vmatpush2.bf16.msra.mxu0 %v12104_v25  ;;  %v12185_v11 = vcombine.high %v735_v12, %v739_v30  ;;  %v879_v3 = vld [vmem:[#allocation5 + $0x1558] sm:$0xff] }
 0x3ee   :  { %7449 = vmatpush1.bf16.msra.mxu1 %v12208_v41  ;;  %7433 = vmatprep.subr.bf16.mxu0 %v12097_v56  ;;  %v883_v38 = vld [vmem:[#allocation5 + $0x1578] sm:$0xff]  ;;  %v12336_v41 = vcombine.low %v887_v39, %v891_v34 }
 0x3ef   :  { %7450 = vmatprep.subr.bf16.mxu1 %v12201_v63  ;;  %v727_v5 = vld [vmem:[#allocation5 + $0x1098] sm:$0xff]  ;;  %v12184_v63 = vcombine.low %v735_v12, %v739_v30  ;;  %v12329_v46 = vcombine.high %v879_v3, %v883_v38 }
 0x3f0   :  { %v731_v14 = vld [vmem:[#allocation5 + $0x10b8] sm:$0xff] }
 0x3f1   :  { %7434 = vmatpush2.bf16.msra.mxu0 %v12096_v26  ;;  %v871_v37 = vld [vmem:[#allocation5 + $0x1518] sm:$0xff]  ;;  %v12176_v34 = vcombine.low %v727_v5, %v731_v14 }
 0x3f2   :  { %7451 = vmatpush1.bf16.msra.mxu1 %v12200_v9  ;;  %7489 = vmatprep.subr.bf16.mxu0 %v12345_v48  ;;  %v875_v26 = vld [vmem:[#allocation5 + $0x1538] sm:$0xff] }
 0x3f3   :  { %7452 = vmatprep.subr.bf16.mxu1 %v12193_v53  ;;  %v719_v9 = vld [vmem:[#allocation5 + $0x1058] sm:$0xff]  ;;  %v12321_v12 = vcombine.high %v871_v37, %v875_v26 }
 0x3f4   :  { %v7136_v50 = vpop.f32.mrf.mxu0  ;;  %7436 = vmatmul.mubr.bf16.vlgmr.msra.gmra.mxu0 %v14324_v49  ;;  %v12177_v49 = vcombine.high %v727_v5, %v731_v14  ;;  %v723_v48 = vld [vmem:[#allocation5 + $0x1078] sm:$0xff] }
 0x3f5   :  { %v7137_v40 = vadd.f32 %v7136_v50, %v14525_v17  ;;  %v7179_v25 = vpop.f32.mrf.mxu1  ;;  %7490 = vmatpush1.bf16.msra.mxu0 %v12344_v6  ;;  %7521 = vmatprep.mubr.bf16.mxu0 %v14329_v62  ;;  %v12328_v62 = vcombine.low %v879_v3, %v883_v38  ;;  %v12169_v6 = vcombine.high %v719_v9, %v723_v48  ;;  %v715_v50 = vld [vmem:[#allocation5 + $0x1038] sm:$0xff] }
 0x3f6   :  { %7453 = vmatpush1.bf16.msra.mxu1 %v12192_v60  ;;  %v14541_v56 = vpop.f32.mrf.mxu0  ;;  %7491 = vmatprep.subr.bf16.mxu0 %v12337_v4  ;;  %v863_v60 = vld [vmem:[#allocation5 + $0x14d8] sm:$0xff] }
 0x3f7   :  { %v14543_v55 = vadd.f32 %v7179_v25, %v7137_v40  ;;  %v14545_v21 = vpop.f32.mrf.mxu1  ;;  %7454 = vmatprep.subr.bf16.mxu1 %v12185_v11  ;;  %v867_v4 = vld [vmem:[#allocation5 + $0x14f8] sm:$0xff]  ;;  %v12320_v40 = vcombine.low %v871_v37, %v875_v26  ;;  %v12168_v25 = vcombine.low %v719_v9, %v723_v48 }
 0x3f8   :  { %v7140_v17 = vpop.f32.mrf.mxu0  ;;  %v711_v11 = vld [vmem:[#allocation5 + $0x1018] sm:$0xff] }
 0x3f9   :  { %v7141_v53 = vadd.f32 %v7140_v17, %v14530_v8  ;;  %7492 = vmatpush1.bf16.msra.mxu0 %v12336_v41  ;;  %v7183_v39 = vpop.f32.mrf.mxu1  ;;  %v12313_v8 = vcombine.high %v863_v60, %v867_v4  ;;  %v12161_v3 = vcombine.high %v711_v11, %v715_v50  ;;  %v855_v38 = vld [vmem:[#allocation5 + $0x1498] sm:$0xff] }
 0x3fa   :  { %7455 = vmatpush1.bf16.msra.mxu1 %v12184_v63  ;;  %7493 = vmatprep.subr.bf16.mxu0 %v12329_v46  ;;  %v859_v5 = vld [vmem:[#allocation5 + $0x14b8] sm:$0xff]  ;;  %v12312_v63 = vcombine.low %v863_v60, %v867_v4  ;;  %v12160_v46 = vcombine.low %v711_v11, %v715_v50 }
 0x3fb   :  { %v14548_v30 = vadd.f32 %v7183_v39, %v7141_v53  ;;  %7456 = vmatprep.subr.bf16.mxu1 %v12177_v49  ;;  %v831_v14 = vld [vmem:[#allocation5 + $0x13d8] sm:$0xff]  ;;  %v12305_v49 = vcombine.high %v855_v38, %v859_v5  ;;  %v12304_v48 = vcombine.low %v855_v38, %v859_v5 }
 0x3fc   :  { %v835_v41 = vld [vmem:[#allocation5 + $0x13f8] sm:$0xff] }
 0x3fd   :  { %7494 = vmatpush1.bf16.msra.mxu0 %v12328_v62  ;;  %v12281_v17 = vcombine.high %v831_v14, %v835_v41  ;;  %v847_v53 = vld [vmem:[#allocation5 + $0x1458] sm:$0xff]  ;;  %v12280_v62 = vcombine.low %v831_v14, %v835_v41 }
 0x3fe   :  { %7457 = vmatpush1.bf16.msra.mxu1 %v12176_v34  ;;  %7495 = vmatprep.subr.bf16.mxu0 %v12321_v12  ;;  %v851_v37 = vld [vmem:[#allocation5 + $0x1478] sm:$0xff] }
 0x3ff   :  { %7458 = vmatprep.subr.bf16.mxu1 %v12169_v6  ;;  %v823_v26 = vld [vmem:[#allocation5 + $0x1398] sm:$0xff]  ;;  %v12297_v39 = vcombine.high %v847_v53, %v851_v37  ;;  %v12296_v11 = vcombine.low %v847_v53, %v851_v37 }
 0x400   :  { %v827_v9 = vld [vmem:[#allocation5 + $0x13b8] sm:$0xff] }
 0x401   :  { %7496 = vmatpush1.bf16.msra.mxu0 %v12320_v40  ;;  %v12273_v34 = vcombine.high %v823_v26, %v827_v9  ;;  %v839_v12 = vld [vmem:[#allocation5 + $0x1418] sm:$0xff]  ;;  %v12272_v50 = vcombine.low %v823_v26, %v827_v9 }
 0x402   :  { %7459 = vmatpush1.bf16.msra.mxu1 %v12168_v25  ;;  %7497 = vmatprep.subr.bf16.mxu0 %v12313_v8  ;;  %v843_v6 = vld [vmem:[#allocation5 + $0x1438] sm:$0xff] }
 0x403   :  { %7460 = vmatprep.subr.bf16.mxu1 %v12161_v3  ;;  %v815_v60 = vld [vmem:[#allocation5 + $0x1358] sm:$0xff]  ;;  %v12289_v40 = vcombine.high %v839_v12, %v843_v6  ;;  %v12288_v14 = vcombine.low %v839_v12, %v843_v6 }
 0x404   :  { %v819_v4 = vld [vmem:[#allocation5 + $0x1378] sm:$0xff] }
 0x405   :  { %7498 = vmatpush1.bf16.msra.mxu0 %v12312_v63  ;;  %v12265_v25 = vcombine.high %v815_v60, %v819_v4  ;;  %v959_v8 = vld [vmem:[#allocation5 + $0x17d8] sm:$0xff]  ;;  %v12264_v41 = vcombine.low %v815_v60, %v819_v4 }
 0x406   :  { %7461 = vmatpush1.bf16.msra.mxu1 %v12160_v46  ;;  %7499 = vmatprep.subr.bf16.mxu0 %v12305_v49  ;;  %v963_v3 = vld [vmem:[#allocation5 + $0x17f8] sm:$0xff] }
 0x407   :  { %7462 = vmatprep.subr.bf16.mxu1 %v12281_v17  ;;  %v807_v38 = vld [vmem:[#allocation5 + $0x1318] sm:$0xff]  ;;  %v12409_v63 = vcombine.high %v959_v8, %v963_v3  ;;  %v12408_v26 = vcombine.low %v959_v8, %v963_v3 }
 0x408   :  { %v811_v5 = vld [vmem:[#allocation5 + $0x1338] sm:$0xff] }
 0x409   :  { %7500 = vmatpush1.bf16.msra.mxu0 %v12304_v48  ;;  %v12257_v46 = vcombine.high %v807_v38, %v811_v5  ;;  %v951_v49 = vld [vmem:[#allocation5 + $0x1798] sm:$0xff]  ;;  %v12256_v9 = vcombine.low %v807_v38, %v811_v5 }
 0x40a   :  { %7463 = vmatpush2.bf16.msra.mxu1 %v12280_v62  ;;  %7501 = vmatprep.subr.bf16.mxu0 %v12297_v39  ;;  %v955_v17 = vld [vmem:[#allocation5 + $0x17b8] sm:$0xff] }
 0x40b   :  { %7464 = vmatprep.subr.bf16.mxu1 %v12273_v34  ;;  %v799_v53 = vld [vmem:[#allocation5 + $0x12d8] sm:$0xff]  ;;  %v12401_v48 = vcombine.high %v951_v49, %v955_v17  ;;  %v12400_v60 = vcombine.low %v951_v49, %v955_v17 }
 0x40c   :  { %v803_v37 = vld [vmem:[#allocation5 + $0x12f8] sm:$0xff] }
 0x40d   :  { %7502 = vmatpush1.bf16.msra.mxu0 %v12296_v11  ;;  %v12249_v62 = vcombine.high %v799_v53, %v803_v37  ;;  %v943_v39 = vld [vmem:[#allocation5 + $0x1758] sm:$0xff]  ;;  %v12248_v4 = vcombine.low %v799_v53, %v803_v37 }
 0x40e   :  { %7465 = vmatpush2.bf16.msra.mxu1 %v12272_v50  ;;  %7503 = vmatprep.subr.bf16.mxu0 %v12289_v40  ;;  %v947_v34 = vld [vmem:[#allocation5 + $0x1778] sm:$0xff] }
 0x40f   :  { %7466 = vmatprep.subr.bf16.mxu1 %v12265_v25  ;;  %v791_v12 = vld [vmem:[#allocation5 + $0x1298] sm:$0xff]  ;;  %v12393_v11 = vcombine.high %v943_v39, %v947_v34  ;;  %v12392_v38 = vcombine.low %v943_v39, %v947_v34 }
 0x410   :  { %v795_v6 = vld [vmem:[#allocation5 + $0x12b8] sm:$0xff] }
 0x411   :  { %7504 = vmatpush1.bf16.msra.mxu0 %v12288_v14  ;;  %v12241_v50 = vcombine.high %v791_v12, %v795_v6  ;;  %v935_v40 = vld [vmem:[#allocation5 + $0x1718] sm:$0xff]  ;;  %v12240_v5 = vcombine.low %v791_v12, %v795_v6 }
 0x412   :  { %7467 = vmatpush2.bf16.msra.mxu1 %v12264_v41  ;;  %7505 = vmatprep.subr.bf16.mxu0 %v12409_v63  ;;  %v939_v25 = vld [vmem:[#allocation5 + $0x1738] sm:$0xff] }
 0x413   :  { %7468 = vmatprep.subr.bf16.mxu1 %v12257_v46  ;;  %v783_v8 = vld [vmem:[#allocation5 + $0x1258] sm:$0xff]  ;;  %v12385_v14 = vcombine.high %v935_v40, %v939_v25  ;;  %v12384_v53 = vcombine.low %v935_v40, %v939_v25 }
 0x414   :  { %v787_v3 = vld [vmem:[#allocation5 + $0x1278] sm:$0xff] }
 0x415   :  { %7506 = vmatpush2.bf16.msra.mxu0 %v12408_v26  ;;  %v12233_v41 = vcombine.high %v783_v8, %v787_v3  ;;  %v927_v63 = vld [vmem:[#allocation5 + $0x16d8] sm:$0xff]  ;;  %v12232_v37 = vcombine.low %v783_v8, %v787_v3 }
 0x416   :  { %7469 = vmatpush2.bf16.msra.mxu1 %v12256_v9  ;;  %7507 = vmatprep.subr.bf16.mxu0 %v12401_v48  ;;  %v931_v46 = vld [vmem:[#allocation5 + $0x16f8] sm:$0xff] }
 0x417   :  { %7470 = vmatprep.subr.bf16.mxu1 %v12249_v62  ;;  %v775_v49 = vld [vmem:[#allocation5 + $0x1218] sm:$0xff]  ;;  %v12377_v26 = vcombine.high %v927_v63, %v931_v46  ;;  %v12376_v12 = vcombine.low %v927_v63, %v931_v46 }
 0x418   :  { %v779_v17 = vld [vmem:[#allocation5 + $0x1238] sm:$0xff] }
 0x419   :  { %7508 = vmatpush2.bf16.msra.mxu0 %v12400_v60  ;;  %v12225_v9 = vcombine.high %v775_v49, %v779_v17  ;;  %v919_v48 = vld [vmem:[#allocation5 + $0x1698] sm:$0xff]  ;;  %v12224_v6 = vcombine.low %v775_v49, %v779_v17 }
 0x41a   :  { %7471 = vmatpush2.bf16.msra.mxu1 %v12248_v4  ;;  %7509 = vmatprep.subr.bf16.mxu0 %v12393_v11  ;;  %v923_v62 = vld [vmem:[#allocation5 + $0x16b8] sm:$0xff] }
 0x41b   :  { %7472 = vmatprep.subr.bf16.mxu1 %v12241_v50  ;;  %v1023_v39 = vld [vmem:[#allocation5 + $0x19d8] sm:$0xff]  ;;  %v12369_v60 = vcombine.high %v919_v48, %v923_v62  ;;  %v12368_v8 = vcombine.low %v919_v48, %v923_v62 }
 0x41c   :  { %v1027_v34 = vld [vmem:[#allocation5 + $0x19f8] sm:$0xff] }
 0x41d   :  { %7510 = vmatpush2.bf16.msra.mxu0 %v12392_v38  ;;  %v12473_v4 = vcombine.high %v1023_v39, %v1027_v34  ;;  %v911_v11 = vld [vmem:[#allocation5 + $0x1658] sm:$0xff]  ;;  %v12472_v3 = vcombine.low %v1023_v39, %v1027_v34 }
 0x41e   :  { %7473 = vmatpush2.bf16.msra.mxu1 %v12240_v5  ;;  %7511 = vmatprep.subr.bf16.mxu0 %v12385_v14  ;;  %v915_v50 = vld [vmem:[#allocation5 + $0x1678] sm:$0xff] }
 0x41f   :  { %7474 = vmatprep.subr.bf16.mxu1 %v12233_v41  ;;  %v1015_v40 = vld [vmem:[#allocation5 + $0x1998] sm:$0xff]  ;;  %v12361_v38 = vcombine.high %v911_v11, %v915_v50  ;;  %v12360_v49 = vcombine.low %v911_v11, %v915_v50 }
 0x420   :  { %v1019_v25 = vld [vmem:[#allocation5 + $0x19b8] sm:$0xff] }
 0x421   :  { %7512 = vmatpush2.bf16.msra.mxu0 %v12384_v53  ;;  %v12465_v5 = vcombine.high %v1015_v40, %v1019_v25  ;;  %v903_v14 = vld [vmem:[#allocation5 + $0x1618] sm:$0xff]  ;;  %v12464_v17 = vcombine.low %v1015_v40, %v1019_v25  ;;  %v14554_v25 = vpop.f32.mrf.mxu0 }
 0x422   :  { %7475 = vmatpush2.bf16.msra.mxu1 %v12232_v37  ;;  %7513 = vmatprep.subr.bf16.mxu0 %v12377_v26  ;;  %v907_v41 = vld [vmem:[#allocation5 + $0x1638] sm:$0xff] }
 0x423   :  { %7476 = vmatprep.subr.bf16.mxu1 %v12225_v9  ;;  %v1007_v63 = vld [vmem:[#allocation5 + $0x1958] sm:$0xff]  ;;  %v12353_v53 = vcombine.high %v903_v14, %v907_v41  ;;  %v12352_v39 = vcombine.low %v903_v14, %v907_v41 }
 0x424   :  { %v1011_v46 = vld [vmem:[#allocation5 + $0x1978] sm:$0xff] }
 0x425   :  { %7514 = vmatpush2.bf16.msra.mxu0 %v12376_v12  ;;  %v12457_v37 = vcombine.high %v1007_v63, %v1011_v46  ;;  %v1151_v26 = vld [vmem:[#allocation5 + $0x1dd8] sm:$0xff]  ;;  %v12456_v34 = vcombine.low %v1007_v63, %v1011_v46 }
 0x426   :  { %7477 = vmatpush2.bf16.msra.mxu1 %v12224_v6  ;;  %7515 = vmatprep.subr.bf16.mxu0 %v12369_v60  ;;  %v1155_v9 = vld [vmem:[#allocation5 + $0x1df8] sm:$0xff] }
 0x427   :  { %7532 = vmatprep.subr.bf16.mxu1 %v12473_v4  ;;  %v999_v48 = vld [vmem:[#allocation5 + $0x1918] sm:$0xff]  ;;  %v14552_v4 = vpop.f32.mrf.mxu1  ;;  %v12600_v40 = vcombine.low %v1151_v26, %v1155_v9 }
 0x428   :  { %v1003_v62 = vld [vmem:[#allocation5 + $0x1938] sm:$0xff] }
 0x429   :  { %7479 = vmatmul.mubr.bf16.vlgmr.msra.gmra.mxu1 %v14334_v20  ;;  %7516 = vmatpush2.bf16.msra.mxu0 %v12368_v8  ;;  %v12601_v20 = vcombine.high %v1151_v26, %v1155_v9  ;;  %v12449_v12 = vcombine.high %v999_v48, %v1003_v62  ;;  %v1143_v6 = vld [vmem:[#allocation5 + $0x1d98] sm:$0xff]  ;;  %v12448_v8 = vcombine.low %v999_v48, %v1003_v62 }
 0x42a   :  { %7533 = vmatpush1.bf16.msra.mxu1 %v12472_v3  ;;  %7517 = vmatprep.subr.bf16.mxu0 %v12361_v38  ;;  %v1147_v60 = vld [vmem:[#allocation5 + $0x1db8] sm:$0xff] }
 0x42b   :  { %7534 = vmatprep.subr.bf16.mxu1 %v12465_v5  ;;  %7564 = vmatprep.mubr.bf16.mxu1 %v14341_v33  ;;  %v991_v11 = vld [vmem:[#allocation5 + $0x18d8] sm:$0xff]  ;;  %v7265_v33 = vpop.f32.mrf.mxu1  ;;  %v12593_v3 = vcombine.high %v1143_v6, %v1147_v60 }
 0x42c   :  { %v995_v50 = vld [vmem:[#allocation5 + $0x18f8] sm:$0xff] }
 0x42d   :  { %7518 = vmatpush2.bf16.msra.mxu0 %v12360_v49  ;;  %v12441_v38 = vcombine.high %v991_v11, %v995_v50  ;;  %v1135_v5 = vld [vmem:[#allocation5 + $0x1d58] sm:$0xff]  ;;  %v12440_v26 = vcombine.low %v991_v11, %v995_v50 }
 0x42e   :  { %7535 = vmatpush1.bf16.msra.mxu1 %v12464_v17  ;;  %7519 = vmatprep.subr.bf16.mxu0 %v12353_v53  ;;  %v1139_v14 = vld [vmem:[#allocation5 + $0x1d78] sm:$0xff]  ;;  %v12592_v17 = vcombine.low %v1143_v6, %v1147_v60  ;;  %v14560_v53 = vpop.f32.mrf.mxu1 }
 0x42f   :  { %7536 = vmatprep.subr.bf16.mxu1 %v12457_v37  ;;  %v983_v63 = vld [vmem:[#allocation5 + $0x1898] sm:$0xff]  ;;  %14761 = vst [vmem:[#allocation41_spill] sm:$0xff] %v14560_v53  ;;  %v12585_v9 = vcombine.high %v1135_v5, %v1139_v14 }
 0x430   :  { %v987_v46 = vld [vmem:[#allocation5 + $0x18b8] sm:$0xff]  ;;  %v7269_v6 = vpop.f32.mrf.mxu1 }
 0x431   :  { %7520 = vmatpush2.bf16.msra.mxu0 %v12352_v39  ;;  %v1127_v62 = vld [vmem:[#allocation5 + $0x1d18] sm:$0xff]  ;;  %v12432_v60 = vcombine.low %v983_v63, %v987_v46 }
 0x432   :  { %7537 = vmatpush1.bf16.msra.mxu1 %v12456_v34  ;;  %7575 = vmatprep.subr.bf16.mxu0 %v12601_v20  ;;  %v1131_v39 = vld [vmem:[#allocation5 + $0x1d38] sm:$0xff] }
 0x433   :  { %7538 = vmatprep.subr.bf16.mxu1 %v12449_v12  ;;  %v979_v20 = vld [vmem:[#allocation5 + $0x1878] sm:$0xff]  ;;  %v12576_v53 = vcombine.low %v1127_v62, %v1131_v39 }
 0x434   :  { %v7222_v41 = vpop.f32.mrf.mxu0  ;;  %7522 = vmatmul.mubr.bf16.vlgmr.msra.gmra.mxu0 %v14336_v22  ;;  %v12433_v22 = vcombine.high %v983_v63, %v987_v46  ;;  %v1111_v46 = vld [vmem:[#allocation5 + $0x1c98] sm:$0xff] }
 0x435   :  { %v7223_v49 = vadd.f32 %v7222_v41, %v14543_v55  ;;  %7576 = vmatpush1.bf16.msra.mxu0 %v12600_v40  ;;  %12645 = vmatprep.mubr.msk.bf16.mxu0 %vm6238_vm0, %v14338_v32  ;;  %v975_v55 = vld [vmem:[#allocation5 + $0x1858] sm:$0xff]  ;;  %v12584_v32 = vcombine.low %v1135_v5, %v1139_v14  ;;  %v12577_v40 = vcombine.high %v1127_v62, %v1131_v39  ;;  %v14568_v62 = vsub.s32 1, %v14350_v45 }
 0x436   :  { %7539 = vmatpush1.bf16.msra.mxu1 %v12448_v8  ;;  %v14562_v37 = vpop.f32.mrf.mxu0  ;;  %7577 = vmatprep.subr.bf16.mxu0 %v12593_v3  ;;  %v12425_v50 = vcombine.high %v975_v55, %v979_v20  ;;  %v1123_v8 = vld [vmem:[#allocation5 + $0x1cf8] sm:$0xff] }
 0x437   :  { %v7266_v48 = vadd.f32 %v7265_v33, %v7223_v49  ;;  %7540 = vmatprep.subr.bf16.mxu1 %v12441_v38  ;;  %v1119_v33 = vld [vmem:[#allocation5 + $0x1cd8] sm:$0xff] }
 0x438   :  { %v7226_v34 = vpop.f32.mrf.mxu0  ;;  %v967_v3 = vld [vmem:[#allocation5 + $0x1818] sm:$0xff]  ;;  %v12569_v5 = vcombine.high %v1119_v33, %v1123_v8 }
 0x439   :  { %v7227_v12 = vadd.f32 %v7226_v34, %v14548_v30  ;;  %7578 = vmatpush1.bf16.msra.mxu0 %v12592_v17  ;;  %v971_v38 = vld [vmem:[#allocation5 + $0x1838] sm:$0xff]  ;;  %v7622_v41 = vmax.f32 %v7266_v48, 0.0  ;;  %v12424_v30 = vcombine.low %v975_v55, %v979_v20 }
 0x43a   :  { %7541 = vmatpush1.bf16.msra.mxu1 %v12440_v26  ;;  %7579 = vmatprep.subr.bf16.mxu0 %v12585_v9  ;;  %v12417_v63 = vcombine.high %v967_v3, %v971_v38  ;;  %v1115_v17 = vld [vmem:[#allocation5 + $0x1cb8] sm:$0xff]  ;;  %v12416_v34 = vcombine.low %v967_v3, %v971_v38 }
 0x43b   :  { %v7270_v11 = vadd.f32 %v7269_v6, %v7227_v12  ;;  %7542 = vmatprep.subr.bf16.mxu1 %v12433_v22  ;;  %v1087_v26 = vld [vmem:[#allocation5 + $0x1bd8] sm:$0xff]  ;;  %v12568_v22 = vcombine.low %v1119_v33, %v1123_v8  ;;  %v12561_v48 = vcombine.high %v1111_v46, %v1115_v17  ;;  %v12560_v6 = vcombine.low %v1111_v46, %v1115_v17 }
 0x43c   :  { %v1091_v9 = vld [vmem:[#allocation5 + $0x1bf8] sm:$0xff]  ;;  %v1212_v46 = vsub.s32 3, %v14350_v45 }
 0x43d   :  { %v7630_v49 = vmax.f32 %v7270_v11, 0.0  ;;  %7580 = vmatpush1.bf16.msra.mxu0 %v12584_v32  ;;  %v12537_v39 = vcombine.high %v1087_v26, %v1091_v9  ;;  %v1103_v55 = vld [vmem:[#allocation5 + $0x1c58] sm:$0xff] }
 0x43e   :  { %7543 = vmatpush1.bf16.msra.mxu1 %v12432_v60  ;;  %7581 = vmatprep.subr.bf16.mxu0 %v12577_v40  ;;  %v1107_v20 = vld [vmem:[#allocation5 + $0x1c78] sm:$0xff]  ;;  %v12536_v60 = vcombine.low %v1087_v26, %v1091_v9  ;;  %v14570_v40 = vld [vmem:[#allocation7] sm:$0xff] }
 0x43f   :  { %v14565_v14 = vpack.c.bf16 %v7630_v49, %v7622_v41  ;;  %7544 = vmatprep.subr.bf16.mxu1 %v12425_v50  ;;  %v1079_v12 = vld [vmem:[#allocation5 + $0x1b98] sm:$0xff]  ;;  %v1205_v11 = vrot.slane %v14570_v40, %v14568_v62  ;;  %v12552_v41 = vcombine.low %v1103_v55, %v1107_v20 }
 0x440   :  { %v1083_v32 = vld [vmem:[#allocation5 + $0x1bb8] sm:$0xff] }
 0x441   :  { %7582 = vmatpush1.bf16.msra.mxu0 %v12576_v53  ;;  %v12553_v53 = vcombine.high %v1103_v55, %v1107_v20  ;;  %v12529_v50 = vcombine.high %v1079_v12, %v1083_v32  ;;  %v1095_v33 = vld [vmem:[#allocation5 + $0x1c18] sm:$0xff]  ;;  %v6283_v49 = vadd.f32 %v14371_v18, %v1205_v11 }
 0x442   :  { %7545 = vmatpush1.bf16.msra.mxu1 %v12424_v30  ;;  %7583 = vmatprep.subr.bf16.mxu0 %v12569_v5  ;;  %v1099_v8 = vld [vmem:[#allocation5 + $0x1c38] sm:$0xff]  ;;  %v12528_v30 = vcombine.low %v1079_v12, %v1083_v32 }
 0x443   :  { %7546 = vmatprep.subr.bf16.mxu1 %v12417_v63  ;;  %v1071_v3 = vld [vmem:[#allocation5 + $0x1b58] sm:$0xff]  ;;  %v12545_v5 = vcombine.high %v1095_v33, %v1099_v8  ;;  %v6279_v63 = vadd.f32 %v14361_v24, %v1205_v11  ;;  %v1213_v24 = vrot.slane %v14570_v40, %v1212_v46 }
 0x444   :  { %v1075_v38 = vld [vmem:[#allocation5 + $0x1b78] sm:$0xff] }
 0x445   :  { %7584 = vmatpush1.bf16.msra.mxu0 %v12568_v22  ;;  %v12521_v17 = vcombine.high %v1071_v3, %v1075_v38  ;;  %v1191_v26 = vld [vmem:[#allocation5 + $0x1f18] sm:$0xff]  ;;  %v12520_v18 = vcombine.low %v1071_v3, %v1075_v38  ;;  %v6322_v20 = vadd.f32 %v14365_v36, %v6279_v63  ;;  %v6623_v3 = vadd.f32 %v14432_v28, %v1213_v24 }
 0x446   :  { %7547 = vmatpush1.bf16.msra.mxu1 %v12416_v34  ;;  %7585 = vmatprep.subr.bf16.mxu0 %v12561_v48  ;;  %v1195_v9 = vld [vmem:[#allocation5 + $0x1f38] sm:$0xff]  ;;  %v12544_v48 = vcombine.low %v1095_v33, %v1099_v8 }
 0x447   :  { %7548 = vmatprep.subr.bf16.mxu1 %v12537_v39  ;;  %v1063_v22 = vld [vmem:[#allocation5 + $0x1b18] sm:$0xff]  ;;  %v6326_v39 = vadd.f32 %v14373_v29, %v6283_v49  ;;  %v12641_v55 = vcombine.high %v1191_v26, %v1195_v9  ;;  %v6365_v29 = vadd.f32 %v14378_v43, %v6322_v20  ;;  %v12640_v33 = vcombine.low %v1191_v26, %v1195_v9 }
 0x448   :  { %v1067_v34 = vld [vmem:[#allocation5 + $0x1b38] sm:$0xff]  ;;  %v6666_v63 = vadd.f32 %v14438_v42, %v6623_v3 }
 0x449   :  { %7586 = vmatpush1.bf16.msra.mxu0 %v12560_v6  ;;  %v12513_v12 = vcombine.high %v1063_v22, %v1067_v34  ;;  %v1183_v32 = vld [vmem:[#allocation5 + $0x1ed8] sm:$0xff]  ;;  %v12512_v36 = vcombine.low %v1063_v22, %v1067_v34 }
 0x44a   :  { %7549 = vmatpush2.bf16.msra.mxu1 %v12536_v60  ;;  %7587 = vmatprep.subr.bf16.mxu0 %v12553_v53  ;;  %v1187_v6 = vld [vmem:[#allocation5 + $0x1ef8] sm:$0xff]  ;;  %v6369_v60 = vadd.f32 %v14389_v59, %v6326_v39  ;;  %v6709_v22 = vadd.f32 %v14447_v1, %v6666_v63  ;;  %v14770_v63 = vld [vmem:[#allocation37_spill] sm:$0xff] }
 0x44b   :  { %7550 = vmatprep.subr.bf16.mxu1 %v12529_v50  ;;  %v1055_v53 = vld [vmem:[#allocation5 + $0x1ad8] sm:$0xff]  ;;  %v6627_v50 = vadd.f32 %v14442_v47, %v1213_v24  ;;  %v12633_v8 = vcombine.high %v1183_v32, %v1187_v6  ;;  %v6408_v47 = vadd.f32 %v14382_v54, %v6365_v29  ;;  %v12632_v26 = vcombine.low %v1183_v32, %v1187_v6  ;;  %v14764_v32 = vld [vmem:[#allocation33_spill] sm:$0xff] }
 0x44c   :  { %v1059_v11 = vld [vmem:[#allocation5 + $0x1af8] sm:$0xff] }
 0x44d   :  { %7588 = vmatpush1.bf16.msra.mxu0 %v12552_v41  ;;  %v6670_v38 = vadd.f32 %v14452_v10, %v6627_v50  ;;  %v12505_v41 = vcombine.high %v1055_v53, %v1059_v11  ;;  %v1175_v49 = vld [vmem:[#allocation5 + $0x1e98] sm:$0xff]  ;;  %v12504_v10 = vcombine.low %v1055_v53, %v1059_v11  ;;  %v6451_v42 = vadd.f32 %v14396_v13, %v6408_v47  ;;  %v14766_v50 = vld [vmem:[#allocation25_spill] sm:$0xff] }
 0x44e   :  { %7551 = vmatpush2.bf16.msra.mxu1 %v12528_v30  ;;  %7589 = vmatprep.subr.bf16.mxu0 %v12545_v5  ;;  %v1179_v59 = vld [vmem:[#allocation5 + $0x1eb8] sm:$0xff]  ;;  %v6412_v30 = vadd.f32 %v14391_v2, %v6369_v60 }
 0x44f   :  { %7552 = vmatprep.subr.bf16.mxu1 %v12521_v17  ;;  %v1047_v5 = vld [vmem:[#allocation5 + $0x1a98] sm:$0xff]  ;;  %v6713_v17 = vadd.f32 %v14460_v44, %v6670_v38  ;;  %v12625_v9 = vcombine.high %v1175_v49, %v1179_v59  ;;  %v12624_v20 = vcombine.low %v1175_v49, %v1179_v59 }
 0x450   :  { %v1051_v43 = vld [vmem:[#allocation5 + $0x1ab8] sm:$0xff]  ;;  %v6455_v28 = vadd.f32 %v14409_v57, %v6412_v30  ;;  %v14769_v30 = vld [vmem:[#allocation28_spill] sm:$0xff] }
 0x451   :  { %7590 = vmatpush1.bf16.msra.mxu0 %v12544_v48  ;;  %v6756_v2 = vadd.f32 %v14470_v15, %v6713_v17  ;;  %v12497_v34 = vcombine.high %v1047_v5, %v1051_v43  ;;  %v1167_v48 = vld [vmem:[#allocation5 + $0x1e58] sm:$0xff]  ;;  %v12496_v1 = vcombine.low %v1047_v5, %v1051_v43 }
 0x452   :  { %7553 = vmatpush2.bf16.msra.mxu1 %v12520_v18  ;;  %7597 = vmatprep.subr.bf16.mxu0 %v12641_v55  ;;  %v1171_v54 = vld [vmem:[#allocation5 + $0x1e78] sm:$0xff]  ;;  %v6752_v18 = vadd.f32 %v14456_v16, %v6709_v22  ;;  %v14762_v55 = vld [vmem:[#allocation36_spill] sm:$0xff]  ;;  %v6494_v16 = vadd.f32 %v14766_v50, %v6451_v42 }
 0x453   :  { %7554 = vmatprep.subr.bf16.mxu1 %v12513_v12  ;;  %v1039_v39 = vld [vmem:[#allocation5 + $0x1a58] sm:$0xff]  ;;  %v6799_v57 = vadd.f32 %v14762_v55, %v6756_v2  ;;  %v12617_v15 = vcombine.high %v1167_v48, %v1171_v54  ;;  %v12616_v59 = vcombine.low %v1167_v48, %v1171_v54  ;;  %v13347_v55 = vld [vmem:[#allocation8 + $0x118] ss:$20 sps:$4 sm:$0xff]  }
 0x454   :  { %v1043_v44 = vld [vmem:[#allocation5 + $0x1a78] sm:$0xff]  ;;  %v6795_v6 = vadd.f32 %v14764_v32, %v6752_v18  ;;  %v6537_v5 = vadd.f32 %v14769_v30, %v6494_v16  ;;  %v13388_v30 = vld [vmem:[#allocation8 + $0x2ac] ss:$20 sps:$4 sm:$0xff]  }
 0x455   :  { %7598 = vmatpush2.bf16.msra.mxu0 %v12640_v33  ;;  %v14763_v24 = vld [vmem:[#allocation26_spill] sm:$0xff]  ;;  %v14765_v60 = vld [vmem:[#allocation35_spill] sm:$0xff]  ;;  %v12489_v13 = vcombine.high %v1039_v39, %v1043_v44  ;;  %v14767_v33 = vld [vmem:[#allocation32_spill] sm:$0xff]  ;;  %v12488_v43 = vcombine.low %v1039_v39, %v1043_v44 }
 0x456   :  { %7555 = vmatpush2.bf16.msra.mxu1 %v12512_v36  ;;  %7599 = vmatprep.subr.bf16.mxu0 %v12633_v8  ;;  %v6498_v12 = vadd.f32 %v14763_v24, %v6455_v28  ;;  %v6842_v53 = vadd.f32 %v14765_v60, %v6799_v57  ;;  %v1159_v11 = vld [vmem:[#allocation5 + $0x1e18] sm:$0xff]  ;;  %v13361_v60 = vld [vmem:[#allocation8 + $0xcc] ss:$20 sps:$4 sm:$0xff]  }
 0x457   :  { %7556 = vmatprep.subr.bf16.mxu1 %v12505_v41  ;;  %v1163_v29 = vld [vmem:[#allocation5 + $0x1e38] sm:$0xff] }
 0x458   :  { %v6541_v36 = vadd.f32 %v14767_v33, %v6498_v12  ;;  %v1031_v8 = vld [vmem:[#allocation5 + $0x1a18] sm:$0xff]  ;;  %v6885_v49 = vadd.f32 %v14502_v52, %v6842_v53  ;;  %v12609_v47 = vcombine.high %v1159_v11, %v1163_v29  ;;  %v12608_v22 = vcombine.low %v1159_v11, %v1163_v29  ;;  %v13364_v53 = vld [vmem:[#allocation8 + $0x34c] ss:$20 sps:$4 sm:$0xff]   ;;  %v13367_v11 = vld [vmem:[#allocation8 + $0xa4] ss:$20 sps:$4 sm:$0xff]  }
 0x459   :  { %7600 = vmatpush2.bf16.msra.mxu0 %v12632_v26  ;;  %v1035_v3 = vld [vmem:[#allocation5 + $0x1a38] sm:$0xff] }
 0x45a   :  { %7557 = vmatpush2.bf16.msra.mxu1 %v12504_v10  ;;  %7601 = vmatprep.subr.bf16.mxu0 %v12625_v9  ;;  %v14768_v38 = vld [vmem:[#allocation34_spill] sm:$0xff]  ;;  %v12481_v26 = vcombine.high %v1031_v8, %v1035_v3  ;;  %v6928_v9 = vadd.f32 %v14500_v23, %v6885_v49  ;;  %v14772_v2 = vld [vmem:[#allocation27_spill] sm:$0xff] }
 0x45b   :  { %7558 = vmatprep.subr.bf16.mxu1 %v12497_v34  ;;  %v6838_v41 = vadd.f32 %v14768_v38, %v6795_v6  ;;  %v14771_v28 = vld [vmem:[#allocation30_spill] sm:$0xff]  ;;  %v6580_v52 = vadd.f32 %v14772_v2, %v6537_v5  ;;  %v12480_v34 = vcombine.low %v1031_v8, %v1035_v3  ;;  %v13355_v24 = vld [vmem:[#allocation8 + $0xf4] ss:$20 sps:$4 sm:$0xff]  }
 0x45c   :  { %v6584_v10 = vadd.f32 %v14771_v28, %v6541_v36  ;;  %v13349_v48 = vld [vmem:[#allocation8 + $0x11c] ss:$20 sps:$4 sm:$0xff]   ;;  %v7629_v18 = vmax.f32 %v6928_v9, 0.0  ;;  %v13350_v23 = vld [vmem:[#allocation8 + $0x398] ss:$20 sps:$4 sm:$0xff]   ;;  %v1220_v9 = vsub.s32 5, %v14350_v45 }
 0x45d   :  { %7602 = vmatpush2.bf16.msra.mxu0 %v12624_v20  ;;  %v6881_v17 = vadd.f32 %v14770_v63, %v6838_v41  ;;  %v14773_v54 = vld [vmem:[#allocation38_spill] sm:$0xff]  ;;  %v7619_v57 = vmax.f32 %v6580_v52, 0.0  ;;  %v13365_v29 = vld [vmem:[#allocation8 + $0xa0] ss:$20 sps:$4 sm:$0xff]   ;;  %v13383_v5 = vld [vmem:[#allocation8 + $0x28] ss:$20 sps:$4 sm:$0xff]  }
 0x45e   :  { %7559 = vmatpush2.bf16.msra.mxu1 %v12496_v1  ;;  %7603 = vmatprep.subr.bf16.mxu0 %v12617_v15  ;;  %v13352_v39 = vld [vmem:[#allocation8 + $0x39c] ss:$20 sps:$4 sm:$0xff]   ;;  %v7627_v44 = vmax.f32 %v6584_v10, 0.0  ;;  %v13358_v1 = vld [vmem:[#allocation8 + $0x374] ss:$20 sps:$4 sm:$0xff]  }
 0x45f   :  { %7560 = vmatprep.subr.bf16.mxu1 %v12489_v13  ;;  %v6924_v42 = vadd.f32 %v14773_v54, %v6881_v17  ;;  %v13353_v32 = vld [vmem:[#allocation8 + $0xf0] ss:$20 sps:$4 sm:$0xff]   ;;  %v13362_v13 = vld [vmem:[#allocation8 + $0x348] ss:$20 sps:$4 sm:$0xff]   ;;  %v13368_v50 = vld [vmem:[#allocation8 + $0x320] ss:$20 sps:$4 sm:$0xff]  }
 0x460   :  { %v14611_v12 = vpack.c.bf16 %v7627_v44, %v7619_v57  ;;  %v13356_v6 = vld [vmem:[#allocation8 + $0x370] ss:$20 sps:$4 sm:$0xff]   ;;  %v13371_v36 = vld [vmem:[#allocation8 + $0x78] ss:$20 sps:$4 sm:$0xff]   ;;  %v13379_v3 = vld [vmem:[#allocation8 + $0x54] ss:$20 sps:$4 sm:$0xff]  }
 0x461   :  { %7604 = vmatpush2.bf16.msra.mxu0 %v12616_v59  ;;  %v7621_v20 = vmax.f32 %v6924_v42, 0.0  ;;  %v13373_v16 = vld [vmem:[#allocation8 + $0x7c] ss:$20 sps:$4 sm:$0xff]   ;;  %v13374_v8 = vld [vmem:[#allocation8 + $0x2f8] ss:$20 sps:$4 sm:$0xff]  }
 0x462   :  { %7561 = vmatpush2.bf16.msra.mxu1 %v12488_v43  ;;  %7605 = vmatprep.subr.bf16.mxu0 %v12609_v47  ;;  %v13376_v33 = vld [vmem:[#allocation8 + $0x2fc] ss:$20 sps:$4 sm:$0xff]   ;;  %v13382_v38 = vld [vmem:[#allocation8 + $0x2d4] ss:$20 sps:$4 sm:$0xff]   ;;  %v13385_v59 = vld [vmem:[#allocation8 + $0x2c] ss:$20 sps:$4 sm:$0xff]  }
 0x463   :  { %7562 = vmatprep.subr.bf16.mxu1 %v12481_v26  ;;  %v14613_v15 = vpack.c.bf16 %v7629_v18, %v7621_v20  ;;  %v13377_v41 = vld [vmem:[#allocation8 + $0x50] ss:$20 sps:$4 sm:$0xff]   ;;  %v13386_v43 = vld [vmem:[#allocation8 + $0x2a8] ss:$20 sps:$4 sm:$0xff]   ;;  %v13389_v17 = vld [vmem:[#allocation8] ss:$20 sps:$4 sm:$0xff]  }
 0x464   :  { %v13380_v49 = vld [vmem:[#allocation8 + $0x2d0] ss:$20 sps:$4 sm:$0xff]   ;;  %v13392_v26 = vld [vmem:[#allocation8 + $0x280] ss:$20 sps:$4 sm:$0xff]   ;;  %v13398_v2 = vld [vmem:[#allocation8 + $0x4d8] ss:$20 sps:$4 sm:$0xff]  }
 0x465   :  { %7606 = vmatpush2.bf16.msra.mxu0 %v12608_v22  ;;  %v13391_v47 = vld [vmem:[#allocation8 + $0x4] ss:$20 sps:$4 sm:$0xff]   ;;  %v13397_v28 = vld [vmem:[#allocation8 + $0x25c] ss:$20 sps:$4 sm:$0xff]   ;;  %v13403_v52 = vld [vmem:[#allocation8 + $0x234] ss:$20 sps:$4 sm:$0xff]  }
 0x466   :  { %7563 = vmatpush2.bf16.msra.mxu1 %v12480_v34  ;;  %9717 = vmatprep.subr.bf16.mxu0 %v13349_v48  ;;  %v13394_v63 = vld [vmem:[#allocation8 + $0x284] ss:$20 sps:$4 sm:$0xff]   ;;  %v13400_v10 = vld [vmem:[#allocation8 + $0x4dc] ss:$20 sps:$4 sm:$0xff]   ;;  %v13406_v34 = vld [vmem:[#allocation8 + $0x4b4] ss:$20 sps:$4 sm:$0xff]   ;;  %v1221_v48 = vrot.slane %v14570_v40, %v1220_v9 }
 0x467   :  { %9760 = vmatprep.subr.bf16.mxu1 %v13352_v39  ;;  %v13395_v22 = vld [vmem:[#allocation8 + $0x258] ss:$20 sps:$4 sm:$0xff]   ;;  %v13401_v54 = vld [vmem:[#allocation8 + $0x230] ss:$20 sps:$4 sm:$0xff]   ;;  %v13407_v57 = vld [vmem:[#allocation8 + $0x208] ss:$20 sps:$4 sm:$0xff]  }
 0x468   :  { %7608 = vmatmul.mubr.bf16.vlgmr.msra.gmra.mxu0 %v14347_v31  ;;  %v13359_v31 = vld [vmem:[#allocation8 + $0xc8] ss:$20 sps:$4 sm:$0xff]   ;;  %v6971_v42 = vadd.f32 %v14516_v0, %v1221_v48  ;;  %v13404_v39 = vld [vmem:[#allocation8 + $0x4b0] ss:$20 sps:$4 sm:$0xff]   ;;  %v13409_v44 = vld [vmem:[#allocation8 + $0x20c] ss:$20 sps:$4 sm:$0xff]  }
 0x469   :  { %7565 = vmatmul.mubr.bf16.vlgmr.msra.gmra.mxu1 %v14356_v7  ;;  %9718 = vmatpush1.bf16.msra.mxu0 %v13347_v55  ;;  %v13370_v7 = vld [vmem:[#allocation8 + $0x324] ss:$20 sps:$4 sm:$0xff]   ;;  %v13412_v18 = vld [vmem:[#allocation8 + $0x48c] ss:$20 sps:$4 sm:$0xff]   ;;  %v6967_v55 = vadd.f32 %v14506_v19, %v1221_v48  ;;  %v13410_v20 = vld [vmem:[#allocation8 + $0x488] ss:$20 sps:$4 sm:$0xff]  }
 0x46a   :  { %9749 = vmatprep.mubr.bf16.mxu0 %v14611_v12  ;;  %9761 = vmatpush1.bf16.msra.mxu1 %v13350_v23  ;;  %v7014_v23 = vadd.f32 %v14518_v58, %v6971_v42  ;;  %v13416_v19 = vld [vmem:[#allocation8 + $0x460] ss:$20 sps:$4 sm:$0xff]   ;;  %v13424_v58 = vld [vmem:[#allocation8 + $0x43c] ss:$20 sps:$4 sm:$0xff]  }
 0x46b   :  { %9792 = vmatprep.mubr.bf16.mxu1 %v14613_v15  ;;  %9719 = vmatprep.subr.bf16.mxu0 %v13355_v24  ;;  %v13415_v24 = vld [vmem:[#allocation8 + $0x1e4] ss:$20 sps:$4 sm:$0xff]   ;;  %v13448_v9 = vld [vmem:[#allocation8 + $0x5f4] ss:$20 sps:$4 sm:$0xff]   ;;  %v13451_v42 = vld [vmem:[#allocation8 + $0x5cc] ss:$20 sps:$4 sm:$0xff]  }
 0x46c   :  { %9762 = vmatprep.subr.bf16.mxu1 %v13358_v1  ;;  %v13418_v1 = vld [vmem:[#allocation8 + $0x464] ss:$20 sps:$4 sm:$0xff]  }
 0x46d   :  { %9720 = vmatpush1.bf16.msra.mxu0 %v13353_v32  ;;  %v14774_v32 = vld [vmem:[#allocation40_spill] sm:$0xff]  ;;  %v14777_v48 = vld [vmem:[#allocation39_spill] sm:$0xff] }
 0x46e   :  { %9763 = vmatpush1.bf16.msra.mxu1 %v13356_v6  ;;  %9721 = vmatprep.subr.bf16.mxu0 %v13361_v60  ;;  %v7010_v0 = vadd.f32 %v14774_v32, %v6967_v55  ;;  %v7057_v6 = vadd.f32 %v14534_v61, %v7014_v23  ;;  %v13413_v60 = vld [vmem:[#allocation8 + $0x1e0] ss:$20 sps:$4 sm:$0xff]   ;;  %v13422_v61 = vld [vmem:[#allocation8 + $0x438] ss:$20 sps:$4 sm:$0xff]   ;;  %v13529_v32 = vld [vmem:[#allocation8 + $0x7fc] ss:$20 sps:$4 sm:$0xff]  }
 0x46f   :  { %9764 = vmatprep.subr.bf16.mxu1 %v13364_v53  ;;  %v13454_v55 = vld [vmem:[#allocation8 + $0x5a4] ss:$20 sps:$4 sm:$0xff]  }
 0x470   :  { %v7053_v53 = vadd.f32 %v14523_v35, %v7010_v0  ;;  %v13430_v35 = vld [vmem:[#allocation8 + $0x414] ss:$20 sps:$4 sm:$0xff]   ;;  %v13523_v23 = vld [vmem:[#allocation8 + $0x824] ss:$20 sps:$4 sm:$0xff]  }
 0x471   :  { %9722 = vmatpush1.bf16.msra.mxu0 %v13359_v31  ;;  %v13421_v31 = vld [vmem:[#allocation8 + $0x1bc] ss:$20 sps:$4 sm:$0xff]   ;;  %v13455_v0 = vld [vmem:[#allocation8 + $0x578] ss:$20 sps:$4 sm:$0xff]  }
 0x472   :  { %9765 = vmatpush1.bf16.msra.mxu1 %v13362_v13  ;;  %9723 = vmatprep.subr.bf16.mxu0 %v13367_v11  ;;  %v7100_v13 = vadd.f32 %v14536_v51, %v7057_v6  ;;  %v13419_v11 = vld [vmem:[#allocation8 + $0x1b8] ss:$20 sps:$4 sm:$0xff]   ;;  %v13428_v51 = vld [vmem:[#allocation8 + $0x410] ss:$20 sps:$4 sm:$0xff]   ;;  %v13460_v6 = vld [vmem:[#allocation8 + $0x554] ss:$20 sps:$4 sm:$0xff]  }
 0x473   :  { %9766 = vmatprep.subr.bf16.mxu1 %v13370_v7  ;;  %v7096_v7 = vadd.f32 %v14527_v27, %v7053_v53  ;;  %v13436_v27 = vld [vmem:[#allocation8 + $0x3ec] ss:$20 sps:$4 sm:$0xff]   ;;  %v13535_v53 = vld [vmem:[#allocation8 + $0x7d4] ss:$20 sps:$4 sm:$0xff]  }
 0x475   :  { %9724 = vmatpush1.bf16.msra.mxu0 %v13365_v29  ;;  %v7143_v29 = vadd.f32 %v14554_v25, %v7100_v13  ;;  %v13541_v13 = vld [vmem:[#allocation8 + $0x7ac] ss:$20 sps:$4 sm:$0xff]  }
 0x476   :  { %9767 = vmatpush1.bf16.msra.mxu1 %v13368_v50  ;;  %9725 = vmatprep.subr.bf16.mxu0 %v13373_v16  ;;  %v13427_v50 = vld [vmem:[#allocation8 + $0x194] ss:$20 sps:$4 sm:$0xff]   ;;  %v7139_v16 = vadd.f32 %v14541_v56, %v7096_v7  ;;  %v13466_v7 = vld [vmem:[#allocation8 + $0x504] ss:$20 sps:$4 sm:$0xff]  }
 0x477   :  { %9768 = vmatprep.subr.bf16.mxu1 %v13376_v33  ;;  %v7228_v33 = vpop.f32.mrf.mxu0  ;;  %v13434_v56 = vld [vmem:[#allocation8 + $0x3e8] ss:$20 sps:$4 sm:$0xff]  }
 0x478   :  { %v7182_v25 = vadd.f32 %v14545_v21, %v7139_v16  ;;  %v13440_v21 = vld [vmem:[#allocation8 + $0x3c0] ss:$20 sps:$4 sm:$0xff]  }
 0x479   :  { %9726 = vmatpush1.bf16.msra.mxu0 %v13371_v36  ;;  %v13425_v36 = vld [vmem:[#allocation8 + $0x190] ss:$20 sps:$4 sm:$0xff]   ;;  %v13545_v16 = vld [vmem:[#allocation8 + $0x780] ss:$20 sps:$4 sm:$0xff]  }
 0x47a   :  { %9769 = vmatpush1.bf16.msra.mxu1 %v13374_v8  ;;  %9727 = vmatprep.subr.bf16.mxu0 %v13379_v3  ;;  %v7186_v8 = vadd.f32 %v14552_v4, %v7143_v29  ;;  %v13433_v3 = vld [vmem:[#allocation8 + $0x16c] ss:$20 sps:$4 sm:$0xff]   ;;  %v13442_v4 = vld [vmem:[#allocation8 + $0x3c4] ss:$20 sps:$4 sm:$0xff]   ;;  %v13539_v29 = vld [vmem:[#allocation8 + $0x7a8] ss:$20 sps:$4 sm:$0xff]  }
 0x47b   :  { %9770 = vmatprep.subr.bf16.mxu1 %v13382_v38 }
 0x47c   :  { %v7229_v38 = vadd.f32 %v7228_v33, %v7186_v8  ;;  %v13553_v33 = vld [vmem:[#allocation8 + $0x9dc] ss:$20 sps:$4 sm:$0xff]   ;;  %v13472_v8 = vld [vmem:[#allocation8 + $0x734] ss:$20 sps:$4 sm:$0xff]  }
 0x47d   :  { %9728 = vmatpush1.bf16.msra.mxu0 %v13377_v41  ;;  %v13431_v41 = vld [vmem:[#allocation8 + $0x168] ss:$20 sps:$4 sm:$0xff]  }
 0x47e   :  { %9771 = vmatpush1.bf16.msra.mxu1 %v13380_v49  ;;  %9729 = vmatprep.subr.bf16.mxu0 %v13385_v59  ;;  %v7225_v49 = vadd.f32 %v14562_v37, %v7182_v25  ;;  %v13439_v59 = vld [vmem:[#allocation8 + $0x144] ss:$20 sps:$4 sm:$0xff]   ;;  %v13475_v25 = vld [vmem:[#allocation8 + $0x70c] ss:$20 sps:$4 sm:$0xff]  }
 0x47f   :  { %9772 = vmatprep.subr.bf16.mxu1 %v13388_v30  ;;  %v7271_v30 = vpop.f32.mrf.mxu1  ;;  %v13443_v37 = vld [vmem:[#allocation8 + $0x618] ss:$20 sps:$4 sm:$0xff]  }
 0x481   :  { %9730 = vmatpush1.bf16.msra.mxu0 %v13383_v5  ;;  %v7272_v5 = vadd.f32 %v7271_v30, %v7229_v38  ;;  %v13557_v38 = vld [vmem:[#allocation8 + $0x9b0] ss:$20 sps:$4 sm:$0xff]  }
 0x482   :  { %9773 = vmatpush1.bf16.msra.mxu1 %v13386_v43  ;;  %9731 = vmatprep.subr.bf16.mxu0 %v13391_v47  ;;  %v13437_v43 = vld [vmem:[#allocation8 + $0x140] ss:$20 sps:$4 sm:$0xff]   ;;  %v14775_v47 = vld [vmem:[#allocation41_spill] sm:$0xff] }
 0x483   :  { %9774 = vmatprep.subr.bf16.mxu1 %v13394_v63  ;;  %v7268_v63 = vadd.f32 %v14775_v47, %v7225_v49  ;;  %v13473_v49 = vld [vmem:[#allocation8 + $0x708] ss:$20 sps:$4 sm:$0xff]   ;;  %v13571_v30 = vld [vmem:[#allocation8 + $0x964] ss:$20 sps:$4 sm:$0xff]  }
 0x484   :  { %v13577_v47 = vld [vmem:[#allocation8 + $0x93c] ss:$20 sps:$4 sm:$0xff]  }
 0x485   :  { %9732 = vmatpush1.bf16.msra.mxu0 %v13389_v17  ;;  %v13445_v17 = vld [vmem:[#allocation8 + $0x61c] ss:$20 sps:$4 sm:$0xff]  }
 0x486   :  { %9775 = vmatpush1.bf16.msra.mxu1 %v13392_v26  ;;  %9733 = vmatprep.subr.bf16.mxu0 %v13397_v28  ;;  %v13505_v26 = vld [vmem:[#allocation8 + $0x89c] ss:$20 sps:$4 sm:$0xff]   ;;  %v7631_v28 = vmax.f32 %v7272_v5, 0.0 }
 0x487   :  { %9776 = vmatprep.subr.bf16.mxu1 %v13400_v10  ;;  %v7623_v10 = vmax.f32 %v7268_v63, 0.0  ;;  %v13481_v5 = vld [vmem:[#allocation8 + $0x6bc] ss:$20 sps:$4 sm:$0xff]   ;;  %v13479_v63 = vld [vmem:[#allocation8 + $0x6b8] ss:$20 sps:$4 sm:$0xff]  }
 0x489   :  { %9734 = vmatpush2.bf16.msra.mxu0 %v13395_v22  ;;  %v13503_v22 = vld [vmem:[#allocation8 + $0x898] ss:$20 sps:$4 sm:$0xff]  }
 0x48a   :  { %9777 = vmatpush2.bf16.msra.mxu1 %v13398_v2  ;;  %9735 = vmatprep.subr.bf16.mxu0 %v13403_v52  ;;  %v14776_v2 = vld [vmem:[#allocation29_spill] sm:$0xff]  ;;  %v14635_v52 = vpack.c.bf16 %v7631_v28, %v7623_v10 }
 0x48b   :  { %9778 = vmatprep.subr.bf16.mxu1 %v13406_v34  ;;  %v13511_v34 = vld [vmem:[#allocation8 + $0x874] ss:$20 sps:$4 sm:$0xff]   ;;  %v13482_v28 = vld [vmem:[#allocation8 + $0x690] ss:$20 sps:$4 sm:$0xff]  }
 0x48c   :  { %v13581_v10 = vld [vmem:[#allocation8 + $0x910] ss:$20 sps:$4 sm:$0xff]  }
 0x48d   :  { %9736 = vmatpush2.bf16.msra.mxu0 %v13401_v54  ;;  %v13446_v54 = vld [vmem:[#allocation8 + $0x5f0] ss:$20 sps:$4 sm:$0xff]  }
 0x48e   :  { %9779 = vmatpush2.bf16.msra.mxu1 %v13404_v39  ;;  %9737 = vmatprep.subr.bf16.mxu0 %v13409_v44  ;;  %v13509_v39 = vld [vmem:[#allocation8 + $0x870] ss:$20 sps:$4 sm:$0xff]   ;;  %v13517_v44 = vld [vmem:[#allocation8 + $0x84c] ss:$20 sps:$4 sm:$0xff]  }
 0x48f   :  { %9780 = vmatprep.subr.bf16.mxu1 %v13412_v18  ;;  %v13449_v18 = vld [vmem:[#allocation8 + $0x5c8] ss:$20 sps:$4 sm:$0xff]  }
 0x491   :  { %9738 = vmatpush2.bf16.msra.mxu0 %v13407_v57  ;;  %v13515_v57 = vld [vmem:[#allocation8 + $0x848] ss:$20 sps:$4 sm:$0xff]  }
 0x492   :  { %9781 = vmatpush2.bf16.msra.mxu1 %v13410_v20  ;;  %9739 = vmatprep.subr.bf16.mxu0 %v13415_v24  ;;  %v13452_v20 = vld [vmem:[#allocation8 + $0x5a0] ss:$20 sps:$4 sm:$0xff]   ;;  %v13457_v24 = vld [vmem:[#allocation8 + $0x57c] ss:$20 sps:$4 sm:$0xff]  }
 0x493   :  { %9782 = vmatprep.subr.bf16.mxu1 %v13418_v1  ;;  %v13521_v1 = vld [vmem:[#allocation8 + $0x820] ss:$20 sps:$4 sm:$0xff]  }
 0x495   :  { %9740 = vmatpush2.bf16.msra.mxu0 %v13413_v60  ;;  %v13527_v60 = vld [vmem:[#allocation8 + $0x7f8] ss:$20 sps:$4 sm:$0xff]  }
 0x496   :  { %9783 = vmatpush2.bf16.msra.mxu1 %v13416_v19  ;;  %9741 = vmatprep.subr.bf16.mxu0 %v13421_v31  ;;  %v13458_v19 = vld [vmem:[#allocation8 + $0x550] ss:$20 sps:$4 sm:$0xff]   ;;  %v13463_v31 = vld [vmem:[#allocation8 + $0x52c] ss:$20 sps:$4 sm:$0xff]  }
 0x497   :  { %9784 = vmatprep.subr.bf16.mxu1 %v13424_v58  ;;  %v13533_v58 = vld [vmem:[#allocation8 + $0x7d0] ss:$20 sps:$4 sm:$0xff]  }
 0x499   :  { %9742 = vmatpush2.bf16.msra.mxu0 %v13419_v11  ;;  %v13461_v11 = vld [vmem:[#allocation8 + $0x528] ss:$20 sps:$4 sm:$0xff]  }
 0x49a   :  { %9785 = vmatpush2.bf16.msra.mxu1 %v13422_v61  ;;  %9743 = vmatprep.subr.bf16.mxu0 %v13427_v50  ;;  %v13547_v61 = vld [vmem:[#allocation8 + $0x784] ss:$20 sps:$4 sm:$0xff]   ;;  %v13464_v50 = vld [vmem:[#allocation8 + $0x500] ss:$20 sps:$4 sm:$0xff]  }
 0x49b   :  { %9786 = vmatprep.subr.bf16.mxu1 %v13430_v35  ;;  %v13469_v35 = vld [vmem:[#allocation8 + $0x75c] ss:$20 sps:$4 sm:$0xff]  }
 0x49d   :  { %9744 = vmatpush2.bf16.msra.mxu0 %v13425_v36  ;;  %v13467_v36 = vld [vmem:[#allocation8 + $0x758] ss:$20 sps:$4 sm:$0xff]  }
 0x49e   :  { %9787 = vmatpush2.bf16.msra.mxu1 %v13428_v51  ;;  %9745 = vmatprep.subr.bf16.mxu0 %v13433_v3  ;;  %v13551_v51 = vld [vmem:[#allocation8 + $0x9d8] ss:$20 sps:$4 sm:$0xff]   ;;  %v13559_v3 = vld [vmem:[#allocation8 + $0x9b4] ss:$20 sps:$4 sm:$0xff]  }
 0x49f   :  { %9788 = vmatprep.subr.bf16.mxu1 %v13436_v27  ;;  %v13470_v27 = vld [vmem:[#allocation8 + $0x730] ss:$20 sps:$4 sm:$0xff]  }
 0x4a1   :  { %9746 = vmatpush2.bf16.msra.mxu0 %v13431_v41  ;;  %v13565_v41 = vld [vmem:[#allocation8 + $0x98c] ss:$20 sps:$4 sm:$0xff]  }
 0x4a2   :  { %9789 = vmatpush2.bf16.msra.mxu1 %v13434_v56  ;;  %9747 = vmatprep.subr.bf16.mxu0 %v13439_v59  ;;  %v13478_v56 = vld [vmem:[#allocation8 + $0x6e4] ss:$20 sps:$4 sm:$0xff]   ;;  %v13563_v59 = vld [vmem:[#allocation8 + $0x988] ss:$20 sps:$4 sm:$0xff]  }
 0x4a3   :  { %9790 = vmatprep.subr.bf16.mxu1 %v13442_v4  ;;  %v13476_v4 = vld [vmem:[#allocation8 + $0x6e0] ss:$20 sps:$4 sm:$0xff]  }
 0x4a5   :  { %9748 = vmatpush2.bf16.msra.mxu0 %v13437_v43  ;;  %v13569_v43 = vld [vmem:[#allocation8 + $0x960] ss:$20 sps:$4 sm:$0xff]  }
 0x4a6   :  { %9791 = vmatpush2.bf16.msra.mxu1 %v13440_v21  ;;  %9803 = vmatprep.subr.bf16.mxu0 %v13445_v17  ;;  %v13484_v21 = vld [vmem:[#allocation8 + $0x694] ss:$20 sps:$4 sm:$0xff]   ;;  %v13575_v17 = vld [vmem:[#allocation8 + $0x938] ss:$20 sps:$4 sm:$0xff]  }
 0x4a7   :  { %9846 = vmatprep.subr.bf16.mxu1 %v13505_v26  ;;  %v13583_v26 = vld [vmem:[#allocation8 + $0x914] ss:$20 sps:$4 sm:$0xff]  }
 0x4a8   :  { %9750 = vmatmul.mubr.bf16.vlgmr.msra.gmra.mxu0 %v14776_v2 }
 0x4a9   :  { %9793 = vmatmul.mubr.bf16.vlgmr.msra.gmra.mxu1 %v14777_v48  ;;  %9804 = vmatpush1.bf16.msra.mxu0 %v13443_v37  ;;  %v13487_v37 = vld [vmem:[#allocation8 + $0x66c] ss:$20 sps:$4 sm:$0xff]  }
 0x4aa   :  { %9835 = vmatprep.mubr.bf16.mxu0 %v14635_v52  ;;  %9805 = vmatprep.subr.bf16.mxu0 %v13448_v9  ;;  %v13589_v9 = vld [vmem:[#allocation8 + $0x8ec] ss:$20 sps:$4 sm:$0xff]  }
 0x4ab   :  { %9847 = vmatpush1.bf16.msra.mxu1 %v13503_v22  ;;  %v13485_v22 = vld [vmem:[#allocation8 + $0x668] ss:$20 sps:$4 sm:$0xff]  }
 0x4ac   :  { %9848 = vmatprep.subr.bf16.mxu1 %v13511_v34  ;;  %v13490_v34 = vld [vmem:[#allocation8 + $0x644] ss:$20 sps:$4 sm:$0xff]  }
 0x4ad   :  { %9806 = vmatpush1.bf16.msra.mxu0 %v13446_v54  ;;  %v13587_v54 = vld [vmem:[#allocation8 + $0x8e8] ss:$20 sps:$4 sm:$0xff]  }
 0x4ae   :  { %9807 = vmatprep.subr.bf16.mxu0 %v13451_v42  ;;  %v13595_v42 = vld [vmem:[#allocation8 + $0x8c4] ss:$20 sps:$4 sm:$0xff]  }
 0x4af   :  { %9849 = vmatpush1.bf16.msra.mxu1 %v13509_v39  ;;  %v13488_v39 = vld [vmem:[#allocation8 + $0x640] ss:$20 sps:$4 sm:$0xff]  }
 0x4b0   :  { %9850 = vmatprep.subr.bf16.mxu1 %v13517_v44  ;;  %v13493_v44 = vld [vmem:[#allocation8 + $0x124] ss:$20 sps:$4 sm:$0xff]  }
 0x4b1   :  { %9808 = vmatpush1.bf16.msra.mxu0 %v13449_v18  ;;  %v13593_v18 = vld [vmem:[#allocation8 + $0x8c0] ss:$20 sps:$4 sm:$0xff]  }
 0x4b2   :  { %9809 = vmatprep.subr.bf16.mxu0 %v13454_v55  ;;  %v13601_v55 = vld [vmem:[#allocation8 + $0x3a4] ss:$20 sps:$4 sm:$0xff]  }
 0x4b3   :  { %9851 = vmatpush1.bf16.msra.mxu1 %v13515_v57  ;;  %v13491_v57 = vld [vmem:[#allocation8 + $0x120] ss:$20 sps:$4 sm:$0xff]  }
 0x4b4   :  { %9852 = vmatprep.subr.bf16.mxu1 %v13523_v23  ;;  %v13496_v23 = vld [vmem:[#allocation8 + $0xfc] ss:$20 sps:$4 sm:$0xff]  }
 0x4b5   :  { %9810 = vmatpush1.bf16.msra.mxu0 %v13452_v20  ;;  %v13494_v20 = vld [vmem:[#allocation8 + $0xf8] ss:$20 sps:$4 sm:$0xff]  }
 0x4b6   :  { %9811 = vmatprep.subr.bf16.mxu0 %v13457_v24  ;;  %v13499_v24 = vld [vmem:[#allocation8 + $0xd4] ss:$20 sps:$4 sm:$0xff]  }
 0x4b7   :  { %9853 = vmatpush1.bf16.msra.mxu1 %v13521_v1  ;;  %v13497_v1 = vld [vmem:[#allocation8 + $0xd0] ss:$20 sps:$4 sm:$0xff]  }
 0x4b8   :  { %9854 = vmatprep.subr.bf16.mxu1 %v13529_v32  ;;  %v13502_v32 = vld [vmem:[#allocation8 + $0xac] ss:$20 sps:$4 sm:$0xff]  }
 0x4b9   :  { %9812 = vmatpush1.bf16.msra.mxu0 %v13455_v0  ;;  %v13500_v0 = vld [vmem:[#allocation8 + $0xa8] ss:$20 sps:$4 sm:$0xff]  }
 0x4ba   :  { %9813 = vmatprep.subr.bf16.mxu0 %v13460_v6  ;;  %v13508_v6 = vld [vmem:[#allocation8 + $0x84] ss:$20 sps:$4 sm:$0xff]  }
 0x4bb   :  { %9855 = vmatpush1.bf16.msra.mxu1 %v13527_v60  ;;  %v13506_v60 = vld [vmem:[#allocation8 + $0x80] ss:$20 sps:$4 sm:$0xff]  }
 0x4bc   :  { %9856 = vmatprep.subr.bf16.mxu1 %v13535_v53  ;;  %v13514_v53 = vld [vmem:[#allocation8 + $0x5c] ss:$20 sps:$4 sm:$0xff]  }
 0x4bd   :  { %9814 = vmatpush1.bf16.msra.mxu0 %v13458_v19  ;;  %v13512_v19 = vld [vmem:[#allocation8 + $0x58] ss:$20 sps:$4 sm:$0xff]  }
 0x4be   :  { %9815 = vmatprep.subr.bf16.mxu0 %v13463_v31  ;;  %v13520_v31 = vld [vmem:[#allocation8 + $0x34] ss:$20 sps:$4 sm:$0xff]  }
 0x4bf   :  { %9857 = vmatpush1.bf16.msra.mxu1 %v13533_v58  ;;  %v13518_v58 = vld [vmem:[#allocation8 + $0x30] ss:$20 sps:$4 sm:$0xff]  }
 0x4c0   :  { %9858 = vmatprep.subr.bf16.mxu1 %v13541_v13  ;;  %v14641_v13 = vpop.f32.mrf.mxu0 }
 0x4c1   :  { %9816 = vmatpush1.bf16.msra.mxu0 %v13461_v11  ;;  %v13526_v11 = vld [vmem:[#allocation8 + $0xc] ss:$20 sps:$4 sm:$0xff]  }
 0x4c2   :  { %9817 = vmatprep.subr.bf16.mxu0 %v13466_v7  ;;  %v7308_v7 = vpop.f32.mrf.mxu1 }
 0x4c3   :  { %9859 = vmatpush1.bf16.msra.mxu1 %v13539_v29  ;;  %v13524_v29 = vld [vmem:[#allocation8 + $0x8] ss:$20 sps:$4 sm:$0xff]  }
 0x4c4   :  { %9860 = vmatprep.subr.bf16.mxu1 %v13547_v61  ;;  %v7353_v61 = vpop.f32.mrf.mxu0 }
 0x4c5   :  { %9818 = vmatpush1.bf16.msra.mxu0 %v13464_v50  ;;  %v13532_v50 = vld [vmem:[#allocation8 + $0x264] ss:$20 sps:$4 sm:$0xff]  }
 0x4c6   :  { %9819 = vmatprep.subr.bf16.mxu0 %v13469_v35  ;;  %v7310_v35 = vpop.f32.mrf.mxu1 }
 0x4c7   :  { %9861 = vmatpush1.bf16.msra.mxu1 %v13545_v16  ;;  %v13530_v16 = vld [vmem:[#allocation8 + $0x260] ss:$20 sps:$4 sm:$0xff]  }
 0x4c8   :  { %9862 = vmatprep.subr.bf16.mxu1 %v13553_v33  ;;  %v7355_v33 = vpop.f32.mrf.mxu0 }
 0x4c9   :  { %9820 = vmatpush2.bf16.msra.mxu0 %v13467_v36  ;;  %v13538_v36 = vld [vmem:[#allocation8 + $0x23c] ss:$20 sps:$4 sm:$0xff]  }
 0x4ca   :  { %9821 = vmatprep.subr.bf16.mxu0 %v13472_v8  ;;  %v7312_v8 = vpop.f32.mrf.mxu1 }
 0x4cb   :  { %9863 = vmatpush2.bf16.msra.mxu1 %v13551_v51  ;;  %v13536_v51 = vld [vmem:[#allocation8 + $0x238] ss:$20 sps:$4 sm:$0xff]  }
 0x4cc   :  { %9864 = vmatprep.subr.bf16.mxu1 %v13559_v3  ;;  %v7357_v3 = vpop.f32.mrf.mxu0 }
 0x4cd   :  { %9822 = vmatpush2.bf16.msra.mxu0 %v13470_v27  ;;  %v13544_v27 = vld [vmem:[#allocation8 + $0x214] ss:$20 sps:$4 sm:$0xff]  }
 0x4ce   :  { %9823 = vmatprep.subr.bf16.mxu0 %v13475_v25  ;;  %v7314_v25 = vpop.f32.mrf.mxu1 }
 0x4cf   :  { %9865 = vmatpush2.bf16.msra.mxu1 %v13557_v38  ;;  %v7437_v38 = vpop.f32.mrf.mxu0 }
 0x4d0   :  { %9866 = vmatprep.subr.bf16.mxu1 %v13565_v41  ;;  %v7394_v41 = vpop.f32.mrf.mxu1 }
 0x4d1   :  { %9824 = vmatpush2.bf16.msra.mxu0 %v13473_v49  ;;  %v13542_v49 = vld [vmem:[#allocation8 + $0x210] ss:$20 sps:$4 sm:$0xff]  }
 0x4d2   :  { %9825 = vmatprep.subr.bf16.mxu0 %v13478_v56  ;;  %v13550_v56 = vld [vmem:[#allocation8 + $0x1ec] ss:$20 sps:$4 sm:$0xff]  }
 0x4d3   :  { %9867 = vmatpush2.bf16.msra.mxu1 %v13563_v59  ;;  %v7439_v59 = vpop.f32.mrf.mxu0 }
 0x4d4   :  { %9868 = vmatprep.subr.bf16.mxu1 %v13571_v30  ;;  %v7396_v30 = vpop.f32.mrf.mxu1 }
 0x4d5   :  { %9826 = vmatpush2.bf16.msra.mxu0 %v13476_v4  ;;  %v13548_v4 = vld [vmem:[#allocation8 + $0x1e8] ss:$20 sps:$4 sm:$0xff]  }
 0x4d6   :  { %9827 = vmatprep.subr.bf16.mxu0 %v13481_v5  ;;  %v13556_v5 = vld [vmem:[#allocation8 + $0x1c4] ss:$20 sps:$4 sm:$0xff]  }
 0x4d7   :  { %9869 = vmatpush2.bf16.msra.mxu1 %v13569_v43  ;;  %v7441_v43 = vpop.f32.mrf.mxu0 }
 0x4d8   :  { %9870 = vmatprep.subr.bf16.mxu1 %v13577_v47  ;;  %v7398_v47 = vpop.f32.mrf.mxu1 }
 0x4d9   :  { %9828 = vmatpush2.bf16.msra.mxu0 %v13479_v63  ;;  %v13554_v63 = vld [vmem:[#allocation8 + $0x1c0] ss:$20 sps:$4 sm:$0xff]  }
 0x4da   :  { %9829 = vmatprep.subr.bf16.mxu0 %v13484_v21  ;;  %v13562_v21 = vld [vmem:[#allocation8 + $0x19c] ss:$20 sps:$4 sm:$0xff]  }
 0x4db   :  { %9871 = vmatpush2.bf16.msra.mxu1 %v13575_v17  ;;  %v1228_v17 = vsub.s32 7, %v14350_v45 }
 0x4dc   :  { %9872 = vmatprep.subr.bf16.mxu1 %v13583_v26  ;;  %v7443_v26 = vpop.f32.mrf.mxu0 }
 0x4dd   :  { %9830 = vmatpush2.bf16.msra.mxu0 %v13482_v28  ;;  %v1224_v28 = vsub.s32 6, %v14350_v45 }
 0x4de   :  { %9831 = vmatprep.subr.bf16.mxu0 %v13487_v37  ;;  %v7400_v37 = vpop.f32.mrf.mxu1 }
 0x4df   :  { %9873 = vmatpush2.bf16.msra.mxu1 %v13581_v10  ;;  %v13560_v10 = vld [vmem:[#allocation8 + $0x198] ss:$20 sps:$4 sm:$0xff]  }
 0x4e0   :  { %9874 = vmatprep.subr.bf16.mxu1 %v13589_v9 }
 0x4e1   :  { %9832 = vmatpush2.bf16.msra.mxu0 %v13485_v22  ;;  %v13568_v22 = vld [vmem:[#allocation8 + $0x174] ss:$20 sps:$4 sm:$0xff]  }
 0x4e2   :  { %9833 = vmatprep.subr.bf16.mxu0 %v13490_v34 }
 0x4e3   :  { %9875 = vmatpush2.bf16.msra.mxu1 %v13587_v54  ;;  %v1229_v54 = vrot.slane %v14570_v40, %v1228_v17  ;;  %v13590_v17 = vld [vmem:[#allocation8 + $0x5d0] ss:$20 sps:$4 sm:$0xff]  }
 0x4e4   :  { %9876 = vmatprep.subr.bf16.mxu1 %v13595_v42  ;;  %v1225_v42 = vrot.slane %v14570_v40, %v1224_v28 }
 0x4e5   :  { %9834 = vmatpush2.bf16.msra.mxu0 %v13488_v39  ;;  %v13566_v39 = vld [vmem:[#allocation8 + $0x170] ss:$20 sps:$4 sm:$0xff]  }
 0x4e6   :  { %9889 = vmatprep.subr.bf16.mxu0 %v13493_v44 }
 0x4e7   :  { %9877 = vmatpush2.bf16.msra.mxu1 %v13593_v18  ;;  %v13574_v18 = vld [vmem:[#allocation8 + $0x14c] ss:$20 sps:$4 sm:$0xff]  }
 0x4e8   :  { %9836 = vmatmul.mubr.bf16.vlgmr.msra.gmra.mxu0 %v14565_v14  ;;  %9932 = vmatprep.subr.bf16.mxu1 %v13601_v55 }
 0x4e9   :  { %9890 = vmatpush1.bf16.msra.mxu0 %v13491_v57  ;;  %9921 = vmatprep.mubr.bf16.mxu0 %v14611_v12  ;;  %v7480_v34 = vpop.f32.mrf.mxu1  ;;  %v7311_v57 = vadd.f32 %v7310_v35, %v1229_v54  ;;  %v13586_v35 = vld [vmem:[#allocation8 + $0x5fc] ss:$20 sps:$4 sm:$0xff]  }
 0x4ea   :  { %9891 = vmatprep.subr.bf16.mxu0 %v13496_v23  ;;  %v7309_v23 = vadd.f32 %v7308_v7, %v1225_v42 }
 0x4eb   :  { %v7482_v55 = vpop.f32.mrf.mxu1 }
 0x4ed   :  { %9892 = vmatpush1.bf16.msra.mxu0 %v13494_v20  ;;  %v13572_v20 = vld [vmem:[#allocation8 + $0x148] ss:$20 sps:$4 sm:$0xff]  }
 0x4ee   :  { %9893 = vmatprep.subr.bf16.mxu0 %v13499_v24  ;;  %v7313_v24 = vadd.f32 %v7312_v8, %v1225_v42 }
 0x4f0   :  { %v7356_v40 = vadd.f32 %v7355_v33, %v7313_v24  ;;  %v13602_v24 = vld [vmem:[#allocation8 + $0x580] ss:$20 sps:$4 sm:$0xff]  }
 0x4f1   :  { %9894 = vmatpush1.bf16.msra.mxu0 %v13497_v1  ;;  %v7354_v1 = vadd.f32 %v7353_v61, %v7311_v57 }
 0x4f2   :  { %9895 = vmatprep.subr.bf16.mxu0 %v13502_v32 }
 0x4f4   :  { %v7523_v9 = vpop.f32.mrf.mxu0 }
 0x4f5   :  { %9896 = vmatpush1.bf16.msra.mxu0 %v13500_v0  ;;  %v13580_v0 = vld [vmem:[#allocation8 + $0x624] ss:$20 sps:$4 sm:$0xff]  }
 0x4f6   :  { %9897 = vmatprep.subr.bf16.mxu0 %v13508_v6  ;;  %v7525_v44 = vpop.f32.mrf.mxu0  ;;  %v7352_v6 = vadd.f32 %v14641_v13, %v7309_v23 }
 0x4f8   :  { %v7527_v32 = vpop.f32.mrf.mxu0 }
 0x4f9   :  { %9898 = vmatpush1.bf16.msra.mxu0 %v13506_v60  ;;  %v7484_v60 = vpop.f32.mrf.mxu1 }
 0x4fa   :  { %9899 = vmatprep.subr.bf16.mxu0 %v13514_v53  ;;  %v7315_v53 = vadd.f32 %v7314_v25, %v1229_v54  ;;  %v7529_v7 = vpop.f32.mrf.mxu0  ;;  %v13584_v25 = vld [vmem:[#allocation8 + $0x5f8] ss:$20 sps:$4 sm:$0xff]  }
 0x4fb   :  { %v7486_v61 = vpop.f32.mrf.mxu1 }
 0x4fd   :  { %9900 = vmatpush1.bf16.msra.mxu0 %v13512_v19  ;;  %v7397_v19 = vadd.f32 %v7396_v30, %v7354_v1 }
 0x4fe   :  { %9901 = vmatprep.subr.bf16.mxu0 %v13520_v31  ;;  %v7395_v31 = vadd.f32 %v7394_v41, %v7352_v6  ;;  %v13607_v6 = vld [vmem:[#allocation8 + $0x37c] ss:$20 sps:$4 sm:$0xff]  }
 0x501   :  { %9902 = vmatpush1.bf16.msra.mxu0 %v13518_v58  ;;  %v13578_v58 = vld [vmem:[#allocation8 + $0x620] ss:$20 sps:$4 sm:$0xff]  }
 0x502   :  { %9903 = vmatprep.subr.bf16.mxu0 %v13526_v11  ;;  %v7358_v11 = vadd.f32 %v7357_v3, %v7315_v53  ;;  %v13608_v53 = vld [vmem:[#allocation8 + $0x558] ss:$20 sps:$4 sm:$0xff]  }
 0x505   :  { %9904 = vmatpush1.bf16.msra.mxu0 %v13524_v29  ;;  %v7399_v29 = vadd.f32 %v7398_v47, %v7356_v40  ;;  %v13605_v40 = vld [vmem:[#allocation8 + $0x378] ss:$20 sps:$4 sm:$0xff]  }
 0x506   :  { %9905 = vmatprep.subr.bf16.mxu0 %v13532_v50  ;;  %v7440_v50 = vadd.f32 %v7439_v59, %v7397_v19  ;;  %v13592_v59 = vld [vmem:[#allocation8 + $0x5d4] ss:$20 sps:$4 sm:$0xff]  }
 0x507   :  { %v7442_v8 = vadd.f32 %v7441_v43, %v7399_v29  ;;  %v13616_v19 = vld [vmem:[#allocation8 + $0x534] ss:$20 sps:$4 sm:$0xff]   ;;  %v13622_v29 = vld [vmem:[#allocation8 + $0x50c] ss:$20 sps:$4 sm:$0xff]  }
 0x509   :  { %9906 = vmatpush2.bf16.msra.mxu0 %v13530_v16  ;;  %v7438_v16 = vadd.f32 %v7437_v38, %v7395_v31  ;;  %v7485_v41 = vadd.f32 %v7484_v60, %v7442_v8  ;;  %v13610_v60 = vld [vmem:[#allocation8 + $0x55c] ss:$20 sps:$4 sm:$0xff]   ;;  %v13613_v31 = vld [vmem:[#allocation8 + $0x354] ss:$20 sps:$4 sm:$0xff]  }
 0x50a   :  { %9907 = vmatprep.subr.bf16.mxu0 %v13538_v36  ;;  %v7401_v36 = vadd.f32 %v7400_v37, %v7358_v11  ;;  %v13611_v11 = vld [vmem:[#allocation8 + $0x350] ss:$20 sps:$4 sm:$0xff]   ;;  %v13623_v8 = vld [vmem:[#allocation8 + $0x300] ss:$20 sps:$4 sm:$0xff]  }
 0x50b   :  { %v7481_v13 = vadd.f32 %v7480_v34, %v7438_v16  ;;  %v13628_v16 = vld [vmem:[#allocation8 + $0x764] ss:$20 sps:$4 sm:$0xff]  }
 0x50c   :  { %v7444_v3 = vadd.f32 %v7443_v26, %v7401_v36  ;;  %v13626_v36 = vld [vmem:[#allocation8 + $0x760] ss:$20 sps:$4 sm:$0xff]  }
 0x50d   :  { %9908 = vmatpush2.bf16.msra.mxu0 %v13536_v51  ;;  %v7483_v51 = vadd.f32 %v7482_v55, %v7440_v50  ;;  %v7524_v38 = vadd.f32 %v7523_v9, %v7481_v13  ;;  %v13596_v9 = vld [vmem:[#allocation8 + $0x5a8] ss:$20 sps:$4 sm:$0xff]   ;;  %v13619_v50 = vld [vmem:[#allocation8 + $0x32c] ss:$20 sps:$4 sm:$0xff]  }
 0x50e   :  { %9909 = vmatprep.subr.bf16.mxu0 %v13544_v27  ;;  %v13632_v13 = vld [vmem:[#allocation8 + $0x738] ss:$20 sps:$4 sm:$0xff]  }
 0x511   :  { %9910 = vmatpush2.bf16.msra.mxu0 %v13542_v49  ;;  %v7526_v49 = vadd.f32 %v7525_v44, %v7483_v51  ;;  %v13634_v51 = vld [vmem:[#allocation8 + $0x73c] ss:$20 sps:$4 sm:$0xff]  }
 0x512   :  { %9911 = vmatprep.subr.bf16.mxu0 %v13550_v56 }
 0x515   :  { %9912 = vmatpush2.bf16.msra.mxu0 %v13548_v4  ;;  %v7487_v4 = vadd.f32 %v7486_v61, %v7444_v3  ;;  %v13625_v61 = vld [vmem:[#allocation8 + $0x304] ss:$20 sps:$4 sm:$0xff]   ;;  %v13637_v3 = vld [vmem:[#allocation8 + $0x2b4] ss:$20 sps:$4 sm:$0xff]  }
 0x516   :  { %9913 = vmatprep.subr.bf16.mxu0 %v13556_v5  ;;  %v7528_v5 = vadd.f32 %v7527_v32, %v7485_v41  ;;  %v13599_v32 = vld [vmem:[#allocation8 + $0x3a0] ss:$20 sps:$4 sm:$0xff]   ;;  %v13638_v41 = vld [vmem:[#allocation8 + $0x710] ss:$20 sps:$4 sm:$0xff]  }
 0x517   :  { %v7530_v28 = vadd.f32 %v7529_v7, %v7487_v4  ;;  %v13620_v7 = vld [vmem:[#allocation8 + $0x508] ss:$20 sps:$4 sm:$0xff]   ;;  %v13652_v4 = vld [vmem:[#allocation8 + $0x6c4] ss:$20 sps:$4 sm:$0xff]  }
 0x519   :  { %9914 = vmatpush2.bf16.msra.mxu0 %v13554_v63 }
 0x51a   :  { %9915 = vmatprep.subr.bf16.mxu0 %v13562_v21 }
 0x51d   :  { %9916 = vmatpush2.bf16.msra.mxu0 %v13560_v10  ;;  %v13598_v10 = vld [vmem:[#allocation8 + $0x5ac] ss:$20 sps:$4 sm:$0xff]  }
 0x51e   :  { %9917 = vmatprep.subr.bf16.mxu0 %v13568_v22 }
 0x521   :  { %9918 = vmatpush2.bf16.msra.mxu0 %v13566_v39 }
 0x522   :  { %9919 = vmatprep.subr.bf16.mxu0 %v13574_v18  ;;  %v13604_v18 = vld [vmem:[#allocation8 + $0x584] ss:$20 sps:$4 sm:$0xff]  }
 0x525   :  { %9920 = vmatpush2.bf16.msra.mxu0 %v13572_v20 }
 0x526   :  { %9975 = vmatprep.subr.bf16.mxu0 %v13580_v0 }
 0x528   :  { %v7609_v27 = vpop.f32.mrf.mxu0  ;;  %9922 = vmatmul.mubr.bf16.vlgmr.msra.gmra.mxu0 %v14776_v2 }
 0x529   :  { %v7566_v33 = vpop.f32.mrf.mxu1  ;;  %9976 = vmatpush1.bf16.msra.mxu0 %v13578_v58  ;;  %10007 = vmatprep.mubr.bf16.mxu0 %v14635_v52  ;;  %v13614_v58 = vld [vmem:[#allocation8 + $0x530] ss:$20 sps:$4 sm:$0xff]  }
 0x52a   :  { %v7611_v56 = vpop.f32.mrf.mxu0  ;;  %9977 = vmatprep.subr.bf16.mxu0 %v13586_v35  ;;  %v7567_v47 = vadd.f32 %v7566_v33, %v7524_v38  ;;  %v13617_v35 = vld [vmem:[#allocation8 + $0x328] ss:$20 sps:$4 sm:$0xff]   ;;  %v13629_v33 = vld [vmem:[#allocation8 + $0x2d8] ss:$20 sps:$4 sm:$0xff]  }
 0x52b   :  { %v7568_v30 = vpop.f32.mrf.mxu1  ;;  %v13644_v38 = vld [vmem:[#allocation8 + $0x6e8] ss:$20 sps:$4 sm:$0xff]  }
 0x52c   :  { %v7569_v43 = vadd.f32 %v7568_v30, %v7526_v49  ;;  %v7613_v21 = vpop.f32.mrf.mxu0  ;;  %v7610_v42 = vadd.f32 %v7609_v27, %v7567_v47  ;;  %v13631_v27 = vld [vmem:[#allocation8 + $0x2dc] ss:$20 sps:$4 sm:$0xff]   ;;  %v13647_v47 = vld [vmem:[#allocation8 + $0x4e0] ss:$20 sps:$4 sm:$0xff]  }
 0x52d   :  { %v7570_v63 = vpop.f32.mrf.mxu1  ;;  %9978 = vmatpush1.bf16.msra.mxu0 %v13584_v25  ;;  %v13640_v25 = vld [vmem:[#allocation8 + $0x714] ss:$20 sps:$4 sm:$0xff]   ;;  %v13635_v49 = vld [vmem:[#allocation8 + $0x2b0] ss:$20 sps:$4 sm:$0xff]  }
 0x52e   :  { %v7571_v37 = vadd.f32 %v7570_v63, %v7528_v5  ;;  %9979 = vmatprep.subr.bf16.mxu0 %v13592_v59  ;;  %v7612_v22 = vadd.f32 %v7611_v56, %v7569_v43  ;;  %v7615_v39 = vpop.f32.mrf.mxu0  ;;  %v7624_v20 = vmax.f32 %v7610_v42, 0.0  ;;  %v13646_v56 = vld [vmem:[#allocation8 + $0x6ec] ss:$20 sps:$4 sm:$0xff]   ;;  %v13641_v30 = vld [vmem:[#allocation8 + $0x288] ss:$20 sps:$4 sm:$0xff]  }
 0x52f   :  { %v7572_v26 = vpop.f32.mrf.mxu1  ;;  %v13643_v59 = vld [vmem:[#allocation8 + $0x28c] ss:$20 sps:$4 sm:$0xff]   ;;  %v13649_v5 = vld [vmem:[#allocation8 + $0x4e4] ss:$20 sps:$4 sm:$0xff]   ;;  %v13658_v63 = vld [vmem:[#allocation8 + $0x69c] ss:$20 sps:$4 sm:$0xff]  }
 0x530   :  { %v7614_v34 = vadd.f32 %v7613_v21, %v7571_v37  ;;  %v7573_v54 = vadd.f32 %v7572_v26, %v7530_v28  ;;  %v7625_v57 = vmax.f32 %v7612_v22, 0.0  ;;  %v13650_v43 = vld [vmem:[#allocation8 + $0x6c0] ss:$20 sps:$4 sm:$0xff]   ;;  %v13655_v21 = vld [vmem:[#allocation8 + $0x4bc] ss:$20 sps:$4 sm:$0xff]  }
 0x531   :  { %9980 = vmatpush1.bf16.msra.mxu0 %v13590_v17  ;;  %v13656_v17 = vld [vmem:[#allocation8 + $0x698] ss:$20 sps:$4 sm:$0xff]   ;;  %v13664_v37 = vld [vmem:[#allocation8 + $0x674] ss:$20 sps:$4 sm:$0xff]   ;;  %v13662_v26 = vld [vmem:[#allocation8 + $0x670] ss:$20 sps:$4 sm:$0xff]  }
 0x532   :  { %v7616_v44 = vadd.f32 %v7615_v39, %v7573_v54  ;;  %9981 = vmatprep.subr.bf16.mxu0 %v13598_v10  ;;  %v7632_v55 = vmax.f32 %v7614_v34, 0.0  ;;  %v13653_v28 = vld [vmem:[#allocation8 + $0x4b8] ss:$20 sps:$4 sm:$0xff]   ;;  %v13661_v10 = vld [vmem:[#allocation8 + $0x494] ss:$20 sps:$4 sm:$0xff]  }
 0x533   :  { %v13659_v22 = vld [vmem:[#allocation8 + $0x490] ss:$20 sps:$4 sm:$0xff]   ;;  %v13670_v34 = vld [vmem:[#allocation8 + $0x64c] ss:$20 sps:$4 sm:$0xff]   ;;  %v13668_v42 = vld [vmem:[#allocation8 + $0x648] ss:$20 sps:$4 sm:$0xff]  }
 0x534   :  { %v7633_v23 = vmax.f32 %v7616_v44, 0.0  ;;  %v14652_v0 = vpack.c.bf16 %v7632_v55, %v7624_v20  ;;  %v13667_v54 = vld [vmem:[#allocation8 + $0x46c] ss:$20 sps:$4 sm:$0xff]   ;;  %v13665_v39 = vld [vmem:[#allocation8 + $0x468] ss:$20 sps:$4 sm:$0xff]  }
 0x535   :  { %9982 = vmatpush1.bf16.msra.mxu0 %v13596_v9  ;;  %v13674_v9 = vld [vmem:[#allocation8 + $0x268] ss:$20 sps:$4 sm:$0xff]   ;;  %v13673_v44 = vld [vmem:[#allocation8 + $0x444] ss:$20 sps:$4 sm:$0xff]   ;;  %v13671_v55 = vld [vmem:[#allocation8 + $0x440] ss:$20 sps:$4 sm:$0xff]  }
 0x536   :  { %v14650_v1 = vpack.c.bf16 %v7633_v23, %v7625_v57  ;;  %9983 = vmatprep.subr.bf16.mxu0 %v13604_v18  ;;  %v13675_v18 = vld [vmem:[#allocation8 + $0x128] ss:$20 sps:$4 sm:$0xff]   ;;  %v13679_v57 = vld [vmem:[#allocation8 + $0x240] ss:$20 sps:$4 sm:$0xff]  }
 0x537   :  { %v13678_v23 = vld [vmem:[#allocation8 + $0x41c] ss:$20 sps:$4 sm:$0xff]   ;;  %v13680_v20 = vld [vmem:[#allocation8 + $0x100] ss:$20 sps:$4 sm:$0xff]  }
 0x538   :  { %9878 = vmatprep.mubr.bf16.mxu1 %v14650_v1 }
 0x539   :  { %9879 = vmatmul.mubr.bf16.vlgmr.msra.gmra.mxu1 %v14652_v0  ;;  %9984 = vmatpush1.bf16.msra.mxu0 %v13602_v24  ;;  %v13676_v24 = vld [vmem:[#allocation8 + $0x418] ss:$20 sps:$4 sm:$0xff]  }
 0x53a   :  { %9933 = vmatpush1.bf16.msra.mxu1 %v13599_v32  ;;  %9964 = vmatprep.mubr.bf16.mxu1 %v14613_v15  ;;  %v13684_v32 = vld [vmem:[#allocation8 + $0x218] ss:$20 sps:$4 sm:$0xff]  }
 0x53b   :  { %9934 = vmatprep.subr.bf16.mxu1 %v13607_v6  ;;  %9985 = vmatprep.subr.bf16.mxu0 %v13610_v60  ;;  %v13683_v6 = vld [vmem:[#allocation8 + $0x3f4] ss:$20 sps:$4 sm:$0xff]   ;;  %v13685_v60 = vld [vmem:[#allocation8 + $0xd8] ss:$20 sps:$4 sm:$0xff]  }
 0x53d   :  { %9986 = vmatpush1.bf16.msra.mxu0 %v13608_v53  ;;  %v13681_v53 = vld [vmem:[#allocation8 + $0x3f0] ss:$20 sps:$4 sm:$0xff]  }
 0x53e   :  { %9935 = vmatpush1.bf16.msra.mxu1 %v13605_v40  ;;  %9987 = vmatprep.subr.bf16.mxu0 %v13616_v19  ;;  %v13689_v40 = vld [vmem:[#allocation8 + $0x1f0] ss:$20 sps:$4 sm:$0xff]   ;;  %v13688_v19 = vld [vmem:[#allocation8 + $0x3cc] ss:$20 sps:$4 sm:$0xff]  }
 0x53f   :  { %9936 = vmatprep.subr.bf16.mxu1 %v13613_v31  ;;  %v13690_v31 = vld [vmem:[#allocation8 + $0xb0] ss:$20 sps:$4 sm:$0xff]  }
 0x541   :  { %9988 = vmatpush1.bf16.msra.mxu0 %v13614_v58  ;;  %v13686_v58 = vld [vmem:[#allocation8 + $0x3c8] ss:$20 sps:$4 sm:$0xff]  }
 0x542   :  { %9937 = vmatpush1.bf16.msra.mxu1 %v13611_v11  ;;  %9989 = vmatprep.subr.bf16.mxu0 %v13622_v29  ;;  %v13693_v11 = vld [vmem:[#allocation8 + $0x8a4] ss:$20 sps:$4 sm:$0xff]   ;;  %v13695_v29 = vld [vmem:[#allocation8 + $0x88] ss:$20 sps:$4 sm:$0xff]  }
 0x543   :  { %9938 = vmatprep.subr.bf16.mxu1 %v13619_v50  ;;  %v13691_v50 = vld [vmem:[#allocation8 + $0x8a0] ss:$20 sps:$4 sm:$0xff]  }
 0x545   :  { %9990 = vmatpush1.bf16.msra.mxu0 %v13620_v7  ;;  %v13698_v7 = vld [vmem:[#allocation8 + $0x87c] ss:$20 sps:$4 sm:$0xff]  }
 0x546   :  { %9939 = vmatpush1.bf16.msra.mxu1 %v13617_v35  ;;  %9991 = vmatprep.subr.bf16.mxu0 %v13628_v16  ;;  %v13699_v35 = vld [vmem:[#allocation8 + $0x1a0] ss:$20 sps:$4 sm:$0xff]  }
 0x547   :  { %9940 = vmatprep.subr.bf16.mxu1 %v13625_v61  ;;  %v13700_v16 = vld [vmem:[#allocation8 + $0x60] ss:$20 sps:$4 sm:$0xff]   ;;  %v13696_v61 = vld [vmem:[#allocation8 + $0x878] ss:$20 sps:$4 sm:$0xff]  }
 0x549   :  { %9992 = vmatpush2.bf16.msra.mxu0 %v13626_v36  ;;  %v13704_v36 = vld [vmem:[#allocation8 + $0x178] ss:$20 sps:$4 sm:$0xff]  }
 0x54a   :  { %9941 = vmatpush1.bf16.msra.mxu1 %v13623_v8  ;;  %9993 = vmatprep.subr.bf16.mxu0 %v13634_v51  ;;  %v13703_v8 = vld [vmem:[#allocation8 + $0x854] ss:$20 sps:$4 sm:$0xff]   ;;  %v13705_v51 = vld [vmem:[#allocation8 + $0x38] ss:$20 sps:$4 sm:$0xff]  }
 0x54b   :  { %9942 = vmatprep.subr.bf16.mxu1 %v13631_v27  ;;  %v13701_v27 = vld [vmem:[#allocation8 + $0x850] ss:$20 sps:$4 sm:$0xff]  }
 0x54d   :  { %9994 = vmatpush2.bf16.msra.mxu0 %v13632_v13  ;;  %v13709_v13 = vld [vmem:[#allocation8 + $0x150] ss:$20 sps:$4 sm:$0xff]  }
 0x54e   :  { %9943 = vmatpush1.bf16.msra.mxu1 %v13629_v33  ;;  %9995 = vmatprep.subr.bf16.mxu0 %v13640_v25  ;;  %v13708_v33 = vld [vmem:[#allocation8 + $0x82c] ss:$20 sps:$4 sm:$0xff]   ;;  %v13710_v25 = vld [vmem:[#allocation8 + $0x10] ss:$20 sps:$4 sm:$0xff]  }
 0x54f   :  { %9944 = vmatprep.subr.bf16.mxu1 %v13637_v3  ;;  %v13706_v3 = vld [vmem:[#allocation8 + $0x828] ss:$20 sps:$4 sm:$0xff]  }
 0x551   :  { %9996 = vmatpush2.bf16.msra.mxu0 %v13638_v41  ;;  %v13714_v41 = vld [vmem:[#allocation8 + $0x768] ss:$20 sps:$4 sm:$0xff]  }
 0x552   :  { %9945 = vmatpush1.bf16.msra.mxu1 %v13635_v49  ;;  %9997 = vmatprep.subr.bf16.mxu0 %v13646_v56  ;;  %v13713_v49 = vld [vmem:[#allocation8 + $0x804] ss:$20 sps:$4 sm:$0xff]   ;;  %v13715_v56 = vld [vmem:[#allocation8 + $0x628] ss:$20 sps:$4 sm:$0xff]  }
 0x553   :  { %9946 = vmatprep.subr.bf16.mxu1 %v13643_v59  ;;  %v13711_v59 = vld [vmem:[#allocation8 + $0x800] ss:$20 sps:$4 sm:$0xff]  }
 0x555   :  { %9998 = vmatpush2.bf16.msra.mxu0 %v13644_v38  ;;  %v13719_v38 = vld [vmem:[#allocation8 + $0x740] ss:$20 sps:$4 sm:$0xff]  }
 0x556   :  { %9947 = vmatpush1.bf16.msra.mxu1 %v13641_v30  ;;  %9999 = vmatprep.subr.bf16.mxu0 %v13652_v4  ;;  %v13718_v30 = vld [vmem:[#allocation8 + $0x7dc] ss:$20 sps:$4 sm:$0xff]   ;;  %v13720_v4 = vld [vmem:[#allocation8 + $0x600] ss:$20 sps:$4 sm:$0xff]  }
 0x557   :  { %9948 = vmatprep.subr.bf16.mxu1 %v13649_v5  ;;  %v13716_v5 = vld [vmem:[#allocation8 + $0x7d8] ss:$20 sps:$4 sm:$0xff]  }
 0x559   :  { %10000 = vmatpush2.bf16.msra.mxu0 %v13650_v43  ;;  %v13724_v43 = vld [vmem:[#allocation8 + $0x718] ss:$20 sps:$4 sm:$0xff]  }
 0x55a   :  { %9949 = vmatpush2.bf16.msra.mxu1 %v13647_v47  ;;  %10001 = vmatprep.subr.bf16.mxu0 %v13658_v63  ;;  %v13723_v47 = vld [vmem:[#allocation8 + $0x7b4] ss:$20 sps:$4 sm:$0xff]   ;;  %v13725_v63 = vld [vmem:[#allocation8 + $0x5d8] ss:$20 sps:$4 sm:$0xff]  }
 0x55b   :  { %9950 = vmatprep.subr.bf16.mxu1 %v13655_v21  ;;  %v13721_v21 = vld [vmem:[#allocation8 + $0x7b0] ss:$20 sps:$4 sm:$0xff]  }
 0x55d   :  { %10002 = vmatpush2.bf16.msra.mxu0 %v13656_v17  ;;  %v13729_v17 = vld [vmem:[#allocation8 + $0x6f0] ss:$20 sps:$4 sm:$0xff]  }
 0x55e   :  { %9951 = vmatpush2.bf16.msra.mxu1 %v13653_v28  ;;  %10003 = vmatprep.subr.bf16.mxu0 %v13664_v37  ;;  %v13728_v28 = vld [vmem:[#allocation8 + $0x78c] ss:$20 sps:$4 sm:$0xff]   ;;  %v13726_v37 = vld [vmem:[#allocation8 + $0x788] ss:$20 sps:$4 sm:$0xff]  }
 0x55f   :  { %9952 = vmatprep.subr.bf16.mxu1 %v13661_v10  ;;  %v13733_v10 = vld [vmem:[#allocation8 + $0x9e4] ss:$20 sps:$4 sm:$0xff]  }
 0x561   :  { %10004 = vmatpush2.bf16.msra.mxu0 %v13662_v26  ;;  %v13735_v26 = vld [vmem:[#allocation8 + $0x588] ss:$20 sps:$4 sm:$0xff]  }
 0x562   :  { %9953 = vmatpush2.bf16.msra.mxu1 %v13659_v22  ;;  %10005 = vmatprep.subr.bf16.mxu0 %v13670_v34  ;;  %v13731_v22 = vld [vmem:[#allocation8 + $0x9e0] ss:$20 sps:$4 sm:$0xff]  }
 0x563   :  { %9954 = vmatprep.subr.bf16.mxu1 %v13667_v54  ;;  %v13739_v34 = vld [vmem:[#allocation8 + $0x6a0] ss:$20 sps:$4 sm:$0xff]   ;;  %v13738_v54 = vld [vmem:[#allocation8 + $0x9bc] ss:$20 sps:$4 sm:$0xff]  }
 0x565   :  { %10006 = vmatpush2.bf16.msra.mxu0 %v13668_v42  ;;  %v13740_v42 = vld [vmem:[#allocation8 + $0x560] ss:$20 sps:$4 sm:$0xff]  }
 0x566   :  { %9955 = vmatpush2.bf16.msra.mxu1 %v13665_v39  ;;  %13111 = vmatprep.subr.bf16.mxu0 %v13674_v9  ;;  %v13736_v39 = vld [vmem:[#allocation8 + $0x9b8] ss:$20 sps:$4 sm:$0xff]  }
 0x567   :  { %9956 = vmatprep.subr.bf16.mxu1 %v13673_v44  ;;  %v13744_v9 = vld [vmem:[#allocation8 + $0x678] ss:$20 sps:$4 sm:$0xff]   ;;  %v13743_v44 = vld [vmem:[#allocation8 + $0x994] ss:$20 sps:$4 sm:$0xff]  }
 0x568   :  { %10008 = vmatmul.mubr.bf16.vlgmr.msra.gmra.mxu0 %v14565_v14 }
 0x569   :  { %13112 = vmatpush3.bf16.msra.mxu0 %v13675_v18  ;;  %10093 = vmatprep.mubr.bf16.mxu0 %v14611_v12  ;;  %v13694_v12 = vld [vmem:[#allocation8 + $0x1c8] ss:$20 sps:$4 sm:$0xff]   ;;  %v13745_v18 = vld [vmem:[#allocation8 + $0x538] ss:$20 sps:$4 sm:$0xff]  }
 0x56a   :  { %9957 = vmatpush2.bf16.msra.mxu1 %v13671_v55  ;;  %13113 = vmatprep.subr.bf16.mxu0 %v13679_v57  ;;  %v13741_v55 = vld [vmem:[#allocation8 + $0x990] ss:$20 sps:$4 sm:$0xff]  }
 0x56b   :  { %9958 = vmatprep.subr.bf16.mxu1 %v13678_v23  ;;  %v13749_v57 = vld [vmem:[#allocation8 + $0x650] ss:$20 sps:$4 sm:$0xff]   ;;  %v13748_v23 = vld [vmem:[#allocation8 + $0x96c] ss:$20 sps:$4 sm:$0xff]  }
 0x56d   :  { %13114 = vmatpush3.bf16.msra.mxu0 %v13680_v20  ;;  %v13750_v20 = vld [vmem:[#allocation8 + $0x510] ss:$20 sps:$4 sm:$0xff]  }
 0x56e   :  { %9959 = vmatpush2.bf16.msra.mxu1 %v13676_v24  ;;  %13115 = vmatprep.subr.bf16.mxu0 %v13684_v32  ;;  %v13746_v24 = vld [vmem:[#allocation8 + $0x968] ss:$20 sps:$4 sm:$0xff]  }
 0x56f   :  { %9960 = vmatprep.subr.bf16.mxu1 %v13683_v6  ;;  %v13773_v32 = vld [vmem:[#allocation11 + $0xac] ss:$12 sps:$4 sm:$0xff]   ;;  %v13753_v6 = vld [vmem:[#allocation8 + $0x944] ss:$20 sps:$4 sm:$0xff]  }
 0x571   :  { %13116 = vmatpush3.bf16.msra.mxu0 %v13685_v60  ;;  %v13771_v60 = vld [vmem:[#allocation11 + $0xa8] ss:$12 sps:$4 sm:$0xff]  }
 0x572   :  { %9961 = vmatpush2.bf16.msra.mxu1 %v13681_v53  ;;  %13117 = vmatprep.subr.bf16.mxu0 %v13689_v40  ;;  %v13751_v53 = vld [vmem:[#allocation8 + $0x940] ss:$20 sps:$4 sm:$0xff]   ;;  %v13778_v40 = vld [vmem:[#allocation11 + $0x94] ss:$12 sps:$4 sm:$0xff]  }
 0x573   :  { %9962 = vmatprep.subr.bf16.mxu1 %v13688_v19  ;;  %v13756_v19 = vld [vmem:[#allocation8 + $0x91c] ss:$20 sps:$4 sm:$0xff]  }
 0x575   :  { %13118 = vmatpush3.bf16.msra.mxu0 %v13690_v31  ;;  %v13776_v31 = vld [vmem:[#allocation11 + $0x90] ss:$12 sps:$4 sm:$0xff]  }
 0x576   :  { %9963 = vmatpush2.bf16.msra.mxu1 %v13686_v58  ;;  %13119 = vmatprep.subr.bf16.mxu0 %v13694_v12  ;;  %v13754_v58 = vld [vmem:[#allocation8 + $0x918] ss:$20 sps:$4 sm:$0xff]  }
 0x577   :  { %10018 = vmatprep.subr.bf16.mxu1 %v13693_v11  ;;  %v13783_v12 = vld [vmem:[#allocation11 + $0x7c] ss:$12 sps:$4 sm:$0xff]   ;;  %v13759_v11 = vld [vmem:[#allocation8 + $0x8f4] ss:$20 sps:$4 sm:$0xff]  }
 0x579   :  { %9965 = vmatmul.mubr.bf16.vlgmr.msra.gmra.mxu1 %v14777_v48  ;;  %13120 = vmatpush3.bf16.msra.mxu0 %v13695_v29  ;;  %v13781_v29 = vld [vmem:[#allocation11 + $0x78] ss:$12 sps:$4 sm:$0xff]  }
 0x57a   :  { %10019 = vmatpush1.bf16.msra.mxu1 %v13691_v50  ;;  %10050 = vmatprep.mubr.bf16.mxu1 %v14650_v1  ;;  %v13757_v50 = vld [vmem:[#allocation8 + $0x8f0] ss:$20 sps:$4 sm:$0xff]  }
 0x57b   :  { %10020 = vmatprep.subr.bf16.mxu1 %v13698_v7  ;;  %13121 = vmatprep.subr.bf16.mxu0 %v13699_v35  ;;  %v13788_v7 = vld [vmem:[#allocation11 + $0x64] ss:$12 sps:$4 sm:$0xff]  }
 0x57c   :  { %v13762_v35 = vld [vmem:[#allocation8 + $0x8cc] ss:$20 sps:$4 sm:$0xff]  }
 0x57d   :  { %13122 = vmatpush3.bf16.msra.mxu0 %v13700_v16  ;;  %v13786_v16 = vld [vmem:[#allocation11 + $0x60] ss:$12 sps:$4 sm:$0xff]  }
 0x57e   :  { %10021 = vmatpush1.bf16.msra.mxu1 %v13696_v61  ;;  %13123 = vmatprep.subr.bf16.mxu0 %v13704_v36  ;;  %v13793_v61 = vld [vmem:[#allocation11 + $0x4c] ss:$12 sps:$4 sm:$0xff]  }
 0x57f   :  { %10022 = vmatprep.subr.bf16.mxu1 %v13703_v8  ;;  %v13763_v36 = vld [vmem:[#allocation8 + $0x4e8] ss:$20 sps:$4 sm:$0xff]  }
 0x580   :  { %v13791_v8 = vld [vmem:[#allocation11 + $0x48] ss:$12 sps:$4 sm:$0xff]  }
 0x581   :  { %13124 = vmatpush3.bf16.msra.mxu0 %v13705_v51  ;;  %v13764_v51 = vld [vmem:[#allocation8 + $0x3a8] ss:$20 sps:$4 sm:$0xff]  }
 0x582   :  { %10023 = vmatpush1.bf16.msra.mxu1 %v13701_v27  ;;  %13125 = vmatprep.subr.bf16.mxu0 %v13709_v13  ;;  %v13765_v27 = vld [vmem:[#allocation8 + $0x4c0] ss:$20 sps:$4 sm:$0xff]   ;;  %v13798_v13 = vld [vmem:[#allocation11 + $0x34] ss:$12 sps:$4 sm:$0xff]  }
 0x583   :  { %10024 = vmatprep.subr.bf16.mxu1 %v13708_v33  ;;  %v13796_v33 = vld [vmem:[#allocation11 + $0x30] ss:$12 sps:$4 sm:$0xff]  }
 0x585   :  { %13126 = vmatpush3.bf16.msra.mxu0 %v13710_v25  ;;  %v13766_v25 = vld [vmem:[#allocation8 + $0x380] ss:$20 sps:$4 sm:$0xff]  }
 0x586   :  { %10025 = vmatpush1.bf16.msra.mxu1 %v13706_v3  ;;  %13155 = vmatprep.subr.bf16.mxu0 %v13714_v41  ;;  %v13803_v3 = vld [vmem:[#allocation11 + $0x1c] ss:$12 sps:$4 sm:$0xff]  }
 0x587   :  { %10026 = vmatprep.subr.bf16.mxu1 %v13713_v49  ;;  %v13767_v41 = vld [vmem:[#allocation8 + $0x498] ss:$20 sps:$4 sm:$0xff]  }
 0x588   :  { %10094 = vmatmul.mubr.bf16.vlgmr.msra.gmra.mxu0 %v14776_v2  ;;  %v13730_v2 = vld [vmem:[#allocation8 + $0x5b0] ss:$20 sps:$4 sm:$0xff]   ;;  %v13801_v49 = vld [vmem:[#allocation11 + $0x18] ss:$12 sps:$4 sm:$0xff]  }
 0x589   :  { %13156 = vmatpush3.bf16.msra.mxu0 %v13715_v56  ;;  %10175 = vmatprep.mubr.bf16.mxu0 %v14635_v52  ;;  %v13734_v52 = vld [vmem:[#allocation8 + $0x6c8] ss:$20 sps:$4 sm:$0xff]   ;;  %v13768_v56 = vld [vmem:[#allocation8 + $0x358] ss:$20 sps:$4 sm:$0xff]  }
 0x58a   :  { %10027 = vmatpush1.bf16.msra.mxu1 %v13711_v59  ;;  %13157 = vmatprep.subr.bf16.mxu0 %v13719_v38  ;;  %v13808_v59 = vld [vmem:[#allocation11 + $0x4] ss:$12 sps:$4 sm:$0xff]   ;;  %v13769_v38 = vld [vmem:[#allocation8 + $0x470] ss:$20 sps:$4 sm:$0xff]  }
 0x58b   :  { %10028 = vmatprep.subr.bf16.mxu1 %v13718_v30  ;;  %v13806_v30 = vld [vmem:[#allocation11] ss:$12 sps:$4 sm:$0xff]  }
 0x58d   :  { %13158 = vmatpush3.bf16.msra.mxu0 %v13720_v4  ;;  %v13770_v4 = vld [vmem:[#allocation8 + $0x330] ss:$20 sps:$4 sm:$0xff]  }
 0x58e   :  { %10029 = vmatpush1.bf16.msra.mxu1 %v13716_v5  ;;  %13159 = vmatprep.subr.bf16.mxu0 %v13724_v43  ;;  %v13813_v5 = vld [vmem:[#allocation11 + $0x16c] ss:$12 sps:$4 sm:$0xff]   ;;  %v13811_v43 = vld [vmem:[#allocation11 + $0x168] ss:$12 sps:$4 sm:$0xff]  }
 0x58f   :  { %10030 = vmatprep.subr.bf16.mxu1 %v13723_v47  ;;  %v13775_v47 = vld [vmem:[#allocation8 + $0x308] ss:$20 sps:$4 sm:$0xff]  }
 0x591   :  { %13160 = vmatpush3.bf16.msra.mxu0 %v13725_v63  ;;  %v13818_v63 = vld [vmem:[#allocation11 + $0x154] ss:$12 sps:$4 sm:$0xff]  }
 0x592   :  { %10031 = vmatpush1.bf16.msra.mxu1 %v13721_v21  ;;  %13161 = vmatprep.subr.bf16.mxu0 %v13729_v17  ;;  %v13779_v21 = vld [vmem:[#allocation8 + $0x420] ss:$20 sps:$4 sm:$0xff]  }
 0x593   :  { %10032 = vmatprep.subr.bf16.mxu1 %v13728_v28  ;;  %v13816_v17 = vld [vmem:[#allocation11 + $0x150] ss:$12 sps:$4 sm:$0xff]  }
 0x594   :  { %v13780_v28 = vld [vmem:[#allocation8 + $0x2e0] ss:$20 sps:$4 sm:$0xff]  }
 0x595   :  { %13162 = vmatpush3.bf16.msra.mxu0 %v13730_v2  ;;  %v13823_v2 = vld [vmem:[#allocation11 + $0x13c] ss:$12 sps:$4 sm:$0xff]  }
 0x596   :  { %10033 = vmatpush1.bf16.msra.mxu1 %v13726_v37  ;;  %13163 = vmatprep.subr.bf16.mxu0 %v13734_v52  ;;  %v13784_v37 = vld [vmem:[#allocation8 + $0x3f8] ss:$20 sps:$4 sm:$0xff]  }
 0x597   :  { %10034 = vmatprep.subr.bf16.mxu1 %v13733_v10  ;;  %v13821_v52 = vld [vmem:[#allocation11 + $0x138] ss:$12 sps:$4 sm:$0xff]  }
 0x598   :  { %v13785_v10 = vld [vmem:[#allocation8 + $0x2b8] ss:$20 sps:$4 sm:$0xff]  }
 0x599   :  { %13164 = vmatpush3.bf16.msra.mxu0 %v13735_v26  ;;  %v13828_v26 = vld [vmem:[#allocation11 + $0x124] ss:$12 sps:$4 sm:$0xff]  }
 0x59a   :  { %10035 = vmatpush2.bf16.msra.mxu1 %v13731_v22  ;;  %13165 = vmatprep.subr.bf16.mxu0 %v13739_v34  ;;  %v13789_v22 = vld [vmem:[#allocation8 + $0x3d0] ss:$20 sps:$4 sm:$0xff]  }
 0x59b   :  { %10036 = vmatprep.subr.bf16.mxu1 %v13738_v54  ;;  %v13826_v34 = vld [vmem:[#allocation11 + $0x120] ss:$12 sps:$4 sm:$0xff]  }
 0x59c   :  { %v13790_v54 = vld [vmem:[#allocation8 + $0x290] ss:$20 sps:$4 sm:$0xff]  }
 0x59d   :  { %13166 = vmatpush3.bf16.msra.mxu0 %v13740_v42  ;;  %v13833_v42 = vld [vmem:[#allocation11 + $0x10c] ss:$12 sps:$4 sm:$0xff]  }
 0x59e   :  { %10037 = vmatpush2.bf16.msra.mxu1 %v13736_v39  ;;  %13167 = vmatprep.subr.bf16.mxu0 %v13744_v9  ;;  %v13794_v39 = vld [vmem:[#allocation8 + $0x9e8] ss:$20 sps:$4 sm:$0xff]  }
 0x59f   :  { %10038 = vmatprep.subr.bf16.mxu1 %v13743_v44  ;;  %v13831_v9 = vld [vmem:[#allocation11 + $0x108] ss:$12 sps:$4 sm:$0xff]  }
 0x5a0   :  { %v13795_v44 = vld [vmem:[#allocation8 + $0x8a8] ss:$20 sps:$4 sm:$0xff]  }
 0x5a1   :  { %13168 = vmatpush3.bf16.msra.mxu0 %v13745_v18  ;;  %v13799_v18 = vld [vmem:[#allocation8 + $0x9c0] ss:$20 sps:$4 sm:$0xff]  }
 0x5a2   :  { %10039 = vmatpush2.bf16.msra.mxu1 %v13741_v55  ;;  %13169 = vmatprep.subr.bf16.mxu0 %v13749_v57  ;;  %v13836_v55 = vld [vmem:[#allocation11 + $0xf4] ss:$12 sps:$4 sm:$0xff]   ;;  %v13834_v57 = vld [vmem:[#allocation11 + $0xf0] ss:$12 sps:$4 sm:$0xff]  }
 0x5a3   :  { %10040 = vmatprep.subr.bf16.mxu1 %v13748_v23  ;;  %v13800_v23 = vld [vmem:[#allocation8 + $0x880] ss:$20 sps:$4 sm:$0xff]  }
 0x5a5   :  { %13170 = vmatpush3.bf16.msra.mxu0 %v13750_v20  ;;  %v13839_v20 = vld [vmem:[#allocation11 + $0xdc] ss:$12 sps:$4 sm:$0xff]  }
 0x5a6   :  { %10041 = vmatpush2.bf16.msra.mxu1 %v13746_v24  ;;  %11057 = vmatprep.subr.bf16.mxu0 %v13773_v32  ;;  %v13804_v24 = vld [vmem:[#allocation8 + $0x998] ss:$20 sps:$4 sm:$0xff]  }
 0x5a7   :  { %10042 = vmatprep.subr.bf16.mxu1 %v13753_v6  ;;  %v13837_v32 = vld [vmem:[#allocation11 + $0xd8] ss:$12 sps:$4 sm:$0xff]  }
 0x5a8   :  { %10176 = vmatmul.mubr.bf16.vlgmr.msra.gmra.mxu0 %v14565_v14  ;;  %v13760_v14 = vld [vmem:[#allocation8 + $0x8c8] ss:$20 sps:$4 sm:$0xff]   ;;  %v13805_v6 = vld [vmem:[#allocation8 + $0x858] ss:$20 sps:$4 sm:$0xff]  }
 0x5a9   :  { %11058 = vmatpush1.bf16.msra.mxu0 %v13771_v60  ;;  %v13842_v60 = vld [vmem:[#allocation11 + $0xc4] ss:$12 sps:$4 sm:$0xff]  }
 0x5aa   :  { %10043 = vmatpush2.bf16.msra.mxu1 %v13751_v53  ;;  %11059 = vmatprep.subr.bf16.mxu0 %v13778_v40  ;;  %v13809_v53 = vld [vmem:[#allocation8 + $0x970] ss:$20 sps:$4 sm:$0xff]   ;;  %v9751_v40 = vpop.f32.mrf.mxu0 }
 0x5ab   :  { %10044 = vmatprep.subr.bf16.mxu1 %v13756_v19  ;;  %v13810_v19 = vld [vmem:[#allocation8 + $0x830] ss:$20 sps:$4 sm:$0xff]  }
 0x5ad   :  { %11060 = vmatpush1.bf16.msra.mxu0 %v13776_v31  ;;  %v9753_v31 = vpop.f32.mrf.mxu0 }
 0x5ae   :  { %10045 = vmatpush2.bf16.msra.mxu1 %v13754_v58  ;;  %11061 = vmatprep.subr.bf16.mxu0 %v13783_v12  ;;  %v13815_v58 = vld [vmem:[#allocation8 + $0x808] ss:$20 sps:$4 sm:$0xff]   ;;  %v13819_v12 = vld [vmem:[#allocation8 + $0x920] ss:$20 sps:$4 sm:$0xff]  }
 0x5af   :  { %10046 = vmatprep.subr.bf16.mxu1 %v13759_v11  ;;  %v9755_v11 = vpop.f32.mrf.mxu0 }
 0x5b1   :  { %11062 = vmatpush1.bf16.msra.mxu0 %v13781_v29  ;;  %v13820_v29 = vld [vmem:[#allocation8 + $0x7e0] ss:$20 sps:$4 sm:$0xff]  }
 0x5b2   :  { %10047 = vmatpush2.bf16.msra.mxu1 %v13757_v50  ;;  %11063 = vmatprep.subr.bf16.mxu0 %v13788_v7  ;;  %v9794_v50 = vpop.f32.mrf.mxu1  ;;  %v13824_v7 = vld [vmem:[#allocation8 + $0x8f8] ss:$20 sps:$4 sm:$0xff]  }
 0x5b3   :  { %10048 = vmatprep.subr.bf16.mxu1 %v13762_v35  ;;  %v9757_v35 = vpop.f32.mrf.mxu0 }
 0x5b5   :  { %11064 = vmatpush1.bf16.msra.mxu0 %v13786_v16  ;;  %v13825_v16 = vld [vmem:[#allocation8 + $0x7b8] ss:$20 sps:$4 sm:$0xff]  }
 0x5b6   :  { %10049 = vmatpush2.bf16.msra.mxu1 %v13760_v14  ;;  %11065 = vmatprep.subr.bf16.mxu0 %v13793_v61  ;;  %v9796_v14 = vpop.f32.mrf.mxu1  ;;  %v9837_v61 = vpop.f32.mrf.mxu0 }
 0x5b7   :  { %13133 = vmatprep.subr.bf16.mxu1 %v13763_v36  ;;  %v13829_v36 = vld [vmem:[#allocation8 + $0x8d0] ss:$20 sps:$4 sm:$0xff]  }
 0x5b9   :  { %10051 = vmatmul.mubr.bf16.vlgmr.msra.gmra.mxu1 %v14652_v0  ;;  %11066 = vmatpush1.bf16.msra.mxu0 %v13791_v8  ;;  %v14668_v8 = vld [vmem:[#allocation10] sm:$0x1f] }
 0x5ba   :  { %13134 = vmatpush3.bf16.msra.mxu1 %v13764_v51  ;;  %10134 = vmatprep.mubr.bf16.mxu1 %v14613_v15  ;;  %v13774_v15 = vld [vmem:[#allocation8 + $0x448] ss:$20 sps:$4 sm:$0xff]   ;;  %v8035_v51 = vrot.slane %v14668_v8, %v14568_v62 }
 0x5bb   :  { %13135 = vmatprep.subr.bf16.mxu1 %v13765_v27  ;;  %11067 = vmatprep.subr.bf16.mxu0 %v13798_v13  ;;  %v13830_v27 = vld [vmem:[#allocation8 + $0x790] ss:$20 sps:$4 sm:$0xff]   ;;  %v14778_v13 = vld [vmem:[#allocation24_spill] sm:$0xff] }
 0x5bd   :  { %11068 = vmatpush1.bf16.msra.mxu0 %v13796_v33  ;;  %v8031_v33 = vrot.slane %v14668_v8, %v14778_v13 }
 0x5be   :  { %13136 = vmatpush3.bf16.msra.mxu1 %v13766_v25  ;;  %11069 = vmatprep.subr.bf16.mxu0 %v13803_v3  ;;  %v9798_v25 = vpop.f32.mrf.mxu1  ;;  %v9839_v3 = vpop.f32.mrf.mxu0 }
 0x5bf   :  { %13137 = vmatprep.subr.bf16.mxu1 %v13767_v41  ;;  %v13845_v41 = vld [vmem:[#allocation11 + $0x22c] ss:$12 sps:$4 sm:$0xff]  }
 0x5c1   :  { %11070 = vmatpush1.bf16.msra.mxu0 %v13801_v49  ;;  %v9754_v49 = vadd.f32 %v9753_v31, %v8035_v51  ;;  %v13861_v31 = vld [vmem:[#allocation11 + $0x198] ss:$12 sps:$4 sm:$0xff]  }
 0x5c2   :  { %13138 = vmatpush3.bf16.msra.mxu1 %v13768_v56  ;;  %11071 = vmatprep.subr.bf16.mxu0 %v13808_v59  ;;  %v9756_v56 = vadd.f32 %v9755_v11, %v8031_v33  ;;  %v13843_v59 = vld [vmem:[#allocation11 + $0x228] ss:$12 sps:$4 sm:$0xff]   ;;  %v13869_v11 = vld [vmem:[#allocation11 + $0x2ec] ss:$12 sps:$4 sm:$0xff]  }
 0x5c3   :  { %13139 = vmatprep.subr.bf16.mxu1 %v13769_v38  ;;  %v9752_v38 = vadd.f32 %v9751_v40, %v8031_v33  ;;  %v13855_v40 = vld [vmem:[#allocation11 + $0x1c8] ss:$12 sps:$4 sm:$0xff]  }
 0x5c4   :  { %v13884_v33 = vld [vmem:[#allocation11 + $0x274] ss:$12 sps:$4 sm:$0xff]  }
 0x5c5   :  { %11072 = vmatpush1.bf16.msra.mxu0 %v13806_v30  ;;  %v9800_v30 = vpop.f32.mrf.mxu1 }
 0x5c6   :  { %13140 = vmatpush3.bf16.msra.mxu1 %v13770_v4  ;;  %11073 = vmatprep.subr.bf16.mxu0 %v13813_v5  ;;  %v9841_v4 = vpop.f32.mrf.mxu0  ;;  %v13848_v5 = vld [vmem:[#allocation11 + $0x214] ss:$12 sps:$4 sm:$0xff]  }
 0x5c7   :  { %13141 = vmatprep.subr.bf16.mxu1 %v13774_v15  ;;  %v9758_v15 = vadd.f32 %v9757_v35, %v8035_v51  ;;  %v13875_v35 = vld [vmem:[#allocation11 + $0x2bc] ss:$12 sps:$4 sm:$0xff]  }
 0x5c8   :  { %v13879_v51 = vld [vmem:[#allocation11 + $0x288] ss:$12 sps:$4 sm:$0xff]  }
 0x5c9   :  { %11074 = vmatpush2.bf16.msra.mxu0 %v13811_v43 }
 0x5ca   :  { %13142 = vmatpush3.bf16.msra.mxu1 %v13775_v47  ;;  %11075 = vmatprep.subr.bf16.mxu0 %v13818_v63  ;;  %v9797_v47 = vadd.f32 %v9796_v14, %v9754_v49  ;;  %v9799_v63 = vadd.f32 %v9798_v25, %v9756_v56  ;;  %v13878_v14 = vld [vmem:[#allocation11 + $0x2a4] ss:$12 sps:$4 sm:$0xff]   ;;  %v13907_v25 = vld [vmem:[#allocation11 + $0x3a8] ss:$12 sps:$4 sm:$0xff]  }
 0x5cb   :  { %13143 = vmatprep.subr.bf16.mxu1 %v13779_v21  ;;  %v13846_v21 = vld [vmem:[#allocation11 + $0x210] ss:$12 sps:$4 sm:$0xff]  }
 0x5cc   :  { %v13882_v49 = vld [vmem:[#allocation11 + $0x270] ss:$12 sps:$4 sm:$0xff]  }
 0x5cd   :  { %11076 = vmatpush2.bf16.msra.mxu0 %v13816_v17  ;;  %v9795_v17 = vadd.f32 %v9794_v50, %v9752_v38  ;;  %v13872_v50 = vld [vmem:[#allocation11 + $0x2d4] ss:$12 sps:$4 sm:$0xff]   ;;  %v13887_v56 = vld [vmem:[#allocation11 + $0x25c] ss:$12 sps:$4 sm:$0xff]   ;;  %v13915_v38 = vld [vmem:[#allocation11 + $0x378] ss:$12 sps:$4 sm:$0xff]  }
 0x5ce   :  { %13144 = vmatpush3.bf16.msra.mxu1 %v13780_v28  ;;  %11077 = vmatprep.subr.bf16.mxu0 %v13823_v2  ;;  %v9843_v28 = vpop.f32.mrf.mxu0 }
 0x5cf   :  { %13145 = vmatprep.subr.bf16.mxu1 %v13784_v37  ;;  %v13851_v37 = vld [vmem:[#allocation11 + $0x1fc] ss:$12 sps:$4 sm:$0xff]  }
 0x5d1   :  { %11078 = vmatpush2.bf16.msra.mxu0 %v13821_v52  ;;  %v9801_v52 = vadd.f32 %v9800_v30, %v9758_v15  ;;  %v13885_v30 = vld [vmem:[#allocation11 + $0x258] ss:$12 sps:$4 sm:$0xff]   ;;  %v13919_v15 = vld [vmem:[#allocation11 + $0x360] ss:$12 sps:$4 sm:$0xff]  }
 0x5d2   :  { %13146 = vmatpush3.bf16.msra.mxu1 %v13785_v10  ;;  %11079 = vmatprep.subr.bf16.mxu0 %v13828_v26  ;;  %v9840_v10 = vadd.f32 %v9839_v3, %v9797_v47  ;;  %v9842_v26 = vadd.f32 %v9841_v4, %v9799_v63  ;;  %v13913_v3 = vld [vmem:[#allocation11 + $0x394] ss:$12 sps:$4 sm:$0xff]   ;;  %v13890_v4 = vld [vmem:[#allocation11 + $0x244] ss:$12 sps:$4 sm:$0xff]   ;;  %v13925_v63 = vld [vmem:[#allocation11 + $0x34c] ss:$12 sps:$4 sm:$0xff]  }
 0x5d3   :  { %13147 = vmatprep.subr.bf16.mxu1 %v13789_v22  ;;  %v9838_v22 = vadd.f32 %v9837_v61, %v9795_v17  ;;  %v13876_v61 = vld [vmem:[#allocation11 + $0x2a0] ss:$12 sps:$4 sm:$0xff]   ;;  %v13891_v47 = vld [vmem:[#allocation11 + $0x170] ss:$12 sps:$4 sm:$0xff]  }
 0x5d4   :  { %v13929_v17 = vld [vmem:[#allocation11 + $0x334] ss:$12 sps:$4 sm:$0xff]  }
 0x5d5   :  { %11080 = vmatpush2.bf16.msra.mxu0 %v13826_v34 }
 0x5d6   :  { %13148 = vmatpush3.bf16.msra.mxu1 %v13790_v54  ;;  %11081 = vmatprep.subr.bf16.mxu0 %v13833_v42  ;;  %v9844_v54 = vadd.f32 %v9843_v28, %v9801_v52  ;;  %v13927_v28 = vld [vmem:[#allocation11 + $0x330] ss:$12 sps:$4 sm:$0xff]  }
 0x5d7   :  { %13177 = vmatprep.subr.bf16.mxu1 %v13794_v39  ;;  %v13937_v52 = vld [vmem:[#allocation11 + $0x304] ss:$12 sps:$4 sm:$0xff]  }
 0x5d9   :  { %10135 = vmatmul.mubr.bf16.vlgmr.msra.gmra.mxu1 %v14777_v48  ;;  %11082 = vmatpush2.bf16.msra.mxu0 %v13831_v9  ;;  %v13840_v48 = vld [vmem:[#allocation11 + $0xc0] ss:$12 sps:$4 sm:$0xff]  }
 0x5da   :  { %13178 = vmatpush3.bf16.msra.mxu1 %v13795_v44  ;;  %10216 = vmatprep.mubr.bf16.mxu1 %v14650_v1  ;;  %v13814_v1 = vld [vmem:[#allocation8 + $0x948] ss:$20 sps:$4 sm:$0xff]  }
 0x5db   :  { %13179 = vmatprep.subr.bf16.mxu1 %v13799_v18  ;;  %11083 = vmatprep.subr.bf16.mxu0 %v13836_v55  ;;  %v13854_v18 = vld [vmem:[#allocation11 + $0x1e4] ss:$12 sps:$4 sm:$0xff]  }
 0x5dd   :  { %11084 = vmatpush2.bf16.msra.mxu0 %v13834_v57 }
 0x5de   :  { %13180 = vmatpush3.bf16.msra.mxu1 %v13800_v23  ;;  %11085 = vmatprep.subr.bf16.mxu0 %v13839_v20 }
 0x5df   :  { %13181 = vmatprep.subr.bf16.mxu1 %v13804_v24  ;;  %v13852_v24 = vld [vmem:[#allocation11 + $0x1e0] ss:$12 sps:$4 sm:$0xff]  }
 0x5e1   :  { %11086 = vmatpush2.bf16.msra.mxu0 %v13837_v32 }
 0x5e2   :  { %13182 = vmatpush3.bf16.msra.mxu1 %v13805_v6  ;;  %11087 = vmatprep.subr.bf16.mxu0 %v13842_v60  ;;  %v13857_v6 = vld [vmem:[#allocation11 + $0x1cc] ss:$12 sps:$4 sm:$0xff]  }
 0x5e3   :  { %13183 = vmatprep.subr.bf16.mxu1 %v13809_v53 }
 0x5e5   :  { %11088 = vmatpush2.bf16.msra.mxu0 %v13840_v48  ;;  %v13860_v48 = vld [vmem:[#allocation11 + $0x1b4] ss:$12 sps:$4 sm:$0xff]  }
 0x5e6   :  { %13184 = vmatpush3.bf16.msra.mxu1 %v13810_v19  ;;  %v13858_v19 = vld [vmem:[#allocation11 + $0x1b0] ss:$12 sps:$4 sm:$0xff]  }
 0x5e7   :  { %13185 = vmatprep.subr.bf16.mxu1 %v13814_v1  ;;  %v13863_v1 = vld [vmem:[#allocation11 + $0x19c] ss:$12 sps:$4 sm:$0xff]  }
 0x5ea   :  { %13186 = vmatpush3.bf16.msra.mxu1 %v13815_v58  ;;  %v13866_v58 = vld [vmem:[#allocation11 + $0x184] ss:$12 sps:$4 sm:$0xff]  }
 0x5eb   :  { %13187 = vmatprep.subr.bf16.mxu1 %v13819_v12  ;;  %v13864_v12 = vld [vmem:[#allocation11 + $0x180] ss:$12 sps:$4 sm:$0xff]  }
 0x5ee   :  { %13188 = vmatpush3.bf16.msra.mxu1 %v13820_v29  ;;  %v13867_v29 = vld [vmem:[#allocation11 + $0x2e8] ss:$12 sps:$4 sm:$0xff]  }
 0x5ef   :  { %13189 = vmatprep.subr.bf16.mxu1 %v13824_v7  ;;  %v13870_v7 = vld [vmem:[#allocation11 + $0x2d0] ss:$12 sps:$4 sm:$0xff]  }
 0x5f2   :  { %13190 = vmatpush3.bf16.msra.mxu1 %v13825_v16  ;;  %v13873_v16 = vld [vmem:[#allocation11 + $0x2b8] ss:$12 sps:$4 sm:$0xff]  }
 0x5f3   :  { %13191 = vmatprep.subr.bf16.mxu1 %v13829_v36  ;;  %v13881_v36 = vld [vmem:[#allocation11 + $0x28c] ss:$12 sps:$4 sm:$0xff]  }
 0x5f6   :  { %13192 = vmatpush3.bf16.msra.mxu1 %v13830_v27  ;;  %v13909_v27 = vld [vmem:[#allocation11 + $0x3ac] ss:$12 sps:$4 sm:$0xff]  }
 0x5f7   :  { %11100 = vmatprep.subr.bf16.mxu1 %v13845_v41  ;;  %11143 = vmatprep.subr.bf16.mxu0 %v13909_v27  ;;  %v13911_v41 = vld [vmem:[#allocation11 + $0x390] ss:$12 sps:$4 sm:$0xff]  }
 0x5f9   :  { %10217 = vmatmul.mubr.bf16.vlgmr.msra.gmra.mxu1 %v14652_v0  ;;  %v9880_v43 = vpop.f32.mrf.mxu1  ;;  %v13849_v0 = vld [vmem:[#allocation11 + $0x1f8] ss:$12 sps:$4 sm:$0xff]  }
 0x5fa   :  { %11101 = vmatpush1.bf16.msra.mxu1 %v13843_v59  ;;  %v9881_v9 = vadd.f32 %v9880_v43, %v9838_v22  ;;  %v13917_v59 = vld [vmem:[#allocation11 + $0x37c] ss:$12 sps:$4 sm:$0xff]   ;;  %v13888_v43 = vld [vmem:[#allocation11 + $0x240] ss:$12 sps:$4 sm:$0xff]   ;;  %v14221_v22 = vmov 0  }
 0x5fb   :  { %v9882_v2 = vpop.f32.mrf.mxu1  ;;  %11102 = vmatprep.subr.bf16.mxu1 %v13848_v5  ;;  %v13921_v5 = vld [vmem:[#allocation11 + $0x364] ss:$12 sps:$4 sm:$0xff]  }
 0x5fc   :  { %v9883_v42 = vadd.f32 %v9882_v2, %v9840_v10  ;;  %v10225_v32 = vmax.f32 %v9881_v9, 0.0  ;;  %v13933_v2 = vld [vmem:[#allocation11 + $0x31c] ss:$12 sps:$4 sm:$0xff]   ;;  %v13935_v10 = vld [vmem:[#allocation11 + $0x300] ss:$12 sps:$4 sm:$0xff]  }
 0x5fd   :  { %v9884_v34 = vpop.f32.mrf.mxu1 }
 0x5fe   :  { %v9885_v39 = vadd.f32 %v9884_v34, %v9842_v26  ;;  %11103 = vmatpush1.bf16.msra.mxu1 %v13846_v21  ;;  %v10226_v23 = vmax.f32 %v9883_v42, 0.0  ;;  %v13923_v21 = vld [vmem:[#allocation11 + $0x348] ss:$12 sps:$4 sm:$0xff]   ;;  %v13939_v26 = vld [vmem:[#allocation11 + $0x2f0] ss:$12 sps:$4 sm:$0xff]   ;;  %v9923_v34 = vpop.f32.mrf.mxu0 }
 0x5ff   :  { %v9886_v44 = vpop.f32.mrf.mxu1  ;;  %11104 = vmatprep.subr.bf16.mxu1 %v13851_v37  ;;  %v13931_v37 = vld [vmem:[#allocation11 + $0x318] ss:$12 sps:$4 sm:$0xff]  }
 0x600   :  { %v9887_v55 = vadd.f32 %v9886_v44, %v9844_v54  ;;  %v10230_v57 = vmax.f32 %v9885_v39, 0.0  ;;  %v9925_v54 = vpop.f32.mrf.mxu0 }
 0x602   :  { %v10231_v20 = vmax.f32 %v9887_v55, 0.0  ;;  %11105 = vmatpush1.bf16.msra.mxu1 %v13849_v0  ;;  %v14677_v53 = vpack.c.bf16 %v10230_v57, %v10225_v32  ;;  %v9927_v42 = vpop.f32.mrf.mxu0  ;;  %v14779_v55 = vld [vmem:[#allocation31_spill] sm:$0xff] }
 0x603   :  { %11106 = vmatprep.subr.bf16.mxu1 %v13854_v18  ;;  %v8043_v18 = vrot.slane %v14668_v8, %v1212_v46  ;;  %v8039_v57 = vrot.slane %v14668_v8, %v14779_v55 }
 0x604   :  { %v14675_v60 = vpack.c.bf16 %v10231_v20, %v10226_v23  ;;  %v9929_v0 = vpop.f32.mrf.mxu0 }
 0x605   :  { %v9928_v32 = vadd.f32 %v9927_v42, %v8039_v57 }
 0x606   :  { %11089 = vmatprep.mubr.bf16.mxu0 %v14675_v60  ;;  %11107 = vmatpush1.bf16.msra.mxu1 %v13852_v24  ;;  %v9926_v24 = vadd.f32 %v9925_v54, %v8043_v18  ;;  %v13914_v54 = vld [vmem:[#allocation11 + $0x398] ss:$12 sps:$4 sm:$0xff]  }
 0x607   :  { %11090 = vmatmul.mubr.bf16.vlgmr.msra.gmra.mxu0 %v14677_v53  ;;  %11108 = vmatprep.subr.bf16.mxu1 %v13857_v6  ;;  %v9924_v6 = vadd.f32 %v9923_v34, %v8039_v57  ;;  %v14222_v34 = vmov 0.0   ;;  %v13922_v57 = vld [vmem:[#allocation11 + $0x368] ss:$12 sps:$4 sm:$0xff]  }
 0x608   :  { %11144 = vmatpush1.bf16.msra.mxu0 %v13907_v25  ;;  %11175 = vmatprep.mubr.bf16.mxu0 %v14221_v22 }
 0x609   :  { %11145 = vmatprep.subr.bf16.mxu0 %v13913_v3 }
 0x60a   :  { %11109 = vmatpush1.bf16.msra.mxu1 %v13855_v40 }
 0x60b   :  { %11110 = vmatprep.subr.bf16.mxu1 %v13860_v48  ;;  %v9930_v48 = vadd.f32 %v9929_v0, %v8043_v18  ;;  %v13918_v0 = vld [vmem:[#allocation11 + $0x380] ss:$12 sps:$4 sm:$0xff]  }
 0x60c   :  { %11146 = vmatpush1.bf16.msra.mxu0 %v13911_v41 }
 0x60d   :  { %11147 = vmatprep.subr.bf16.mxu0 %v13917_v59  ;;  %v13892_v59 = vld [vmem:[#allocation11 + $0xb0] ss:$12 sps:$4 sm:$0xff]  }
 0x60e   :  { %11111 = vmatpush1.bf16.msra.mxu1 %v13858_v19 }
 0x60f   :  { %11112 = vmatprep.subr.bf16.mxu1 %v13863_v1 }
 0x610   :  { %11148 = vmatpush1.bf16.msra.mxu0 %v13915_v38 }
 0x611   :  { %11149 = vmatprep.subr.bf16.mxu0 %v13921_v5  ;;  %v13895_v5 = vld [vmem:[#allocation11 + $0x140] ss:$12 sps:$4 sm:$0xff]  }
 0x612   :  { %11113 = vmatpush1.bf16.msra.mxu1 %v13861_v31 }
 0x613   :  { %11114 = vmatprep.subr.bf16.mxu1 %v13866_v58 }
 0x614   :  { %11150 = vmatpush1.bf16.msra.mxu0 %v13919_v15  ;;  %v13896_v15 = vld [vmem:[#allocation11 + $0x80] ss:$12 sps:$4 sm:$0xff]  }
 0x615   :  { %11151 = vmatprep.subr.bf16.mxu0 %v13925_v63  ;;  %v13899_v63 = vld [vmem:[#allocation11 + $0x110] ss:$12 sps:$4 sm:$0xff]  }
 0x616   :  { %11115 = vmatpush1.bf16.msra.mxu1 %v13864_v12 }
 0x617   :  { %11116 = vmatprep.subr.bf16.mxu1 %v13869_v11 }
 0x618   :  { %11152 = vmatpush1.bf16.msra.mxu0 %v13923_v21  ;;  %v13900_v21 = vld [vmem:[#allocation11 + $0x50] ss:$12 sps:$4 sm:$0xff]  }
 0x619   :  { %11153 = vmatprep.subr.bf16.mxu0 %v13929_v17  ;;  %v13901_v17 = vld [vmem:[#allocation11 + $0xf8] ss:$12 sps:$4 sm:$0xff]  }
 0x61a   :  { %11117 = vmatpush2.bf16.msra.mxu1 %v13867_v29 }
 0x61b   :  { %11118 = vmatprep.subr.bf16.mxu1 %v13872_v50 }
 0x61c   :  { %11154 = vmatpush1.bf16.msra.mxu0 %v13927_v28  ;;  %v13902_v28 = vld [vmem:[#allocation11 + $0x38] ss:$12 sps:$4 sm:$0xff]  }
 0x61d   :  { %11155 = vmatprep.subr.bf16.mxu0 %v13933_v2  ;;  %v13903_v2 = vld [vmem:[#allocation11 + $0xe0] ss:$12 sps:$4 sm:$0xff]  }
 0x61e   :  { %11119 = vmatpush2.bf16.msra.mxu1 %v13870_v7 }
 0x61f   :  { %11120 = vmatprep.subr.bf16.mxu1 %v13875_v35 }
 0x620   :  { %11156 = vmatpush1.bf16.msra.mxu0 %v13931_v37  ;;  %v13905_v37 = vld [vmem:[#allocation11 + $0xc8] ss:$12 sps:$4 sm:$0xff]  }
 0x621   :  { %11157 = vmatprep.subr.bf16.mxu0 %v13937_v52  ;;  %v13906_v52 = vld [vmem:[#allocation11 + $0x8] ss:$12 sps:$4 sm:$0xff]  }
 0x622   :  { %11121 = vmatpush2.bf16.msra.mxu1 %v13873_v16 }
 0x623   :  { %11122 = vmatprep.subr.bf16.mxu1 %v13878_v14 }
 0x624   :  { %11158 = vmatpush1.bf16.msra.mxu0 %v13935_v10 }
 0x625   :  { %13221 = vmatprep.subr.bf16.mxu0 %v13939_v26  ;;  %v13910_v26 = vld [vmem:[#allocation11 + $0x3b0] ss:$12 sps:$4 sm:$0xff]  }
 0x626   :  { %11123 = vmatpush2.bf16.msra.mxu1 %v13876_v61 }
 0x627   :  { %11124 = vmatprep.subr.bf16.mxu1 %v13881_v36 }
 0x628   :  { %v10009_v44 = vpop.f32.mrf.mxu0 }
 0x62a   :  { %11125 = vmatpush2.bf16.msra.mxu1 %v13879_v51  ;;  %v10011_v20 = vpop.f32.mrf.mxu0 }
 0x62b   :  { %11126 = vmatprep.subr.bf16.mxu1 %v13884_v33 }
 0x62c   :  { %v10013_v31 = vpop.f32.mrf.mxu0 }
 0x62e   :  { %11127 = vmatpush2.bf16.msra.mxu1 %v13882_v49  ;;  %v10015_v46 = vpop.f32.mrf.mxu0 }
 0x62f   :  { %11128 = vmatprep.subr.bf16.mxu1 %v13887_v56 }
 0x632   :  { %11129 = vmatpush2.bf16.msra.mxu1 %v13885_v30  ;;  %v13893_v30 = vld [vmem:[#allocation11 + $0x158] ss:$12 sps:$4 sm:$0xff]  }
 0x633   :  { %11130 = vmatprep.subr.bf16.mxu1 %v13890_v4  ;;  %v13894_v4 = vld [vmem:[#allocation11 + $0x98] ss:$12 sps:$4 sm:$0xff]  }
 0x636   :  { %11131 = vmatpush2.bf16.msra.mxu1 %v13888_v43  ;;  %v13897_v43 = vld [vmem:[#allocation11 + $0x128] ss:$12 sps:$4 sm:$0xff]  }
 0x637   :  { %13199 = vmatprep.subr.bf16.mxu1 %v13891_v47  ;;  %v13898_v47 = vld [vmem:[#allocation11 + $0x68] ss:$12 sps:$4 sm:$0xff]  }
 0x639   :  { %v9966_v39 = vpop.f32.mrf.mxu1 }
 0x63a   :  { %v9967_v58 = vadd.f32 %v9966_v39, %v9924_v6  ;;  %v13926_v6 = vld [vmem:[#allocation11 + $0x350] ss:$12 sps:$4 sm:$0xff]  }
 0x63b   :  { %v9968_v9 = vpop.f32.mrf.mxu1 }
 0x63c   :  { %v9969_v19 = vadd.f32 %v9968_v9, %v9926_v24  ;;  %v10010_v35 = vadd.f32 %v10009_v44, %v9967_v58 }
 0x63d   :  { %v9970_v23 = vpop.f32.mrf.mxu1 }
 0x63e   :  { %v9971_v1 = vadd.f32 %v9970_v23, %v9928_v32  ;;  %v10012_v50 = vadd.f32 %v10011_v20, %v9969_v19  ;;  %v14780_v20 = vsub.s32 4, %v14350_v45 }
 0x63f   :  { %v9972_v40 = vpop.f32.mrf.mxu1 }
 0x640   :  { %v9973_v11 = vadd.f32 %v9972_v40, %v9930_v48  ;;  %v10014_v7 = vadd.f32 %v10013_v31, %v9971_v1  ;;  %v8047_v24 = vrot.slane %v14668_v8, %v14780_v20  ;;  %v13968_v20 = vld [vmem:[#allocation14 + $0x8] sm:$0xff]  }
 0x642   :  { %v10016_v36 = vadd.f32 %v10015_v46, %v9973_v11 }
 0x648   :  { %v13127_v10 = vpop.f32.mrf.mxu0 }
 0x64a   :  { %v13128_v22 = vpop.f32.mrf.mxu0 }
 0x64b   :  { %v13129_v32 = vadd.f32 %v13128_v22, %v13127_v10  ;;  %v13954_v10 = vld [vmem:[#allocation11 + $0x188] ss:$12 sps:$4 sm:$0xff]   ;;  %v13956_v22 = vld [vmem:[#allocation14 + $0x38] sm:$0xff]  }
 0x64c   :  { %v13130_v42 = vpop.f32.mrf.mxu0 }
 0x64d   :  { %v10096_v31 = vadd.f32 %v13129_v32, %v8047_v24  ;;  %v13970_v32 = vld [vmem:[#allocation14] sm:$0xff]  }
 0x64e   :  { %v13131_v9 = vpop.f32.mrf.mxu0 }
 0x64f   :  { %v13132_v48 = vadd.f32 %v13131_v9, %v13130_v42  ;;  %v13958_v42 = vld [vmem:[#allocation14 + $0x30] sm:$0xff]   ;;  %v13961_v9 = vld [vmem:[#allocation14 + $0x60] sm:$0xff]  }
 0x668   :  { %v13171_v18 = vpop.f32.mrf.mxu0 }
 0x66a   :  { %v13172_v23 = vpop.f32.mrf.mxu0 }
 0x66c   :  { %v13174_v1 = vpop.f32.mrf.mxu0 }
 0x679   :  { %v10052_v12 = vpop.f32.mrf.mxu1 }
 0x67a   :  { %v10053_v51 = vadd.f32 %v10052_v12, %v10010_v35  ;;  %v13930_v12 = vld [vmem:[#allocation11 + $0x338] ss:$12 sps:$4 sm:$0xff]  }
 0x67b   :  { %v10054_v29 = vpop.f32.mrf.mxu1 }
 0x67c   :  { %v10055_v14 = vadd.f32 %v10054_v29, %v10012_v50  ;;  %v10227_v49 = vmax.f32 %v10053_v51, 0.0  ;;  %v10099_v29 = vadd.f32 %v13132_v48, %v8047_v24  ;;  %v13175_v50 = vpop.f32.mrf.mxu0  ;;  %v13969_v24 = vld [vmem:[#allocation14 + $0x40] sm:$0xff]   ;;  %v13973_v48 = vld [vmem:[#allocation14 + $0xa8] sm:$0xff]  }
 0x67d   :  { %v10056_v16 = vpop.f32.mrf.mxu1 }
 0x67e   :  { %v10057_v61 = vadd.f32 %v10056_v16, %v10014_v7  ;;  %v10228_v3 = vmax.f32 %v10055_v14, 0.0  ;;  %v13173_v7 = vadd.f32 %v13172_v23, %v13171_v18  ;;  %v13934_v16 = vld [vmem:[#allocation11 + $0x320] ss:$12 sps:$4 sm:$0xff]  }
 0x67f   :  { %v10058_v27 = vpop.f32.mrf.mxu1  ;;  %v13963_v18 = vld [vmem:[#allocation14 + $0x58] sm:$0xff]   ;;  %v13967_v23 = vld [vmem:[#allocation14 + $0x48] sm:$0xff]  }
 0x680   :  { %v10059_v33 = vadd.f32 %v10058_v27, %v10016_v36  ;;  %v10232_v25 = vmax.f32 %v10057_v61, 0.0  ;;  %v13176_v61 = vadd.f32 %v13175_v50, %v13174_v1  ;;  %v13975_v1 = vld [vmem:[#allocation14 + $0x98] sm:$0xff]  }
 0x682   :  { %v10233_v41 = vmax.f32 %v10059_v33, 0.0  ;;  %v14688_v38 = vpack.c.bf16 %v10232_v25, %v10227_v49 }
 0x684   :  { %v14686_v56 = vpack.c.bf16 %v10233_v41, %v10228_v3  ;;  %v13938_v3 = vld [vmem:[#allocation11 + $0x308] ss:$12 sps:$4 sm:$0xff]  }
 0x686   :  { %11132 = vmatprep.mubr.bf16.mxu1 %v14686_v56 }
 0x687   :  { %11133 = vmatmul.mubr.bf16.vlgmr.msra.gmra.mxu1 %v14688_v38 }
 0x688   :  { %13200 = vmatpush3.bf16.msra.mxu1 %v13892_v59  ;;  %11218 = vmatprep.mubr.bf16.mxu1 %v14675_v60  ;;  %v13904_v60 = vld [vmem:[#allocation11 + $0x20] ss:$12 sps:$4 sm:$0xff]  }
 0x689   :  { %13201 = vmatprep.subr.bf16.mxu1 %v13893_v30  ;;  %v13940_v30 = vld [vmem:[#allocation11 + $0x230] ss:$12 sps:$4 sm:$0xff]  }
 0x68c   :  { %13202 = vmatpush3.bf16.msra.mxu1 %v13894_v4 }
 0x68d   :  { %13203 = vmatprep.subr.bf16.mxu1 %v13895_v5  ;;  %v13941_v5 = vld [vmem:[#allocation11 + $0x2d8] ss:$12 sps:$4 sm:$0xff]  }
 0x690   :  { %13204 = vmatpush3.bf16.msra.mxu1 %v13896_v15  ;;  %v13942_v15 = vld [vmem:[#allocation11 + $0x218] ss:$12 sps:$4 sm:$0xff]  }
 0x691   :  { %13205 = vmatprep.subr.bf16.mxu1 %v13897_v43  ;;  %v13943_v43 = vld [vmem:[#allocation11 + $0x2c0] ss:$12 sps:$4 sm:$0xff]  }
 0x694   :  { %13206 = vmatpush3.bf16.msra.mxu1 %v13898_v47  ;;  %v13944_v47 = vld [vmem:[#allocation11 + $0x200] ss:$12 sps:$4 sm:$0xff]  }
 0x695   :  { %13207 = vmatprep.subr.bf16.mxu1 %v13899_v63  ;;  %v13945_v63 = vld [vmem:[#allocation11 + $0x2a8] ss:$12 sps:$4 sm:$0xff]  }
 0x698   :  { %13208 = vmatpush3.bf16.msra.mxu1 %v13900_v21  ;;  %v13946_v21 = vld [vmem:[#allocation11 + $0x1e8] ss:$12 sps:$4 sm:$0xff]  }
 0x699   :  { %13209 = vmatprep.subr.bf16.mxu1 %v13901_v17  ;;  %v13149_v39 = vpop.f32.mrf.mxu1  ;;  %v13947_v17 = vld [vmem:[#allocation11 + $0x290] ss:$12 sps:$4 sm:$0xff]  }
 0x69b   :  { %v13150_v44 = vpop.f32.mrf.mxu1 }
 0x69c   :  { %13210 = vmatpush3.bf16.msra.mxu1 %v13902_v28  ;;  %v13151_v19 = vadd.f32 %v13150_v44, %v13149_v39  ;;  %v13948_v28 = vld [vmem:[#allocation11 + $0x1d0] ss:$12 sps:$4 sm:$0xff]   ;;  %v13962_v44 = vld [vmem:[#allocation14 + $0x20] sm:$0xff]  }
 0x69d   :  { %13211 = vmatprep.subr.bf16.mxu1 %v13903_v2  ;;  %v13949_v2 = vld [vmem:[#allocation11 + $0x278] ss:$12 sps:$4 sm:$0xff]   ;;  %v13959_v39 = vld [vmem:[#allocation14 + $0x68] sm:$0xff]  }
 0x69e   :  { %v10137_v45 = vadd.f32 %v13151_v19, %v10096_v31  ;;  %v13974_v19 = vld [vmem:[#allocation14 + $0xa0] sm:$0xff]   ;;  %v13976_v31 = vld [vmem:[#allocation14 + $0x90] sm:$0xff]  }
 0x6a0   :  { %13212 = vmatpush3.bf16.msra.mxu1 %v13904_v60  ;;  %v10178_v36 = vadd.f32 %v13173_v7, %v10137_v45  ;;  %v13951_v60 = vld [vmem:[#allocation11 + $0x260] ss:$12 sps:$4 sm:$0xff]  }
 0x6a1   :  { %13213 = vmatprep.subr.bf16.mxu1 %v13905_v37  ;;  %v13952_v37 = vld [vmem:[#allocation11 + $0x1a0] ss:$12 sps:$4 sm:$0xff]  }
 0x6a4   :  { %13214 = vmatpush3.bf16.msra.mxu1 %v13906_v52  ;;  %v13953_v52 = vld [vmem:[#allocation11 + $0x248] ss:$12 sps:$4 sm:$0xff]  }
 0x6a5   :  { %13283 = vmatprep.subr.bf16.mxu1 %v14222_v34 }
 0x6a7   :  { %11219 = vmatmul.mubr.bf16.vlgmr.msra.gmra.mxu1 %v14677_v53  ;;  %v13152_v53 = vpop.f32.mrf.mxu1 }
 0x6a8   :  { %13284 = vmatpush3.bf16.msra.mxu1 %v13910_v26  ;;  %13299 = vmatprep.mubr.msk.bf16.mxu1 %vm14223_vm1, %v14222_v34  ;;  %v13955_v26 = vld [vmem:[#allocation14 + $0x78] sm:$0xff]  }
 0x6a9   :  { %13285 = vmatprep.subr.bf16.mxu1 %v14222_v34  ;;  %v13153_v40 = vpop.f32.mrf.mxu1 }
 0x6aa   :  { %v13154_v58 = vadd.f32 %v13153_v40, %v13152_v53  ;;  %v13966_v53 = vld [vmem:[#allocation14 + $0x10] sm:$0xff]  }
 0x6ab   :  { %v13972_v40 = vld [vmem:[#allocation14 + $0xb0] sm:$0xff]  }
 0x6ac   :  { %13286 = vmatpush3.bf16.msra.mxu1 %v13914_v54  ;;  %v10140_v46 = vadd.f32 %v13154_v58, %v10099_v29  ;;  %v13957_v54 = vld [vmem:[#allocation14 + $0x70] sm:$0xff]   ;;  %v13977_v58 = vld [vmem:[#allocation14 + $0x88] sm:$0xff]  }
 0x6ad   :  { %13287 = vmatprep.subr.bf16.mxu1 %v14222_v34 }
 0x6ae   :  { %v10181_v33 = vadd.f32 %v13176_v61, %v10140_v46  ;;  %v10400_v61 = vld [vmem:[#allocation13] sm:$0x7] }
 0x6b0   :  { %13288 = vmatpush3.bf16.msra.mxu1 %v13918_v0  ;;  %v13960_v0 = vld [vmem:[#allocation14 + $0x28] sm:$0xff]  }
 0x6b1   :  { %13289 = vmatprep.subr.bf16.mxu1 %v14222_v34 }
 0x6b4   :  { %13290 = vmatpush3.bf16.msra.mxu1 %v13922_v57  ;;  %v13964_v57 = vld [vmem:[#allocation14 + $0x18] sm:$0xff]  }
 0x6b5   :  { %13291 = vmatprep.subr.bf16.mxu1 %v14222_v34 }
 0x6b8   :  { %13292 = vmatpush3.bf16.msra.mxu1 %v13926_v6  ;;  %v13971_v6 = vld [vmem:[#allocation14 + $0xb8] sm:$0xff]  }
 0x6b9   :  { %v13193_v11 = vpop.f32.mrf.mxu1  ;;  %13293 = vmatprep.subr.bf16.mxu1 %v14222_v34 }
 0x6bb   :  { %v13194_v8 = vpop.f32.mrf.mxu1 }
 0x6bc   :  { %v13195_v35 = vadd.f32 %v13194_v8, %v13193_v11  ;;  %13294 = vmatpush3.bf16.msra.mxu1 %v13930_v12  ;;  %v13978_v12 = vld [vmem:[#allocation14 + $0x80] sm:$0xff]  }
 0x6bd   :  { %v13196_v14 = vpop.f32.mrf.mxu1  ;;  %13295 = vmatprep.subr.bf16.mxu1 %v14222_v34 }
 0x6be   :  { %v10219_v27 = vadd.f32 %v13195_v35, %v10178_v36  ;;  %v10409_v36 = vrot.slane %v10400_v61, %v14568_v62 }
 0x6bf   :  { %v13197_v51 = vpop.f32.mrf.mxu1 }
 0x6c0   :  { %v13198_v25 = vadd.f32 %v13197_v51, %v13196_v14  ;;  %13296 = vmatpush3.bf16.msra.mxu1 %v13934_v16  ;;  %v10229_v49 = vmax.f32 %v10219_v27, 0.0  ;;  %v10405_v51 = vrot.slane %v10400_v61, %v14778_v13 }
 0x6c1   :  { %13297 = vmatprep.subr.bf16.mxu1 %v14222_v34 }
 0x6c2   :  { %v10222_v41 = vadd.f32 %v13198_v25, %v10181_v33 }
 0x6c4   :  { %v10234_v59 = vmax.f32 %v10222_v41, 0.0  ;;  %13298 = vmatpush3.bf16.msra.mxu1 %v13938_v3 }
 0x6c5   :  { %13303 = vmatprep.subr.bf16.mxu1 %v14222_v34 }
 0x6c6   :  { %v10239_v4 = vpack.c.bf16 %v10234_v59, %v10229_v49 }
 0x6c7   :  { %v11091_v8 = vpop.f32.mrf.mxu0 }
 0x6c8   :  { %11176 = vmatmul.mubr.bf16.vlgmr.msra.gmra.mxu0 %v10239_v4  ;;  %13300 = vmatmul.mubr.bf16.vlgmr.msra.gmra.mxu1 %v10239_v4  ;;  %v11092_v49 = vadd.f32 %v11091_v8, %v10405_v51 }
 0x6c9   :  { %13222 = vmatpush3.bf16.msra.mxu0 %v13940_v30  ;;  %11259 = vmatprep.mubr.bf16.mxu0 %v14686_v56  ;;  %v13950_v56 = vld [vmem:[#allocation11 + $0x1b8] ss:$12 sps:$4 sm:$0xff]   ;;  %v11093_v46 = vpop.f32.mrf.mxu0 }
 0x6ca   :  { %13223 = vmatprep.subr.bf16.mxu0 %v13941_v5  ;;  %13319 = vmatprep.mubr.msk.bf16.mxu1 %vm14223_vm1, %v14222_v34  ;;  %v11094_v3 = vadd.f32 %v11093_v46, %v10409_v36 }
 0x6cb   :  { %13304 = vmatpush3.bf16.msra.mxu1 %v13971_v6  ;;  %v11095_v16 = vpop.f32.mrf.mxu0 }
 0x6cc   :  { %13305 = vmatprep.subr.bf16.mxu1 %v14222_v34  ;;  %v11096_v41 = vadd.f32 %v11095_v16, %v10405_v51 }
 0x6cd   :  { %13224 = vmatpush3.bf16.msra.mxu0 %v13942_v15  ;;  %v11097_v27 = vpop.f32.mrf.mxu0 }
 0x6ce   :  { %13225 = vmatprep.subr.bf16.mxu0 %v13943_v43  ;;  %v11098_v4 = vadd.f32 %v11097_v27, %v10409_v36 }
 0x6cf   :  { %13306 = vmatpush3.bf16.msra.mxu1 %v13972_v40 }
 0x6d0   :  { %13307 = vmatprep.subr.bf16.mxu1 %v14222_v34 }
 0x6d1   :  { %13226 = vmatpush3.bf16.msra.mxu0 %v13944_v47 }
 0x6d2   :  { %13227 = vmatprep.subr.bf16.mxu0 %v13945_v63 }
 0x6d3   :  { %13308 = vmatpush3.bf16.msra.mxu1 %v13973_v48 }
 0x6d4   :  { %13309 = vmatprep.subr.bf16.mxu1 %v14222_v34 }
 0x6d5   :  { %13228 = vmatpush3.bf16.msra.mxu0 %v13946_v21 }
 0x6d6   :  { %13229 = vmatprep.subr.bf16.mxu0 %v13947_v17 }
 0x6d7   :  { %13310 = vmatpush3.bf16.msra.mxu1 %v13974_v19 }
 0x6d8   :  { %13311 = vmatprep.subr.bf16.mxu1 %v14222_v34 }
 0x6d9   :  { %13230 = vmatpush3.bf16.msra.mxu0 %v13948_v28 }
 0x6da   :  { %13231 = vmatprep.subr.bf16.mxu0 %v13949_v2 }
 0x6db   :  { %13312 = vmatpush3.bf16.msra.mxu1 %v13975_v1 }
 0x6dc   :  { %13313 = vmatprep.subr.bf16.mxu1 %v14222_v34 }
 0x6dd   :  { %13232 = vmatpush3.bf16.msra.mxu0 %v13950_v56 }
 0x6de   :  { %13233 = vmatprep.subr.bf16.mxu0 %v13951_v60 }
 0x6df   :  { %13314 = vmatpush3.bf16.msra.mxu1 %v13976_v31 }
 0x6e0   :  { %13315 = vmatprep.subr.bf16.mxu1 %v14222_v34 }
 0x6e1   :  { %13234 = vmatpush3.bf16.msra.mxu0 %v13952_v37 }
 0x6e2   :  { %13235 = vmatprep.subr.bf16.mxu0 %v13953_v52 }
 0x6e3   :  { %13316 = vmatpush3.bf16.msra.mxu1 %v13977_v58 }
 0x6e4   :  { %13317 = vmatprep.subr.bf16.mxu1 %v14222_v34 }
 0x6e5   :  { %13236 = vmatpush3.bf16.msra.mxu0 %v13954_v10 }
 0x6e6   :  { %13252 = vmatprep.subr.bf16.mxu0 %v13955_v26 }
 0x6e7   :  { %13318 = vmatpush3.bf16.msra.mxu1 %v13978_v12 }
 0x6e8   :  { %11260 = vmatmul.mubr.bf16.vlgmr.msra.gmra.mxu0 %v14688_v38  ;;  %v13965_v38 = vld [vmem:[#allocation14 + $0x50] sm:$0xff]  }
 0x6e9   :  { %13253 = vmatpush3.bf16.msra.mxu0 %v13956_v22 }
 0x6ea   :  { %13254 = vmatprep.subr.bf16.mxu0 %v13957_v54  ;;  %v10413_v54 = vrot.slane %v10400_v61, %v14779_v55 }
 0x6ed   :  { %13255 = vmatpush3.bf16.msra.mxu0 %v13958_v42 }
 0x6ee   :  { %13256 = vmatprep.subr.bf16.mxu0 %v13959_v39 }
 0x6f1   :  { %13257 = vmatpush3.bf16.msra.mxu0 %v13960_v0 }
 0x6f2   :  { %13258 = vmatprep.subr.bf16.mxu0 %v13961_v9 }
 0x6f5   :  { %13259 = vmatpush3.bf16.msra.mxu0 %v13962_v44 }
 0x6f6   :  { %13260 = vmatprep.subr.bf16.mxu0 %v13963_v18 }
 0x6f9   :  { %13261 = vmatpush3.bf16.msra.mxu0 %v13964_v57 }
 0x6fa   :  { %13262 = vmatprep.subr.bf16.mxu0 %v13965_v38 }
 0x6fd   :  { %13263 = vmatpush3.bf16.msra.mxu0 %v13966_v53 }
 0x6fe   :  { %13264 = vmatprep.subr.bf16.mxu0 %v13967_v23 }
 0x701   :  { %13265 = vmatpush3.bf16.msra.mxu0 %v13968_v20 }
 0x702   :  { %13266 = vmatprep.subr.bf16.mxu0 %v13969_v24 }
 0x705   :  { %13267 = vmatpush3.bf16.msra.mxu0 %v13970_v32 }
 0x747   :  { %v11134_v11 = vpop.f32.mrf.mxu1 }
 0x748   :  { %v11135_v43 = vadd.f32 %v11134_v11, %v11092_v49  ;;  %v13086_v11 = vld [vmem:[#allocation16] ss:$0 sm:$0xff] }
 0x749   :  { %v11136_v29 = vpop.f32.mrf.mxu1 }
 0x74a   :  { %v11137_v5 = vadd.f32 %v11136_v29, %v11094_v3 }
 0x74b   :  { %v11138_v45 = vpop.f32.mrf.mxu1 }
 0x74c   :  { %v11139_v15 = vadd.f32 %v11138_v45, %v11096_v41 }
 0x74d   :  { %v11140_v50 = vpop.f32.mrf.mxu1 }
 0x74e   :  { %v11141_v21 = vadd.f32 %v11140_v50, %v11098_v4 }
 0x767   :  { %v13215_v7 = vpop.f32.mrf.mxu1 }
 0x769   :  { %v13216_v35 = vpop.f32.mrf.mxu1 }
 0x76a   :  { %v13217_v42 = vadd.f32 %v13216_v35, %v13215_v7 }
 0x76b   :  { %v13218_v14 = vpop.f32.mrf.mxu1 }
 0x76c   :  { %v11221_v9 = vadd.f32 %v13217_v42, %v10413_v54 }
 0x76d   :  { %v13219_v33 = vpop.f32.mrf.mxu1 }
 0x76e   :  { %v13220_v44 = vadd.f32 %v13219_v33, %v13218_v14 }
 0x770   :  { %v11224_v23 = vadd.f32 %v13220_v44, %v10413_v54 }
 0x788   :  { %v11177_v34 = vpop.f32.mrf.mxu0  ;;  %v11302_v25 = vpop.f32.mrf.mxu1 }
 0x789   :  { %v11178_v28 = vadd.f32 %v11177_v34, %v11135_v43 }
 0x78a   :  { %v11179_v59 = vpop.f32.mrf.mxu0  ;;  %v13301_v30 = vpop.f32.mrf.mxu1 }
 0x78b   :  { %v11180_v17 = vadd.f32 %v11179_v59, %v11137_v5  ;;  %v11309_v10 = vmax.f32 %v11178_v28, 0.0 }
 0x78c   :  { %v11181_v47 = vpop.f32.mrf.mxu0  ;;  %v11305_v63 = vpop.f32.mrf.mxu1 }
 0x78d   :  { %v11182_v62 = vadd.f32 %v11181_v47, %v11139_v15  ;;  %v11310_v37 = vmax.f32 %v11180_v17, 0.0 }
 0x78e   :  { %v11183_v13 = vpop.f32.mrf.mxu0  ;;  %v13302_v2 = vpop.f32.mrf.mxu1 }
 0x78f   :  { %v11184_v56 = vadd.f32 %v11183_v13, %v11141_v21  ;;  %v11312_v60 = vmax.f32 %v11182_v62, 0.0 }
 0x791   :  { %v11313_v52 = vmax.f32 %v11184_v56, 0.0  ;;  %v11315_v22 = vpack.c.bf16 %v11312_v60, %v11309_v10 }
 0x793   :  { %v11316_v26 = vpack.c.bf16 %v11313_v52, %v11310_v37 }
 0x795   :  { %11549 = vmatprep.mubr.bf16.mxu0 %v11316_v26 }
 0x796   :  { %11550 = vmatmul.mubr.bf16.vlgmr.msra.gmra.mxu0 %v11315_v22 }
 0x7a8   :  { %v13237_v39 = vpop.f32.mrf.mxu0 }
 0x7aa   :  { %v13238_v0 = vpop.f32.mrf.mxu0 }
 0x7ab   :  { %v13239_v18 = vadd.f32 %v13238_v0, %v13237_v39 }
 0x7ac   :  { %v13240_v57 = vpop.f32.mrf.mxu0 }
 0x7ad   :  { %v11262_v38 = vadd.f32 %v13239_v18, %v11221_v9 }
 0x7ae   :  { %v13241_v53 = vpop.f32.mrf.mxu0 }
 0x7af   :  { %v13242_v20 = vadd.f32 %v13241_v53, %v13240_v57  ;;  %v11303_v24 = vadd.f32 %v11302_v25, %v11262_v38 }
 0x7b1   :  { %v11265_v32 = vadd.f32 %v13242_v20, %v11224_v23  ;;  %v11311_v40 = vmax.f32 %v11303_v24, 0.0 }
 0x7b3   :  { %v11306_v6 = vadd.f32 %v11305_v63, %v11265_v32 }
 0x7b5   :  { %v11314_v48 = vmax.f32 %v11306_v6, 0.0 }
 0x7b7   :  { %v11317_v19 = vpack.c.bf16 %v11314_v48, %v11311_v40 }
 0x7b9   :  { %13320 = vmatmul.mubr.bf16.vlgmr.msra.gmra.mxu1 %v11317_v19 }
 0x856   :  { %v13268_v1 = vpop.f32.mrf.mxu0 }
 0x858   :  { %v13269_v55 = vpop.f32.mrf.mxu0 }
 0x859   :  { %v13270_v58 = vadd.f32 %v13269_v55, %v13268_v1 }
 0x85a   :  { %v13271_v31 = vpop.f32.mrf.mxu0 }
 0x85b   :  { %v11552_v45 = vadd.f32 %v13270_v58, %v13086_v11 }
 0x85c   :  { %v13272_v12 = vpop.f32.mrf.mxu0 }
 0x85d   :  { %v13273_v29 = vadd.f32 %v13272_v12, %v13271_v31 }
 0x85f   :  { %v11555_v46 = vadd.f32 %v13273_v29, %v13086_v11 }
 0x879   :  { %v11592_v50 = vpop.f32.mrf.mxu1 }
 0x87a   :  { %v11593_v8 = vadd.f32 %v11592_v50, %v11552_v45 }
 0x87b   :  { %v13321_v7 = vpop.f32.mrf.mxu1 }
 0x87c   :  { %11599 = vmax.xlane.f32.xlu0 %v11593_v8 }
 0x87d   :  { %v11595_v35 = vpop.f32.mrf.mxu1 }
 0x87e   :  { %v11596_v16 = vadd.f32 %v11595_v35, %v11555_v46 }
 0x87f   :  { %v13322_v14 = vpop.f32.mrf.mxu1 }
 0x880   :  { %11601 = vmax.xlane.f32.xlu0 %v11596_v16 }
 0x905   :  { %v11600_v61 = vpop.xlane.xlu0 %11599 }
 0x906   :  { %v11603_v36 = vsub.f32 %v11593_v8, %v11600_v61 }
 0x908   :  { %v11605_v51 = vmul.f32 1.442695, %v11603_v36 }
 0x909   :  { %v11602_v27 = vpop.xlane.xlu0 %11601 }
 0x90a   :  { %v11604_v33 = vsub.f32 %v11596_v16, %v11602_v27  ;;  %13979 = vpow2.f32 %v11605_v51 }
 0x90c   :  { %v11607_v34 = vmul.f32 1.442695, %v11604_v33 }
 0x90e   :  { %13981 = vpow2.f32 %v11607_v34 }
 0x917   :  { %v13980_v25 = vpop.eup %13979 }
 0x918   :  { %11609 = vadd.xlane.f32.xlu1 %v13980_v25 }
 0x91b   :  { %v13982_v3 = vpop.eup %13981 }
 0x91c   :  { %11611 = vadd.xlane.f32.xlu1 %v13982_v3 }
 0x9a1   :  { %v11610_v41 = vpop.xlane.xlu1 %11609 }
 0x9a2   :  { %13983 = vlog2.f32 %v11610_v41 }
 0x9a5   :  { %v11612_v49 = vpop.xlane.xlu1 %11611 }
 0x9a6   :  { %13985 = vlog2.f32 %v11612_v49 }
 0x9af   :  { %v13984_v59 = vpop.eup %13983 }
 0x9b0   :  { %v11614_v30 = vmul.f32 0.6931472, %v13984_v59 }
 0x9b2   :  { %v11617_v4 = vsub.f32 %v11603_v36, %v11614_v30 }
 0x9b3   :  { %v13986_v5 = vpop.eup %13985 }
 0x9b4   :  { %11619 = vst [vmem:[#allocation17] sm:$0xff] %v11617_v4  ;;  %v11616_v15 = vmul.f32 0.6931472, %v13986_v5 }
 0x9b6   :  { %v11618_v43 = vsub.f32 %v11604_v33, %v11616_v15 }
 0x9b8   :  { %11620 = vst [vmem:[#allocation17 + $0x8] sm:$0xff] %v11618_v43 }
 0x9b9   :  { %14181 = shalt.err (!%p14178_p7)
}
 0x9ba   :  { %s14225_s16 = smov 8  }
 0x9bb   :  { %11632 = dma.vmem_to_hbm [thread:$0]  %s11627_s8, 256, %s14736_s9, [#allocation4], %s14216_s17, %s14216_s17, %s14225_s16  }
 0x9bc   :  { %14200 = dma.done.wait [#allocation4], 256  }
 0x9bd   :  { %14201 = vsyncadd [#allocation4], 4294967040 }
 0x9be   :  { %11636 = vsyncpa [#allocation3], 1 }
 0x9bf   :  { %11637 = vsyncpa [#allocation6], 1 }
 0x9c0   :  { %11638 = vsyncpa [#allocation9], 1 }
 0x9c1   :  { %11639 = vsyncpa [#allocation12], 1 }
 0x9c2   :  { %11640 = vsyncpa [#allocation15], 1 }
 0x9c3   :  { %11641 = vsyncpa [#allocation4], 1 }

</bundles_post_ra>
